<compile_context>
chip_gen: v5e
topology: v5e:2x2
jax: 0.10.0
libtpu: 0.0.40
codegen_flags: <defaults>
</compile_context>

<pallas_src>
import jax
import jax.numpy as jnp
from jax import lax
from jax.experimental import pallas as pl
from jax.experimental.pallas import tpu as pltpu

NEG_SLOPE = 0.01  # nn.LeakyReLU default negative_slope

H_FEAT = 128
IN_FEATS = 16
NUM_CLASSES = 4
N_LAYERS = 20


# ----------------------------- Pallas kernel --------------------------------

def fused_gcn_kernel(a_ref, h0_ref, w_ref, b_ref, o_ref):
    """Single invocation: all 20 GraphConv layers + final Linear.

    a_ref : (Np, Np)      normalized weighted adjacency (zero-padded)
    h0_ref: (Np, 128)     padded input features
    w_ref : (21, 128, 128) stacked layer weights (layer 20 = fc, col-padded)
    b_ref : (21, 1, 128)   stacked biases
    o_ref : (Np, 128)      lane-dense output (classes in cols [:4])
    """
    a = a_ref[...]

    def layer(l, h):
        w = w_ref[l]          # (128, 128)
        b = b_ref[l]          # (1, 128)
        agg = jnp.dot(a, h, preferred_element_type=jnp.float32)       # aggregate
        z = jnp.dot(agg, w, preferred_element_type=jnp.float32) + b   # transform
        return jnp.where(z >= 0, z, NEG_SLOPE * z)                    # LeakyReLU

    # H carried in vregs across the fully unrolled layer chain.
    h = lax.fori_loop(0, N_LAYERS, layer, h0_ref[...], unroll=True)

    # final Linear: no aggregation, no activation.
    z = jnp.dot(h, w_ref[N_LAYERS], preferred_element_type=jnp.float32) + b_ref[N_LAYERS]
    o_ref[...] = z.astype(o_ref.dtype)


# ------------------------------ wrapper --------------------------------------

def _full_spec(shape):
    return pl.BlockSpec(shape, lambda: (0,) * len(shape))


def net_forward_fused(a_hat_p, h0_p, w_stack, b_stack):
    n_pad, f = h0_p.shape
    n_steps = w_stack.shape[0]  # N_LAYERS + 1
    out_padded = pl.pallas_call(
        fused_gcn_kernel,
        out_shape=jax.ShapeDtypeStruct((n_pad, f), jnp.float32),
        in_specs=[
            _full_spec((n_pad, n_pad)),      # A_hat: loaded into VMEM once
            _full_spec((n_pad, f)),          # padded input features
            _full_spec((n_steps, f, f)),     # full weight stack resident in VMEM
            _full_spec((n_steps, 1, f)),     # full bias stack resident in VMEM
        ],
        out_specs=_full_spec((n_pad, f)),
        compiler_params=pltpu.CompilerParams(
            vmem_limit_bytes=16 * 1024 * 1024),
    )(a_hat_p, h0_p, w_stack, b_stack)
    return out_padded


# --------------------------- model construction -----------------------------

def init_params(key):
    params = {"convs": [], "fc": None}
    dims = [IN_FEATS] + [H_FEAT] * N_LAYERS
    keys = jax.random.split(key, N_LAYERS + 1)
    for i in range(N_LAYERS):
        kw, _ = jax.random.split(keys[i])
        fan_in, fan_out = dims[i], dims[i + 1]
        scale = jnp.sqrt(6.0 / (fan_in + fan_out))  # Glorot-uniform-like
        w = jax.random.uniform(kw, (fan_in, fan_out), jnp.float32, -scale, scale)
        bias = jnp.zeros((fan_out,), jnp.float32)
        params["convs"].append((w, bias))
    kw, kb = jax.random.split(keys[-1])
    scale = 1.0 / jnp.sqrt(H_FEAT)
    w_fc = jax.random.uniform(kw, (H_FEAT, NUM_CLASSES), jnp.float32, -scale, scale)
    b_fc = jax.random.uniform(kb, (NUM_CLASSES,), jnp.float32, -scale, scale)
    params["fc"] = (w_fc, b_fc)
    return params


def pack_params(params):
    """Pack all layer weights/biases into uniform stacked slabs (done once).

    - W1 (16,128) zero-padded along the ROW (input-feature) axis to (128,128)
      so padded input features cannot leak into the output.
    - fc weight (128,4) zero-padded along the output-column axis to (128,128)
      so the final store is lane-dense; real classes live in columns [:4].
    """
    f = H_FEAT
    w_slabs, b_slabs = [], []
    for (w, b) in params["convs"]:
        w_pad = jnp.zeros((f, f), jnp.float32).at[: w.shape[0], :].set(w)
        w_slabs.append(w_pad)
        b_slabs.append(b.reshape(1, f))
    w_fc, b_fc = params["fc"]
    w_fc_pad = jnp.zeros((f, f), jnp.float32).at[:, :NUM_CLASSES].set(w_fc)
    b_fc_pad = jnp.zeros((1, f), jnp.float32).at[0, :NUM_CLASSES].set(b_fc)
    w_slabs.append(w_fc_pad)
    b_slabs.append(b_fc_pad)
    return jnp.stack(w_slabs, 0), jnp.stack(b_slabs, 0)  # (21,128,128), (21,1,128)


def build_a_hat(src, dst, edge_w, num_nodes):
    # weighted adjacency A_w[dst, src]
    a = jnp.zeros((num_nodes, num_nodes), jnp.float32)
    a = a.at[dst, src].add(edge_w)
    ones = jnp.ones_like(edge_w)
    out_deg = jnp.zeros((num_nodes,), jnp.float32).at[src].add(ones)
    in_deg = jnp.zeros((num_nodes,), jnp.float32).at[dst].add(ones)
    out_deg = jnp.clip(out_deg, 1.0, None)
    in_deg = jnp.clip(in_deg, 1.0, None)
    d_in = in_deg ** -0.5
    d_out = out_deg ** -0.5
    return d_in[:, None] * a * d_out[None, :]


def net_forward(params_packed, a_hat, node_feat):
    w_stack, b_stack = params_packed
    n = node_feat.shape[0]
    # pad node axis to a multiple of 128 (full-lane MXU operands); pad features
    # 16 -> 128. All padding is zero, so padded nodes/features never influence
    # real-node outputs (padded rows only pick up a bias and are sliced off).
    n_pad = ((n + H_FEAT - 1) // H_FEAT) * H_FEAT
    a_p = jnp.zeros((n_pad, n_pad), jnp.float32).at[:n, :n].set(a_hat)
    h0_p = jnp.zeros((n_pad, H_FEAT), jnp.float32).at[:n, : node_feat.shape[1]].set(node_feat)
    out_padded = net_forward_fused(a_p, h0_p, w_stack, b_stack)
    return out_padded[:n, :NUM_CLASSES]


# --------------------------------- main --------------------------------------

if __name__ == "__main__":
    key = jax.random.PRNGKey(0)
    k_feat, k_src, k_dst, k_ew, k_param = jax.random.split(key, 5)

    num_nodes = 64
    num_edges = 256

    node_feat = jax.random.normal(k_feat, (num_nodes, IN_FEATS), jnp.float32)
    src = jax.random.randint(k_src, (num_edges,), 0, num_nodes)
    dst = jax.random.randint(k_dst, (num_edges,), 0, num_nodes)
    # g.edata['feat'][:, 0] -> one scalar weight per edge
    edge_w = jax.random.uniform(k_ew, (num_edges,), jnp.float32, 0.1, 1.0)

    a_hat = build_a_hat(src, dst, edge_w, num_nodes)
    params = init_params(k_param)
    packed = pack_params(params)  # pack/pad once at init

    out = net_forward(packed, a_hat, node_feat)
    out = jax.block_until_ready(out)

    # pure-JAX reference check
    h_ref = node_feat
    for (w, b) in params["convs"]:
        z = (a_hat @ h_ref) @ w + b[None, :]
        h_ref = jnp.where(z >= 0, z, NEG_SLOPE * z)
    ref = h_ref @ params["fc"][0] + params["fc"][1][None, :]
    assert out.shape == (num_nodes, NUM_CLASSES)
    assert jnp.allclose(out, ref, atol=1e-3, rtol=1e-3)

    print("KERNEL_OK")
</pallas_src>

<mosaic_0001>
module attributes {stable_mosaic.version = 11 : i64} {
  func.func @fused_gcn_kernel(%arg0: memref<128x128xf32, #tpu.memory_space<vmem>>, %arg1: memref<128x128xf32, #tpu.memory_space<vmem>>, %arg2: memref<21x128x128xf32, #tpu.memory_space<vmem>>, %arg3: memref<21x1x128xf32, #tpu.memory_space<vmem>>, %arg4: memref<128x128xf32, #tpu.memory_space<vmem>>) attributes {dimension_semantics = [], scalar_prefetch = 0 : i64, scratch_operands = 0 : i64, tpu.core_type = #tpu.core_type<tc>} {
    %c0 = arith.constant 0 : index
    %c0_0 = arith.constant 0 : index
    %0 = vector.load %arg0[%c0, %c0_0] : memref<128x128xf32, #tpu.memory_space<vmem>>, vector<128x128xf32>
    %c0_1 = arith.constant 0 : index
    %c0_2 = arith.constant 0 : index
    %1 = vector.load %arg1[%c0_1, %c0_2] : memref<128x128xf32, #tpu.memory_space<vmem>>, vector<128x128xf32>
    %c0_i32 = arith.constant 0 : i32
    %2 = arith.index_cast %c0_i32 : i32 to index
    %c0_3 = arith.constant 0 : index
    %c0_4 = arith.constant 0 : index
    %3 = vector.load %arg2[%2, %c0_3, %c0_4] : memref<21x128x128xf32, #tpu.memory_space<vmem>>, vector<1x128x128xf32>
    %4 = vector.shape_cast %3 : vector<1x128x128xf32> to vector<128x128xf32>
    %5 = arith.index_cast %c0_i32 : i32 to index
    %c0_5 = arith.constant 0 : index
    %c0_6 = arith.constant 0 : index
    %6 = vector.load %arg3[%5, %c0_5, %c0_6] : memref<21x1x128xf32, #tpu.memory_space<vmem>>, vector<1x1x128xf32>
    %7 = vector.shape_cast %6 : vector<1x1x128xf32> to vector<1x128xf32>
    %cst = arith.constant dense<0.000000e+00> : vector<128x128xf32>
    %8 = tpu.matmul %0, %1, %cst {dimension_numbers = #tpu.dot_dimension_numbers<[1], [0], [0], [1], [0, 0, 1, 1], [], []>} : vector<128x128xf32>, vector<128x128xf32>, vector<128x128xf32> -> vector<128x128xf32>
    %cst_7 = arith.constant dense<0.000000e+00> : vector<128x128xf32>
    %9 = tpu.matmul %8, %4, %cst_7 {dimension_numbers = #tpu.dot_dimension_numbers<[1], [0], [0], [1], [0, 0, 1, 1], [], []>} : vector<128x128xf32>, vector<128x128xf32>, vector<128x128xf32> -> vector<128x128xf32>
    %10 = vector.broadcast %7 : vector<1x128xf32> to vector<128x128xf32>
    %11 = arith.addf %9, %10 : vector<128x128xf32>
    %cst_8 = arith.constant 0.000000e+00 : f32
    %12 = vector.broadcast %cst_8 : f32 to vector<128x128xf32>
    %13 = arith.cmpf oge, %11, %12 : vector<128x128xf32>
    %cst_9 = arith.constant 0.00999999977 : f32
    %14 = vector.broadcast %cst_9 : f32 to vector<128x128xf32>
    %15 = arith.mulf %14, %11 : vector<128x128xf32>
    %16 = arith.select %13, %11, %15 : vector<128x128xi1>, vector<128x128xf32>
    %c1_i32 = arith.constant 1 : i32
    %17 = arith.index_cast %c1_i32 : i32 to index
    %c0_10 = arith.constant 0 : index
    %c0_11 = arith.constant 0 : index
    %18 = vector.load %arg2[%17, %c0_10, %c0_11] : memref<21x128x128xf32, #tpu.memory_space<vmem>>, vector<1x128x128xf32>
    %19 = vector.shape_cast %18 : vector<1x128x128xf32> to vector<128x128xf32>
    %20 = arith.index_cast %c1_i32 : i32 to index
    %c0_12 = arith.constant 0 : index
    %c0_13 = arith.constant 0 : index
    %21 = vector.load %arg3[%20, %c0_12, %c0_13] : memref<21x1x128xf32, #tpu.memory_space<vmem>>, vector<1x1x128xf32>
    %22 = vector.shape_cast %21 : vector<1x1x128xf32> to vector<1x128xf32>
    %cst_14 = arith.constant dense<0.000000e+00> : vector<128x128xf32>
    %23 = tpu.matmul %0, %16, %cst_14 {dimension_numbers = #tpu.dot_dimension_numbers<[1], [0], [0], [1], [0, 0, 1, 1], [], []>} : vector<128x128xf32>, vector<128x128xf32>, vector<128x128xf32> -> vector<128x128xf32>
    %cst_15 = arith.constant dense<0.000000e+00> : vector<128x128xf32>
    %24 = tpu.matmul %23, %19, %cst_15 {dimension_numbers = #tpu.dot_dimension_numbers<[1], [0], [0], [1], [0, 0, 1, 1], [], []>} : vector<128x128xf32>, vector<128x128xf32>, vector<128x128xf32> -> vector<128x128xf32>
    %25 = vector.broadcast %22 : vector<1x128xf32> to vector<128x128xf32>
    %26 = arith.addf %24, %25 : vector<128x128xf32>
    %cst_16 = arith.constant 0.000000e+00 : f32
    %27 = vector.broadcast %cst_16 : f32 to vector<128x128xf32>
    %28 = arith.cmpf oge, %26, %27 : vector<128x128xf32>
    %cst_17 = arith.constant 0.00999999977 : f32
    %29 = vector.broadcast %cst_17 : f32 to vector<128x128xf32>
    %30 = arith.mulf %29, %26 : vector<128x128xf32>
    %31 = arith.select %28, %26, %30 : vector<128x128xi1>, vector<128x128xf32>
    %c2_i32 = arith.constant 2 : i32
    %32 = arith.index_cast %c2_i32 : i32 to index
    %c0_18 = arith.constant 0 : index
    %c0_19 = arith.constant 0 : index
    %33 = vector.load %arg2[%32, %c0_18, %c0_19] : memref<21x128x128xf32, #tpu.memory_space<vmem>>, vector<1x128x128xf32>
    %34 = vector.shape_cast %33 : vector<1x128x128xf32> to vector<128x128xf32>
    %35 = arith.index_cast %c2_i32 : i32 to index
    %c0_20 = arith.constant 0 : index
    %c0_21 = arith.constant 0 : index
    %36 = vector.load %arg3[%35, %c0_20, %c0_21] : memref<21x1x128xf32, #tpu.memory_space<vmem>>, vector<1x1x128xf32>
    %37 = vector.shape_cast %36 : vector<1x1x128xf32> to vector<1x128xf32>
    %cst_22 = arith.constant dense<0.000000e+00> : vector<128x128xf32>
    %38 = tpu.matmul %0, %31, %cst_22 {dimension_numbers = #tpu.dot_dimension_numbers<[1], [0], [0], [1], [0, 0, 1, 1], [], []>} : vector<128x128xf32>, vector<128x128xf32>, vector<128x128xf32> -> vector<128x128xf32>
    %cst_23 = arith.constant dense<0.000000e+00> : vector<128x128xf32>
    %39 = tpu.matmul %38, %34, %cst_23 {dimension_numbers = #tpu.dot_dimension_numbers<[1], [0], [0], [1], [0, 0, 1, 1], [], []>} : vector<128x128xf32>, vector<128x128xf32>, vector<128x128xf32> -> vector<128x128xf32>
    %40 = vector.broadcast %37 : vector<1x128xf32> to vector<128x128xf32>
    %41 = arith.addf %39, %40 : vector<128x128xf32>
    %cst_24 = arith.constant 0.000000e+00 : f32
    %42 = vector.broadcast %cst_24 : f32 to vector<128x128xf32>
    %43 = arith.cmpf oge, %41, %42 : vector<128x128xf32>
    %cst_25 = arith.constant 0.00999999977 : f32
    %44 = vector.broadcast %cst_25 : f32 to vector<128x128xf32>
    %45 = arith.mulf %44, %41 : vector<128x128xf32>
    %46 = arith.select %43, %41, %45 : vector<128x128xi1>, vector<128x128xf32>
    %c3_i32 = arith.constant 3 : i32
    %47 = arith.index_cast %c3_i32 : i32 to index
    %c0_26 = arith.constant 0 : index
    %c0_27 = arith.constant 0 : index
    %48 = vector.load %arg2[%47, %c0_26, %c0_27] : memref<21x128x128xf32, #tpu.memory_space<vmem>>, vector<1x128x128xf32>
    %49 = vector.shape_cast %48 : vector<1x128x128xf32> to vector<128x128xf32>
    %50 = arith.index_cast %c3_i32 : i32 to index
    %c0_28 = arith.constant 0 : index
    %c0_29 = arith.constant 0 : index
    %51 = vector.load %arg3[%50, %c0_28, %c0_29] : memref<21x1x128xf32, #tpu.memory_space<vmem>>, vector<1x1x128xf32>
    %52 = vector.shape_cast %51 : vector<1x1x128xf32> to vector<1x128xf32>
    %cst_30 = arith.constant dense<0.000000e+00> : vector<128x128xf32>
    %53 = tpu.matmul %0, %46, %cst_30 {dimension_numbers = #tpu.dot_dimension_numbers<[1], [0], [0], [1], [0, 0, 1, 1], [], []>} : vector<128x128xf32>, vector<128x128xf32>, vector<128x128xf32> -> vector<128x128xf32>
    %cst_31 = arith.constant dense<0.000000e+00> : vector<128x128xf32>
    %54 = tpu.matmul %53, %49, %cst_31 {dimension_numbers = #tpu.dot_dimension_numbers<[1], [0], [0], [1], [0, 0, 1, 1], [], []>} : vector<128x128xf32>, vector<128x128xf32>, vector<128x128xf32> -> vector<128x128xf32>
    %55 = vector.broadcast %52 : vector<1x128xf32> to vector<128x128xf32>
    %56 = arith.addf %54, %55 : vector<128x128xf32>
    %cst_32 = arith.constant 0.000000e+00 : f32
    %57 = vector.broadcast %cst_32 : f32 to vector<128x128xf32>
    %58 = arith.cmpf oge, %56, %57 : vector<128x128xf32>
    %cst_33 = arith.constant 0.00999999977 : f32
    %59 = vector.broadcast %cst_33 : f32 to vector<128x128xf32>
    %60 = arith.mulf %59, %56 : vector<128x128xf32>
    %61 = arith.select %58, %56, %60 : vector<128x128xi1>, vector<128x128xf32>
    %c4_i32 = arith.constant 4 : i32
    %62 = arith.index_cast %c4_i32 : i32 to index
    %c0_34 = arith.constant 0 : index
    %c0_35 = arith.constant 0 : index
    %63 = vector.load %arg2[%62, %c0_34, %c0_35] : memref<21x128x128xf32, #tpu.memory_space<vmem>>, vector<1x128x128xf32>
    %64 = vector.shape_cast %63 : vector<1x128x128xf32> to vector<128x128xf32>
    %65 = arith.index_cast %c4_i32 : i32 to index
    %c0_36 = arith.constant 0 : index
    %c0_37 = arith.constant 0 : index
    %66 = vector.load %arg3[%65, %c0_36, %c0_37] : memref<21x1x128xf32, #tpu.memory_space<vmem>>, vector<1x1x128xf32>
    %67 = vector.shape_cast %66 : vector<1x1x128xf32> to vector<1x128xf32>
    %cst_38 = arith.constant dense<0.000000e+00> : vector<128x128xf32>
    %68 = tpu.matmul %0, %61, %cst_38 {dimension_numbers = #tpu.dot_dimension_numbers<[1], [0], [0], [1], [0, 0, 1, 1], [], []>} : vector<128x128xf32>, vector<128x128xf32>, vector<128x128xf32> -> vector<128x128xf32>
    %cst_39 = arith.constant dense<0.000000e+00> : vector<128x128xf32>
    %69 = tpu.matmul %68, %64, %cst_39 {dimension_numbers = #tpu.dot_dimension_numbers<[1], [0], [0], [1], [0, 0, 1, 1], [], []>} : vector<128x128xf32>, vector<128x128xf32>, vector<128x128xf32> -> vector<128x128xf32>
    %70 = vector.broadcast %67 : vector<1x128xf32> to vector<128x128xf32>
    %71 = arith.addf %69, %70 : vector<128x128xf32>
    %cst_40 = arith.constant 0.000000e+00 : f32
    %72 = vector.broadcast %cst_40 : f32 to vector<128x128xf32>
    %73 = arith.cmpf oge, %71, %72 : vector<128x128xf32>
    %cst_41 = arith.constant 0.00999999977 : f32
    %74 = vector.broadcast %cst_41 : f32 to vector<128x128xf32>
    %75 = arith.mulf %74, %71 : vector<128x128xf32>
    %76 = arith.select %73, %71, %75 : vector<128x128xi1>, vector<128x128xf32>
    %c5_i32 = arith.constant 5 : i32
    %77 = arith.index_cast %c5_i32 : i32 to index
    %c0_42 = arith.constant 0 : index
    %c0_43 = arith.constant 0 : index
    %78 = vector.load %arg2[%77, %c0_42, %c0_43] : memref<21x128x128xf32, #tpu.memory_space<vmem>>, vector<1x128x128xf32>
    %79 = vector.shape_cast %78 : vector<1x128x128xf32> to vector<128x128xf32>
    %80 = arith.index_cast %c5_i32 : i32 to index
    %c0_44 = arith.constant 0 : index
    %c0_45 = arith.constant 0 : index
    %81 = vector.load %arg3[%80, %c0_44, %c0_45] : memref<21x1x128xf32, #tpu.memory_space<vmem>>, vector<1x1x128xf32>
    %82 = vector.shape_cast %81 : vector<1x1x128xf32> to vector<1x128xf32>
    %cst_46 = arith.constant dense<0.000000e+00> : vector<128x128xf32>
    %83 = tpu.matmul %0, %76, %cst_46 {dimension_numbers = #tpu.dot_dimension_numbers<[1], [0], [0], [1], [0, 0, 1, 1], [], []>} : vector<128x128xf32>, vector<128x128xf32>, vector<128x128xf32> -> vector<128x128xf32>
    %cst_47 = arith.constant dense<0.000000e+00> : vector<128x128xf32>
    %84 = tpu.matmul %83, %79, %cst_47 {dimension_numbers = #tpu.dot_dimension_numbers<[1], [0], [0], [1], [0, 0, 1, 1], [], []>} : vector<128x128xf32>, vector<128x128xf32>, vector<128x128xf32> -> vector<128x128xf32>
    %85 = vector.broadcast %82 : vector<1x128xf32> to vector<128x128xf32>
    %86 = arith.addf %84, %85 : vector<128x128xf32>
    %cst_48 = arith.constant 0.000000e+00 : f32
    %87 = vector.broadcast %cst_48 : f32 to vector<128x128xf32>
    %88 = arith.cmpf oge, %86, %87 : vector<128x128xf32>
    %cst_49 = arith.constant 0.00999999977 : f32
    %89 = vector.broadcast %cst_49 : f32 to vector<128x128xf32>
    %90 = arith.mulf %89, %86 : vector<128x128xf32>
    %91 = arith.select %88, %86, %90 : vector<128x128xi1>, vector<128x128xf32>
    %c6_i32 = arith.constant 6 : i32
    %92 = arith.index_cast %c6_i32 : i32 to index
    %c0_50 = arith.constant 0 : index
    %c0_51 = arith.constant 0 : index
    %93 = vector.load %arg2[%92, %c0_50, %c0_51] : memref<21x128x128xf32, #tpu.memory_space<vmem>>, vector<1x128x128xf32>
    %94 = vector.shape_cast %93 : vector<1x128x128xf32> to vector<128x128xf32>
    %95 = arith.index_cast %c6_i32 : i32 to index
    %c0_52 = arith.constant 0 : index
    %c0_53 = arith.constant 0 : index
    %96 = vector.load %arg3[%95, %c0_52, %c0_53] : memref<21x1x128xf32, #tpu.memory_space<vmem>>, vector<1x1x128xf32>
    %97 = vector.shape_cast %96 : vector<1x1x128xf32> to vector<1x128xf32>
    %cst_54 = arith.constant dense<0.000000e+00> : vector<128x128xf32>
    %98 = tpu.matmul %0, %91, %cst_54 {dimension_numbers = #tpu.dot_dimension_numbers<[1], [0], [0], [1], [0, 0, 1, 1], [], []>} : vector<128x128xf32>, vector<128x128xf32>, vector<128x128xf32> -> vector<128x128xf32>
    %cst_55 = arith.constant dense<0.000000e+00> : vector<128x128xf32>
    %99 = tpu.matmul %98, %94, %cst_55 {dimension_numbers = #tpu.dot_dimension_numbers<[1], [0], [0], [1], [0, 0, 1, 1], [], []>} : vector<128x128xf32>, vector<128x128xf32>, vector<128x128xf32> -> vector<128x128xf32>
    %100 = vector.broadcast %97 : vector<1x128xf32> to vector<128x128xf32>
    %101 = arith.addf %99, %100 : vector<128x128xf32>
    %cst_56 = arith.constant 0.000000e+00 : f32
    %102 = vector.broadcast %cst_56 : f32 to vector<128x128xf32>
    %103 = arith.cmpf oge, %101, %102 : vector<128x128xf32>
    %cst_57 = arith.constant 0.00999999977 : f32
    %104 = vector.broadcast %cst_57 : f32 to vector<128x128xf32>
    %105 = arith.mulf %104, %101 : vector<128x128xf32>
    %106 = arith.select %103, %101, %105 : vector<128x128xi1>, vector<128x128xf32>
    %c7_i32 = arith.constant 7 : i32
    %107 = arith.index_cast %c7_i32 : i32 to index
    %c0_58 = arith.constant 0 : index
    %c0_59 = arith.constant 0 : index
    %108 = vector.load %arg2[%107, %c0_58, %c0_59] : memref<21x128x128xf32, #tpu.memory_space<vmem>>, vector<1x128x128xf32>
    %109 = vector.shape_cast %108 : vector<1x128x128xf32> to vector<128x128xf32>
    %110 = arith.index_cast %c7_i32 : i32 to index
    %c0_60 = arith.constant 0 : index
    %c0_61 = arith.constant 0 : index
    %111 = vector.load %arg3[%110, %c0_60, %c0_61] : memref<21x1x128xf32, #tpu.memory_space<vmem>>, vector<1x1x128xf32>
    %112 = vector.shape_cast %111 : vector<1x1x128xf32> to vector<1x128xf32>
    %cst_62 = arith.constant dense<0.000000e+00> : vector<128x128xf32>
    %113 = tpu.matmul %0, %106, %cst_62 {dimension_numbers = #tpu.dot_dimension_numbers<[1], [0], [0], [1], [0, 0, 1, 1], [], []>} : vector<128x128xf32>, vector<128x128xf32>, vector<128x128xf32> -> vector<128x128xf32>
    %cst_63 = arith.constant dense<0.000000e+00> : vector<128x128xf32>
    %114 = tpu.matmul %113, %109, %cst_63 {dimension_numbers = #tpu.dot_dimension_numbers<[1], [0], [0], [1], [0, 0, 1, 1], [], []>} : vector<128x128xf32>, vector<128x128xf32>, vector<128x128xf32> -> vector<128x128xf32>
    %115 = vector.broadcast %112 : vector<1x128xf32> to vector<128x128xf32>
    %116 = arith.addf %114, %115 : vector<128x128xf32>
    %cst_64 = arith.constant 0.000000e+00 : f32
    %117 = vector.broadcast %cst_64 : f32 to vector<128x128xf32>
    %118 = arith.cmpf oge, %116, %117 : vector<128x128xf32>
    %cst_65 = arith.constant 0.00999999977 : f32
    %119 = vector.broadcast %cst_65 : f32 to vector<128x128xf32>
    %120 = arith.mulf %119, %116 : vector<128x128xf32>
    %121 = arith.select %118, %116, %120 : vector<128x128xi1>, vector<128x128xf32>
    %c8_i32 = arith.constant 8 : i32
    %122 = arith.index_cast %c8_i32 : i32 to index
    %c0_66 = arith.constant 0 : index
    %c0_67 = arith.constant 0 : index
    %123 = vector.load %arg2[%122, %c0_66, %c0_67] : memref<21x128x128xf32, #tpu.memory_space<vmem>>, vector<1x128x128xf32>
    %124 = vector.shape_cast %123 : vector<1x128x128xf32> to vector<128x128xf32>
    %125 = arith.index_cast %c8_i32 : i32 to index
    %c0_68 = arith.constant 0 : index
    %c0_69 = arith.constant 0 : index
    %126 = vector.load %arg3[%125, %c0_68, %c0_69] : memref<21x1x128xf32, #tpu.memory_space<vmem>>, vector<1x1x128xf32>
    %127 = vector.shape_cast %126 : vector<1x1x128xf32> to vector<1x128xf32>
    %cst_70 = arith.constant dense<0.000000e+00> : vector<128x128xf32>
    %128 = tpu.matmul %0, %121, %cst_70 {dimension_numbers = #tpu.dot_dimension_numbers<[1], [0], [0], [1], [0, 0, 1, 1], [], []>} : vector<128x128xf32>, vector<128x128xf32>, vector<128x128xf32> -> vector<128x128xf32>
    %cst_71 = arith.constant dense<0.000000e+00> : vector<128x128xf32>
    %129 = tpu.matmul %128, %124, %cst_71 {dimension_numbers = #tpu.dot_dimension_numbers<[1], [0], [0], [1], [0, 0, 1, 1], [], []>} : vector<128x128xf32>, vector<128x128xf32>, vector<128x128xf32> -> vector<128x128xf32>
    %130 = vector.broadcast %127 : vector<1x128xf32> to vector<128x128xf32>
    %131 = arith.addf %129, %130 : vector<128x128xf32>
    %cst_72 = arith.constant 0.000000e+00 : f32
    %132 = vector.broadcast %cst_72 : f32 to vector<128x128xf32>
    %133 = arith.cmpf oge, %131, %132 : vector<128x128xf32>
    %cst_73 = arith.constant 0.00999999977 : f32
    %134 = vector.broadcast %cst_73 : f32 to vector<128x128xf32>
    %135 = arith.mulf %134, %131 : vector<128x128xf32>
    %136 = arith.select %133, %131, %135 : vector<128x128xi1>, vector<128x128xf32>
    %c9_i32 = arith.constant 9 : i32
    %137 = arith.index_cast %c9_i32 : i32 to index
    %c0_74 = arith.constant 0 : index
    %c0_75 = arith.constant 0 : index
    %138 = vector.load %arg2[%137, %c0_74, %c0_75] : memref<21x128x128xf32, #tpu.memory_space<vmem>>, vector<1x128x128xf32>
    %139 = vector.shape_cast %138 : vector<1x128x128xf32> to vector<128x128xf32>
    %140 = arith.index_cast %c9_i32 : i32 to index
    %c0_76 = arith.constant 0 : index
    %c0_77 = arith.constant 0 : index
    %141 = vector.load %arg3[%140, %c0_76, %c0_77] : memref<21x1x128xf32, #tpu.memory_space<vmem>>, vector<1x1x128xf32>
    %142 = vector.shape_cast %141 : vector<1x1x128xf32> to vector<1x128xf32>
    %cst_78 = arith.constant dense<0.000000e+00> : vector<128x128xf32>
    %143 = tpu.matmul %0, %136, %cst_78 {dimension_numbers = #tpu.dot_dimension_numbers<[1], [0], [0], [1], [0, 0, 1, 1], [], []>} : vector<128x128xf32>, vector<128x128xf32>, vector<128x128xf32> -> vector<128x128xf32>
    %cst_79 = arith.constant dense<0.000000e+00> : vector<128x128xf32>
    %144 = tpu.matmul %143, %139, %cst_79 {dimension_numbers = #tpu.dot_dimension_numbers<[1], [0], [0], [1], [0, 0, 1, 1], [], []>} : vector<128x128xf32>, vector<128x128xf32>, vector<128x128xf32> -> vector<128x128xf32>
    %145 = vector.broadcast %142 : vector<1x128xf32> to vector<128x128xf32>
    %146 = arith.addf %144, %145 : vector<128x128xf32>
    %cst_80 = arith.constant 0.000000e+00 : f32
    %147 = vector.broadcast %cst_80 : f32 to vector<128x128xf32>
    %148 = arith.cmpf oge, %146, %147 : vector<128x128xf32>
    %cst_81 = arith.constant 0.00999999977 : f32
    %149 = vector.broadcast %cst_81 : f32 to vector<128x128xf32>
    %150 = arith.mulf %149, %146 : vector<128x128xf32>
    %151 = arith.select %148, %146, %150 : vector<128x128xi1>, vector<128x128xf32>
    %c10_i32 = arith.constant 10 : i32
    %152 = arith.index_cast %c10_i32 : i32 to index
    %c0_82 = arith.constant 0 : index
    %c0_83 = arith.constant 0 : index
    %153 = vector.load %arg2[%152, %c0_82, %c0_83] : memref<21x128x128xf32, #tpu.memory_space<vmem>>, vector<1x128x128xf32>
    %154 = vector.shape_cast %153 : vector<1x128x128xf32> to vector<128x128xf32>
    %155 = arith.index_cast %c10_i32 : i32 to index
    %c0_84 = arith.constant 0 : index
    %c0_85 = arith.constant 0 : index
    %156 = vector.load %arg3[%155, %c0_84, %c0_85] : memref<21x1x128xf32, #tpu.memory_space<vmem>>, vector<1x1x128xf32>
    %157 = vector.shape_cast %156 : vector<1x1x128xf32> to vector<1x128xf32>
    %cst_86 = arith.constant dense<0.000000e+00> : vector<128x128xf32>
    %158 = tpu.matmul %0, %151, %cst_86 {dimension_numbers = #tpu.dot_dimension_numbers<[1], [0], [0], [1], [0, 0, 1, 1], [], []>} : vector<128x128xf32>, vector<128x128xf32>, vector<128x128xf32> -> vector<128x128xf32>
    %cst_87 = arith.constant dense<0.000000e+00> : vector<128x128xf32>
    %159 = tpu.matmul %158, %154, %cst_87 {dimension_numbers = #tpu.dot_dimension_numbers<[1], [0], [0], [1], [0, 0, 1, 1], [], []>} : vector<128x128xf32>, vector<128x128xf32>, vector<128x128xf32> -> vector<128x128xf32>
    %160 = vector.broadcast %157 : vector<1x128xf32> to vector<128x128xf32>
    %161 = arith.addf %159, %160 : vector<128x128xf32>
    %cst_88 = arith.constant 0.000000e+00 : f32
    %162 = vector.broadcast %cst_88 : f32 to vector<128x128xf32>
    %163 = arith.cmpf oge, %161, %162 : vector<128x128xf32>
    %cst_89 = arith.constant 0.00999999977 : f32
    %164 = vector.broadcast %cst_89 : f32 to vector<128x128xf32>
    %165 = arith.mulf %164, %161 : vector<128x128xf32>
    %166 = arith.select %163, %161, %165 : vector<128x128xi1>, vector<128x128xf32>
    %c11_i32 = arith.constant 11 : i32
    %167 = arith.index_cast %c11_i32 : i32 to index
    %c0_90 = arith.constant 0 : index
    %c0_91 = arith.constant 0 : index
    %168 = vector.load %arg2[%167, %c0_90, %c0_91] : memref<21x128x128xf32, #tpu.memory_space<vmem>>, vector<1x128x128xf32>
    %169 = vector.shape_cast %168 : vector<1x128x128xf32> to vector<128x128xf32>
    %170 = arith.index_cast %c11_i32 : i32 to index
    %c0_92 = arith.constant 0 : index
    %c0_93 = arith.constant 0 : index
    %171 = vector.load %arg3[%170, %c0_92, %c0_93] : memref<21x1x128xf32, #tpu.memory_space<vmem>>, vector<1x1x128xf32>
    %172 = vector.shape_cast %171 : vector<1x1x128xf32> to vector<1x128xf32>
    %cst_94 = arith.constant dense<0.000000e+00> : vector<128x128xf32>
    %173 = tpu.matmul %0, %166, %cst_94 {dimension_numbers = #tpu.dot_dimension_numbers<[1], [0], [0], [1], [0, 0, 1, 1], [], []>} : vector<128x128xf32>, vector<128x128xf32>, vector<128x128xf32> -> vector<128x128xf32>
    %cst_95 = arith.constant dense<0.000000e+00> : vector<128x128xf32>
    %174 = tpu.matmul %173, %169, %cst_95 {dimension_numbers = #tpu.dot_dimension_numbers<[1], [0], [0], [1], [0, 0, 1, 1], [], []>} : vector<128x128xf32>, vector<128x128xf32>, vector<128x128xf32> -> vector<128x128xf32>
    %175 = vector.broadcast %172 : vector<1x128xf32> to vector<128x128xf32>
    %176 = arith.addf %174, %175 : vector<128x128xf32>
    %cst_96 = arith.constant 0.000000e+00 : f32
    %177 = vector.broadcast %cst_96 : f32 to vector<128x128xf32>
    %178 = arith.cmpf oge, %176, %177 : vector<128x128xf32>
    %cst_97 = arith.constant 0.00999999977 : f32
    %179 = vector.broadcast %cst_97 : f32 to vector<128x128xf32>
    %180 = arith.mulf %179, %176 : vector<128x128xf32>
    %181 = arith.select %178, %176, %180 : vector<128x128xi1>, vector<128x128xf32>
    %c12_i32 = arith.constant 12 : i32
    %182 = arith.index_cast %c12_i32 : i32 to index
    %c0_98 = arith.constant 0 : index
    %c0_99 = arith.constant 0 : index
    %183 = vector.load %arg2[%182, %c0_98, %c0_99] : memref<21x128x128xf32, #tpu.memory_space<vmem>>, vector<1x128x128xf32>
    %184 = vector.shape_cast %183 : vector<1x128x128xf32> to vector<128x128xf32>
    %185 = arith.index_cast %c12_i32 : i32 to index
    %c0_100 = arith.constant 0 : index
    %c0_101 = arith.constant 0 : index
    %186 = vector.load %arg3[%185, %c0_100, %c0_101] : memref<21x1x128xf32, #tpu.memory_space<vmem>>, vector<1x1x128xf32>
    %187 = vector.shape_cast %186 : vector<1x1x128xf32> to vector<1x128xf32>
    %cst_102 = arith.constant dense<0.000000e+00> : vector<128x128xf32>
    %188 = tpu.matmul %0, %181, %cst_102 {dimension_numbers = #tpu.dot_dimension_numbers<[1], [0], [0], [1], [0, 0, 1, 1], [], []>} : vector<128x128xf32>, vector<128x128xf32>, vector<128x128xf32> -> vector<128x128xf32>
    %cst_103 = arith.constant dense<0.000000e+00> : vector<128x128xf32>
    %189 = tpu.matmul %188, %184, %cst_103 {dimension_numbers = #tpu.dot_dimension_numbers<[1], [0], [0], [1], [0, 0, 1, 1], [], []>} : vector<128x128xf32>, vector<128x128xf32>, vector<128x128xf32> -> vector<128x128xf32>
    %190 = vector.broadcast %187 : vector<1x128xf32> to vector<128x128xf32>
    %191 = arith.addf %189, %190 : vector<128x128xf32>
    %cst_104 = arith.constant 0.000000e+00 : f32
    %192 = vector.broadcast %cst_104 : f32 to vector<128x128xf32>
    %193 = arith.cmpf oge, %191, %192 : vector<128x128xf32>
    %cst_105 = arith.constant 0.00999999977 : f32
    %194 = vector.broadcast %cst_105 : f32 to vector<128x128xf32>
    %195 = arith.mulf %194, %191 : vector<128x128xf32>
    %196 = arith.select %193, %191, %195 : vector<128x128xi1>, vector<128x128xf32>
    %c13_i32 = arith.constant 13 : i32
    %197 = arith.index_cast %c13_i32 : i32 to index
    %c0_106 = arith.constant 0 : index
    %c0_107 = arith.constant 0 : index
    %198 = vector.load %arg2[%197, %c0_106, %c0_107] : memref<21x128x128xf32, #tpu.memory_space<vmem>>, vector<1x128x128xf32>
    %199 = vector.shape_cast %198 : vector<1x128x128xf32> to vector<128x128xf32>
    %200 = arith.index_cast %c13_i32 : i32 to index
    %c0_108 = arith.constant 0 : index
    %c0_109 = arith.constant 0 : index
    %201 = vector.load %arg3[%200, %c0_108, %c0_109] : memref<21x1x128xf32, #tpu.memory_space<vmem>>, vector<1x1x128xf32>
    %202 = vector.shape_cast %201 : vector<1x1x128xf32> to vector<1x128xf32>
    %cst_110 = arith.constant dense<0.000000e+00> : vector<128x128xf32>
    %203 = tpu.matmul %0, %196, %cst_110 {dimension_numbers = #tpu.dot_dimension_numbers<[1], [0], [0], [1], [0, 0, 1, 1], [], []>} : vector<128x128xf32>, vector<128x128xf32>, vector<128x128xf32> -> vector<128x128xf32>
    %cst_111 = arith.constant dense<0.000000e+00> : vector<128x128xf32>
    %204 = tpu.matmul %203, %199, %cst_111 {dimension_numbers = #tpu.dot_dimension_numbers<[1], [0], [0], [1], [0, 0, 1, 1], [], []>} : vector<128x128xf32>, vector<128x128xf32>, vector<128x128xf32> -> vector<128x128xf32>
    %205 = vector.broadcast %202 : vector<1x128xf32> to vector<128x128xf32>
    %206 = arith.addf %204, %205 : vector<128x128xf32>
    %cst_112 = arith.constant 0.000000e+00 : f32
    %207 = vector.broadcast %cst_112 : f32 to vector<128x128xf32>
    %208 = arith.cmpf oge, %206, %207 : vector<128x128xf32>
    %cst_113 = arith.constant 0.00999999977 : f32
    %209 = vector.broadcast %cst_113 : f32 to vector<128x128xf32>
    %210 = arith.mulf %209, %206 : vector<128x128xf32>
    %211 = arith.select %208, %206, %210 : vector<128x128xi1>, vector<128x128xf32>
    %c14_i32 = arith.constant 14 : i32
    %212 = arith.index_cast %c14_i32 : i32 to index
    %c0_114 = arith.constant 0 : index
    %c0_115 = arith.constant 0 : index
    %213 = vector.load %arg2[%212, %c0_114, %c0_115] : memref<21x128x128xf32, #tpu.memory_space<vmem>>, vector<1x128x128xf32>
    %214 = vector.shape_cast %213 : vector<1x128x128xf32> to vector<128x128xf32>
    %215 = arith.index_cast %c14_i32 : i32 to index
    %c0_116 = arith.constant 0 : index
    %c0_117 = arith.constant 0 : index
    %216 = vector.load %arg3[%215, %c0_116, %c0_117] : memref<21x1x128xf32, #tpu.memory_space<vmem>>, vector<1x1x128xf32>
    %217 = vector.shape_cast %216 : vector<1x1x128xf32> to vector<1x128xf32>
    %cst_118 = arith.constant dense<0.000000e+00> : vector<128x128xf32>
    %218 = tpu.matmul %0, %211, %cst_118 {dimension_numbers = #tpu.dot_dimension_numbers<[1], [0], [0], [1], [0, 0, 1, 1], [], []>} : vector<128x128xf32>, vector<128x128xf32>, vector<128x128xf32> -> vector<128x128xf32>
    %cst_119 = arith.constant dense<0.000000e+00> : vector<128x128xf32>
    %219 = tpu.matmul %218, %214, %cst_119 {dimension_numbers = #tpu.dot_dimension_numbers<[1], [0], [0], [1], [0, 0, 1, 1], [], []>} : vector<128x128xf32>, vector<128x128xf32>, vector<128x128xf32> -> vector<128x128xf32>
    %220 = vector.broadcast %217 : vector<1x128xf32> to vector<128x128xf32>
    %221 = arith.addf %219, %220 : vector<128x128xf32>
    %cst_120 = arith.constant 0.000000e+00 : f32
    %222 = vector.broadcast %cst_120 : f32 to vector<128x128xf32>
    %223 = arith.cmpf oge, %221, %222 : vector<128x128xf32>
    %cst_121 = arith.constant 0.00999999977 : f32
    %224 = vector.broadcast %cst_121 : f32 to vector<128x128xf32>
    %225 = arith.mulf %224, %221 : vector<128x128xf32>
    %226 = arith.select %223, %221, %225 : vector<128x128xi1>, vector<128x128xf32>
    %c15_i32 = arith.constant 15 : i32
    %227 = arith.index_cast %c15_i32 : i32 to index
    %c0_122 = arith.constant 0 : index
    %c0_123 = arith.constant 0 : index
    %228 = vector.load %arg2[%227, %c0_122, %c0_123] : memref<21x128x128xf32, #tpu.memory_space<vmem>>, vector<1x128x128xf32>
    %229 = vector.shape_cast %228 : vector<1x128x128xf32> to vector<128x128xf32>
    %230 = arith.index_cast %c15_i32 : i32 to index
    %c0_124 = arith.constant 0 : index
    %c0_125 = arith.constant 0 : index
    %231 = vector.load %arg3[%230, %c0_124, %c0_125] : memref<21x1x128xf32, #tpu.memory_space<vmem>>, vector<1x1x128xf32>
    %232 = vector.shape_cast %231 : vector<1x1x128xf32> to vector<1x128xf32>
    %cst_126 = arith.constant dense<0.000000e+00> : vector<128x128xf32>
    %233 = tpu.matmul %0, %226, %cst_126 {dimension_numbers = #tpu.dot_dimension_numbers<[1], [0], [0], [1], [0, 0, 1, 1], [], []>} : vector<128x128xf32>, vector<128x128xf32>, vector<128x128xf32> -> vector<128x128xf32>
    %cst_127 = arith.constant dense<0.000000e+00> : vector<128x128xf32>
    %234 = tpu.matmul %233, %229, %cst_127 {dimension_numbers = #tpu.dot_dimension_numbers<[1], [0], [0], [1], [0, 0, 1, 1], [], []>} : vector<128x128xf32>, vector<128x128xf32>, vector<128x128xf32> -> vector<128x128xf32>
    %235 = vector.broadcast %232 : vector<1x128xf32> to vector<128x128xf32>
    %236 = arith.addf %234, %235 : vector<128x128xf32>
    %cst_128 = arith.constant 0.000000e+00 : f32
    %237 = vector.broadcast %cst_128 : f32 to vector<128x128xf32>
    %238 = arith.cmpf oge, %236, %237 : vector<128x128xf32>
    %cst_129 = arith.constant 0.00999999977 : f32
    %239 = vector.broadcast %cst_129 : f32 to vector<128x128xf32>
    %240 = arith.mulf %239, %236 : vector<128x128xf32>
    %241 = arith.select %238, %236, %240 : vector<128x128xi1>, vector<128x128xf32>
    %c16_i32 = arith.constant 16 : i32
    %242 = arith.index_cast %c16_i32 : i32 to index
    %c0_130 = arith.constant 0 : index
    %c0_131 = arith.constant 0 : index
    %243 = vector.load %arg2[%242, %c0_130, %c0_131] : memref<21x128x128xf32, #tpu.memory_space<vmem>>, vector<1x128x128xf32>
    %244 = vector.shape_cast %243 : vector<1x128x128xf32> to vector<128x128xf32>
    %245 = arith.index_cast %c16_i32 : i32 to index
    %c0_132 = arith.constant 0 : index
    %c0_133 = arith.constant 0 : index
    %246 = vector.load %arg3[%245, %c0_132, %c0_133] : memref<21x1x128xf32, #tpu.memory_space<vmem>>, vector<1x1x128xf32>
    %247 = vector.shape_cast %246 : vector<1x1x128xf32> to vector<1x128xf32>
    %cst_134 = arith.constant dense<0.000000e+00> : vector<128x128xf32>
    %248 = tpu.matmul %0, %241, %cst_134 {dimension_numbers = #tpu.dot_dimension_numbers<[1], [0], [0], [1], [0, 0, 1, 1], [], []>} : vector<128x128xf32>, vector<128x128xf32>, vector<128x128xf32> -> vector<128x128xf32>
    %cst_135 = arith.constant dense<0.000000e+00> : vector<128x128xf32>
    %249 = tpu.matmul %248, %244, %cst_135 {dimension_numbers = #tpu.dot_dimension_numbers<[1], [0], [0], [1], [0, 0, 1, 1], [], []>} : vector<128x128xf32>, vector<128x128xf32>, vector<128x128xf32> -> vector<128x128xf32>
    %250 = vector.broadcast %247 : vector<1x128xf32> to vector<128x128xf32>
    %251 = arith.addf %249, %250 : vector<128x128xf32>
    %cst_136 = arith.constant 0.000000e+00 : f32
    %252 = vector.broadcast %cst_136 : f32 to vector<128x128xf32>
    %253 = arith.cmpf oge, %251, %252 : vector<128x128xf32>
    %cst_137 = arith.constant 0.00999999977 : f32
    %254 = vector.broadcast %cst_137 : f32 to vector<128x128xf32>
    %255 = arith.mulf %254, %251 : vector<128x128xf32>
    %256 = arith.select %253, %251, %255 : vector<128x128xi1>, vector<128x128xf32>
    %c17_i32 = arith.constant 17 : i32
    %257 = arith.index_cast %c17_i32 : i32 to index
    %c0_138 = arith.constant 0 : index
    %c0_139 = arith.constant 0 : index
    %258 = vector.load %arg2[%257, %c0_138, %c0_139] : memref<21x128x128xf32, #tpu.memory_space<vmem>>, vector<1x128x128xf32>
    %259 = vector.shape_cast %258 : vector<1x128x128xf32> to vector<128x128xf32>
    %260 = arith.index_cast %c17_i32 : i32 to index
    %c0_140 = arith.constant 0 : index
    %c0_141 = arith.constant 0 : index
    %261 = vector.load %arg3[%260, %c0_140, %c0_141] : memref<21x1x128xf32, #tpu.memory_space<vmem>>, vector<1x1x128xf32>
    %262 = vector.shape_cast %261 : vector<1x1x128xf32> to vector<1x128xf32>
    %cst_142 = arith.constant dense<0.000000e+00> : vector<128x128xf32>
    %263 = tpu.matmul %0, %256, %cst_142 {dimension_numbers = #tpu.dot_dimension_numbers<[1], [0], [0], [1], [0, 0, 1, 1], [], []>} : vector<128x128xf32>, vector<128x128xf32>, vector<128x128xf32> -> vector<128x128xf32>
    %cst_143 = arith.constant dense<0.000000e+00> : vector<128x128xf32>
    %264 = tpu.matmul %263, %259, %cst_143 {dimension_numbers = #tpu.dot_dimension_numbers<[1], [0], [0], [1], [0, 0, 1, 1], [], []>} : vector<128x128xf32>, vector<128x128xf32>, vector<128x128xf32> -> vector<128x128xf32>
    %265 = vector.broadcast %262 : vector<1x128xf32> to vector<128x128xf32>
    %266 = arith.addf %264, %265 : vector<128x128xf32>
    %cst_144 = arith.constant 0.000000e+00 : f32
    %267 = vector.broadcast %cst_144 : f32 to vector<128x128xf32>
    %268 = arith.cmpf oge, %266, %267 : vector<128x128xf32>
    %cst_145 = arith.constant 0.00999999977 : f32
    %269 = vector.broadcast %cst_145 : f32 to vector<128x128xf32>
    %270 = arith.mulf %269, %266 : vector<128x128xf32>
    %271 = arith.select %268, %266, %270 : vector<128x128xi1>, vector<128x128xf32>
    %c18_i32 = arith.constant 18 : i32
    %272 = arith.index_cast %c18_i32 : i32 to index
    %c0_146 = arith.constant 0 : index
    %c0_147 = arith.constant 0 : index
    %273 = vector.load %arg2[%272, %c0_146, %c0_147] : memref<21x128x128xf32, #tpu.memory_space<vmem>>, vector<1x128x128xf32>
    %274 = vector.shape_cast %273 : vector<1x128x128xf32> to vector<128x128xf32>
    %275 = arith.index_cast %c18_i32 : i32 to index
    %c0_148 = arith.constant 0 : index
    %c0_149 = arith.constant 0 : index
    %276 = vector.load %arg3[%275, %c0_148, %c0_149] : memref<21x1x128xf32, #tpu.memory_space<vmem>>, vector<1x1x128xf32>
    %277 = vector.shape_cast %276 : vector<1x1x128xf32> to vector<1x128xf32>
    %cst_150 = arith.constant dense<0.000000e+00> : vector<128x128xf32>
    %278 = tpu.matmul %0, %271, %cst_150 {dimension_numbers = #tpu.dot_dimension_numbers<[1], [0], [0], [1], [0, 0, 1, 1], [], []>} : vector<128x128xf32>, vector<128x128xf32>, vector<128x128xf32> -> vector<128x128xf32>
    %cst_151 = arith.constant dense<0.000000e+00> : vector<128x128xf32>
    %279 = tpu.matmul %278, %274, %cst_151 {dimension_numbers = #tpu.dot_dimension_numbers<[1], [0], [0], [1], [0, 0, 1, 1], [], []>} : vector<128x128xf32>, vector<128x128xf32>, vector<128x128xf32> -> vector<128x128xf32>
    %280 = vector.broadcast %277 : vector<1x128xf32> to vector<128x128xf32>
    %281 = arith.addf %279, %280 : vector<128x128xf32>
    %cst_152 = arith.constant 0.000000e+00 : f32
    %282 = vector.broadcast %cst_152 : f32 to vector<128x128xf32>
    %283 = arith.cmpf oge, %281, %282 : vector<128x128xf32>
    %cst_153 = arith.constant 0.00999999977 : f32
    %284 = vector.broadcast %cst_153 : f32 to vector<128x128xf32>
    %285 = arith.mulf %284, %281 : vector<128x128xf32>
    %286 = arith.select %283, %281, %285 : vector<128x128xi1>, vector<128x128xf32>
    %c19_i32 = arith.constant 19 : i32
    %287 = arith.index_cast %c19_i32 : i32 to index
    %c0_154 = arith.constant 0 : index
    %c0_155 = arith.constant 0 : index
    %288 = vector.load %arg2[%287, %c0_154, %c0_155] : memref<21x128x128xf32, #tpu.memory_space<vmem>>, vector<1x128x128xf32>
    %289 = vector.shape_cast %288 : vector<1x128x128xf32> to vector<128x128xf32>
    %290 = arith.index_cast %c19_i32 : i32 to index
    %c0_156 = arith.constant 0 : index
    %c0_157 = arith.constant 0 : index
    %291 = vector.load %arg3[%290, %c0_156, %c0_157] : memref<21x1x128xf32, #tpu.memory_space<vmem>>, vector<1x1x128xf32>
    %292 = vector.shape_cast %291 : vector<1x1x128xf32> to vector<1x128xf32>
    %cst_158 = arith.constant dense<0.000000e+00> : vector<128x128xf32>
    %293 = tpu.matmul %0, %286, %cst_158 {dimension_numbers = #tpu.dot_dimension_numbers<[1], [0], [0], [1], [0, 0, 1, 1], [], []>} : vector<128x128xf32>, vector<128x128xf32>, vector<128x128xf32> -> vector<128x128xf32>
    %cst_159 = arith.constant dense<0.000000e+00> : vector<128x128xf32>
    %294 = tpu.matmul %293, %289, %cst_159 {dimension_numbers = #tpu.dot_dimension_numbers<[1], [0], [0], [1], [0, 0, 1, 1], [], []>} : vector<128x128xf32>, vector<128x128xf32>, vector<128x128xf32> -> vector<128x128xf32>
    %295 = vector.broadcast %292 : vector<1x128xf32> to vector<128x128xf32>
    %296 = arith.addf %294, %295 : vector<128x128xf32>
    %cst_160 = arith.constant 0.000000e+00 : f32
    %297 = vector.broadcast %cst_160 : f32 to vector<128x128xf32>
    %298 = arith.cmpf oge, %296, %297 : vector<128x128xf32>
    %cst_161 = arith.constant 0.00999999977 : f32
    %299 = vector.broadcast %cst_161 : f32 to vector<128x128xf32>
    %300 = arith.mulf %299, %296 : vector<128x128xf32>
    %301 = arith.select %298, %296, %300 : vector<128x128xi1>, vector<128x128xf32>
    %c20_i32 = arith.constant 20 : i32
    %c20 = arith.constant 20 : index
    %c0_162 = arith.constant 0 : index
    %c0_163 = arith.constant 0 : index
    %302 = vector.load %arg2[%c20, %c0_162, %c0_163] : memref<21x128x128xf32, #tpu.memory_space<vmem>>, vector<1x128x128xf32>
    %303 = vector.shape_cast %302 : vector<1x128x128xf32> to vector<128x128xf32>
    %cst_164 = arith.constant dense<0.000000e+00> : vector<128x128xf32>
    %304 = tpu.matmul %301, %303, %cst_164 {dimension_numbers = #tpu.dot_dimension_numbers<[1], [0], [0], [1], [0, 0, 1, 1], [], []>} : vector<128x128xf32>, vector<128x128xf32>, vector<128x128xf32> -> vector<128x128xf32>
    %c20_165 = arith.constant 20 : index
    %c0_166 = arith.constant 0 : index
    %c0_167 = arith.constant 0 : index
    %305 = vector.load %arg3[%c20_165, %c0_166, %c0_167] : memref<21x1x128xf32, #tpu.memory_space<vmem>>, vector<1x1x128xf32>
    %306 = vector.shape_cast %305 : vector<1x1x128xf32> to vector<1x128xf32>
    %307 = vector.broadcast %306 : vector<1x128xf32> to vector<128x128xf32>
    %308 = arith.addf %304, %307 : vector<128x128xf32>
    %c0_168 = arith.constant 0 : index
    %c0_169 = arith.constant 0 : index
    %309 = vector.load %arg4[%c0_168, %c0_169] : memref<128x128xf32, #tpu.memory_space<vmem>>, vector<128x128xf32>
    tpu.vector_store %arg4[%c0_168, %c0_169], %308 {strides = array<i32>} : memref<128x128xf32, #tpu.memory_space<vmem>>, vector<128x128xf32>,
    return
  }
}

</mosaic_0001>

<bundles_post_ra>
// kernel: tpu_custom_call.1
= control target key start
LH: loop header
LB: loop body
LE: loop exit
PB: predicated region body
PF: predicated region fallthrough
CT: control target
= control target key end

     0   :  { %9 = vsyncpa [#allocation3], 0  ;;  %s5670_s0 = inlined_call_operand.hbm [shape: f32[128,128], index: 0, kind: input, shape index: {}]   ;;  %s5671_s1 = inlined_call_operand.hbm [shape: f32[128,128], index: 1, kind: input, shape index: {}]   ;;  %s5672_s2 = inlined_call_operand.hbm [shape: f32[21,128,128], index: 2, kind: input, shape index: {}]   ;;  %s5673_s3 = inlined_call_operand.hbm [shape: f32[21,1,128], index: 3, kind: input, shape index: {}]   ;;  %s5674_s4 = inlined_call_operand.hbm [shape: f32[128,128], index: 4, kind: output, shape index: {}]  }
   0x1   :  { %10 = vsyncpa [#allocation6], 0 }
   0x2   :  { %11 = vsyncpa [#allocation9], 0 }
   0x3   :  { %12 = vsyncpa [#allocation4], 0  ;;  %s30_s17 = sshll.u32 %s5671_s1, 4  ;;  %s4537_s18 = smov [#allocation5]   ;;  %s31_s17 = int_to_ptr.hbm [resolvable:$true] %s30_s17 }
   0x4   :  { %s32_s19 = sshll.u32 %s4537_s18, 4  ;;  %s17_s22 = sshll.u32 %s5670_s0, 4  ;;  %s33_s19 = int_to_ptr.vmem [resolvable:$true] %s32_s19  ;;  %s18_s22 = int_to_ptr.hbm [resolvable:$true] %s17_s22 }
   0x5   :  { %s4538_s23 = smov 128   ;;  %s4539_s24 = smov 8  }
   0x6   :  { %38 = dma.hbm_to_vmem [thread:$0]  %s31_s17, 2048, %s33_s19, [#allocation6], %s4538_s23, %s4538_s23, %s4539_s24  }
   0x7   :  { %s4540_s25 = smov [#allocation2]   ;;  %s43_s1 = sshll.u32 %s5672_s2, 4  ;;  %s44_s1 = int_to_ptr.hbm [resolvable:$true] %s43_s1 }
   0x8   :  { %s19_s26 = sshll.u32 %s4540_s25, 4  ;;  %s56_s30 = sshll.u32 %s5673_s3, 4  ;;  %s20_s26 = int_to_ptr.vmem [resolvable:$true] %s19_s26  ;;  %s57_s30 = int_to_ptr.hbm [resolvable:$true] %s56_s30 }
   0x9   :  { %25 = dma.hbm_to_vmem [thread:$0]  %s18_s22, 2048, %s20_s26, [#allocation3], %s4538_s23, %s4538_s23, %s4539_s24  }
   0xa   :  { %s4541_s5 = smov [#allocation7]   ;;  %s4542_s7 = smov [#allocation8]  }
   0xb   :  { %s45_s6 = sshll.u32 %s4541_s5, 4  ;;  %s58_s2 = sshll.u32 %s4542_s7, 4  ;;  %s46_s6 = int_to_ptr.vmem [resolvable:$true] %s45_s6  ;;  %s59_s2 = int_to_ptr.vmem [resolvable:$true] %s58_s2 }
   0xc   :  { %51 = dma.hbm_to_vmem [thread:$0]  %s44_s1, 43008, %s46_s6, [#allocation6], %s4538_s23, %s4538_s23, %s4539_s24  }
   0xd   :  { %s4543_s8 = smov 16   ;;  %s4544_s9 = smov 1  }
   0xe   :  { %64 = dma.hbm_to_vmem [thread:$0]  %s57_s30, 336, %s59_s2, [#allocation9], %s4543_s8, %s4543_s8, %s4544_s9  }
   0xf   :  { %4529 = dma.done.wait [#allocation3], 2048  }
  0x10   :  { %4530 = vsyncadd [#allocation3], 4294965248 }
  0x11   :  { %4531 = dma.done.wait [#allocation6], 45056  }
  0x12   :  { %4532 = vsyncadd [#allocation6], 4294922240 }
  0x13   :  { %4533 = dma.done.wait [#allocation9], 336  }
  0x14   :  { %4534 = vsyncadd [#allocation9], 4294966960  ;;  %v112_v0 = vld [vmem:[#allocation5 + $0x78] sm:$0xff]  ;;  %v111_v1 = vld [vmem:[#allocation5 + $0x70] sm:$0xff]  ;;  %s4545_s3 = smov [#allocation10]   ;;  %s4220_s13 = sshll.u32 %s5674_s4, 4  ;;  %s4221_s13 = int_to_ptr.hbm [resolvable:$true] %s4220_s13 }
  0x15   :  { %130 = vmatpush.msra.mxu0 %v112_v0  ;;  %4235 = vmatpush.msra.mxu1 %v112_v0  ;;  %v110_v2 = vld [vmem:[#allocation5 + $0x68] sm:$0xff]  ;;  %v109_v3 = vld [vmem:[#allocation5 + $0x60] sm:$0xff]  ;;  %v108_v4 = vld [vmem:[#allocation5 + $0x58] sm:$0xff]  ;;  %s4218_s10 = sshll.u32 %s4545_s3, 4  ;;  %s4219_s10 = int_to_ptr.vmem [resolvable:$true] %s4218_s10 }
  0x16   :  { %4236 = vmatpush.msra.mxu2 %v112_v0  ;;  %4237 = vmatpush.msra.mxu3 %v112_v0  ;;  %v107_v5 = vld [vmem:[#allocation5 + $0x50] sm:$0xff]  ;;  %v106_v6 = vld [vmem:[#allocation5 + $0x48] sm:$0xff]  ;;  %v105_v7 = vld [vmem:[#allocation5 + $0x40] sm:$0xff] }
  0x17   :  { %131 = vmatpush.msra.mxu0 %v111_v1  ;;  %4238 = vmatpush.msra.mxu1 %v111_v1  ;;  %v104_v8 = vld [vmem:[#allocation5 + $0x38] sm:$0xff]  ;;  %v103_v9 = vld [vmem:[#allocation5 + $0x30] sm:$0xff]  ;;  %v102_v10 = vld [vmem:[#allocation5 + $0x28] sm:$0xff] }
  0x18   :  { %4239 = vmatpush.msra.mxu2 %v111_v1  ;;  %4240 = vmatpush.msra.mxu3 %v111_v1  ;;  %v101_v11 = vld [vmem:[#allocation5 + $0x20] sm:$0xff]  ;;  %v100_v12 = vld [vmem:[#allocation5 + $0x18] sm:$0xff]  ;;  %v99_v13 = vld [vmem:[#allocation5 + $0x10] sm:$0xff] }
  0x19   :  { %132 = vmatpush.msra.mxu0 %v110_v2  ;;  %4241 = vmatpush.msra.mxu1 %v110_v2  ;;  %v98_v14 = vld [vmem:[#allocation5 + $0x8] sm:$0xff]  ;;  %v97_v15 = vld [vmem:[#allocation5] sm:$0xff]  ;;  %v128_v20 = vld [vmem:[#allocation7 + $0x78] sm:$0xff] }
  0x1a   :  { %4242 = vmatpush.msra.mxu2 %v110_v2  ;;  %4243 = vmatpush.msra.mxu3 %v110_v2  ;;  %v4592_v16 = vld [vmem:[#allocation2] sm:$0xff]  ;;  %v127_v21 = vld [vmem:[#allocation7 + $0x70] sm:$0xff]  ;;  %v126_v22 = vld [vmem:[#allocation7 + $0x68] sm:$0xff] }
  0x1b   :  { %133 = vmatpush.msra.mxu0 %v109_v3  ;;  %4244 = vmatpush.msra.mxu1 %v109_v3  ;;  %v4594_v17 = vld [vmem:[#allocation2 + $0x20] sm:$0xff]  ;;  %v4604_v23 = vld [vmem:[#allocation2 + $0x8] sm:$0xff]  ;;  %v124_v28 = vld [vmem:[#allocation7 + $0x58] sm:$0xff] }
  0x1c   :  { %4245 = vmatpush.msra.mxu2 %v109_v3  ;;  %4246 = vmatpush.msra.mxu3 %v109_v3  ;;  %v4596_v18 = vld [vmem:[#allocation2 + $0x40] sm:$0xff]  ;;  %v4606_v24 = vld [vmem:[#allocation2 + $0x28] sm:$0xff]  ;;  %v123_v29 = vld [vmem:[#allocation7 + $0x50] sm:$0xff] }
  0x1d   :  { %134 = vmatpush.msra.mxu0 %v108_v4  ;;  %4247 = vmatpush.msra.mxu1 %v108_v4  ;;  %v4598_v19 = vld [vmem:[#allocation2 + $0x60] sm:$0xff]  ;;  %v4608_v26 = vld [vmem:[#allocation2 + $0x48] sm:$0xff]  ;;  %v4616_v31 = vld [vmem:[#allocation2 + $0x10] sm:$0xff] }
  0x1e   :  { %4248 = vmatpush.msra.mxu2 %v108_v4  ;;  %4249 = vmatpush.msra.mxu3 %v108_v4  ;;  %v125_v25 = vld [vmem:[#allocation7 + $0x60] sm:$0xff]  ;;  %v4610_v27 = vld [vmem:[#allocation2 + $0x68] sm:$0xff]  ;;  %v4618_v32 = vld [vmem:[#allocation2 + $0x30] sm:$0xff] }
  0x1f   :  { %135 = vmatpush.msra.mxu0 %v107_v5  ;;  %4250 = vmatpush.msra.mxu1 %v107_v5  ;;  %v122_v30 = vld [vmem:[#allocation7 + $0x48] sm:$0xff]  ;;  %v121_v33 = vld [vmem:[#allocation7 + $0x40] sm:$0xff]  ;;  %v4620_v34 = vld [vmem:[#allocation2 + $0x50] sm:$0xff] }
  0x20   :  { %4251 = vmatpush.msra.mxu2 %v107_v5  ;;  %4252 = vmatpush.msra.mxu3 %v107_v5  ;;  %v4622_v35 = vld [vmem:[#allocation2 + $0x70] sm:$0xff]  ;;  %v120_v36 = vld [vmem:[#allocation7 + $0x38] sm:$0xff]  ;;  %v118_v38 = vld [vmem:[#allocation7 + $0x28] sm:$0xff] }
  0x21   :  { %136 = vmatpush.msra.mxu0 %v106_v6  ;;  %4253 = vmatpush.msra.mxu1 %v106_v6  ;;  %v119_v37 = vld [vmem:[#allocation7 + $0x30] sm:$0xff]  ;;  %v4628_v39 = vld [vmem:[#allocation2 + $0x18] sm:$0xff]  ;;  %v117_v41 = vld [vmem:[#allocation7 + $0x20] sm:$0xff] }
  0x22   :  { %4254 = vmatpush.msra.mxu2 %v106_v6  ;;  %4255 = vmatpush.msra.mxu3 %v106_v6  ;;  %v4630_v40 = vld [vmem:[#allocation2 + $0x38] sm:$0xff]  ;;  %v115_v45 = vld [vmem:[#allocation7 + $0x10] sm:$0xff]  ;;  %v114_v46 = vld [vmem:[#allocation7 + $0x8] sm:$0xff] }
  0x23   :  { %137 = vmatpush.msra.mxu0 %v105_v7  ;;  %4256 = vmatpush.msra.mxu1 %v105_v7  ;;  %v4632_v42 = vld [vmem:[#allocation2 + $0x58] sm:$0xff]  ;;  %v113_v47 = vld [vmem:[#allocation7] sm:$0xff] }
  0x24   :  { %4257 = vmatpush.msra.mxu2 %v105_v7  ;;  %4258 = vmatpush.msra.mxu3 %v105_v7  ;;  %v4634_v43 = vld [vmem:[#allocation2 + $0x78] sm:$0xff] }
  0x25   :  { %138 = vmatpush.msra.mxu0 %v104_v8  ;;  %4259 = vmatpush.msra.mxu1 %v104_v8  ;;  %v116_v44 = vld [vmem:[#allocation7 + $0x18] sm:$0xff] }
  0x26   :  { %4260 = vmatpush.msra.mxu2 %v104_v8  ;;  %4261 = vmatpush.msra.mxu3 %v104_v8 }
  0x27   :  { %139 = vmatpush.msra.mxu0 %v103_v9  ;;  %4262 = vmatpush.msra.mxu1 %v103_v9 }
  0x28   :  { %4263 = vmatpush.msra.mxu2 %v103_v9  ;;  %4264 = vmatpush.msra.mxu3 %v103_v9 }
  0x29   :  { %140 = vmatpush.msra.mxu0 %v102_v10  ;;  %4265 = vmatpush.msra.mxu1 %v102_v10 }
  0x2a   :  { %4266 = vmatpush.msra.mxu2 %v102_v10  ;;  %4267 = vmatpush.msra.mxu3 %v102_v10 }
  0x2b   :  { %141 = vmatpush.msra.mxu0 %v101_v11  ;;  %4268 = vmatpush.msra.mxu1 %v101_v11 }
  0x2c   :  { %4269 = vmatpush.msra.mxu2 %v101_v11  ;;  %4270 = vmatpush.msra.mxu3 %v101_v11 }
  0x2d   :  { %142 = vmatpush.msra.mxu0 %v100_v12  ;;  %4271 = vmatpush.msra.mxu1 %v100_v12 }
  0x2e   :  { %4272 = vmatpush.msra.mxu2 %v100_v12  ;;  %4273 = vmatpush.msra.mxu3 %v100_v12 }
  0x2f   :  { %143 = vmatpush.msra.mxu0 %v99_v13  ;;  %4274 = vmatpush.msra.mxu1 %v99_v13 }
  0x30   :  { %4275 = vmatpush.msra.mxu2 %v99_v13  ;;  %4276 = vmatpush.msra.mxu3 %v99_v13 }
  0x31   :  { %144 = vmatpush.msra.mxu0 %v98_v14  ;;  %4277 = vmatpush.msra.mxu1 %v98_v14 }
  0x32   :  { %4278 = vmatpush.msra.mxu2 %v98_v14  ;;  %4279 = vmatpush.msra.mxu3 %v98_v14 }
  0x33   :  { %145 = vmatpush.msra.mxu0 %v97_v15  ;;  %4280 = vmatpush.msra.mxu1 %v97_v15 }
  0x34   :  { %146 = vmatmul.f32.vlgmr.msra.gmra.mxu0 %v4592_v16  ;;  %158 = vmatmul.f32.vlgmr.msra.gmra.mxu1 %v4594_v17 }
  0x35   :  { %4281 = vmatpush.msra.mxu2 %v97_v15  ;;  %4282 = vmatpush.msra.mxu3 %v97_v15  ;;  %v4646_v15 = vld [vmem:[#allocation8] ss:$0 sm:$0xff] }
  0x36   :  { %170 = vmatmul.f32.vlgmr.msra.gmra.mxu2 %v4596_v18  ;;  %182 = vmatmul.f32.vlgmr.msra.gmra.mxu3 %v4598_v19 }
  0x37   :  { %198 = vmatpush.msrb.mxu1 %v128_v20 }
  0x39   :  { %199 = vmatpush.msrb.mxu1 %v127_v21 }
  0x3b   :  { %200 = vmatpush.msrb.mxu1 %v126_v22 }
  0x3c   :  { %149 = vmatmul.f32.gmra.mxu0 %v4604_v23  ;;  %161 = vmatmul.f32.gmra.mxu1 %v4606_v24 }
  0x3d   :  { %201 = vmatpush.msrb.mxu1 %v125_v25 }
  0x3e   :  { %173 = vmatmul.f32.gmra.mxu2 %v4608_v26  ;;  %185 = vmatmul.f32.gmra.mxu3 %v4610_v27 }
  0x3f   :  { %202 = vmatpush.msrb.mxu1 %v124_v28 }
  0x41   :  { %203 = vmatpush.msrb.mxu1 %v123_v29 }
  0x43   :  { %204 = vmatpush.msrb.mxu1 %v122_v30 }
  0x44   :  { %152 = vmatmul.f32.gmra.mxu0 %v4616_v31  ;;  %164 = vmatmul.f32.gmra.mxu1 %v4618_v32 }
  0x45   :  { %205 = vmatpush.msrb.mxu1 %v121_v33 }
  0x46   :  { %176 = vmatmul.f32.gmra.mxu2 %v4620_v34  ;;  %188 = vmatmul.f32.gmra.mxu3 %v4622_v35 }
  0x47   :  { %206 = vmatpush.msrb.mxu1 %v120_v36 }
  0x49   :  { %207 = vmatpush.msrb.mxu1 %v119_v37 }
  0x4b   :  { %208 = vmatpush.msrb.mxu1 %v118_v38 }
  0x4c   :  { %155 = vmatmul.f32.gmra.mxu0 %v4628_v39  ;;  %167 = vmatmul.f32.gmra.mxu1 %v4630_v40 }
  0x4d   :  { %209 = vmatpush.msrb.mxu1 %v117_v41 }
  0x4e   :  { %179 = vmatmul.f32.gmra.mxu2 %v4632_v42  ;;  %191 = vmatmul.f32.gmra.mxu3 %v4634_v43 }
  0x4f   :  { %210 = vmatpush.msrb.mxu1 %v116_v44 }
  0x51   :  { %211 = vmatpush.msrb.mxu1 %v115_v45 }
  0x53   :  { %212 = vmatpush.msrb.mxu1 %v114_v46 }
  0x55   :  { %213 = vmatpush.msrb.mxu1 %v113_v47 }
  0xb1   :  { %v147_v48 = vpop.f32.mrf.mxu0  ;;  %v159_v52 = vpop.f32.mrf.mxu1 }
  0xb2   :  { %214 = vmatmul.f32.vlgmr.msrb.gmra.mxu1 %v147_v48 }
  0xb9   :  { %v150_v49 = vpop.f32.mrf.mxu0  ;;  %v162_v53 = vpop.f32.mrf.mxu1 }
  0xba   :  { %217 = vmatmul.f32.gmra.mxu1 %v150_v49  ;;  %v171_v56 = vpop.f32.mrf.mxu2  ;;  %v183_v60 = vpop.f32.mrf.mxu3 }
  0xc1   :  { %v153_v50 = vpop.f32.mrf.mxu0  ;;  %v165_v54 = vpop.f32.mrf.mxu1 }
  0xc2   :  { %220 = vmatmul.f32.gmra.mxu1 %v153_v50  ;;  %v174_v57 = vpop.f32.mrf.mxu2  ;;  %v186_v61 = vpop.f32.mrf.mxu3 }
  0xc9   :  { %v156_v51 = vpop.f32.mrf.mxu0  ;;  %v168_v55 = vpop.f32.mrf.mxu1 }
  0xca   :  { %223 = vmatmul.f32.gmra.mxu1 %v156_v51  ;;  %v177_v58 = vpop.f32.mrf.mxu2  ;;  %v189_v62 = vpop.f32.mrf.mxu3 }
  0xd2   :  { %226 = vmatmul.f32.gmra.mxu1 %v159_v52  ;;  %v180_v59 = vpop.f32.mrf.mxu2  ;;  %v192_v63 = vpop.f32.mrf.mxu3 }
  0xda   :  { %229 = vmatmul.f32.gmra.mxu1 %v162_v53 }
  0xe2   :  { %232 = vmatmul.f32.gmra.mxu1 %v165_v54 }
  0xea   :  { %235 = vmatmul.f32.gmra.mxu1 %v168_v55 }
  0xf2   :  { %238 = vmatmul.f32.gmra.mxu1 %v171_v56 }
  0xfa   :  { %241 = vmatmul.f32.gmra.mxu1 %v174_v57 }
 0x102   :  { %244 = vmatmul.f32.gmra.mxu1 %v177_v58 }
 0x10a   :  { %247 = vmatmul.f32.gmra.mxu1 %v180_v59 }
 0x112   :  { %250 = vmatmul.f32.gmra.mxu1 %v183_v60 }
 0x11a   :  { %253 = vmatmul.f32.gmra.mxu1 %v186_v61 }
 0x122   :  { %256 = vmatmul.f32.gmra.mxu1 %v189_v62 }
 0x12a   :  { %259 = vmatmul.f32.gmra.mxu1 %v192_v63 }
 0x12f   :  { %v4640_v0 = vpop.f32.mrf.mxu1 }
 0x137   :  { %v4642_v1 = vpop.f32.mrf.mxu1 }
 0x13f   :  { %v4644_v2 = vpop.f32.mrf.mxu1 }
 0x147   :  { %v224_v3 = vpop.f32.mrf.mxu1 }
 0x148   :  { %v225_v63 = vadd.f32 %v4646_v15, %v224_v3  ;;  %v216_v3 = vadd.f32 %v4646_v15, %v4640_v0  ;;  %v327_v0 = vld [vmem:[#allocation7 + $0xf8] sm:$0xff] }
 0x149   :  { %398 = vmatpush.msrb.mxu3 %v327_v0 }
 0x14a   :  { %vm266_vm12 = vcmp.ge.f32.partialorder %v225_v63, 0.0  ;;  %vm263_vm15 = vcmp.ge.f32.partialorder %v216_v3, 0.0 }
 0x14f   :  { %v227_v4 = vpop.f32.mrf.mxu1 }
 0x150   :  { %v228_v60 = vadd.f32 %v4646_v15, %v227_v4  ;;  %v219_v4 = vadd.f32 %v4646_v15, %v4642_v1 }
 0x152   :  { %vm267_vm11 = vcmp.ge.f32.partialorder %v228_v60, 0.0  ;;  %vm264_vm14 = vcmp.ge.f32.partialorder %v219_v4, 0.0 }
 0x157   :  { %v230_v5 = vpop.f32.mrf.mxu1 }
 0x158   :  { %v231_v57 = vadd.f32 %v4646_v15, %v230_v5 }
 0x15a   :  { %vm268_vm10 = vcmp.ge.f32.partialorder %v231_v57, 0.0 }
 0x15f   :  { %v233_v6 = vpop.f32.mrf.mxu1 }
 0x160   :  { %v234_v54 = vadd.f32 %v4646_v15, %v233_v6  ;;  %v284_v6 = vmul.f32 0.01, %v231_v57 }
 0x162   :  { %v285_v62 = vmul.f32 0.01, %v234_v54  ;;  %vm269_vm9 = vcmp.ge.f32.partialorder %v234_v54, 0.0 }
 0x164   :  { %v301_v5 = vsel %vm269_vm9, %v234_v54, %v285_v62 }
 0x167   :  { %v236_v7 = vpop.f32.mrf.mxu1 }
 0x168   :  { %v237_v51 = vadd.f32 %v4646_v15, %v236_v7 }
 0x16a   :  { %v286_v59 = vmul.f32 0.01, %v237_v51  ;;  %vm270_vm8 = vcmp.ge.f32.partialorder %v237_v51, 0.0 }
 0x16c   :  { %v302_v7 = vsel %vm270_vm8, %v237_v51, %v286_v59 }
 0x16f   :  { %v239_v8 = vpop.f32.mrf.mxu1 }
 0x170   :  { %v240_v48 = vadd.f32 %v4646_v15, %v239_v8  ;;  %v222_v8 = vadd.f32 %v4646_v15, %v4644_v2  ;;  %v280_v2 = vmul.f32 0.01, %v219_v4 }
 0x172   :  { %v287_v56 = vmul.f32 0.01, %v240_v48  ;;  %vm271_vm7 = vcmp.ge.f32.partialorder %v240_v48, 0.0  ;;  %vm265_vm13 = vcmp.ge.f32.partialorder %v222_v8, 0.0  ;;  %v296_v1 = vsel %vm264_vm14, %v219_v4, %v280_v2 }
 0x174   :  { %v303_v61 = vsel %vm271_vm7, %v240_v48, %v287_v56  ;;  %v312_v48 = vld [vmem:[#allocation7 + $0x80] sm:$0xff] }
 0x177   :  { %v242_v9 = vpop.f32.mrf.mxu1 }
 0x178   :  { %v243_v45 = vadd.f32 %v4646_v15, %v242_v9  ;;  %v283_v9 = vmul.f32 0.01, %v228_v60 }
 0x17a   :  { %v288_v53 = vmul.f32 0.01, %v243_v45  ;;  %vm272_vm6 = vcmp.ge.f32.partialorder %v243_v45, 0.0 }
 0x17c   :  { %v304_v58 = vsel %vm272_vm6, %v243_v45, %v288_v53  ;;  %v315_v45 = vld [vmem:[#allocation7 + $0x98] sm:$0xff] }
 0x17f   :  { %v245_v10 = vpop.f32.mrf.mxu1 }
 0x180   :  { %v246_v38 = vadd.f32 %v4646_v15, %v245_v10  ;;  %v300_v10 = vsel %vm268_vm10, %v231_v57, %v284_v6 }
 0x182   :  { %v289_v50 = vmul.f32 0.01, %v246_v38  ;;  %vm273_vm5 = vcmp.ge.f32.partialorder %v246_v38, 0.0 }
 0x184   :  { %v305_v55 = vsel %vm273_vm5, %v246_v38, %v289_v50  ;;  %v318_v38 = vld [vmem:[#allocation7 + $0xb0] sm:$0xff] }
 0x187   :  { %v248_v11 = vpop.f32.mrf.mxu1 }
 0x188   :  { %v249_v33 = vadd.f32 %v4646_v15, %v248_v11  ;;  %v282_v11 = vmul.f32 0.01, %v225_v63 }
 0x18a   :  { %v290_v47 = vmul.f32 0.01, %v249_v33  ;;  %vm274_vm4 = vcmp.ge.f32.partialorder %v249_v33, 0.0 }
 0x18c   :  { %v306_v52 = vsel %vm274_vm4, %v249_v33, %v290_v47  ;;  %v321_v33 = vld [vmem:[#allocation7 + $0xc8] sm:$0xff] }
 0x18d   :  { %v313_v47 = vld [vmem:[#allocation7 + $0x88] sm:$0xff] }
 0x18f   :  { %v251_v12 = vpop.f32.mrf.mxu1 }
 0x190   :  { %v252_v28 = vadd.f32 %v4646_v15, %v251_v12  ;;  %v299_v12 = vsel %vm267_vm11, %v228_v60, %v283_v9 }
 0x192   :  { %v291_v44 = vmul.f32 0.01, %v252_v28  ;;  %vm275_vm3 = vcmp.ge.f32.partialorder %v252_v28, 0.0 }
 0x194   :  { %v307_v49 = vsel %vm275_vm3, %v252_v28, %v291_v44  ;;  %v324_v28 = vld [vmem:[#allocation7 + $0xe0] sm:$0xff] }
 0x195   :  { %v316_v44 = vld [vmem:[#allocation7 + $0xa0] sm:$0xff] }
 0x197   :  { %v254_v13 = vpop.f32.mrf.mxu1 }
 0x198   :  { %v255_v22 = vadd.f32 %v4646_v15, %v254_v13  ;;  %v281_v13 = vmul.f32 0.01, %v222_v8 }
 0x19a   :  { %v292_v37 = vmul.f32 0.01, %v255_v22  ;;  %vm276_vm2 = vcmp.ge.f32.partialorder %v255_v22, 0.0 }
 0x19c   :  { %v308_v46 = vsel %vm276_vm2, %v255_v22, %v292_v37  ;;  %v319_v37 = vld [vmem:[#allocation7 + $0xb8] sm:$0xff] }
 0x19f   :  { %v257_v14 = vpop.f32.mrf.mxu1 }
 0x1a0   :  { %v258_v20 = vadd.f32 %v4646_v15, %v257_v14  ;;  %v298_v14 = vsel %vm266_vm12, %v225_v63, %v282_v11 }
 0x1a2   :  { %v293_v30 = vmul.f32 0.01, %v258_v20  ;;  %vm277_vm1 = vcmp.ge.f32.partialorder %v258_v20, 0.0 }
 0x1a4   :  { %v309_v41 = vsel %vm277_vm1, %v258_v20, %v293_v30  ;;  %v297_v20 = vsel %vm265_vm13, %v222_v8, %v281_v13  ;;  %v322_v30 = vld [vmem:[#allocation7 + $0xd0] sm:$0xff] }
 0x1a7   :  { %v260_v21 = vpop.f32.mrf.mxu1 }
 0x1a8   :  { %v261_v25 = vadd.f32 %v4646_v15, %v260_v21  ;;  %v279_v21 = vmul.f32 0.01, %v216_v3  ;;  %v326_v15 = vld [vmem:[#allocation7 + $0xf0] sm:$0xff] }
 0x1a9   :  { %399 = vmatpush.msrb.mxu3 %v326_v15 }
 0x1aa   :  { %vm278_vm0 = vcmp.ge.f32.partialorder %v261_v25, 0.0  ;;  %v294_v29 = vmul.f32 0.01, %v261_v25  ;;  %v295_v22 = vsel %vm263_vm15, %v216_v3, %v279_v21 }
 0x1ac   :  { %v310_v36 = vsel %vm278_vm0, %v261_v25, %v294_v29  ;;  %v325_v25 = vld [vmem:[#allocation7 + $0xe8] sm:$0xff]  ;;  %v323_v29 = vld [vmem:[#allocation7 + $0xd8] sm:$0xff] }
 0x1ad   :  { %330 = vmatpush.msrb.mxu2 %v310_v36  ;;  %400 = vmatpush.msrb.mxu3 %v325_v25  ;;  %v320_v36 = vld [vmem:[#allocation7 + $0xc0] sm:$0xff] }
 0x1af   :  { %331 = vmatpush.msrb.mxu2 %v309_v41  ;;  %401 = vmatpush.msrb.mxu3 %v324_v28  ;;  %v317_v41 = vld [vmem:[#allocation7 + $0xa8] sm:$0xff] }
 0x1b1   :  { %332 = vmatpush.msrb.mxu2 %v308_v46  ;;  %402 = vmatpush.msrb.mxu3 %v323_v29  ;;  %v314_v46 = vld [vmem:[#allocation7 + $0x90] sm:$0xff] }
 0x1b3   :  { %333 = vmatpush.msrb.mxu2 %v307_v49  ;;  %403 = vmatpush.msrb.mxu3 %v322_v30 }
 0x1b5   :  { %334 = vmatpush.msrb.mxu2 %v306_v52  ;;  %404 = vmatpush.msrb.mxu3 %v321_v33 }
 0x1b7   :  { %335 = vmatpush.msrb.mxu2 %v305_v55  ;;  %405 = vmatpush.msrb.mxu3 %v320_v36 }
 0x1b9   :  { %336 = vmatpush.msrb.mxu2 %v304_v58  ;;  %406 = vmatpush.msrb.mxu3 %v319_v37 }
 0x1bb   :  { %337 = vmatpush.msrb.mxu2 %v303_v61  ;;  %407 = vmatpush.msrb.mxu3 %v318_v38 }
 0x1bd   :  { %338 = vmatpush.msrb.mxu2 %v302_v7  ;;  %408 = vmatpush.msrb.mxu3 %v317_v41 }
 0x1bf   :  { %339 = vmatpush.msrb.mxu2 %v301_v5  ;;  %409 = vmatpush.msrb.mxu3 %v316_v44 }
 0x1c1   :  { %340 = vmatpush.msrb.mxu2 %v300_v10  ;;  %410 = vmatpush.msrb.mxu3 %v315_v45 }
 0x1c3   :  { %341 = vmatpush.msrb.mxu2 %v299_v12  ;;  %411 = vmatpush.msrb.mxu3 %v314_v46 }
 0x1c5   :  { %342 = vmatpush.msrb.mxu2 %v298_v14  ;;  %412 = vmatpush.msrb.mxu3 %v313_v47 }
 0x1c7   :  { %343 = vmatpush.msrb.mxu2 %v297_v20  ;;  %413 = vmatpush.msrb.mxu3 %v312_v48 }
 0x1c9   :  { %344 = vmatpush.msrb.mxu2 %v296_v1 }
 0x1cb   :  { %345 = vmatpush.msrb.mxu2 %v295_v22  ;;  %v4689_v22 = vld [vmem:[#allocation8 + $0x1] ss:$0 sm:$0xff] }
 0x1cc   :  { %346 = vmatmul.f32.vlgmr.msrb.gmra.mxu2 %v4592_v16 }
 0x1d4   :  { %349 = vmatmul.f32.gmra.mxu2 %v4604_v23 }
 0x1dc   :  { %352 = vmatmul.f32.gmra.mxu2 %v4616_v31 }
 0x1e4   :  { %355 = vmatmul.f32.gmra.mxu2 %v4628_v39 }
 0x1ec   :  { %358 = vmatmul.f32.gmra.mxu2 %v4594_v17 }
 0x1f4   :  { %361 = vmatmul.f32.gmra.mxu2 %v4606_v24 }
 0x1fc   :  { %364 = vmatmul.f32.gmra.mxu2 %v4618_v32 }
 0x204   :  { %367 = vmatmul.f32.gmra.mxu2 %v4630_v40 }
 0x20c   :  { %370 = vmatmul.f32.gmra.mxu2 %v4596_v18 }
 0x214   :  { %373 = vmatmul.f32.gmra.mxu2 %v4608_v26 }
 0x21c   :  { %376 = vmatmul.f32.gmra.mxu2 %v4620_v34 }
 0x224   :  { %379 = vmatmul.f32.gmra.mxu2 %v4632_v42 }
 0x22c   :  { %382 = vmatmul.f32.gmra.mxu2 %v4598_v19 }
 0x234   :  { %385 = vmatmul.f32.gmra.mxu2 %v4610_v27 }
 0x23c   :  { %388 = vmatmul.f32.gmra.mxu2 %v4622_v35 }
 0x244   :  { %391 = vmatmul.f32.gmra.mxu2 %v4634_v43 }
 0x24f   :  { %v347_v49 = vpop.f32.mrf.mxu2 }
 0x250   :  { %414 = vmatmul.f32.vlgmr.msrb.gmra.mxu3 %v347_v49 }
 0x257   :  { %v350_v50 = vpop.f32.mrf.mxu2 }
 0x258   :  { %417 = vmatmul.f32.gmra.mxu3 %v350_v50 }
 0x25f   :  { %v353_v51 = vpop.f32.mrf.mxu2 }
 0x260   :  { %420 = vmatmul.f32.gmra.mxu3 %v353_v51 }
 0x267   :  { %v356_v52 = vpop.f32.mrf.mxu2 }
 0x268   :  { %423 = vmatmul.f32.gmra.mxu3 %v356_v52 }
 0x26f   :  { %v359_v53 = vpop.f32.mrf.mxu2 }
 0x270   :  { %426 = vmatmul.f32.gmra.mxu3 %v359_v53 }
 0x277   :  { %v362_v54 = vpop.f32.mrf.mxu2 }
 0x278   :  { %429 = vmatmul.f32.gmra.mxu3 %v362_v54 }
 0x27f   :  { %v365_v55 = vpop.f32.mrf.mxu2 }
 0x280   :  { %432 = vmatmul.f32.gmra.mxu3 %v365_v55 }
 0x287   :  { %v368_v56 = vpop.f32.mrf.mxu2 }
 0x288   :  { %435 = vmatmul.f32.gmra.mxu3 %v368_v56 }
 0x28f   :  { %v371_v57 = vpop.f32.mrf.mxu2 }
 0x290   :  { %438 = vmatmul.f32.gmra.mxu3 %v371_v57 }
 0x297   :  { %v374_v58 = vpop.f32.mrf.mxu2 }
 0x298   :  { %441 = vmatmul.f32.gmra.mxu3 %v374_v58 }
 0x29f   :  { %v377_v59 = vpop.f32.mrf.mxu2 }
 0x2a0   :  { %444 = vmatmul.f32.gmra.mxu3 %v377_v59 }
 0x2a7   :  { %v380_v60 = vpop.f32.mrf.mxu2 }
 0x2a8   :  { %447 = vmatmul.f32.gmra.mxu3 %v380_v60 }
 0x2af   :  { %v383_v61 = vpop.f32.mrf.mxu2 }
 0x2b0   :  { %450 = vmatmul.f32.gmra.mxu3 %v383_v61 }
 0x2b7   :  { %v386_v62 = vpop.f32.mrf.mxu2 }
 0x2b8   :  { %453 = vmatmul.f32.gmra.mxu3 %v386_v62 }
 0x2bf   :  { %v389_v63 = vpop.f32.mrf.mxu2 }
 0x2c0   :  { %456 = vmatmul.f32.gmra.mxu3 %v389_v63 }
 0x2c7   :  { %v392_v7 = vpop.f32.mrf.mxu2 }
 0x2c8   :  { %459 = vmatmul.f32.gmra.mxu3 %v392_v7 }
 0x2d3   :  { %v4683_v6 = vpop.f32.mrf.mxu3 }
 0x2db   :  { %v4685_v8 = vpop.f32.mrf.mxu3 }
 0x2e3   :  { %v4687_v5 = vpop.f32.mrf.mxu3 }
 0x2eb   :  { %v424_v9 = vpop.f32.mrf.mxu3 }
 0x2ec   :  { %v425_v7 = vadd.f32 %v4689_v22, %v424_v9  ;;  %v416_v9 = vadd.f32 %v4689_v22, %v4683_v6  ;;  %v527_v6 = vld [vmem:[#allocation7 + $0x178] sm:$0xff] }
 0x2ed   :  { %598 = vmatpush.msra.mxu1 %v527_v6 }
 0x2ee   :  { %vm466_vm12 = vcmp.ge.f32.partialorder %v425_v7, 0.0  ;;  %vm463_vm15 = vcmp.ge.f32.partialorder %v416_v9, 0.0 }
 0x2f3   :  { %v427_v4 = vpop.f32.mrf.mxu3 }
 0x2f4   :  { %v428_v61 = vadd.f32 %v4689_v22, %v427_v4  ;;  %v419_v4 = vadd.f32 %v4689_v22, %v4685_v8 }
 0x2f6   :  { %vm467_vm11 = vcmp.ge.f32.partialorder %v428_v61, 0.0  ;;  %vm464_vm14 = vcmp.ge.f32.partialorder %v419_v4, 0.0 }
 0x2fb   :  { %v430_v10 = vpop.f32.mrf.mxu3 }
 0x2fc   :  { %v431_v58 = vadd.f32 %v4689_v22, %v430_v10 }
 0x2fe   :  { %vm468_vm10 = vcmp.ge.f32.partialorder %v431_v58, 0.0 }
 0x303   :  { %v433_v11 = vpop.f32.mrf.mxu3 }
 0x304   :  { %v434_v55 = vadd.f32 %v4689_v22, %v433_v11  ;;  %v484_v11 = vmul.f32 0.01, %v431_v58 }
 0x306   :  { %v485_v63 = vmul.f32 0.01, %v434_v55  ;;  %vm469_vm9 = vcmp.ge.f32.partialorder %v434_v55, 0.0 }
 0x308   :  { %v501_v10 = vsel %vm469_vm9, %v434_v55, %v485_v63 }
 0x30b   :  { %v436_v3 = vpop.f32.mrf.mxu3 }
 0x30c   :  { %v437_v52 = vadd.f32 %v4689_v22, %v436_v3 }
 0x30e   :  { %v486_v60 = vmul.f32 0.01, %v437_v52  ;;  %vm470_vm8 = vcmp.ge.f32.partialorder %v437_v52, 0.0 }
 0x310   :  { %v502_v3 = vsel %vm470_vm8, %v437_v52, %v486_v60 }
 0x313   :  { %v439_v12 = vpop.f32.mrf.mxu3 }
 0x314   :  { %v440_v49 = vadd.f32 %v4689_v22, %v439_v12  ;;  %v422_v12 = vadd.f32 %v4689_v22, %v4687_v5  ;;  %v480_v5 = vmul.f32 0.01, %v419_v4 }
 0x316   :  { %v487_v57 = vmul.f32 0.01, %v440_v49  ;;  %vm471_vm7 = vcmp.ge.f32.partialorder %v440_v49, 0.0  ;;  %vm465_vm13 = vcmp.ge.f32.partialorder %v422_v12, 0.0  ;;  %v496_v8 = vsel %vm464_vm14, %v419_v4, %v480_v5 }
 0x318   :  { %v503_v62 = vsel %vm471_vm7, %v440_v49, %v487_v57 }
 0x31b   :  { %v442_v13 = vpop.f32.mrf.mxu3 }
 0x31c   :  { %v443_v46 = vadd.f32 %v4689_v22, %v442_v13  ;;  %v483_v13 = vmul.f32 0.01, %v428_v61 }
 0x31e   :  { %v488_v54 = vmul.f32 0.01, %v443_v46  ;;  %vm472_vm6 = vcmp.ge.f32.partialorder %v443_v46, 0.0 }
 0x320   :  { %v504_v59 = vsel %vm472_vm6, %v443_v46, %v488_v54 }
 0x323   :  { %v445_v14 = vpop.f32.mrf.mxu3 }
 0x324   :  { %v446_v41 = vadd.f32 %v4689_v22, %v445_v14  ;;  %v500_v14 = vsel %vm468_vm10, %v431_v58, %v484_v11 }
 0x326   :  { %v489_v51 = vmul.f32 0.01, %v446_v41  ;;  %vm473_vm5 = vcmp.ge.f32.partialorder %v446_v41, 0.0 }
 0x328   :  { %v505_v56 = vsel %vm473_vm5, %v446_v41, %v489_v51 }
 0x32b   :  { %v448_v2 = vpop.f32.mrf.mxu3 }
 0x32c   :  { %v449_v36 = vadd.f32 %v4689_v22, %v448_v2  ;;  %v482_v2 = vmul.f32 0.01, %v425_v7 }
 0x32e   :  { %v490_v48 = vmul.f32 0.01, %v449_v36  ;;  %vm474_vm4 = vcmp.ge.f32.partialorder %v449_v36, 0.0 }
 0x330   :  { %v506_v53 = vsel %vm474_vm4, %v449_v36, %v490_v48  ;;  %v513_v36 = vld [vmem:[#allocation7 + $0x108] sm:$0xff] }
 0x333   :  { %v451_v20 = vpop.f32.mrf.mxu3 }
 0x334   :  { %v452_v29 = vadd.f32 %v4689_v22, %v451_v20  ;;  %v499_v20 = vsel %vm467_vm11, %v428_v61, %v483_v13 }
 0x336   :  { %v491_v45 = vmul.f32 0.01, %v452_v29  ;;  %vm475_vm3 = vcmp.ge.f32.partialorder %v452_v29, 0.0 }
 0x338   :  { %v507_v50 = vsel %vm475_vm3, %v452_v29, %v491_v45  ;;  %v517_v29 = vld [vmem:[#allocation7 + $0x128] sm:$0xff] }
 0x33b   :  { %v454_v21 = vpop.f32.mrf.mxu3 }
 0x33c   :  { %v455_v25 = vadd.f32 %v4689_v22, %v454_v21  ;;  %v481_v21 = vmul.f32 0.01, %v422_v12 }
 0x33e   :  { %v492_v38 = vmul.f32 0.01, %v455_v25  ;;  %vm476_vm2 = vcmp.ge.f32.partialorder %v455_v25, 0.0 }
 0x340   :  { %v508_v47 = vsel %vm476_vm2, %v455_v25, %v492_v38 }
 0x343   :  { %v457_v1 = vpop.f32.mrf.mxu3 }
 0x344   :  { %v458_v0 = vadd.f32 %v4689_v22, %v457_v1  ;;  %v498_v1 = vsel %vm466_vm12, %v425_v7, %v482_v2 }
 0x346   :  { %v493_v33 = vmul.f32 0.01, %v458_v0  ;;  %vm477_vm1 = vcmp.ge.f32.partialorder %v458_v0, 0.0 }
 0x348   :  { %v509_v44 = vsel %vm477_vm1, %v458_v0, %v493_v33  ;;  %v497_v0 = vsel %vm465_vm13, %v422_v12, %v481_v21  ;;  %v515_v33 = vld [vmem:[#allocation7 + $0x118] sm:$0xff]  ;;  %v4732_v12 = vld [vmem:[#allocation8 + $0x2] ss:$0 sm:$0xff] }
 0x34b   :  { %v460_v15 = vpop.f32.mrf.mxu3 }
 0x34c   :  { %v461_v28 = vadd.f32 %v4689_v22, %v460_v15  ;;  %v479_v15 = vmul.f32 0.01, %v416_v9  ;;  %v526_v22 = vld [vmem:[#allocation7 + $0x170] sm:$0xff] }
 0x34d   :  { %599 = vmatpush.msra.mxu1 %v526_v22 }
 0x34e   :  { %vm478_vm0 = vcmp.ge.f32.partialorder %v461_v28, 0.0  ;;  %v494_v30 = vmul.f32 0.01, %v461_v28  ;;  %v495_v25 = vsel %vm463_vm15, %v416_v9, %v479_v15 }
 0x350   :  { %v510_v37 = vsel %vm478_vm0, %v461_v28, %v494_v30  ;;  %v519_v28 = vld [vmem:[#allocation7 + $0x138] sm:$0xff]  ;;  %v516_v30 = vld [vmem:[#allocation7 + $0x120] sm:$0xff] }
 0x351   :  { %530 = vmatpush.msrb.mxu0 %v510_v37  ;;  %v512_v37 = vld [vmem:[#allocation7 + $0x100] sm:$0xff] }
 0x353   :  { %531 = vmatpush.msrb.mxu0 %v509_v44 }
 0x355   :  { %532 = vmatpush.msrb.mxu0 %v508_v47 }
 0x357   :  { %533 = vmatpush.msrb.mxu0 %v507_v50 }
 0x359   :  { %534 = vmatpush.msrb.mxu0 %v506_v53 }
 0x35b   :  { %535 = vmatpush.msrb.mxu0 %v505_v56 }
 0x35d   :  { %536 = vmatpush.msrb.mxu0 %v504_v59 }
 0x35f   :  { %537 = vmatpush.msrb.mxu0 %v503_v62 }
 0x361   :  { %538 = vmatpush.msrb.mxu0 %v502_v3 }
 0x363   :  { %539 = vmatpush.msrb.mxu0 %v501_v10 }
 0x365   :  { %540 = vmatpush.msrb.mxu0 %v500_v14 }
 0x367   :  { %541 = vmatpush.msrb.mxu0 %v499_v20 }
 0x369   :  { %542 = vmatpush.msrb.mxu0 %v498_v1 }
 0x36b   :  { %543 = vmatpush.msrb.mxu0 %v497_v0 }
 0x36d   :  { %544 = vmatpush.msrb.mxu0 %v496_v8 }
 0x36f   :  { %545 = vmatpush.msrb.mxu0 %v495_v25 }
 0x370   :  { %546 = vmatmul.f32.vlgmr.msrb.gmra.mxu0 %v4592_v16  ;;  %v525_v16 = vld [vmem:[#allocation7 + $0x168] sm:$0xff] }
 0x371   :  { %600 = vmatpush.msra.mxu1 %v525_v16 }
 0x378   :  { %549 = vmatmul.f32.gmra.mxu0 %v4604_v23  ;;  %v524_v23 = vld [vmem:[#allocation7 + $0x160] sm:$0xff] }
 0x379   :  { %601 = vmatpush.msra.mxu1 %v524_v23 }
 0x380   :  { %552 = vmatmul.f32.gmra.mxu0 %v4616_v31  ;;  %v523_v31 = vld [vmem:[#allocation7 + $0x158] sm:$0xff] }
 0x381   :  { %602 = vmatpush.msra.mxu1 %v523_v31 }
 0x388   :  { %555 = vmatmul.f32.gmra.mxu0 %v4628_v39 }
 0x390   :  { %558 = vmatmul.f32.gmra.mxu0 %v4594_v17  ;;  %v522_v17 = vld [vmem:[#allocation7 + $0x150] sm:$0xff] }
 0x391   :  { %603 = vmatpush.msra.mxu1 %v522_v17 }
 0x398   :  { %561 = vmatmul.f32.gmra.mxu0 %v4606_v24  ;;  %v521_v24 = vld [vmem:[#allocation7 + $0x148] sm:$0xff] }
 0x399   :  { %604 = vmatpush.msra.mxu1 %v521_v24 }
 0x3a0   :  { %564 = vmatmul.f32.gmra.mxu0 %v4618_v32  ;;  %v520_v32 = vld [vmem:[#allocation7 + $0x140] sm:$0xff] }
 0x3a1   :  { %605 = vmatpush.msra.mxu1 %v520_v32 }
 0x3a3   :  { %606 = vmatpush.msra.mxu1 %v519_v28 }
 0x3a8   :  { %567 = vmatmul.f32.gmra.mxu0 %v4630_v40 }
 0x3b0   :  { %570 = vmatmul.f32.gmra.mxu0 %v4596_v18  ;;  %v518_v18 = vld [vmem:[#allocation7 + $0x130] sm:$0xff] }
 0x3b1   :  { %607 = vmatpush.msra.mxu1 %v518_v18 }
 0x3b3   :  { %608 = vmatpush.msra.mxu1 %v517_v29 }
 0x3b5   :  { %609 = vmatpush.msra.mxu1 %v516_v30 }
 0x3b7   :  { %610 = vmatpush.msra.mxu1 %v515_v33 }
 0x3b8   :  { %573 = vmatmul.f32.gmra.mxu0 %v4608_v26  ;;  %v514_v26 = vld [vmem:[#allocation7 + $0x110] sm:$0xff] }
 0x3b9   :  { %611 = vmatpush.msra.mxu1 %v514_v26 }
 0x3bb   :  { %612 = vmatpush.msra.mxu1 %v513_v36 }
 0x3bd   :  { %613 = vmatpush.msra.mxu1 %v512_v37 }
 0x3c0   :  { %576 = vmatmul.f32.gmra.mxu0 %v4620_v34 }
 0x3c8   :  { %579 = vmatmul.f32.gmra.mxu0 %v4632_v42 }
 0x3d0   :  { %582 = vmatmul.f32.gmra.mxu0 %v4598_v19 }
 0x3d8   :  { %585 = vmatmul.f32.gmra.mxu0 %v4610_v27 }
 0x3e0   :  { %588 = vmatmul.f32.gmra.mxu0 %v4622_v35 }
 0x3e8   :  { %591 = vmatmul.f32.gmra.mxu0 %v4634_v43 }
 0x3ed   :  { %v547_v34 = vpop.f32.mrf.mxu0 }
 0x3ee   :  { %614 = vmatmul.f32.vlgmr.msra.gmra.mxu1 %v547_v34 }
 0x3f5   :  { %v550_v38 = vpop.f32.mrf.mxu0 }
 0x3f6   :  { %617 = vmatmul.f32.gmra.mxu1 %v550_v38 }
 0x3fd   :  { %v553_v41 = vpop.f32.mrf.mxu0 }
 0x3fe   :  { %620 = vmatmul.f32.gmra.mxu1 %v553_v41 }
 0x405   :  { %v556_v42 = vpop.f32.mrf.mxu0 }
 0x406   :  { %623 = vmatmul.f32.gmra.mxu1 %v556_v42 }
 0x40d   :  { %v559_v44 = vpop.f32.mrf.mxu0 }
 0x40e   :  { %626 = vmatmul.f32.gmra.mxu1 %v559_v44 }
 0x415   :  { %v562_v45 = vpop.f32.mrf.mxu0 }
 0x416   :  { %629 = vmatmul.f32.gmra.mxu1 %v562_v45 }
 0x41d   :  { %v565_v46 = vpop.f32.mrf.mxu0 }
 0x41e   :  { %632 = vmatmul.f32.gmra.mxu1 %v565_v46 }
 0x425   :  { %v568_v19 = vpop.f32.mrf.mxu0 }
 0x426   :  { %635 = vmatmul.f32.gmra.mxu1 %v568_v19 }
 0x42d   :  { %v571_v27 = vpop.f32.mrf.mxu0 }
 0x42e   :  { %638 = vmatmul.f32.gmra.mxu1 %v571_v27 }
 0x435   :  { %v574_v35 = vpop.f32.mrf.mxu0 }
 0x436   :  { %641 = vmatmul.f32.gmra.mxu1 %v574_v35 }
 0x43d   :  { %v577_v43 = vpop.f32.mrf.mxu0 }
 0x43e   :  { %644 = vmatmul.f32.gmra.mxu1 %v577_v43 }
 0x445   :  { %v580_v47 = vpop.f32.mrf.mxu0 }
 0x446   :  { %647 = vmatmul.f32.gmra.mxu1 %v580_v47 }
 0x44d   :  { %v583_v48 = vpop.f32.mrf.mxu0 }
 0x44e   :  { %650 = vmatmul.f32.gmra.mxu1 %v583_v48 }
 0x455   :  { %v586_v49 = vpop.f32.mrf.mxu0 }
 0x456   :  { %653 = vmatmul.f32.gmra.mxu1 %v586_v49 }
 0x45d   :  { %v589_v50 = vpop.f32.mrf.mxu0 }
 0x45e   :  { %656 = vmatmul.f32.gmra.mxu1 %v589_v50 }
 0x465   :  { %v592_v51 = vpop.f32.mrf.mxu0 }
 0x466   :  { %659 = vmatmul.f32.gmra.mxu1 %v592_v51 }
 0x46b   :  { %v4726_v52 = vpop.f32.mrf.mxu1 }
 0x46c   :  { %v616_v43 = vadd.f32 %v4732_v12, %v4726_v52  ;;  %v4756_v52 = vld [vmem:[#allocation2 + $0x8] sm:$0xff] }
 0x46e   :  { %vm663_vm15 = vcmp.ge.f32.partialorder %v616_v43, 0.0 }
 0x473   :  { %v4728_v53 = vpop.f32.mrf.mxu1 }
 0x474   :  { %v619_v19 = vadd.f32 %v4732_v12, %v4728_v53 }
 0x476   :  { %v680_v50 = vmul.f32 0.01, %v619_v19  ;;  %vm664_vm14 = vcmp.ge.f32.partialorder %v619_v19, 0.0 }
 0x478   :  { %v696_v53 = vsel %vm664_vm14, %v619_v19, %v680_v50 }
 0x47b   :  { %v4730_v54 = vpop.f32.mrf.mxu1 }
 0x47c   :  { %v622_v44 = vadd.f32 %v4732_v12, %v4730_v54  ;;  %v679_v54 = vmul.f32 0.01, %v616_v43 }
 0x47e   :  { %v681_v48 = vmul.f32 0.01, %v622_v44  ;;  %vm665_vm13 = vcmp.ge.f32.partialorder %v622_v44, 0.0 }
 0x480   :  { %v697_v51 = vsel %vm665_vm13, %v622_v44, %v681_v48 }
 0x483   :  { %v624_v55 = vpop.f32.mrf.mxu1 }
 0x484   :  { %v625_v38 = vadd.f32 %v4732_v12, %v624_v55  ;;  %v695_v55 = vsel %vm663_vm15, %v616_v43, %v679_v54  ;;  %v4803_v54 = vld [vmem:[#allocation8 + $0x3] ss:$0 sm:$0xff] }
 0x486   :  { %v682_v35 = vmul.f32 0.01, %v625_v38  ;;  %vm666_vm12 = vcmp.ge.f32.partialorder %v625_v38, 0.0 }
 0x488   :  { %v698_v49 = vsel %vm666_vm12, %v625_v38, %v682_v35 }
 0x48b   :  { %v627_v56 = vpop.f32.mrf.mxu1 }
 0x48c   :  { %v628_v36 = vadd.f32 %v4732_v12, %v627_v56  ;;  %v4753_v56 = vld [vmem:[#allocation2] sm:$0xff] }
 0x48e   :  { %v683_v46 = vmul.f32 0.01, %v628_v36  ;;  %vm667_vm11 = vcmp.ge.f32.partialorder %v628_v36, 0.0 }
 0x490   :  { %v699_v47 = vsel %vm667_vm11, %v628_v36, %v683_v46 }
 0x493   :  { %v630_v57 = vpop.f32.mrf.mxu1 }
 0x494   :  { %v631_v30 = vadd.f32 %v4732_v12, %v630_v57  ;;  %v4759_v57 = vld [vmem:[#allocation2 + $0x10] sm:$0xff] }
 0x496   :  { %v684_v42 = vmul.f32 0.01, %v631_v30  ;;  %vm668_vm10 = vcmp.ge.f32.partialorder %v631_v30, 0.0 }
 0x498   :  { %v700_v27 = vsel %vm668_vm10, %v631_v30, %v684_v42 }
 0x49b   :  { %v633_v58 = vpop.f32.mrf.mxu1 }
 0x49c   :  { %v634_v28 = vadd.f32 %v4732_v12, %v633_v58  ;;  %v4763_v58 = vld [vmem:[#allocation2 + $0x20] sm:$0xff] }
 0x49e   :  { %v685_v34 = vmul.f32 0.01, %v634_v28  ;;  %vm669_vm9 = vcmp.ge.f32.partialorder %v634_v28, 0.0 }
 0x4a0   :  { %v701_v45 = vsel %vm669_vm9, %v634_v28, %v685_v34 }
 0x4a3   :  { %v636_v59 = vpop.f32.mrf.mxu1 }
 0x4a4   :  { %v637_v17 = vadd.f32 %v4732_v12, %v636_v59  ;;  %v4766_v59 = vld [vmem:[#allocation2 + $0x28] sm:$0xff] }
 0x4a6   :  { %v686_v26 = vmul.f32 0.01, %v637_v17  ;;  %vm670_vm8 = vcmp.ge.f32.partialorder %v637_v17, 0.0 }
 0x4a8   :  { %v702_v41 = vsel %vm670_vm8, %v637_v17, %v686_v26 }
 0x4ab   :  { %v639_v60 = vpop.f32.mrf.mxu1 }
 0x4ac   :  { %v640_v16 = vadd.f32 %v4732_v12, %v639_v60  ;;  %v4769_v60 = vld [vmem:[#allocation2 + $0x30] sm:$0xff] }
 0x4ae   :  { %v687_v29 = vmul.f32 0.01, %v640_v16  ;;  %vm671_vm7 = vcmp.ge.f32.partialorder %v640_v16, 0.0 }
 0x4b0   :  { %v703_v37 = vsel %vm671_vm7, %v640_v16, %v687_v29 }
 0x4b3   :  { %v642_v61 = vpop.f32.mrf.mxu1 }
 0x4b4   :  { %v643_v25 = vadd.f32 %v4732_v12, %v642_v61  ;;  %v4773_v61 = vld [vmem:[#allocation2 + $0x40] sm:$0xff] }
 0x4b6   :  { %v688_v32 = vmul.f32 0.01, %v643_v25  ;;  %vm672_vm6 = vcmp.ge.f32.partialorder %v643_v25, 0.0 }
 0x4b8   :  { %v704_v33 = vsel %vm672_vm6, %v643_v25, %v688_v32  ;;  %v4791_v25 = vld [vmem:[#allocation2 + $0x70] sm:$0xff] }
 0x4bb   :  { %v645_v62 = vpop.f32.mrf.mxu1 }
 0x4bc   :  { %v646_v0 = vadd.f32 %v4732_v12, %v645_v62  ;;  %v727_v62 = vld [vmem:[#allocation7 + $0x1f8] sm:$0xff] }
 0x4bd   :  { %798 = vmatpush.msra.mxu3 %v727_v62 }
 0x4be   :  { %v689_v31 = vmul.f32 0.01, %v646_v0  ;;  %vm673_vm5 = vcmp.ge.f32.partialorder %v646_v0, 0.0 }
 0x4c0   :  { %v705_v18 = vsel %vm673_vm5, %v646_v0, %v689_v31  ;;  %v4785_v0 = vld [vmem:[#allocation2 + $0x60] sm:$0xff] }
 0x4c3   :  { %v648_v63 = vpop.f32.mrf.mxu1 }
 0x4c4   :  { %v649_v21 = vadd.f32 %v4732_v12, %v648_v63  ;;  %v4776_v63 = vld [vmem:[#allocation2 + $0x48] sm:$0xff] }
 0x4c6   :  { %v690_v22 = vmul.f32 0.01, %v649_v21  ;;  %vm674_vm4 = vcmp.ge.f32.partialorder %v649_v21, 0.0 }
 0x4c8   :  { %v706_v24 = vsel %vm674_vm4, %v649_v21, %v690_v22  ;;  %v715_v21 = vld [vmem:[#allocation7 + $0x198] sm:$0xff] }
 0x4cb   :  { %v651_v7 = vpop.f32.mrf.mxu1 }
 0x4cc   :  { %v652_v2 = vadd.f32 %v4732_v12, %v651_v7  ;;  %v725_v7 = vld [vmem:[#allocation7 + $0x1e8] sm:$0xff] }
 0x4ce   :  { %v691_v8 = vmul.f32 0.01, %v652_v2  ;;  %vm675_vm3 = vcmp.ge.f32.partialorder %v652_v2, 0.0 }
 0x4d0   :  { %v707_v23 = vsel %vm675_vm3, %v652_v2, %v691_v8  ;;  %v4782_v2 = vld [vmem:[#allocation2 + $0x58] sm:$0xff]  ;;  %v4788_v8 = vld [vmem:[#allocation2 + $0x68] sm:$0xff] }
 0x4d3   :  { %v654_v3 = vpop.f32.mrf.mxu1 }
 0x4d4   :  { %v655_v4 = vadd.f32 %v4732_v12, %v654_v3  ;;  %v724_v3 = vld [vmem:[#allocation7 + $0x1e0] sm:$0xff] }
 0x4d6   :  { %v692_v5 = vmul.f32 0.01, %v655_v4  ;;  %vm676_vm2 = vcmp.ge.f32.partialorder %v655_v4, 0.0 }
 0x4d8   :  { %v708_v6 = vsel %vm676_vm2, %v655_v4, %v692_v5  ;;  %v719_v4 = vld [vmem:[#allocation7 + $0x1b8] sm:$0xff]  ;;  %v713_v5 = vld [vmem:[#allocation7 + $0x188] sm:$0xff] }
 0x4db   :  { %v657_v11 = vpop.f32.mrf.mxu1 }
 0x4dc   :  { %v658_v10 = vadd.f32 %v4732_v12, %v657_v11  ;;  %v723_v11 = vld [vmem:[#allocation7 + $0x1d8] sm:$0xff] }
 0x4de   :  { %v693_v20 = vmul.f32 0.01, %v658_v10  ;;  %vm677_vm1 = vcmp.ge.f32.partialorder %v658_v10, 0.0 }
 0x4e0   :  { %v709_v15 = vsel %vm677_vm1, %v658_v10, %v693_v20  ;;  %v721_v10 = vld [vmem:[#allocation7 + $0x1c8] sm:$0xff]  ;;  %v716_v20 = vld [vmem:[#allocation7 + $0x1a0] sm:$0xff] }
 0x4e3   :  { %v660_v13 = vpop.f32.mrf.mxu1 }
 0x4e4   :  { %v661_v14 = vadd.f32 %v4732_v12, %v660_v13  ;;  %v722_v12 = vld [vmem:[#allocation7 + $0x1d0] sm:$0xff]  ;;  %v720_v13 = vld [vmem:[#allocation7 + $0x1c0] sm:$0xff] }
 0x4e6   :  { %v694_v9 = vmul.f32 0.01, %v661_v14  ;;  %vm678_vm0 = vcmp.ge.f32.partialorder %v661_v14, 0.0 }
 0x4e8   :  { %v710_v1 = vsel %vm678_vm0, %v661_v14, %v694_v9  ;;  %v718_v14 = vld [vmem:[#allocation7 + $0x1b0] sm:$0xff]  ;;  %v717_v9 = vld [vmem:[#allocation7 + $0x1a8] sm:$0xff] }
 0x4e9   :  { %730 = vmatpush.msra.mxu2 %v710_v1  ;;  %v714_v1 = vld [vmem:[#allocation7 + $0x190] sm:$0xff] }
 0x4eb   :  { %731 = vmatpush.msra.mxu2 %v709_v15  ;;  %v712_v15 = vld [vmem:[#allocation7 + $0x180] sm:$0xff] }
 0x4ed   :  { %732 = vmatpush.msra.mxu2 %v708_v6  ;;  %v4794_v6 = vld [vmem:[#allocation2 + $0x78] sm:$0xff] }
 0x4ef   :  { %733 = vmatpush.msra.mxu2 %v707_v23 }
 0x4f1   :  { %734 = vmatpush.msra.mxu2 %v706_v24 }
 0x4f3   :  { %735 = vmatpush.msra.mxu2 %v705_v18 }
 0x4f5   :  { %736 = vmatpush.msra.mxu2 %v704_v33 }
 0x4f7   :  { %737 = vmatpush.msra.mxu2 %v703_v37 }
 0x4f9   :  { %738 = vmatpush.msra.mxu2 %v702_v41 }
 0x4fb   :  { %739 = vmatpush.msra.mxu2 %v701_v45 }
 0x4fd   :  { %740 = vmatpush.msra.mxu2 %v700_v27 }
 0x4ff   :  { %741 = vmatpush.msra.mxu2 %v699_v47 }
 0x501   :  { %742 = vmatpush.msra.mxu2 %v698_v49 }
 0x503   :  { %743 = vmatpush.msra.mxu2 %v697_v51 }
 0x505   :  { %744 = vmatpush.msra.mxu2 %v696_v53 }
 0x507   :  { %745 = vmatpush.msra.mxu2 %v695_v55 }
 0x508   :  { %746 = vmatmul.f32.vlgmr.msra.gmra.mxu2 %v4753_v56 }
 0x510   :  { %749 = vmatmul.f32.gmra.mxu2 %v4756_v52 }
 0x518   :  { %752 = vmatmul.f32.gmra.mxu2 %v4759_v57 }
 0x520   :  { %755 = vmatmul.f32.gmra.mxu2 %v4628_v39  ;;  %v726_v39 = vld [vmem:[#allocation7 + $0x1f0] sm:$0xff] }
 0x521   :  { %799 = vmatpush.msra.mxu3 %v726_v39 }
 0x523   :  { %800 = vmatpush.msra.mxu3 %v725_v7 }
 0x525   :  { %801 = vmatpush.msra.mxu3 %v724_v3 }
 0x527   :  { %802 = vmatpush.msra.mxu3 %v723_v11 }
 0x528   :  { %758 = vmatmul.f32.gmra.mxu2 %v4763_v58 }
 0x529   :  { %803 = vmatpush.msra.mxu3 %v722_v12 }
 0x52b   :  { %804 = vmatpush.msra.mxu3 %v721_v10 }
 0x52d   :  { %805 = vmatpush.msra.mxu3 %v720_v13 }
 0x52f   :  { %806 = vmatpush.msra.mxu3 %v719_v4 }
 0x530   :  { %761 = vmatmul.f32.gmra.mxu2 %v4766_v59 }
 0x531   :  { %807 = vmatpush.msra.mxu3 %v718_v14 }
 0x533   :  { %808 = vmatpush.msra.mxu3 %v717_v9 }
 0x535   :  { %809 = vmatpush.msra.mxu3 %v716_v20 }
 0x537   :  { %810 = vmatpush.msra.mxu3 %v715_v21 }
 0x538   :  { %764 = vmatmul.f32.gmra.mxu2 %v4769_v60 }
 0x539   :  { %811 = vmatpush.msra.mxu3 %v714_v1 }
 0x53b   :  { %812 = vmatpush.msra.mxu3 %v713_v5 }
 0x53d   :  { %813 = vmatpush.msra.mxu3 %v712_v15 }
 0x540   :  { %767 = vmatmul.f32.gmra.mxu2 %v4630_v40  ;;  %v4779_v40 = vld [vmem:[#allocation2 + $0x50] sm:$0xff] }
 0x548   :  { %770 = vmatmul.f32.gmra.mxu2 %v4773_v61 }
 0x550   :  { %773 = vmatmul.f32.gmra.mxu2 %v4776_v63 }
 0x558   :  { %776 = vmatmul.f32.gmra.mxu2 %v4779_v40 }
 0x560   :  { %779 = vmatmul.f32.gmra.mxu2 %v4782_v2 }
 0x568   :  { %782 = vmatmul.f32.gmra.mxu2 %v4785_v0 }
 0x570   :  { %785 = vmatmul.f32.gmra.mxu2 %v4788_v8 }
 0x578   :  { %788 = vmatmul.f32.gmra.mxu2 %v4791_v25 }
 0x580   :  { %791 = vmatmul.f32.gmra.mxu2 %v4794_v6 }
 0x58b   :  { %v747_v22 = vpop.f32.mrf.mxu2 }
 0x58c   :  { %814 = vmatmul.f32.vlgmr.msra.gmra.mxu3 %v747_v22 }
 0x593   :  { %v750_v16 = vpop.f32.mrf.mxu2 }
 0x594   :  { %817 = vmatmul.f32.gmra.mxu3 %v750_v16 }
 0x59b   :  { %v753_v23 = vpop.f32.mrf.mxu2 }
 0x59c   :  { %820 = vmatmul.f32.gmra.mxu3 %v753_v23 }
 0x5a3   :  { %v756_v31 = vpop.f32.mrf.mxu2 }
 0x5a4   :  { %823 = vmatmul.f32.gmra.mxu3 %v756_v31 }
 0x5ab   :  { %v759_v17 = vpop.f32.mrf.mxu2 }
 0x5ac   :  { %826 = vmatmul.f32.gmra.mxu3 %v759_v17 }
 0x5b3   :  { %v762_v24 = vpop.f32.mrf.mxu2 }
 0x5b4   :  { %829 = vmatmul.f32.gmra.mxu3 %v762_v24 }
 0x5bb   :  { %v765_v32 = vpop.f32.mrf.mxu2 }
 0x5bc   :  { %832 = vmatmul.f32.gmra.mxu3 %v765_v32 }
 0x5c3   :  { %v768_v28 = vpop.f32.mrf.mxu2 }
 0x5c4   :  { %835 = vmatmul.f32.gmra.mxu3 %v768_v28 }
 0x5cb   :  { %v771_v18 = vpop.f32.mrf.mxu2 }
 0x5cc   :  { %838 = vmatmul.f32.gmra.mxu3 %v771_v18 }
 0x5d3   :  { %v774_v29 = vpop.f32.mrf.mxu2 }
 0x5d4   :  { %841 = vmatmul.f32.gmra.mxu3 %v774_v29 }
 0x5db   :  { %v777_v30 = vpop.f32.mrf.mxu2 }
 0x5dc   :  { %844 = vmatmul.f32.gmra.mxu3 %v777_v30 }
 0x5e3   :  { %v780_v33 = vpop.f32.mrf.mxu2 }
 0x5e4   :  { %847 = vmatmul.f32.gmra.mxu3 %v780_v33 }
 0x5eb   :  { %v783_v26 = vpop.f32.mrf.mxu2 }
 0x5ec   :  { %850 = vmatmul.f32.gmra.mxu3 %v783_v26 }
 0x5f3   :  { %v786_v36 = vpop.f32.mrf.mxu2 }
 0x5f4   :  { %853 = vmatmul.f32.gmra.mxu3 %v786_v36 }
 0x5fb   :  { %v789_v37 = vpop.f32.mrf.mxu2 }
 0x5fc   :  { %856 = vmatmul.f32.gmra.mxu3 %v789_v37 }
 0x603   :  { %v792_v34 = vpop.f32.mrf.mxu2 }
 0x604   :  { %859 = vmatmul.f32.gmra.mxu3 %v792_v34 }
 0x60f   :  { %v4797_v38 = vpop.f32.mrf.mxu3 }
 0x617   :  { %v4799_v41 = vpop.f32.mrf.mxu3 }
 0x61f   :  { %v4801_v42 = vpop.f32.mrf.mxu3 }
 0x627   :  { %v824_v44 = vpop.f32.mrf.mxu3 }
 0x628   :  { %v825_v36 = vadd.f32 %v4803_v54, %v824_v44  ;;  %v816_v44 = vadd.f32 %v4803_v54, %v4797_v38  ;;  %v4827_v38 = vld [vmem:[#allocation2 + $0x18] sm:$0xff] }
 0x62a   :  { %vm866_vm12 = vcmp.ge.f32.partialorder %v825_v36, 0.0  ;;  %vm863_vm15 = vcmp.ge.f32.partialorder %v816_v44, 0.0 }
 0x62f   :  { %v827_v45 = vpop.f32.mrf.mxu3 }
 0x630   :  { %v828_v30 = vadd.f32 %v4803_v54, %v827_v45  ;;  %v819_v45 = vadd.f32 %v4803_v54, %v4799_v41 }
 0x632   :  { %vm867_vm11 = vcmp.ge.f32.partialorder %v828_v30, 0.0  ;;  %vm864_vm14 = vcmp.ge.f32.partialorder %v819_v45, 0.0 }
 0x637   :  { %v830_v46 = vpop.f32.mrf.mxu3 }
 0x638   :  { %v831_v28 = vadd.f32 %v4803_v54, %v830_v46 }
 0x63a   :  { %v884_v34 = vmul.f32 0.01, %v831_v28  ;;  %vm868_vm10 = vcmp.ge.f32.partialorder %v831_v28, 0.0 }
 0x63f   :  { %v833_v19 = vpop.f32.mrf.mxu3 }
 0x640   :  { %v834_v17 = vadd.f32 %v4803_v54, %v833_v19  ;;  %v822_v19 = vadd.f32 %v4803_v54, %v4801_v42  ;;  %v880_v42 = vmul.f32 0.01, %v819_v45 }
 0x642   :  { %v885_v26 = vmul.f32 0.01, %v834_v17  ;;  %vm869_vm9 = vcmp.ge.f32.partialorder %v834_v17, 0.0  ;;  %vm865_vm13 = vcmp.ge.f32.partialorder %v822_v19, 0.0  ;;  %v896_v41 = vsel %vm864_vm14, %v819_v45, %v880_v42 }
 0x644   :  { %v901_v46 = vsel %vm869_vm9, %v834_v17, %v885_v26 }
 0x647   :  { %v836_v27 = vpop.f32.mrf.mxu3 }
 0x648   :  { %v837_v16 = vadd.f32 %v4803_v54, %v836_v27  ;;  %v883_v27 = vmul.f32 0.01, %v828_v30 }
 0x64a   :  { %v886_v29 = vmul.f32 0.01, %v837_v16  ;;  %vm870_vm8 = vcmp.ge.f32.partialorder %v837_v16, 0.0 }
 0x64c   :  { %v902_v37 = vsel %vm870_vm8, %v837_v16, %v886_v29 }
 0x64f   :  { %v839_v35 = vpop.f32.mrf.mxu3 }
 0x650   :  { %v840_v5 = vadd.f32 %v4803_v54, %v839_v35  ;;  %v900_v35 = vsel %vm868_vm10, %v831_v28, %v884_v34 }
 0x652   :  { %v887_v32 = vmul.f32 0.01, %v840_v5  ;;  %vm871_vm7 = vcmp.ge.f32.partialorder %v840_v5, 0.0 }
 0x654   :  { %v903_v33 = vsel %vm871_vm7, %v840_v5, %v887_v32  ;;  %v912_v5 = vld [vmem:[#allocation7 + $0x200] sm:$0xff] }
 0x657   :  { %v842_v43 = vpop.f32.mrf.mxu3 }
 0x658   :  { %v843_v20 = vadd.f32 %v4803_v54, %v842_v43  ;;  %v882_v43 = vmul.f32 0.01, %v825_v36 }
 0x65a   :  { %v888_v31 = vmul.f32 0.01, %v843_v20  ;;  %vm872_vm6 = vcmp.ge.f32.partialorder %v843_v20, 0.0 }
 0x65c   :  { %v904_v18 = vsel %vm872_vm6, %v843_v20, %v888_v31  ;;  %v915_v20 = vld [vmem:[#allocation7 + $0x218] sm:$0xff] }
 0x65f   :  { %v845_v47 = vpop.f32.mrf.mxu3 }
 0x660   :  { %v846_v4 = vadd.f32 %v4803_v54, %v845_v47  ;;  %v899_v47 = vsel %vm867_vm11, %v828_v30, %v883_v27 }
 0x662   :  { %v889_v22 = vmul.f32 0.01, %v846_v4  ;;  %vm873_vm5 = vcmp.ge.f32.partialorder %v846_v4, 0.0 }
 0x664   :  { %v905_v24 = vsel %vm873_vm5, %v846_v4, %v889_v22  ;;  %v918_v4 = vld [vmem:[#allocation7 + $0x230] sm:$0xff] }
 0x667   :  { %v848_v48 = vpop.f32.mrf.mxu3 }
 0x668   :  { %v849_v12 = vadd.f32 %v4803_v54, %v848_v48  ;;  %v881_v48 = vmul.f32 0.01, %v822_v19 }
 0x66a   :  { %v890_v1 = vmul.f32 0.01, %v849_v12  ;;  %vm874_vm4 = vcmp.ge.f32.partialorder %v849_v12, 0.0 }
 0x66c   :  { %v906_v23 = vsel %vm874_vm4, %v849_v12, %v890_v1  ;;  %v921_v12 = vld [vmem:[#allocation7 + $0x248] sm:$0xff] }
 0x66d   :  { %v913_v1 = vld [vmem:[#allocation7 + $0x208] sm:$0xff] }
 0x66f   :  { %v851_v49 = vpop.f32.mrf.mxu3 }
 0x670   :  { %v852_v7 = vadd.f32 %v4803_v54, %v851_v49  ;;  %v898_v49 = vsel %vm866_vm12, %v825_v36, %v882_v43 }
 0x672   :  { %v891_v9 = vmul.f32 0.01, %v852_v7  ;;  %vm875_vm3 = vcmp.ge.f32.partialorder %v852_v7, 0.0 }
 0x674   :  { %v907_v15 = vsel %vm875_vm3, %v852_v7, %v891_v9  ;;  %v924_v7 = vld [vmem:[#allocation7 + $0x260] sm:$0xff] }
 0x675   :  { %v916_v9 = vld [vmem:[#allocation7 + $0x220] sm:$0xff] }
 0x677   :  { %v854_v50 = vpop.f32.mrf.mxu3 }
 0x678   :  { %v855_v62 = vadd.f32 %v4803_v54, %v854_v50  ;;  %v897_v50 = vsel %vm865_vm13, %v822_v19, %v881_v48 }
 0x67a   :  { %v892_v13 = vmul.f32 0.01, %v855_v62  ;;  %vm876_vm2 = vcmp.ge.f32.partialorder %v855_v62, 0.0 }
 0x67c   :  { %v908_v21 = vsel %vm876_vm2, %v855_v62, %v892_v13  ;;  %v926_v62 = vld [vmem:[#allocation7 + $0x270] sm:$0xff]  ;;  %v919_v13 = vld [vmem:[#allocation7 + $0x238] sm:$0xff] }
 0x67f   :  { %v857_v51 = vpop.f32.mrf.mxu3 }
 0x680   :  { %v858_v53 = vadd.f32 %v4803_v54, %v857_v51  ;;  %v879_v51 = vmul.f32 0.01, %v816_v44 }
 0x682   :  { %v893_v11 = vmul.f32 0.01, %v858_v53  ;;  %vm877_vm1 = vcmp.ge.f32.partialorder %v858_v53, 0.0 }
 0x684   :  { %v909_v14 = vsel %vm877_vm1, %v858_v53, %v893_v11  ;;  %v895_v53 = vsel %vm863_vm15, %v816_v44, %v879_v51  ;;  %v922_v11 = vld [vmem:[#allocation7 + $0x250] sm:$0xff] }
 0x687   :  { %v860_v55 = vpop.f32.mrf.mxu3 }
 0x688   :  { %v861_v39 = vadd.f32 %v4803_v54, %v860_v55  ;;  %v4833_v54 = vld [vmem:[#allocation2 + $0x38] sm:$0xff] }
 0x689   :  { %v927_v55 = vld [vmem:[#allocation7 + $0x278] sm:$0xff] }
 0x68a   :  { %v894_v3 = vmul.f32 0.01, %v861_v39  ;;  %vm878_vm0 = vcmp.ge.f32.partialorder %v861_v39, 0.0  ;;  %998 = vmatpush.msrb.mxu1 %v927_v55 }
 0x68c   :  { %v910_v10 = vsel %vm878_vm0, %v861_v39, %v894_v3  ;;  %v925_v39 = vld [vmem:[#allocation7 + $0x268] sm:$0xff]  ;;  %999 = vmatpush.msrb.mxu1 %v926_v62  ;;  %v923_v3 = vld [vmem:[#allocation7 + $0x258] sm:$0xff] }
 0x68d   :  { %930 = vmatpush.msra.mxu0 %v910_v10  ;;  %v920_v10 = vld [vmem:[#allocation7 + $0x240] sm:$0xff] }
 0x68e   :  { %1000 = vmatpush.msrb.mxu1 %v925_v39 }
 0x68f   :  { %931 = vmatpush.msra.mxu0 %v909_v14  ;;  %v917_v14 = vld [vmem:[#allocation7 + $0x228] sm:$0xff] }
 0x690   :  { %1001 = vmatpush.msrb.mxu1 %v924_v7 }
 0x691   :  { %932 = vmatpush.msra.mxu0 %v908_v21  ;;  %v914_v21 = vld [vmem:[#allocation7 + $0x210] sm:$0xff] }
 0x692   :  { %1002 = vmatpush.msrb.mxu1 %v923_v3 }
 0x693   :  { %933 = vmatpush.msra.mxu0 %v907_v15 }
 0x694   :  { %1003 = vmatpush.msrb.mxu1 %v922_v11 }
 0x695   :  { %934 = vmatpush.msra.mxu0 %v906_v23 }
 0x696   :  { %1004 = vmatpush.msrb.mxu1 %v921_v12 }
 0x697   :  { %935 = vmatpush.msra.mxu0 %v905_v24 }
 0x698   :  { %1005 = vmatpush.msrb.mxu1 %v920_v10 }
 0x699   :  { %936 = vmatpush.msra.mxu0 %v904_v18 }
 0x69a   :  { %1006 = vmatpush.msrb.mxu1 %v919_v13 }
 0x69b   :  { %937 = vmatpush.msra.mxu0 %v903_v33 }
 0x69c   :  { %1007 = vmatpush.msrb.mxu1 %v918_v4 }
 0x69d   :  { %938 = vmatpush.msra.mxu0 %v902_v37 }
 0x69e   :  { %1008 = vmatpush.msrb.mxu1 %v917_v14 }
 0x69f   :  { %939 = vmatpush.msra.mxu0 %v901_v46 }
 0x6a0   :  { %1009 = vmatpush.msrb.mxu1 %v916_v9 }
 0x6a1   :  { %940 = vmatpush.msra.mxu0 %v900_v35 }
 0x6a2   :  { %1010 = vmatpush.msrb.mxu1 %v915_v20 }
 0x6a3   :  { %941 = vmatpush.msra.mxu0 %v899_v47 }
 0x6a4   :  { %1011 = vmatpush.msrb.mxu1 %v914_v21 }
 0x6a5   :  { %942 = vmatpush.msra.mxu0 %v898_v49 }
 0x6a6   :  { %1012 = vmatpush.msrb.mxu1 %v913_v1 }
 0x6a7   :  { %943 = vmatpush.msra.mxu0 %v897_v50 }
 0x6a8   :  { %1013 = vmatpush.msrb.mxu1 %v912_v5 }
 0x6a9   :  { %944 = vmatpush.msra.mxu0 %v896_v41 }
 0x6ab   :  { %945 = vmatpush.msra.mxu0 %v895_v53  ;;  %v4850_v53 = vld [vmem:[#allocation8 + $0x4] ss:$0 sm:$0xff] }
 0x6ac   :  { %946 = vmatmul.f32.vlgmr.msra.gmra.mxu0 %v4753_v56 }
 0x6b4   :  { %949 = vmatmul.f32.gmra.mxu0 %v4756_v52 }
 0x6bc   :  { %952 = vmatmul.f32.gmra.mxu0 %v4759_v57 }
 0x6c4   :  { %955 = vmatmul.f32.gmra.mxu0 %v4827_v38 }
 0x6cc   :  { %958 = vmatmul.f32.gmra.mxu0 %v4763_v58 }
 0x6d4   :  { %961 = vmatmul.f32.gmra.mxu0 %v4766_v59 }
 0x6dc   :  { %964 = vmatmul.f32.gmra.mxu0 %v4769_v60 }
 0x6e4   :  { %967 = vmatmul.f32.gmra.mxu0 %v4833_v54 }
 0x6ec   :  { %970 = vmatmul.f32.gmra.mxu0 %v4773_v61 }
 0x6f4   :  { %973 = vmatmul.f32.gmra.mxu0 %v4776_v63 }
 0x6fc   :  { %976 = vmatmul.f32.gmra.mxu0 %v4779_v40 }
 0x704   :  { %979 = vmatmul.f32.gmra.mxu0 %v4782_v2 }
 0x70c   :  { %982 = vmatmul.f32.gmra.mxu0 %v4785_v0 }
 0x714   :  { %985 = vmatmul.f32.gmra.mxu0 %v4788_v8 }
 0x71c   :  { %988 = vmatmul.f32.gmra.mxu0 %v4791_v25 }
 0x724   :  { %991 = vmatmul.f32.gmra.mxu0 %v4794_v6 }
 0x729   :  { %v947_v15 = vpop.f32.mrf.mxu0 }
 0x72a   :  { %1014 = vmatmul.f32.vlgmr.msrb.gmra.mxu1 %v947_v15 }
 0x731   :  { %v950_v22 = vpop.f32.mrf.mxu0 }
 0x732   :  { %1017 = vmatmul.f32.gmra.mxu1 %v950_v22 }
 0x739   :  { %v953_v16 = vpop.f32.mrf.mxu0 }
 0x73a   :  { %1020 = vmatmul.f32.gmra.mxu1 %v953_v16 }
 0x741   :  { %v956_v23 = vpop.f32.mrf.mxu0 }
 0x742   :  { %1023 = vmatmul.f32.gmra.mxu1 %v956_v23 }
 0x749   :  { %v959_v31 = vpop.f32.mrf.mxu0 }
 0x74a   :  { %1026 = vmatmul.f32.gmra.mxu1 %v959_v31 }
 0x751   :  { %v962_v17 = vpop.f32.mrf.mxu0 }
 0x752   :  { %1029 = vmatmul.f32.gmra.mxu1 %v962_v17 }
 0x759   :  { %v965_v24 = vpop.f32.mrf.mxu0 }
 0x75a   :  { %1032 = vmatmul.f32.gmra.mxu1 %v965_v24 }
 0x761   :  { %v968_v32 = vpop.f32.mrf.mxu0 }
 0x762   :  { %1035 = vmatmul.f32.gmra.mxu1 %v968_v32 }
 0x769   :  { %v971_v28 = vpop.f32.mrf.mxu0 }
 0x76a   :  { %1038 = vmatmul.f32.gmra.mxu1 %v971_v28 }
 0x771   :  { %v974_v18 = vpop.f32.mrf.mxu0 }
 0x772   :  { %1041 = vmatmul.f32.gmra.mxu1 %v974_v18 }
 0x779   :  { %v977_v29 = vpop.f32.mrf.mxu0 }
 0x77a   :  { %1044 = vmatmul.f32.gmra.mxu1 %v977_v29 }
 0x781   :  { %v980_v30 = vpop.f32.mrf.mxu0 }
 0x782   :  { %1047 = vmatmul.f32.gmra.mxu1 %v980_v30 }
 0x789   :  { %v983_v33 = vpop.f32.mrf.mxu0 }
 0x78a   :  { %1050 = vmatmul.f32.gmra.mxu1 %v983_v33 }
 0x791   :  { %v986_v26 = vpop.f32.mrf.mxu0 }
 0x792   :  { %1053 = vmatmul.f32.gmra.mxu1 %v986_v26 }
 0x799   :  { %v989_v36 = vpop.f32.mrf.mxu0 }
 0x79a   :  { %1056 = vmatmul.f32.gmra.mxu1 %v989_v36 }
 0x7a1   :  { %v992_v37 = vpop.f32.mrf.mxu0 }
 0x7a2   :  { %1059 = vmatmul.f32.gmra.mxu1 %v992_v37 }
 0x7a7   :  { %v4844_v34 = vpop.f32.mrf.mxu1 }
 0x7af   :  { %v4846_v19 = vpop.f32.mrf.mxu1 }
 0x7b7   :  { %v4848_v46 = vpop.f32.mrf.mxu1 }
 0x7bf   :  { %v1024_v27 = vpop.f32.mrf.mxu1 }
 0x7c0   :  { %v1025_v37 = vadd.f32 %v4850_v53, %v1024_v27  ;;  %v1016_v27 = vadd.f32 %v4850_v53, %v4844_v34  ;;  %v1127_v34 = vld [vmem:[#allocation7 + $0x2f8] sm:$0xff] }
 0x7c1   :  { %1198 = vmatpush.msrb.mxu3 %v1127_v34 }
 0x7c2   :  { %vm1066_vm12 = vcmp.ge.f32.partialorder %v1025_v37, 0.0  ;;  %vm1063_vm15 = vcmp.ge.f32.partialorder %v1016_v27, 0.0 }
 0x7c7   :  { %v1027_v45 = vpop.f32.mrf.mxu1 }
 0x7c8   :  { %v1028_v33 = vadd.f32 %v4850_v53, %v1027_v45  ;;  %v1019_v45 = vadd.f32 %v4850_v53, %v4846_v19 }
 0x7ca   :  { %vm1067_vm11 = vcmp.ge.f32.partialorder %v1028_v33, 0.0  ;;  %vm1064_vm14 = vcmp.ge.f32.partialorder %v1019_v45, 0.0 }
 0x7cf   :  { %v1030_v35 = vpop.f32.mrf.mxu1 }
 0x7d0   :  { %v1031_v18 = vadd.f32 %v4850_v53, %v1030_v35 }
 0x7d2   :  { %vm1068_vm10 = vcmp.ge.f32.partialorder %v1031_v18, 0.0 }
 0x7d7   :  { %v1033_v43 = vpop.f32.mrf.mxu1 }
 0x7d8   :  { %v1034_v24 = vadd.f32 %v4850_v53, %v1033_v43  ;;  %v1084_v43 = vmul.f32 0.01, %v1031_v18 }
 0x7da   :  { %v1085_v36 = vmul.f32 0.01, %v1034_v24  ;;  %vm1069_vm9 = vcmp.ge.f32.partialorder %v1034_v24, 0.0 }
 0x7dc   :  { %v1101_v35 = vsel %vm1069_vm9, %v1034_v24, %v1085_v36 }
 0x7df   :  { %v1036_v44 = vpop.f32.mrf.mxu1 }
 0x7e0   :  { %v1037_v23 = vadd.f32 %v4850_v53, %v1036_v44 }
 0x7e2   :  { %v1086_v30 = vmul.f32 0.01, %v1037_v23  ;;  %vm1070_vm8 = vcmp.ge.f32.partialorder %v1037_v23, 0.0 }
 0x7e4   :  { %v1102_v44 = vsel %vm1070_vm8, %v1037_v23, %v1086_v30 }
 0x7e7   :  { %v1039_v47 = vpop.f32.mrf.mxu1 }
 0x7e8   :  { %v1040_v15 = vadd.f32 %v4850_v53, %v1039_v47  ;;  %v1022_v47 = vadd.f32 %v4850_v53, %v4848_v46  ;;  %v1080_v46 = vmul.f32 0.01, %v1019_v45 }
 0x7ea   :  { %v1087_v28 = vmul.f32 0.01, %v1040_v15  ;;  %vm1071_vm7 = vcmp.ge.f32.partialorder %v1040_v15, 0.0  ;;  %vm1065_vm13 = vcmp.ge.f32.partialorder %v1022_v47, 0.0  ;;  %v1096_v19 = vsel %vm1064_vm14, %v1019_v45, %v1080_v46 }
 0x7ec   :  { %v1103_v26 = vsel %vm1071_vm7, %v1040_v15, %v1087_v28 }
 0x7ef   :  { %v1042_v48 = vpop.f32.mrf.mxu1 }
 0x7f0   :  { %v1043_v21 = vadd.f32 %v4850_v53, %v1042_v48  ;;  %v1083_v48 = vmul.f32 0.01, %v1028_v33 }
 0x7f2   :  { %v1088_v17 = vmul.f32 0.01, %v1043_v21  ;;  %vm1072_vm6 = vcmp.ge.f32.partialorder %v1043_v21, 0.0 }
 0x7f4   :  { %v1104_v29 = vsel %vm1072_vm6, %v1043_v21, %v1088_v17 }
 0x7f7   :  { %v1045_v49 = vpop.f32.mrf.mxu1 }
 0x7f8   :  { %v1046_v14 = vadd.f32 %v4850_v53, %v1045_v49  ;;  %v1100_v49 = vsel %vm1068_vm10, %v1031_v18, %v1084_v43 }
 0x7fa   :  { %v1089_v16 = vmul.f32 0.01, %v1046_v14  ;;  %vm1073_vm5 = vcmp.ge.f32.partialorder %v1046_v14, 0.0 }
 0x7fc   :  { %v1105_v32 = vsel %vm1073_vm5, %v1046_v14, %v1089_v16 }
 0x7ff   :  { %v1048_v42 = vpop.f32.mrf.mxu1 }
 0x800   :  { %v1049_v10 = vadd.f32 %v4850_v53, %v1048_v42  ;;  %v1082_v42 = vmul.f32 0.01, %v1025_v37 }
 0x802   :  { %v1090_v5 = vmul.f32 0.01, %v1049_v10  ;;  %vm1074_vm4 = vcmp.ge.f32.partialorder %v1049_v10, 0.0 }
 0x804   :  { %v1106_v31 = vsel %vm1074_vm4, %v1049_v10, %v1090_v5  ;;  %v1113_v10 = vld [vmem:[#allocation7 + $0x288] sm:$0xff] }
 0x807   :  { %v1051_v50 = vpop.f32.mrf.mxu1 }
 0x808   :  { %v1052_v3 = vadd.f32 %v4850_v53, %v1051_v50  ;;  %v1099_v50 = vsel %vm1067_vm11, %v1028_v33, %v1083_v48 }
 0x80a   :  { %v1091_v20 = vmul.f32 0.01, %v1052_v3  ;;  %vm1075_vm3 = vcmp.ge.f32.partialorder %v1052_v3, 0.0 }
 0x80c   :  { %v1107_v22 = vsel %vm1075_vm3, %v1052_v3, %v1091_v20  ;;  %v1116_v3 = vld [vmem:[#allocation7 + $0x2a0] sm:$0xff] }
 0x80f   :  { %v1054_v51 = vpop.f32.mrf.mxu1 }
 0x810   :  { %v1055_v39 = vadd.f32 %v4850_v53, %v1054_v51  ;;  %v1081_v51 = vmul.f32 0.01, %v1022_v47 }
 0x812   :  { %v1092_v4 = vmul.f32 0.01, %v1055_v39  ;;  %vm1076_vm2 = vcmp.ge.f32.partialorder %v1055_v39, 0.0 }
 0x814   :  { %v1108_v1 = vsel %vm1076_vm2, %v1055_v39, %v1092_v4 }
 0x817   :  { %v1057_v41 = vpop.f32.mrf.mxu1 }
 0x818   :  { %v1058_v55 = vadd.f32 %v4850_v53, %v1057_v41  ;;  %v1098_v41 = vsel %vm1066_vm12, %v1025_v37, %v1082_v42 }
 0x81a   :  { %v1093_v12 = vmul.f32 0.01, %v1058_v55  ;;  %vm1077_vm1 = vcmp.ge.f32.partialorder %v1058_v55, 0.0 }
 0x81c   :  { %v1109_v9 = vsel %vm1077_vm1, %v1058_v55, %v1093_v12  ;;  %v1097_v55 = vsel %vm1065_vm13, %v1022_v47, %v1081_v51  ;;  %v1114_v12 = vld [vmem:[#allocation7 + $0x290] sm:$0xff]  ;;  %v4893_v47 = vld [vmem:[#allocation8 + $0x5] ss:$0 sm:$0xff] }
 0x81f   :  { %v1060_v62 = vpop.f32.mrf.mxu1 }
 0x820   :  { %v1061_v7 = vadd.f32 %v4850_v53, %v1060_v62  ;;  %v1079_v62 = vmul.f32 0.01, %v1016_v27  ;;  %v1126_v53 = vld [vmem:[#allocation7 + $0x2f0] sm:$0xff] }
 0x821   :  { %1199 = vmatpush.msrb.mxu3 %v1126_v53 }
 0x822   :  { %v1094_v11 = vmul.f32 0.01, %v1061_v7  ;;  %vm1078_vm0 = vcmp.ge.f32.partialorder %v1061_v7, 0.0  ;;  %v1095_v39 = vsel %vm1063_vm15, %v1016_v27, %v1079_v62 }
 0x824   :  { %v1110_v13 = vsel %vm1078_vm0, %v1061_v7, %v1094_v11  ;;  %v1118_v7 = vld [vmem:[#allocation7 + $0x2b0] sm:$0xff]  ;;  %v1115_v11 = vld [vmem:[#allocation7 + $0x298] sm:$0xff] }
 0x825   :  { %1130 = vmatpush.msrb.mxu2 %v1110_v13 }
 0x827   :  { %1131 = vmatpush.msrb.mxu2 %v1109_v9 }
 0x829   :  { %1132 = vmatpush.msrb.mxu2 %v1108_v1 }
 0x82b   :  { %1133 = vmatpush.msrb.mxu2 %v1107_v22 }
 0x82d   :  { %1134 = vmatpush.msrb.mxu2 %v1106_v31 }
 0x82f   :  { %1135 = vmatpush.msrb.mxu2 %v1105_v32 }
 0x831   :  { %1136 = vmatpush.msrb.mxu2 %v1104_v29 }
 0x833   :  { %1137 = vmatpush.msrb.mxu2 %v1103_v26 }
 0x835   :  { %1138 = vmatpush.msrb.mxu2 %v1102_v44 }
 0x837   :  { %1139 = vmatpush.msrb.mxu2 %v1101_v35 }
 0x839   :  { %1140 = vmatpush.msrb.mxu2 %v1100_v49 }
 0x83b   :  { %1141 = vmatpush.msrb.mxu2 %v1099_v50 }
 0x83d   :  { %1142 = vmatpush.msrb.mxu2 %v1098_v41 }
 0x83f   :  { %1143 = vmatpush.msrb.mxu2 %v1097_v55 }
 0x841   :  { %1144 = vmatpush.msrb.mxu2 %v1096_v19 }
 0x843   :  { %1145 = vmatpush.msrb.mxu2 %v1095_v39 }
 0x844   :  { %1146 = vmatmul.f32.vlgmr.msrb.gmra.mxu2 %v4753_v56  ;;  %v1125_v56 = vld [vmem:[#allocation7 + $0x2e8] sm:$0xff] }
 0x845   :  { %1200 = vmatpush.msrb.mxu3 %v1125_v56 }
 0x84c   :  { %1149 = vmatmul.f32.gmra.mxu2 %v4756_v52  ;;  %v1124_v52 = vld [vmem:[#allocation7 + $0x2e0] sm:$0xff] }
 0x84d   :  { %1201 = vmatpush.msrb.mxu3 %v1124_v52 }
 0x854   :  { %1152 = vmatmul.f32.gmra.mxu2 %v4759_v57  ;;  %v1123_v57 = vld [vmem:[#allocation7 + $0x2d8] sm:$0xff] }
 0x855   :  { %1202 = vmatpush.msrb.mxu3 %v1123_v57 }
 0x85c   :  { %1155 = vmatmul.f32.gmra.mxu2 %v4827_v38 }
 0x864   :  { %1158 = vmatmul.f32.gmra.mxu2 %v4763_v58  ;;  %v1122_v58 = vld [vmem:[#allocation7 + $0x2d0] sm:$0xff] }
 0x865   :  { %1203 = vmatpush.msrb.mxu3 %v1122_v58 }
 0x86c   :  { %1161 = vmatmul.f32.gmra.mxu2 %v4766_v59  ;;  %v1121_v59 = vld [vmem:[#allocation7 + $0x2c8] sm:$0xff] }
 0x86d   :  { %1204 = vmatpush.msrb.mxu3 %v1121_v59 }
 0x874   :  { %1164 = vmatmul.f32.gmra.mxu2 %v4769_v60  ;;  %v1120_v60 = vld [vmem:[#allocation7 + $0x2c0] sm:$0xff] }
 0x875   :  { %1205 = vmatpush.msrb.mxu3 %v1120_v60 }
 0x87c   :  { %1167 = vmatmul.f32.gmra.mxu2 %v4833_v54 }
 0x884   :  { %1170 = vmatmul.f32.gmra.mxu2 %v4773_v61  ;;  %v1119_v61 = vld [vmem:[#allocation7 + $0x2b8] sm:$0xff] }
 0x885   :  { %1206 = vmatpush.msrb.mxu3 %v1119_v61 }
 0x887   :  { %1207 = vmatpush.msrb.mxu3 %v1118_v7 }
 0x88c   :  { %1173 = vmatmul.f32.gmra.mxu2 %v4776_v63  ;;  %v1117_v63 = vld [vmem:[#allocation7 + $0x2a8] sm:$0xff] }
 0x88d   :  { %1208 = vmatpush.msrb.mxu3 %v1117_v63 }
 0x88f   :  { %1209 = vmatpush.msrb.mxu3 %v1116_v3 }
 0x891   :  { %1210 = vmatpush.msrb.mxu3 %v1115_v11 }
 0x893   :  { %1211 = vmatpush.msrb.mxu3 %v1114_v12 }
 0x894   :  { %1176 = vmatmul.f32.gmra.mxu2 %v4779_v40  ;;  %v1112_v40 = vld [vmem:[#allocation7 + $0x280] sm:$0xff] }
 0x895   :  { %1212 = vmatpush.msrb.mxu3 %v1113_v10 }
 0x897   :  { %1213 = vmatpush.msrb.mxu3 %v1112_v40 }
 0x89c   :  { %1179 = vmatmul.f32.gmra.mxu2 %v4782_v2 }
 0x8a4   :  { %1182 = vmatmul.f32.gmra.mxu2 %v4785_v0 }
 0x8ac   :  { %1185 = vmatmul.f32.gmra.mxu2 %v4788_v8 }
 0x8b4   :  { %1188 = vmatmul.f32.gmra.mxu2 %v4791_v25 }
 0x8bc   :  { %1191 = vmatmul.f32.gmra.mxu2 %v4794_v6 }
 0x8c7   :  { %v1147_v2 = vpop.f32.mrf.mxu2 }
 0x8c8   :  { %1214 = vmatmul.f32.vlgmr.msrb.gmra.mxu3 %v1147_v2 }
 0x8cf   :  { %v1150_v13 = vpop.f32.mrf.mxu2 }
 0x8d0   :  { %1217 = vmatmul.f32.gmra.mxu3 %v1150_v13 }
 0x8d7   :  { %v1153_v4 = vpop.f32.mrf.mxu2 }
 0x8d8   :  { %1220 = vmatmul.f32.gmra.mxu3 %v1153_v4 }
 0x8df   :  { %v1156_v14 = vpop.f32.mrf.mxu2 }
 0x8e0   :  { %1223 = vmatmul.f32.gmra.mxu3 %v1156_v14 }
 0x8e7   :  { %v1159_v9 = vpop.f32.mrf.mxu2 }
 0x8e8   :  { %1226 = vmatmul.f32.gmra.mxu3 %v1159_v9 }
 0x8ef   :  { %v1162_v0 = vpop.f32.mrf.mxu2 }
 0x8f0   :  { %1229 = vmatmul.f32.gmra.mxu3 %v1162_v0 }
 0x8f7   :  { %v1165_v20 = vpop.f32.mrf.mxu2 }
 0x8f8   :  { %1232 = vmatmul.f32.gmra.mxu3 %v1165_v20 }
 0x8ff   :  { %v1168_v21 = vpop.f32.mrf.mxu2 }
 0x900   :  { %1235 = vmatmul.f32.gmra.mxu3 %v1168_v21 }
 0x907   :  { %v1171_v8 = vpop.f32.mrf.mxu2 }
 0x908   :  { %1238 = vmatmul.f32.gmra.mxu3 %v1171_v8 }
 0x90f   :  { %v1174_v25 = vpop.f32.mrf.mxu2 }
 0x910   :  { %1241 = vmatmul.f32.gmra.mxu3 %v1174_v25 }
 0x917   :  { %v1177_v6 = vpop.f32.mrf.mxu2 }
 0x918   :  { %1244 = vmatmul.f32.gmra.mxu3 %v1177_v6 }
 0x91f   :  { %v1180_v1 = vpop.f32.mrf.mxu2 }
 0x920   :  { %1247 = vmatmul.f32.gmra.mxu3 %v1180_v1 }
 0x927   :  { %v1183_v5 = vpop.f32.mrf.mxu2 }
 0x928   :  { %1250 = vmatmul.f32.gmra.mxu3 %v1183_v5 }
 0x92f   :  { %v1186_v15 = vpop.f32.mrf.mxu2 }
 0x930   :  { %1253 = vmatmul.f32.gmra.mxu3 %v1186_v15 }
 0x937   :  { %v1189_v22 = vpop.f32.mrf.mxu2 }
 0x938   :  { %1256 = vmatmul.f32.gmra.mxu3 %v1189_v22 }
 0x93f   :  { %v1192_v16 = vpop.f32.mrf.mxu2 }
 0x940   :  { %1259 = vmatmul.f32.gmra.mxu3 %v1192_v16 }
 0x94b   :  { %v4887_v23 = vpop.f32.mrf.mxu3 }
 0x94c   :  { %v1216_v6 = vadd.f32 %v4893_v47, %v4887_v23  ;;  %v4917_v23 = vld [vmem:[#allocation2 + $0x8] sm:$0xff] }
 0x94e   :  { %vm1263_vm15 = vcmp.ge.f32.partialorder %v1216_v6, 0.0 }
 0x953   :  { %v4889_v31 = vpop.f32.mrf.mxu3 }
 0x954   :  { %v1219_v21 = vadd.f32 %v4893_v47, %v4889_v31 }
 0x956   :  { %v1280_v22 = vmul.f32 0.01, %v1219_v21  ;;  %vm1264_vm14 = vcmp.ge.f32.partialorder %v1219_v21, 0.0 }
 0x958   :  { %v1296_v31 = vsel %vm1264_vm14, %v1219_v21, %v1280_v22 }
 0x95b   :  { %v4891_v17 = vpop.f32.mrf.mxu3 }
 0x95c   :  { %v1222_v9 = vadd.f32 %v4893_v47, %v4891_v17  ;;  %v1279_v17 = vmul.f32 0.01, %v1216_v6 }
 0x95e   :  { %v1281_v5 = vmul.f32 0.01, %v1222_v9  ;;  %vm1265_vm13 = vcmp.ge.f32.partialorder %v1222_v9, 0.0 }
 0x960   :  { %v1297_v16 = vsel %vm1265_vm13, %v1222_v9, %v1281_v5 }
 0x963   :  { %v1224_v24 = vpop.f32.mrf.mxu3 }
 0x964   :  { %v1225_v13 = vadd.f32 %v4893_v47, %v1224_v24  ;;  %v1295_v24 = vsel %vm1263_vm15, %v1216_v6, %v1279_v17  ;;  %v4964_v17 = vld [vmem:[#allocation8 + $0x6] ss:$0 sm:$0xff] }
 0x966   :  { %v1282_v25 = vmul.f32 0.01, %v1225_v13  ;;  %vm1266_vm12 = vcmp.ge.f32.partialorder %v1225_v13, 0.0 }
 0x968   :  { %v1298_v15 = vsel %vm1266_vm12, %v1225_v13, %v1282_v25 }
 0x96b   :  { %v1227_v32 = vpop.f32.mrf.mxu3 }
 0x96c   :  { %v1228_v10 = vadd.f32 %v4893_v47, %v1227_v32  ;;  %v4914_v32 = vld [vmem:[#allocation2] sm:$0xff] }
 0x96e   :  { %v1283_v20 = vmul.f32 0.01, %v1228_v10  ;;  %vm1267_vm11 = vcmp.ge.f32.partialorder %v1228_v10, 0.0 }
 0x970   :  { %v1299_v1 = vsel %vm1267_vm11, %v1228_v10, %v1283_v20 }
 0x973   :  { %v1230_v28 = vpop.f32.mrf.mxu3 }
 0x974   :  { %v1231_v3 = vadd.f32 %v4893_v47, %v1230_v28  ;;  %v4920_v28 = vld [vmem:[#allocation2 + $0x10] sm:$0xff] }
 0x976   :  { %v1284_v14 = vmul.f32 0.01, %v1231_v3  ;;  %vm1268_vm10 = vcmp.ge.f32.partialorder %v1231_v3, 0.0 }
 0x978   :  { %v1300_v8 = vsel %vm1268_vm10, %v1231_v3, %v1284_v14 }
 0x97b   :  { %v1233_v18 = vpop.f32.mrf.mxu3 }
 0x97c   :  { %v1234_v61 = vadd.f32 %v4893_v47, %v1233_v18  ;;  %v4924_v18 = vld [vmem:[#allocation2 + $0x20] sm:$0xff] }
 0x97e   :  { %v1285_v2 = vmul.f32 0.01, %v1234_v61  ;;  %vm1269_vm9 = vcmp.ge.f32.partialorder %v1234_v61, 0.0 }
 0x980   :  { %v1301_v0 = vsel %vm1269_vm9, %v1234_v61, %v1285_v2 }
 0x983   :  { %v1236_v29 = vpop.f32.mrf.mxu3 }
 0x984   :  { %v1237_v58 = vadd.f32 %v4893_v47, %v1236_v29  ;;  %v4927_v29 = vld [vmem:[#allocation2 + $0x28] sm:$0xff] }
 0x986   :  { %v1286_v12 = vmul.f32 0.01, %v1237_v58  ;;  %vm1270_vm8 = vcmp.ge.f32.partialorder %v1237_v58, 0.0 }
 0x988   :  { %v1302_v4 = vsel %vm1270_vm8, %v1237_v58, %v1286_v12 }
 0x98b   :  { %v1239_v30 = vpop.f32.mrf.mxu3 }
 0x98c   :  { %v1240_v56 = vadd.f32 %v4893_v47, %v1239_v30  ;;  %v4930_v30 = vld [vmem:[#allocation2 + $0x30] sm:$0xff] }
 0x98e   :  { %v1287_v63 = vmul.f32 0.01, %v1240_v56  ;;  %vm1271_vm7 = vcmp.ge.f32.partialorder %v1240_v56, 0.0 }
 0x990   :  { %v1303_v40 = vsel %vm1271_vm7, %v1240_v56, %v1287_v63 }
 0x993   :  { %v1242_v33 = vpop.f32.mrf.mxu3 }
 0x994   :  { %v1243_v39 = vadd.f32 %v4893_v47, %v1242_v33  ;;  %v1327_v33 = vld [vmem:[#allocation7 + $0x378] sm:$0xff] }
 0x995   :  { %1398 = vmatpush.msra.mxu1 %v1327_v33 }
 0x996   :  { %v1288_v60 = vmul.f32 0.01, %v1243_v39  ;;  %vm1272_vm6 = vcmp.ge.f32.partialorder %v1243_v39, 0.0 }
 0x998   :  { %v1304_v11 = vsel %vm1272_vm6, %v1243_v39, %v1288_v60  ;;  %v4952_v39 = vld [vmem:[#allocation2 + $0x70] sm:$0xff] }
 0x99b   :  { %v1245_v26 = vpop.f32.mrf.mxu3 }
 0x99c   :  { %v1246_v55 = vadd.f32 %v4893_v47, %v1245_v26  ;;  %v4934_v26 = vld [vmem:[#allocation2 + $0x40] sm:$0xff] }
 0x99e   :  { %v1289_v57 = vmul.f32 0.01, %v1246_v55  ;;  %vm1273_vm5 = vcmp.ge.f32.partialorder %v1246_v55, 0.0 }
 0x9a0   :  { %v1305_v7 = vsel %vm1273_vm5, %v1246_v55, %v1289_v57  ;;  %v1312_v55 = vld [vmem:[#allocation7 + $0x300] sm:$0xff] }
 0x9a3   :  { %v1248_v36 = vpop.f32.mrf.mxu3 }
 0x9a4   :  { %v1249_v51 = vadd.f32 %v4893_v47, %v1248_v36  ;;  %v1325_v36 = vld [vmem:[#allocation7 + $0x368] sm:$0xff] }
 0x9a6   :  { %v1290_v53 = vmul.f32 0.01, %v1249_v51  ;;  %vm1274_vm4 = vcmp.ge.f32.partialorder %v1249_v51, 0.0 }
 0x9a8   :  { %v1306_v59 = vsel %vm1274_vm4, %v1249_v51, %v1290_v53  ;;  %v4943_v51 = vld [vmem:[#allocation2 + $0x58] sm:$0xff] }
 0x9ab   :  { %v1251_v37 = vpop.f32.mrf.mxu3 }
 0x9ac   :  { %v1252_v42 = vadd.f32 %v4893_v47, %v1251_v37  ;;  %v1324_v37 = vld [vmem:[#allocation7 + $0x360] sm:$0xff] }
 0x9ae   :  { %v1291_v19 = vmul.f32 0.01, %v1252_v42  ;;  %vm1275_vm3 = vcmp.ge.f32.partialorder %v1252_v42, 0.0 }
 0x9b0   :  { %v1307_v52 = vsel %vm1275_vm3, %v1252_v42, %v1291_v19  ;;  %v1317_v42 = vld [vmem:[#allocation7 + $0x328] sm:$0xff] }
 0x9b1   :  { %v4949_v19 = vld [vmem:[#allocation2 + $0x68] sm:$0xff] }
 0x9b3   :  { %v1254_v44 = vpop.f32.mrf.mxu3 }
 0x9b4   :  { %v1255_v45 = vadd.f32 %v4893_v47, %v1254_v44  ;;  %v1323_v44 = vld [vmem:[#allocation7 + $0x358] sm:$0xff] }
 0x9b6   :  { %v1292_v46 = vmul.f32 0.01, %v1255_v45  ;;  %vm1276_vm2 = vcmp.ge.f32.partialorder %v1255_v45, 0.0 }
 0x9b8   :  { %v1308_v34 = vsel %vm1276_vm2, %v1255_v45, %v1292_v46  ;;  %v4940_v45 = vld [vmem:[#allocation2 + $0x50] sm:$0xff]  ;;  %v1313_v46 = vld [vmem:[#allocation7 + $0x308] sm:$0xff] }
 0x9bb   :  { %v1257_v43 = vpop.f32.mrf.mxu3 }
 0x9bc   :  { %v1258_v35 = vadd.f32 %v4893_v47, %v1257_v43  ;;  %v4937_v43 = vld [vmem:[#allocation2 + $0x48] sm:$0xff] }
 0x9be   :  { %v1293_v50 = vmul.f32 0.01, %v1258_v35  ;;  %vm1277_vm1 = vcmp.ge.f32.partialorder %v1258_v35, 0.0 }
 0x9c0   :  { %v1309_v62 = vsel %vm1277_vm1, %v1258_v35, %v1293_v50  ;;  %v1320_v35 = vld [vmem:[#allocation7 + $0x340] sm:$0xff]  ;;  %v1315_v50 = vld [vmem:[#allocation7 + $0x318] sm:$0xff] }
 0x9c3   :  { %v1260_v48 = vpop.f32.mrf.mxu3 }
 0x9c4   :  { %v1261_v49 = vadd.f32 %v4893_v47, %v1260_v48  ;;  %v1322_v47 = vld [vmem:[#allocation7 + $0x350] sm:$0xff]  ;;  %v1319_v48 = vld [vmem:[#allocation7 + $0x338] sm:$0xff] }
 0x9c6   :  { %v1294_v27 = vmul.f32 0.01, %v1261_v49  ;;  %vm1278_vm0 = vcmp.ge.f32.partialorder %v1261_v49, 0.0 }
 0x9c8   :  { %v1310_v41 = vsel %vm1278_vm0, %v1261_v49, %v1294_v27  ;;  %v1318_v49 = vld [vmem:[#allocation7 + $0x330] sm:$0xff]  ;;  %v1316_v27 = vld [vmem:[#allocation7 + $0x320] sm:$0xff] }
 0x9c9   :  { %1330 = vmatpush.msrb.mxu0 %v1310_v41  ;;  %v1314_v41 = vld [vmem:[#allocation7 + $0x310] sm:$0xff] }
 0x9cb   :  { %1331 = vmatpush.msrb.mxu0 %v1309_v62  ;;  %v4946_v62 = vld [vmem:[#allocation2 + $0x60] sm:$0xff] }
 0x9cd   :  { %1332 = vmatpush.msrb.mxu0 %v1308_v34  ;;  %v4955_v34 = vld [vmem:[#allocation2 + $0x78] sm:$0xff] }
 0x9cf   :  { %1333 = vmatpush.msrb.mxu0 %v1307_v52 }
 0x9d1   :  { %1334 = vmatpush.msrb.mxu0 %v1306_v59 }
 0x9d3   :  { %1335 = vmatpush.msrb.mxu0 %v1305_v7 }
 0x9d5   :  { %1336 = vmatpush.msrb.mxu0 %v1304_v11 }
 0x9d7   :  { %1337 = vmatpush.msrb.mxu0 %v1303_v40 }
 0x9d9   :  { %1338 = vmatpush.msrb.mxu0 %v1302_v4 }
 0x9db   :  { %1339 = vmatpush.msrb.mxu0 %v1301_v0 }
 0x9dd   :  { %1340 = vmatpush.msrb.mxu0 %v1300_v8 }
 0x9df   :  { %1341 = vmatpush.msrb.mxu0 %v1299_v1 }
 0x9e1   :  { %1342 = vmatpush.msrb.mxu0 %v1298_v15 }
 0x9e3   :  { %1343 = vmatpush.msrb.mxu0 %v1297_v16 }
 0x9e5   :  { %1344 = vmatpush.msrb.mxu0 %v1296_v31 }
 0x9e7   :  { %1345 = vmatpush.msrb.mxu0 %v1295_v24 }
 0x9e8   :  { %1346 = vmatmul.f32.vlgmr.msrb.gmra.mxu0 %v4914_v32 }
 0x9f0   :  { %1349 = vmatmul.f32.gmra.mxu0 %v4917_v23 }
 0x9f8   :  { %1352 = vmatmul.f32.gmra.mxu0 %v4920_v28 }
 0xa00   :  { %1355 = vmatmul.f32.gmra.mxu0 %v4827_v38  ;;  %v1326_v38 = vld [vmem:[#allocation7 + $0x370] sm:$0xff] }
 0xa01   :  { %1399 = vmatpush.msra.mxu1 %v1326_v38 }
 0xa03   :  { %1400 = vmatpush.msra.mxu1 %v1325_v36 }
 0xa05   :  { %1401 = vmatpush.msra.mxu1 %v1324_v37 }
 0xa07   :  { %1402 = vmatpush.msra.mxu1 %v1323_v44 }
 0xa08   :  { %1358 = vmatmul.f32.gmra.mxu0 %v4924_v18 }
 0xa09   :  { %1403 = vmatpush.msra.mxu1 %v1322_v47 }
 0xa10   :  { %1361 = vmatmul.f32.gmra.mxu0 %v4927_v29 }
 0xa18   :  { %1364 = vmatmul.f32.gmra.mxu0 %v4930_v30 }
 0xa20   :  { %1367 = vmatmul.f32.gmra.mxu0 %v4833_v54  ;;  %v1321_v54 = vld [vmem:[#allocation7 + $0x348] sm:$0xff] }
 0xa21   :  { %1404 = vmatpush.msra.mxu1 %v1321_v54 }
 0xa23   :  { %1405 = vmatpush.msra.mxu1 %v1320_v35 }
 0xa25   :  { %1406 = vmatpush.msra.mxu1 %v1319_v48 }
 0xa27   :  { %1407 = vmatpush.msra.mxu1 %v1318_v49 }
 0xa28   :  { %1370 = vmatmul.f32.gmra.mxu0 %v4934_v26 }
 0xa29   :  { %1408 = vmatpush.msra.mxu1 %v1317_v42 }
 0xa2b   :  { %1409 = vmatpush.msra.mxu1 %v1316_v27 }
 0xa2d   :  { %1410 = vmatpush.msra.mxu1 %v1315_v50 }
 0xa2f   :  { %1411 = vmatpush.msra.mxu1 %v1314_v41 }
 0xa30   :  { %1373 = vmatmul.f32.gmra.mxu0 %v4937_v43 }
 0xa31   :  { %1412 = vmatpush.msra.mxu1 %v1313_v46 }
 0xa33   :  { %1413 = vmatpush.msra.mxu1 %v1312_v55 }
 0xa38   :  { %1376 = vmatmul.f32.gmra.mxu0 %v4940_v45 }
 0xa40   :  { %1379 = vmatmul.f32.gmra.mxu0 %v4943_v51 }
 0xa48   :  { %1382 = vmatmul.f32.gmra.mxu0 %v4946_v62 }
 0xa50   :  { %1385 = vmatmul.f32.gmra.mxu0 %v4949_v19 }
 0xa58   :  { %1388 = vmatmul.f32.gmra.mxu0 %v4952_v39 }
 0xa60   :  { %1391 = vmatmul.f32.gmra.mxu0 %v4955_v34 }
 0xa65   :  { %v1347_v53 = vpop.f32.mrf.mxu0 }
 0xa66   :  { %1414 = vmatmul.f32.vlgmr.msra.gmra.mxu1 %v1347_v53 }
 0xa6d   :  { %v1350_v56 = vpop.f32.mrf.mxu0 }
 0xa6e   :  { %1417 = vmatmul.f32.gmra.mxu1 %v1350_v56 }
 0xa75   :  { %v1353_v52 = vpop.f32.mrf.mxu0 }
 0xa76   :  { %1420 = vmatmul.f32.gmra.mxu1 %v1353_v52 }
 0xa7d   :  { %v1356_v57 = vpop.f32.mrf.mxu0 }
 0xa7e   :  { %1423 = vmatmul.f32.gmra.mxu1 %v1356_v57 }
 0xa85   :  { %v1359_v58 = vpop.f32.mrf.mxu0 }
 0xa86   :  { %1426 = vmatmul.f32.gmra.mxu1 %v1359_v58 }
 0xa8d   :  { %v1362_v59 = vpop.f32.mrf.mxu0 }
 0xa8e   :  { %1429 = vmatmul.f32.gmra.mxu1 %v1362_v59 }
 0xa95   :  { %v1365_v60 = vpop.f32.mrf.mxu0 }
 0xa96   :  { %1432 = vmatmul.f32.gmra.mxu1 %v1365_v60 }
 0xa9d   :  { %v1368_v61 = vpop.f32.mrf.mxu0 }
 0xa9e   :  { %1435 = vmatmul.f32.gmra.mxu1 %v1368_v61 }
 0xaa5   :  { %v1371_v7 = vpop.f32.mrf.mxu0 }
 0xaa6   :  { %1438 = vmatmul.f32.gmra.mxu1 %v1371_v7 }
 0xaad   :  { %v1374_v63 = vpop.f32.mrf.mxu0 }
 0xaae   :  { %1441 = vmatmul.f32.gmra.mxu1 %v1374_v63 }
 0xab5   :  { %v1377_v3 = vpop.f32.mrf.mxu0 }
 0xab6   :  { %1444 = vmatmul.f32.gmra.mxu1 %v1377_v3 }
 0xabd   :  { %v1380_v11 = vpop.f32.mrf.mxu0 }
 0xabe   :  { %1447 = vmatmul.f32.gmra.mxu1 %v1380_v11 }
 0xac5   :  { %v1383_v12 = vpop.f32.mrf.mxu0 }
 0xac6   :  { %1450 = vmatmul.f32.gmra.mxu1 %v1383_v12 }
 0xacd   :  { %v1386_v10 = vpop.f32.mrf.mxu0 }
 0xace   :  { %1453 = vmatmul.f32.gmra.mxu1 %v1386_v10 }
 0xad5   :  { %v1389_v40 = vpop.f32.mrf.mxu0 }
 0xad6   :  { %1456 = vmatmul.f32.gmra.mxu1 %v1389_v40 }
 0xadd   :  { %v1392_v2 = vpop.f32.mrf.mxu0 }
 0xade   :  { %1459 = vmatmul.f32.gmra.mxu1 %v1392_v2 }
 0xae3   :  { %v4958_v13 = vpop.f32.mrf.mxu1 }
 0xaeb   :  { %v4960_v4 = vpop.f32.mrf.mxu1 }
 0xaf3   :  { %v4962_v14 = vpop.f32.mrf.mxu1 }
 0xafb   :  { %v1424_v9 = vpop.f32.mrf.mxu1 }
 0xafc   :  { %v1425_v10 = vadd.f32 %v4964_v17, %v1424_v9  ;;  %v1416_v9 = vadd.f32 %v4964_v17, %v4958_v13  ;;  %v4988_v13 = vld [vmem:[#allocation2 + $0x18] sm:$0xff] }
 0xafe   :  { %vm1466_vm12 = vcmp.ge.f32.partialorder %v1425_v10, 0.0  ;;  %vm1463_vm15 = vcmp.ge.f32.partialorder %v1416_v9, 0.0 }
 0xb03   :  { %v1427_v0 = vpop.f32.mrf.mxu1 }
 0xb04   :  { %v1428_v3 = vadd.f32 %v4964_v17, %v1427_v0  ;;  %v1419_v0 = vadd.f32 %v4964_v17, %v4960_v4 }
 0xb06   :  { %vm1467_vm11 = vcmp.ge.f32.partialorder %v1428_v3, 0.0  ;;  %vm1464_vm14 = vcmp.ge.f32.partialorder %v1419_v0, 0.0 }
 0xb0b   :  { %v1430_v20 = vpop.f32.mrf.mxu1 }
 0xb0c   :  { %v1431_v61 = vadd.f32 %v4964_v17, %v1430_v20 }
 0xb0e   :  { %v1484_v2 = vmul.f32 0.01, %v1431_v61  ;;  %vm1468_vm10 = vcmp.ge.f32.partialorder %v1431_v61, 0.0 }
 0xb13   :  { %v1433_v21 = vpop.f32.mrf.mxu1 }
 0xb14   :  { %v1434_v58 = vadd.f32 %v4964_v17, %v1433_v21  ;;  %v1422_v21 = vadd.f32 %v4964_v17, %v4962_v14  ;;  %v1480_v14 = vmul.f32 0.01, %v1419_v0 }
 0xb16   :  { %v1485_v12 = vmul.f32 0.01, %v1434_v58  ;;  %vm1469_vm9 = vcmp.ge.f32.partialorder %v1434_v58, 0.0  ;;  %vm1465_vm13 = vcmp.ge.f32.partialorder %v1422_v21, 0.0  ;;  %v1496_v4 = vsel %vm1464_vm14, %v1419_v0, %v1480_v14 }
 0xb18   :  { %v1501_v20 = vsel %vm1469_vm9, %v1434_v58, %v1485_v12 }
 0xb1b   :  { %v1436_v8 = vpop.f32.mrf.mxu1 }
 0xb1c   :  { %v1437_v56 = vadd.f32 %v4964_v17, %v1436_v8  ;;  %v1483_v8 = vmul.f32 0.01, %v1428_v3 }
 0xb1e   :  { %v1486_v63 = vmul.f32 0.01, %v1437_v56  ;;  %vm1470_vm8 = vcmp.ge.f32.partialorder %v1437_v56, 0.0 }
 0xb20   :  { %v1502_v40 = vsel %vm1470_vm8, %v1437_v56, %v1486_v63 }
 0xb23   :  { %v1439_v25 = vpop.f32.mrf.mxu1 }
 0xb24   :  { %v1440_v46 = vadd.f32 %v4964_v17, %v1439_v25  ;;  %v1500_v25 = vsel %vm1468_vm10, %v1431_v61, %v1484_v2 }
 0xb26   :  { %v1487_v60 = vmul.f32 0.01, %v1440_v46  ;;  %vm1471_vm7 = vcmp.ge.f32.partialorder %v1440_v46, 0.0 }
 0xb28   :  { %v1503_v11 = vsel %vm1471_vm7, %v1440_v46, %v1487_v60  ;;  %v1512_v46 = vld [vmem:[#allocation7 + $0x380] sm:$0xff] }
 0xb2b   :  { %v1442_v6 = vpop.f32.mrf.mxu1 }
 0xb2c   :  { %v1443_v27 = vadd.f32 %v4964_v17, %v1442_v6  ;;  %v1482_v6 = vmul.f32 0.01, %v1425_v10 }
 0xb2e   :  { %v1488_v57 = vmul.f32 0.01, %v1443_v27  ;;  %vm1472_vm6 = vcmp.ge.f32.partialorder %v1443_v27, 0.0 }
 0xb30   :  { %v1504_v7 = vsel %vm1472_vm6, %v1443_v27, %v1488_v57  ;;  %v1515_v27 = vld [vmem:[#allocation7 + $0x398] sm:$0xff] }
 0xb33   :  { %v1445_v1 = vpop.f32.mrf.mxu1 }
 0xb34   :  { %v1446_v48 = vadd.f32 %v4964_v17, %v1445_v1  ;;  %v1499_v1 = vsel %vm1467_vm11, %v1428_v3, %v1483_v8 }
 0xb36   :  { %v1489_v53 = vmul.f32 0.01, %v1446_v48  ;;  %vm1473_vm5 = vcmp.ge.f32.partialorder %v1446_v48, 0.0 }
 0xb38   :  { %v1505_v59 = vsel %vm1473_vm5, %v1446_v48, %v1489_v53  ;;  %v1518_v48 = vld [vmem:[#allocation7 + $0x3b0] sm:$0xff] }
 0xb3b   :  { %v1448_v5 = vpop.f32.mrf.mxu1 }
 0xb3c   :  { %v1449_v47 = vadd.f32 %v4964_v17, %v1448_v5  ;;  %v1481_v5 = vmul.f32 0.01, %v1422_v21 }
 0xb3e   :  { %v1490_v41 = vmul.f32 0.01, %v1449_v47  ;;  %vm1474_vm4 = vcmp.ge.f32.partialorder %v1449_v47, 0.0 }
 0xb40   :  { %v1506_v52 = vsel %vm1474_vm4, %v1449_v47, %v1490_v41  ;;  %v1521_v47 = vld [vmem:[#allocation7 + $0x3c8] sm:$0xff] }
 0xb41   :  { %v1513_v41 = vld [vmem:[#allocation7 + $0x388] sm:$0xff] }
 0xb43   :  { %v1451_v15 = vpop.f32.mrf.mxu1 }
 0xb44   :  { %v1452_v36 = vadd.f32 %v4964_v17, %v1451_v15  ;;  %v1498_v15 = vsel %vm1466_vm12, %v1425_v10, %v1482_v6 }
 0xb46   :  { %v1491_v42 = vmul.f32 0.01, %v1452_v36  ;;  %vm1475_vm3 = vcmp.ge.f32.partialorder %v1452_v36, 0.0 }
 0xb48   :  { %v1507_v55 = vsel %vm1475_vm3, %v1452_v36, %v1491_v42  ;;  %v1524_v36 = vld [vmem:[#allocation7 + $0x3e0] sm:$0xff] }
 0xb49   :  { %v1516_v42 = vld [vmem:[#allocation7 + $0x3a0] sm:$0xff] }
 0xb4b   :  { %v1454_v22 = vpop.f32.mrf.mxu1 }
 0xb4c   :  { %v1455_v33 = vadd.f32 %v4964_v17, %v1454_v22  ;;  %v1497_v22 = vsel %vm1465_vm13, %v1422_v21, %v1481_v5 }
 0xb4e   :  { %v1492_v35 = vmul.f32 0.01, %v1455_v33  ;;  %vm1476_vm2 = vcmp.ge.f32.partialorder %v1455_v33, 0.0 }
 0xb50   :  { %v1508_v50 = vsel %vm1476_vm2, %v1455_v33, %v1492_v35  ;;  %v1526_v33 = vld [vmem:[#allocation7 + $0x3f0] sm:$0xff]  ;;  %v1519_v35 = vld [vmem:[#allocation7 + $0x3b8] sm:$0xff] }
 0xb53   :  { %v1457_v16 = vpop.f32.mrf.mxu1 }
 0xb54   :  { %v1458_v31 = vadd.f32 %v4964_v17, %v1457_v16  ;;  %v1479_v16 = vmul.f32 0.01, %v1416_v9 }
 0xb56   :  { %v1493_v44 = vmul.f32 0.01, %v1458_v31  ;;  %vm1477_vm1 = vcmp.ge.f32.partialorder %v1458_v31, 0.0 }
 0xb58   :  { %v1509_v49 = vsel %vm1477_vm1, %v1458_v31, %v1493_v44  ;;  %v1495_v31 = vsel %vm1463_vm15, %v1416_v9, %v1479_v16  ;;  %v1522_v44 = vld [vmem:[#allocation7 + $0x3d0] sm:$0xff] }
 0xb5b   :  { %v1460_v24 = vpop.f32.mrf.mxu1 }
 0xb5c   :  { %v1461_v38 = vadd.f32 %v4964_v17, %v1460_v24  ;;  %v4994_v17 = vld [vmem:[#allocation2 + $0x38] sm:$0xff] }
 0xb5d   :  { %v1527_v24 = vld [vmem:[#allocation7 + $0x3f8] sm:$0xff] }
 0xb5e   :  { %v1494_v37 = vmul.f32 0.01, %v1461_v38  ;;  %vm1478_vm0 = vcmp.ge.f32.partialorder %v1461_v38, 0.0  ;;  %1598 = vmatpush.msra.mxu3 %v1527_v24 }
 0xb60   :  { %v1510_v54 = vsel %vm1478_vm0, %v1461_v38, %v1494_v37  ;;  %1599 = vmatpush.msra.mxu3 %v1526_v33  ;;  %v1525_v38 = vld [vmem:[#allocation7 + $0x3e8] sm:$0xff]  ;;  %v1523_v37 = vld [vmem:[#allocation7 + $0x3d8] sm:$0xff] }
 0xb61   :  { %1530 = vmatpush.msra.mxu2 %v1510_v54  ;;  %v1520_v54 = vld [vmem:[#allocation7 + $0x3c0] sm:$0xff] }
 0xb62   :  { %1600 = vmatpush.msra.mxu3 %v1525_v38 }
 0xb63   :  { %1531 = vmatpush.msra.mxu2 %v1509_v49  ;;  %v1517_v49 = vld [vmem:[#allocation7 + $0x3a8] sm:$0xff] }
 0xb64   :  { %1601 = vmatpush.msra.mxu3 %v1524_v36 }
 0xb65   :  { %1532 = vmatpush.msra.mxu2 %v1508_v50  ;;  %v1514_v50 = vld [vmem:[#allocation7 + $0x390] sm:$0xff] }
 0xb66   :  { %1602 = vmatpush.msra.mxu3 %v1523_v37 }
 0xb67   :  { %1533 = vmatpush.msra.mxu2 %v1507_v55 }
 0xb68   :  { %1603 = vmatpush.msra.mxu3 %v1522_v44 }
 0xb69   :  { %1534 = vmatpush.msra.mxu2 %v1506_v52 }
 0xb6a   :  { %1604 = vmatpush.msra.mxu3 %v1521_v47 }
 0xb6b   :  { %1535 = vmatpush.msra.mxu2 %v1505_v59 }
 0xb6c   :  { %1605 = vmatpush.msra.mxu3 %v1520_v54 }
 0xb6d   :  { %1536 = vmatpush.msra.mxu2 %v1504_v7 }
 0xb6e   :  { %1606 = vmatpush.msra.mxu3 %v1519_v35 }
 0xb6f   :  { %1537 = vmatpush.msra.mxu2 %v1503_v11 }
 0xb70   :  { %1607 = vmatpush.msra.mxu3 %v1518_v48 }
 0xb71   :  { %1538 = vmatpush.msra.mxu2 %v1502_v40 }
 0xb72   :  { %1608 = vmatpush.msra.mxu3 %v1517_v49 }
 0xb73   :  { %1539 = vmatpush.msra.mxu2 %v1501_v20 }
 0xb74   :  { %1609 = vmatpush.msra.mxu3 %v1516_v42 }
 0xb75   :  { %1540 = vmatpush.msra.mxu2 %v1500_v25 }
 0xb76   :  { %1610 = vmatpush.msra.mxu3 %v1515_v27 }
 0xb77   :  { %1541 = vmatpush.msra.mxu2 %v1499_v1 }
 0xb78   :  { %1611 = vmatpush.msra.mxu3 %v1514_v50 }
 0xb79   :  { %1542 = vmatpush.msra.mxu2 %v1498_v15 }
 0xb7a   :  { %1612 = vmatpush.msra.mxu3 %v1513_v41 }
 0xb7b   :  { %1543 = vmatpush.msra.mxu2 %v1497_v22 }
 0xb7c   :  { %1613 = vmatpush.msra.mxu3 %v1512_v46 }
 0xb7d   :  { %1544 = vmatpush.msra.mxu2 %v1496_v4 }
 0xb7f   :  { %1545 = vmatpush.msra.mxu2 %v1495_v31  ;;  %v5011_v31 = vld [vmem:[#allocation8 + $0x7] ss:$0 sm:$0xff] }
 0xb80   :  { %1546 = vmatmul.f32.vlgmr.msra.gmra.mxu2 %v4914_v32 }
 0xb88   :  { %1549 = vmatmul.f32.gmra.mxu2 %v4917_v23 }
 0xb90   :  { %1552 = vmatmul.f32.gmra.mxu2 %v4920_v28 }
 0xb98   :  { %1555 = vmatmul.f32.gmra.mxu2 %v4988_v13 }
 0xba0   :  { %1558 = vmatmul.f32.gmra.mxu2 %v4924_v18 }
 0xba8   :  { %1561 = vmatmul.f32.gmra.mxu2 %v4927_v29 }
 0xbb0   :  { %1564 = vmatmul.f32.gmra.mxu2 %v4930_v30 }
 0xbb8   :  { %1567 = vmatmul.f32.gmra.mxu2 %v4994_v17 }
 0xbc0   :  { %1570 = vmatmul.f32.gmra.mxu2 %v4934_v26 }
 0xbc8   :  { %1573 = vmatmul.f32.gmra.mxu2 %v4937_v43 }
 0xbd0   :  { %1576 = vmatmul.f32.gmra.mxu2 %v4940_v45 }
 0xbd8   :  { %1579 = vmatmul.f32.gmra.mxu2 %v4943_v51 }
 0xbe0   :  { %1582 = vmatmul.f32.gmra.mxu2 %v4946_v62 }
 0xbe8   :  { %1585 = vmatmul.f32.gmra.mxu2 %v4949_v19 }
 0xbf0   :  { %1588 = vmatmul.f32.gmra.mxu2 %v4952_v39 }
 0xbf8   :  { %1591 = vmatmul.f32.gmra.mxu2 %v4955_v34 }
 0xc03   :  { %v1547_v55 = vpop.f32.mrf.mxu2 }
 0xc04   :  { %1614 = vmatmul.f32.vlgmr.msra.gmra.mxu3 %v1547_v55 }
 0xc0b   :  { %v1550_v53 = vpop.f32.mrf.mxu2 }
 0xc0c   :  { %1617 = vmatmul.f32.gmra.mxu3 %v1550_v53 }
 0xc13   :  { %v1553_v56 = vpop.f32.mrf.mxu2 }
 0xc14   :  { %1620 = vmatmul.f32.gmra.mxu3 %v1553_v56 }
 0xc1b   :  { %v1556_v52 = vpop.f32.mrf.mxu2 }
 0xc1c   :  { %1623 = vmatmul.f32.gmra.mxu3 %v1556_v52 }
 0xc23   :  { %v1559_v57 = vpop.f32.mrf.mxu2 }
 0xc24   :  { %1626 = vmatmul.f32.gmra.mxu3 %v1559_v57 }
 0xc2b   :  { %v1562_v58 = vpop.f32.mrf.mxu2 }
 0xc2c   :  { %1629 = vmatmul.f32.gmra.mxu3 %v1562_v58 }
 0xc33   :  { %v1565_v59 = vpop.f32.mrf.mxu2 }
 0xc34   :  { %1632 = vmatmul.f32.gmra.mxu3 %v1565_v59 }
 0xc3b   :  { %v1568_v60 = vpop.f32.mrf.mxu2 }
 0xc3c   :  { %1635 = vmatmul.f32.gmra.mxu3 %v1568_v60 }
 0xc43   :  { %v1571_v61 = vpop.f32.mrf.mxu2 }
 0xc44   :  { %1638 = vmatmul.f32.gmra.mxu3 %v1571_v61 }
 0xc4b   :  { %v1574_v7 = vpop.f32.mrf.mxu2 }
 0xc4c   :  { %1641 = vmatmul.f32.gmra.mxu3 %v1574_v7 }
 0xc53   :  { %v1577_v63 = vpop.f32.mrf.mxu2 }
 0xc54   :  { %1644 = vmatmul.f32.gmra.mxu3 %v1577_v63 }
 0xc5b   :  { %v1580_v3 = vpop.f32.mrf.mxu2 }
 0xc5c   :  { %1647 = vmatmul.f32.gmra.mxu3 %v1580_v3 }
 0xc63   :  { %v1583_v11 = vpop.f32.mrf.mxu2 }
 0xc64   :  { %1650 = vmatmul.f32.gmra.mxu3 %v1583_v11 }
 0xc6b   :  { %v1586_v12 = vpop.f32.mrf.mxu2 }
 0xc6c   :  { %1653 = vmatmul.f32.gmra.mxu3 %v1586_v12 }
 0xc73   :  { %v1589_v10 = vpop.f32.mrf.mxu2 }
 0xc74   :  { %1656 = vmatmul.f32.gmra.mxu3 %v1589_v10 }
 0xc7b   :  { %v1592_v40 = vpop.f32.mrf.mxu2 }
 0xc7c   :  { %1659 = vmatmul.f32.gmra.mxu3 %v1592_v40 }
 0xc87   :  { %v5005_v2 = vpop.f32.mrf.mxu3 }
 0xc8f   :  { %v5007_v21 = vpop.f32.mrf.mxu3 }
 0xc97   :  { %v5009_v20 = vpop.f32.mrf.mxu3 }
 0xc9f   :  { %v1624_v8 = vpop.f32.mrf.mxu3 }
 0xca0   :  { %v1625_v40 = vadd.f32 %v5011_v31, %v1624_v8  ;;  %v1616_v8 = vadd.f32 %v5011_v31, %v5005_v2  ;;  %v1727_v2 = vld [vmem:[#allocation7 + $0x478] sm:$0xff] }
 0xca1   :  { %1798 = vmatpush.msrb.mxu1 %v1727_v2 }
 0xca2   :  { %vm1666_vm12 = vcmp.ge.f32.partialorder %v1625_v40, 0.0  ;;  %vm1663_vm15 = vcmp.ge.f32.partialorder %v1616_v8, 0.0 }
 0xca7   :  { %v1627_v0 = vpop.f32.mrf.mxu3 }
 0xca8   :  { %v1628_v11 = vadd.f32 %v5011_v31, %v1627_v0  ;;  %v1619_v0 = vadd.f32 %v5011_v31, %v5007_v21 }
 0xcaa   :  { %vm1667_vm11 = vcmp.ge.f32.partialorder %v1628_v11, 0.0  ;;  %vm1664_vm14 = vcmp.ge.f32.partialorder %v1619_v0, 0.0 }
 0xcaf   :  { %v1630_v25 = vpop.f32.mrf.mxu3 }
 0xcb0   :  { %v1631_v7 = vadd.f32 %v5011_v31, %v1630_v25 }
 0xcb2   :  { %vm1668_vm10 = vcmp.ge.f32.partialorder %v1631_v7, 0.0 }
 0xcb7   :  { %v1633_v6 = vpop.f32.mrf.mxu3 }
 0xcb8   :  { %v1634_v59 = vadd.f32 %v5011_v31, %v1633_v6  ;;  %v1684_v6 = vmul.f32 0.01, %v1631_v7 }
 0xcba   :  { %v1685_v10 = vmul.f32 0.01, %v1634_v59  ;;  %vm1669_vm9 = vcmp.ge.f32.partialorder %v1634_v59, 0.0 }
 0xcbc   :  { %v1701_v25 = vsel %vm1669_vm9, %v1634_v59, %v1685_v10 }
 0xcbf   :  { %v1636_v9 = vpop.f32.mrf.mxu3 }
 0xcc0   :  { %v1637_v52 = vadd.f32 %v5011_v31, %v1636_v9 }
 0xcc2   :  { %v1686_v3 = vmul.f32 0.01, %v1637_v52  ;;  %vm1670_vm8 = vcmp.ge.f32.partialorder %v1637_v52, 0.0 }
 0xcc4   :  { %v1702_v9 = vsel %vm1670_vm8, %v1637_v52, %v1686_v3 }
 0xcc7   :  { %v1639_v1 = vpop.f32.mrf.mxu3 }
 0xcc8   :  { %v1640_v55 = vadd.f32 %v5011_v31, %v1639_v1  ;;  %v1622_v1 = vadd.f32 %v5011_v31, %v5009_v20  ;;  %v1680_v20 = vmul.f32 0.01, %v1619_v0 }
 0xcca   :  { %v1687_v61 = vmul.f32 0.01, %v1640_v55  ;;  %vm1671_vm7 = vcmp.ge.f32.partialorder %v1640_v55, 0.0  ;;  %vm1665_vm13 = vcmp.ge.f32.partialorder %v1622_v1, 0.0  ;;  %v1696_v21 = vsel %vm1664_vm14, %v1619_v0, %v1680_v20 }
 0xccc   :  { %v1703_v12 = vsel %vm1671_vm7, %v1640_v55, %v1687_v61 }
 0xccf   :  { %v1642_v5 = vpop.f32.mrf.mxu3 }
 0xcd0   :  { %v1643_v50 = vadd.f32 %v5011_v31, %v1642_v5  ;;  %v1683_v5 = vmul.f32 0.01, %v1628_v11 }
 0xcd2   :  { %v1688_v58 = vmul.f32 0.01, %v1643_v50  ;;  %vm1672_vm6 = vcmp.ge.f32.partialorder %v1643_v50, 0.0 }
 0xcd4   :  { %v1704_v63 = vsel %vm1672_vm6, %v1643_v50, %v1688_v58 }
 0xcd7   :  { %v1645_v15 = vpop.f32.mrf.mxu3 }
 0xcd8   :  { %v1646_v49 = vadd.f32 %v5011_v31, %v1645_v15  ;;  %v1700_v15 = vsel %vm1668_vm10, %v1631_v7, %v1684_v6 }
 0xcda   :  { %v1689_v56 = vmul.f32 0.01, %v1646_v49  ;;  %vm1673_vm5 = vcmp.ge.f32.partialorder %v1646_v49, 0.0 }
 0xcdc   :  { %v1705_v60 = vsel %vm1673_vm5, %v1646_v49, %v1689_v56 }
 0xcdf   :  { %v1648_v14 = vpop.f32.mrf.mxu3 }
 0xce0   :  { %v1649_v54 = vadd.f32 %v5011_v31, %v1648_v14  ;;  %v1682_v14 = vmul.f32 0.01, %v1625_v40 }
 0xce2   :  { %v1690_v46 = vmul.f32 0.01, %v1649_v54  ;;  %vm1674_vm4 = vcmp.ge.f32.partialorder %v1649_v54, 0.0 }
 0xce4   :  { %v1706_v57 = vsel %vm1674_vm4, %v1649_v54, %v1690_v46  ;;  %v1713_v54 = vld [vmem:[#allocation7 + $0x408] sm:$0xff] }
 0xce7   :  { %v1651_v22 = vpop.f32.mrf.mxu3 }
 0xce8   :  { %v1652_v37 = vadd.f32 %v5011_v31, %v1651_v22  ;;  %v1699_v22 = vsel %vm1667_vm11, %v1628_v11, %v1683_v5 }
 0xcea   :  { %v1691_v27 = vmul.f32 0.01, %v1652_v37  ;;  %vm1675_vm3 = vcmp.ge.f32.partialorder %v1652_v37, 0.0 }
 0xcec   :  { %v1707_v53 = vsel %vm1675_vm3, %v1652_v37, %v1691_v27  ;;  %v1717_v37 = vld [vmem:[#allocation7 + $0x428] sm:$0xff] }
 0xcef   :  { %v1654_v16 = vpop.f32.mrf.mxu3 }
 0xcf0   :  { %v1655_v38 = vadd.f32 %v5011_v31, %v1654_v16  ;;  %v1681_v16 = vmul.f32 0.01, %v1622_v1 }
 0xcf2   :  { %v1692_v48 = vmul.f32 0.01, %v1655_v38  ;;  %vm1676_vm2 = vcmp.ge.f32.partialorder %v1655_v38, 0.0 }
 0xcf4   :  { %v1708_v41 = vsel %vm1676_vm2, %v1655_v38, %v1692_v48 }
 0xcf7   :  { %v1657_v4 = vpop.f32.mrf.mxu3 }
 0xcf8   :  { %v1658_v24 = vadd.f32 %v5011_v31, %v1657_v4  ;;  %v1698_v4 = vsel %vm1666_vm12, %v1625_v40, %v1682_v14 }
 0xcfa   :  { %v1693_v47 = vmul.f32 0.01, %v1658_v24  ;;  %vm1677_vm1 = vcmp.ge.f32.partialorder %v1658_v24, 0.0 }
 0xcfc   :  { %v1709_v42 = vsel %vm1677_vm1, %v1658_v24, %v1693_v47  ;;  %v1697_v24 = vsel %vm1665_vm13, %v1622_v1, %v1681_v16  ;;  %v1715_v47 = vld [vmem:[#allocation7 + $0x418] sm:$0xff]  ;;  %v5054_v1 = vld [vmem:[#allocation8 + $0x8] ss:$0 sm:$0xff] }
 0xcff   :  { %v1660_v33 = vpop.f32.mrf.mxu3 }
 0xd00   :  { %v1661_v36 = vadd.f32 %v5011_v31, %v1660_v33  ;;  %v1679_v33 = vmul.f32 0.01, %v1616_v8  ;;  %v1726_v31 = vld [vmem:[#allocation7 + $0x470] sm:$0xff] }
 0xd01   :  { %1799 = vmatpush.msrb.mxu1 %v1726_v31 }
 0xd02   :  { %v1694_v44 = vmul.f32 0.01, %v1661_v36  ;;  %vm1678_vm0 = vcmp.ge.f32.partialorder %v1661_v36, 0.0  ;;  %v1695_v38 = vsel %vm1663_vm15, %v1616_v8, %v1679_v33 }
 0xd04   :  { %v1710_v35 = vsel %vm1678_vm0, %v1661_v36, %v1694_v44  ;;  %v1719_v36 = vld [vmem:[#allocation7 + $0x438] sm:$0xff]  ;;  %v1716_v44 = vld [vmem:[#allocation7 + $0x420] sm:$0xff] }
 0xd05   :  { %1730 = vmatpush.msra.mxu0 %v1710_v35  ;;  %v1712_v35 = vld [vmem:[#allocation7 + $0x400] sm:$0xff] }
 0xd07   :  { %1731 = vmatpush.msra.mxu0 %v1709_v42 }
 0xd09   :  { %1732 = vmatpush.msra.mxu0 %v1708_v41 }
 0xd0b   :  { %1733 = vmatpush.msra.mxu0 %v1707_v53 }
 0xd0d   :  { %1734 = vmatpush.msra.mxu0 %v1706_v57 }
 0xd0f   :  { %1735 = vmatpush.msra.mxu0 %v1705_v60 }
 0xd11   :  { %1736 = vmatpush.msra.mxu0 %v1704_v63 }
 0xd13   :  { %1737 = vmatpush.msra.mxu0 %v1703_v12 }
 0xd15   :  { %1738 = vmatpush.msra.mxu0 %v1702_v9 }
 0xd17   :  { %1739 = vmatpush.msra.mxu0 %v1701_v25 }
 0xd19   :  { %1740 = vmatpush.msra.mxu0 %v1700_v15 }
 0xd1b   :  { %1741 = vmatpush.msra.mxu0 %v1699_v22 }
 0xd1d   :  { %1742 = vmatpush.msra.mxu0 %v1698_v4 }
 0xd1f   :  { %1743 = vmatpush.msra.mxu0 %v1697_v24 }
 0xd21   :  { %1744 = vmatpush.msra.mxu0 %v1696_v21 }
 0xd23   :  { %1745 = vmatpush.msra.mxu0 %v1695_v38 }
 0xd24   :  { %1746 = vmatmul.f32.vlgmr.msra.gmra.mxu0 %v4914_v32  ;;  %v1725_v32 = vld [vmem:[#allocation7 + $0x468] sm:$0xff] }
 0xd25   :  { %1800 = vmatpush.msrb.mxu1 %v1725_v32 }
 0xd2c   :  { %1749 = vmatmul.f32.gmra.mxu0 %v4917_v23  ;;  %v1724_v23 = vld [vmem:[#allocation7 + $0x460] sm:$0xff] }
 0xd2d   :  { %1801 = vmatpush.msrb.mxu1 %v1724_v23 }
 0xd34   :  { %1752 = vmatmul.f32.gmra.mxu0 %v4920_v28  ;;  %v1723_v28 = vld [vmem:[#allocation7 + $0x458] sm:$0xff] }
 0xd35   :  { %1802 = vmatpush.msrb.mxu1 %v1723_v28 }
 0xd3c   :  { %1755 = vmatmul.f32.gmra.mxu0 %v4988_v13 }
 0xd44   :  { %1758 = vmatmul.f32.gmra.mxu0 %v4924_v18  ;;  %v1722_v18 = vld [vmem:[#allocation7 + $0x450] sm:$0xff] }
 0xd45   :  { %1803 = vmatpush.msrb.mxu1 %v1722_v18 }
 0xd4c   :  { %1761 = vmatmul.f32.gmra.mxu0 %v4927_v29  ;;  %v1721_v29 = vld [vmem:[#allocation7 + $0x448] sm:$0xff] }
 0xd4d   :  { %1804 = vmatpush.msrb.mxu1 %v1721_v29 }
 0xd54   :  { %1764 = vmatmul.f32.gmra.mxu0 %v4930_v30  ;;  %v1720_v30 = vld [vmem:[#allocation7 + $0x440] sm:$0xff] }
 0xd55   :  { %1805 = vmatpush.msrb.mxu1 %v1720_v30 }
 0xd57   :  { %1806 = vmatpush.msrb.mxu1 %v1719_v36 }
 0xd5c   :  { %1767 = vmatmul.f32.gmra.mxu0 %v4994_v17 }
 0xd64   :  { %1770 = vmatmul.f32.gmra.mxu0 %v4934_v26  ;;  %v1718_v26 = vld [vmem:[#allocation7 + $0x430] sm:$0xff] }
 0xd65   :  { %1807 = vmatpush.msrb.mxu1 %v1718_v26 }
 0xd67   :  { %1808 = vmatpush.msrb.mxu1 %v1717_v37 }
 0xd69   :  { %1809 = vmatpush.msrb.mxu1 %v1716_v44 }
 0xd6b   :  { %1810 = vmatpush.msrb.mxu1 %v1715_v47 }
 0xd6c   :  { %1773 = vmatmul.f32.gmra.mxu0 %v4937_v43  ;;  %v1714_v43 = vld [vmem:[#allocation7 + $0x410] sm:$0xff] }
 0xd6d   :  { %1811 = vmatpush.msrb.mxu1 %v1714_v43 }
 0xd6f   :  { %1812 = vmatpush.msrb.mxu1 %v1713_v54 }
 0xd71   :  { %1813 = vmatpush.msrb.mxu1 %v1712_v35 }
 0xd74   :  { %1776 = vmatmul.f32.gmra.mxu0 %v4940_v45 }
 0xd7c   :  { %1779 = vmatmul.f32.gmra.mxu0 %v4943_v51 }
 0xd84   :  { %1782 = vmatmul.f32.gmra.mxu0 %v4946_v62 }
 0xd8c   :  { %1785 = vmatmul.f32.gmra.mxu0 %v4949_v19 }
 0xd94   :  { %1788 = vmatmul.f32.gmra.mxu0 %v4952_v39 }
 0xd9c   :  { %1791 = vmatmul.f32.gmra.mxu0 %v4955_v34 }
 0xda1   :  { %v1747_v45 = vpop.f32.mrf.mxu0 }
 0xda2   :  { %1814 = vmatmul.f32.vlgmr.msrb.gmra.mxu1 %v1747_v45 }
 0xda9   :  { %v1750_v48 = vpop.f32.mrf.mxu0 }
 0xdaa   :  { %1817 = vmatmul.f32.gmra.mxu1 %v1750_v48 }
 0xdb1   :  { %v1753_v49 = vpop.f32.mrf.mxu0 }
 0xdb2   :  { %1820 = vmatmul.f32.gmra.mxu1 %v1753_v49 }
 0xdb9   :  { %v1756_v51 = vpop.f32.mrf.mxu0 }
 0xdba   :  { %1823 = vmatmul.f32.gmra.mxu1 %v1756_v51 }
 0xdc1   :  { %v1759_v42 = vpop.f32.mrf.mxu0 }
 0xdc2   :  { %1826 = vmatmul.f32.gmra.mxu1 %v1759_v42 }
 0xdc9   :  { %v1762_v27 = vpop.f32.mrf.mxu0 }
 0xdca   :  { %1829 = vmatmul.f32.gmra.mxu1 %v1762_v27 }
 0xdd1   :  { %v1765_v50 = vpop.f32.mrf.mxu0 }
 0xdd2   :  { %1832 = vmatmul.f32.gmra.mxu1 %v1765_v50 }
 0xdd9   :  { %v1768_v62 = vpop.f32.mrf.mxu0 }
 0xdda   :  { %1835 = vmatmul.f32.gmra.mxu1 %v1768_v62 }
 0xde1   :  { %v1771_v19 = vpop.f32.mrf.mxu0 }
 0xde2   :  { %1838 = vmatmul.f32.gmra.mxu1 %v1771_v19 }
 0xde9   :  { %v1774_v39 = vpop.f32.mrf.mxu0 }
 0xdea   :  { %1841 = vmatmul.f32.gmra.mxu1 %v1774_v39 }
 0xdf1   :  { %v1777_v34 = vpop.f32.mrf.mxu0 }
 0xdf2   :  { %1844 = vmatmul.f32.gmra.mxu1 %v1777_v34 }
 0xdf9   :  { %v1780_v41 = vpop.f32.mrf.mxu0 }
 0xdfa   :  { %1847 = vmatmul.f32.gmra.mxu1 %v1780_v41 }
 0xe01   :  { %v1783_v46 = vpop.f32.mrf.mxu0 }
 0xe02   :  { %1850 = vmatmul.f32.gmra.mxu1 %v1783_v46 }
 0xe09   :  { %v1786_v55 = vpop.f32.mrf.mxu0 }
 0xe0a   :  { %1853 = vmatmul.f32.gmra.mxu1 %v1786_v55 }
 0xe11   :  { %v1789_v53 = vpop.f32.mrf.mxu0 }
 0xe12   :  { %1856 = vmatmul.f32.gmra.mxu1 %v1789_v53 }
 0xe19   :  { %v1792_v56 = vpop.f32.mrf.mxu0 }
 0xe1a   :  { %1859 = vmatmul.f32.gmra.mxu1 %v1792_v56 }
 0xe1f   :  { %v5048_v52 = vpop.f32.mrf.mxu1 }
 0xe20   :  { %v1816_v34 = vadd.f32 %v5054_v1, %v5048_v52  ;;  %v5078_v52 = vld [vmem:[#allocation2 + $0x8] sm:$0xff] }
 0xe22   :  { %vm1863_vm15 = vcmp.ge.f32.partialorder %v1816_v34, 0.0 }
 0xe27   :  { %v5050_v57 = vpop.f32.mrf.mxu1 }
 0xe28   :  { %v1819_v62 = vadd.f32 %v5054_v1, %v5050_v57 }
 0xe2a   :  { %v1880_v53 = vmul.f32 0.01, %v1819_v62  ;;  %vm1864_vm14 = vcmp.ge.f32.partialorder %v1819_v62, 0.0 }
 0xe2c   :  { %v1896_v57 = vsel %vm1864_vm14, %v1819_v62, %v1880_v53 }
 0xe2f   :  { %v5052_v58 = vpop.f32.mrf.mxu1 }
 0xe30   :  { %v1822_v42 = vadd.f32 %v5054_v1, %v5052_v58  ;;  %v1879_v58 = vmul.f32 0.01, %v1816_v34 }
 0xe32   :  { %v1881_v46 = vmul.f32 0.01, %v1822_v42  ;;  %vm1865_vm13 = vcmp.ge.f32.partialorder %v1822_v42, 0.0 }
 0xe34   :  { %v1897_v56 = vsel %vm1865_vm13, %v1822_v42, %v1881_v46 }
 0xe37   :  { %v1824_v59 = vpop.f32.mrf.mxu1 }
 0xe38   :  { %v1825_v48 = vadd.f32 %v5054_v1, %v1824_v59  ;;  %v1895_v59 = vsel %vm1863_vm15, %v1816_v34, %v1879_v58  ;;  %v5125_v58 = vld [vmem:[#allocation8 + $0x9] ss:$0 sm:$0xff] }
 0xe3a   :  { %v1882_v39 = vmul.f32 0.01, %v1825_v48  ;;  %vm1866_vm12 = vcmp.ge.f32.partialorder %v1825_v48, 0.0 }
 0xe3c   :  { %v1898_v55 = vsel %vm1866_vm12, %v1825_v48, %v1882_v39 }
 0xe3f   :  { %v1827_v60 = vpop.f32.mrf.mxu1 }
 0xe40   :  { %v1828_v54 = vadd.f32 %v5054_v1, %v1827_v60  ;;  %v5075_v60 = vld [vmem:[#allocation2] sm:$0xff] }
 0xe42   :  { %v1883_v50 = vmul.f32 0.01, %v1828_v54  ;;  %vm1867_vm11 = vcmp.ge.f32.partialorder %v1828_v54, 0.0 }
 0xe44   :  { %v1899_v41 = vsel %vm1867_vm11, %v1828_v54, %v1883_v50 }
 0xe47   :  { %v1830_v61 = vpop.f32.mrf.mxu1 }
 0xe48   :  { %v1831_v44 = vadd.f32 %v5054_v1, %v1830_v61  ;;  %v5081_v61 = vld [vmem:[#allocation2 + $0x10] sm:$0xff] }
 0xe4a   :  { %v1884_v51 = vmul.f32 0.01, %v1831_v44  ;;  %vm1868_vm10 = vcmp.ge.f32.partialorder %v1831_v44, 0.0 }
 0xe4c   :  { %v1900_v19 = vsel %vm1868_vm10, %v1831_v44, %v1884_v51 }
 0xe4f   :  { %v1833_v7 = vpop.f32.mrf.mxu1 }
 0xe50   :  { %v1834_v36 = vadd.f32 %v5054_v1, %v1833_v7  ;;  %v5085_v7 = vld [vmem:[#allocation2 + $0x20] sm:$0xff] }
 0xe52   :  { %v1885_v45 = vmul.f32 0.01, %v1834_v36  ;;  %vm1869_vm9 = vcmp.ge.f32.partialorder %v1834_v36, 0.0 }
 0xe54   :  { %v1901_v27 = vsel %vm1869_vm9, %v1834_v36, %v1885_v45 }
 0xe57   :  { %v1836_v63 = vpop.f32.mrf.mxu1 }
 0xe58   :  { %v1837_v18 = vadd.f32 %v5054_v1, %v1836_v63  ;;  %v5088_v63 = vld [vmem:[#allocation2 + $0x28] sm:$0xff] }
 0xe5a   :  { %v1886_v43 = vmul.f32 0.01, %v1837_v18  ;;  %vm1870_vm8 = vcmp.ge.f32.partialorder %v1837_v18, 0.0 }
 0xe5c   :  { %v1902_v49 = vsel %vm1870_vm8, %v1837_v18, %v1886_v43 }
 0xe5f   :  { %v1839_v3 = vpop.f32.mrf.mxu1 }
 0xe60   :  { %v1840_v32 = vadd.f32 %v5054_v1, %v1839_v3  ;;  %v5091_v3 = vld [vmem:[#allocation2 + $0x30] sm:$0xff] }
 0xe62   :  { %v1887_v37 = vmul.f32 0.01, %v1840_v32  ;;  %vm1871_vm7 = vcmp.ge.f32.partialorder %v1840_v32, 0.0 }
 0xe64   :  { %v1903_v35 = vsel %vm1871_vm7, %v1840_v32, %v1887_v37 }
 0xe67   :  { %v1842_v11 = vpop.f32.mrf.mxu1 }
 0xe68   :  { %v1843_v38 = vadd.f32 %v5054_v1, %v1842_v11  ;;  %v5095_v11 = vld [vmem:[#allocation2 + $0x40] sm:$0xff] }
 0xe6a   :  { %v1888_v30 = vmul.f32 0.01, %v1843_v38  ;;  %vm1872_vm6 = vcmp.ge.f32.partialorder %v1843_v38, 0.0 }
 0xe6c   :  { %v1904_v47 = vsel %vm1872_vm6, %v1843_v38, %v1888_v30  ;;  %v5113_v38 = vld [vmem:[#allocation2 + $0x70] sm:$0xff] }
 0xe6f   :  { %v1845_v12 = vpop.f32.mrf.mxu1 }
 0xe70   :  { %v1846_v24 = vadd.f32 %v5054_v1, %v1845_v12  ;;  %v1927_v12 = vld [vmem:[#allocation7 + $0x4f8] sm:$0xff] }
 0xe71   :  { %1998 = vmatpush.msrb.mxu3 %v1927_v12 }
 0xe72   :  { %v1889_v28 = vmul.f32 0.01, %v1846_v24  ;;  %vm1873_vm5 = vcmp.ge.f32.partialorder %v1846_v24, 0.0 }
 0xe74   :  { %v1905_v26 = vsel %vm1873_vm5, %v1846_v24, %v1889_v28  ;;  %v5107_v24 = vld [vmem:[#allocation2 + $0x60] sm:$0xff] }
 0xe77   :  { %v1848_v10 = vpop.f32.mrf.mxu1 }
 0xe78   :  { %v1849_v16 = vadd.f32 %v5054_v1, %v1848_v10  ;;  %v5098_v10 = vld [vmem:[#allocation2 + $0x48] sm:$0xff] }
 0xe7a   :  { %v1890_v31 = vmul.f32 0.01, %v1849_v16  ;;  %vm1874_vm4 = vcmp.ge.f32.partialorder %v1849_v16, 0.0 }
 0xe7c   :  { %v1906_v29 = vsel %vm1874_vm4, %v1849_v16, %v1890_v31  ;;  %v1915_v16 = vld [vmem:[#allocation7 + $0x498] sm:$0xff] }
 0xe7f   :  { %v1851_v40 = vpop.f32.mrf.mxu1 }
 0xe80   :  { %v1852_v14 = vadd.f32 %v5054_v1, %v1851_v40  ;;  %v1925_v40 = vld [vmem:[#allocation7 + $0x4e8] sm:$0xff] }
 0xe82   :  { %v1891_v21 = vmul.f32 0.01, %v1852_v14  ;;  %vm1875_vm3 = vcmp.ge.f32.partialorder %v1852_v14, 0.0 }
 0xe84   :  { %v1907_v23 = vsel %vm1875_vm3, %v1852_v14, %v1891_v21  ;;  %v5104_v14 = vld [vmem:[#allocation2 + $0x58] sm:$0xff]  ;;  %v5110_v21 = vld [vmem:[#allocation2 + $0x68] sm:$0xff] }
 0xe87   :  { %v1854_v9 = vpop.f32.mrf.mxu1 }
 0xe88   :  { %v1855_v0 = vadd.f32 %v5054_v1, %v1854_v9  ;;  %v1924_v9 = vld [vmem:[#allocation7 + $0x4e0] sm:$0xff] }
 0xe8a   :  { %v1892_v20 = vmul.f32 0.01, %v1855_v0  ;;  %vm1876_vm2 = vcmp.ge.f32.partialorder %v1855_v0, 0.0 }
 0xe8c   :  { %v1908_v2 = vsel %vm1876_vm2, %v1855_v0, %v1892_v20  ;;  %v1919_v0 = vld [vmem:[#allocation7 + $0x4b8] sm:$0xff]  ;;  %v1913_v20 = vld [vmem:[#allocation7 + $0x488] sm:$0xff] }
 0xe8f   :  { %v1857_v6 = vpop.f32.mrf.mxu1 }
 0xe90   :  { %v1858_v25 = vadd.f32 %v5054_v1, %v1857_v6  ;;  %v1923_v6 = vld [vmem:[#allocation7 + $0x4d8] sm:$0xff] }
 0xe92   :  { %v1893_v22 = vmul.f32 0.01, %v1858_v25  ;;  %vm1877_vm1 = vcmp.ge.f32.partialorder %v1858_v25, 0.0 }
 0xe94   :  { %v1909_v33 = vsel %vm1877_vm1, %v1858_v25, %v1893_v22  ;;  %v1921_v25 = vld [vmem:[#allocation7 + $0x4c8] sm:$0xff]  ;;  %v1916_v22 = vld [vmem:[#allocation7 + $0x4a0] sm:$0xff] }
 0xe97   :  { %v1860_v5 = vpop.f32.mrf.mxu1 }
 0xe98   :  { %v1861_v15 = vadd.f32 %v5054_v1, %v1860_v5  ;;  %v1922_v1 = vld [vmem:[#allocation7 + $0x4d0] sm:$0xff]  ;;  %v1920_v5 = vld [vmem:[#allocation7 + $0x4c0] sm:$0xff] }
 0xe9a   :  { %v1894_v8 = vmul.f32 0.01, %v1861_v15  ;;  %vm1878_vm0 = vcmp.ge.f32.partialorder %v1861_v15, 0.0 }
 0xe9c   :  { %v1910_v4 = vsel %vm1878_vm0, %v1861_v15, %v1894_v8  ;;  %v1918_v15 = vld [vmem:[#allocation7 + $0x4b0] sm:$0xff]  ;;  %v1917_v8 = vld [vmem:[#allocation7 + $0x4a8] sm:$0xff] }
 0xe9d   :  { %1930 = vmatpush.msrb.mxu2 %v1910_v4  ;;  %v1914_v4 = vld [vmem:[#allocation7 + $0x490] sm:$0xff] }
 0xe9f   :  { %1931 = vmatpush.msrb.mxu2 %v1909_v33  ;;  %v1912_v33 = vld [vmem:[#allocation7 + $0x480] sm:$0xff] }
 0xea1   :  { %1932 = vmatpush.msrb.mxu2 %v1908_v2  ;;  %v5116_v2 = vld [vmem:[#allocation2 + $0x78] sm:$0xff] }
 0xea3   :  { %1933 = vmatpush.msrb.mxu2 %v1907_v23 }
 0xea5   :  { %1934 = vmatpush.msrb.mxu2 %v1906_v29 }
 0xea7   :  { %1935 = vmatpush.msrb.mxu2 %v1905_v26 }
 0xea9   :  { %1936 = vmatpush.msrb.mxu2 %v1904_v47 }
 0xeab   :  { %1937 = vmatpush.msrb.mxu2 %v1903_v35 }
 0xead   :  { %1938 = vmatpush.msrb.mxu2 %v1902_v49 }
 0xeaf   :  { %1939 = vmatpush.msrb.mxu2 %v1901_v27 }
 0xeb1   :  { %1940 = vmatpush.msrb.mxu2 %v1900_v19 }
 0xeb3   :  { %1941 = vmatpush.msrb.mxu2 %v1899_v41 }
 0xeb5   :  { %1942 = vmatpush.msrb.mxu2 %v1898_v55 }
 0xeb7   :  { %1943 = vmatpush.msrb.mxu2 %v1897_v56 }
 0xeb9   :  { %1944 = vmatpush.msrb.mxu2 %v1896_v57 }
 0xebb   :  { %1945 = vmatpush.msrb.mxu2 %v1895_v59 }
 0xebc   :  { %1946 = vmatmul.f32.vlgmr.msrb.gmra.mxu2 %v5075_v60 }
 0xec4   :  { %1949 = vmatmul.f32.gmra.mxu2 %v5078_v52 }
 0xecc   :  { %1952 = vmatmul.f32.gmra.mxu2 %v5081_v61 }
 0xed4   :  { %1955 = vmatmul.f32.gmra.mxu2 %v4988_v13  ;;  %v1926_v13 = vld [vmem:[#allocation7 + $0x4f0] sm:$0xff] }
 0xed5   :  { %1999 = vmatpush.msrb.mxu3 %v1926_v13 }
 0xed7   :  { %2000 = vmatpush.msrb.mxu3 %v1925_v40 }
 0xed9   :  { %2001 = vmatpush.msrb.mxu3 %v1924_v9 }
 0xedb   :  { %2002 = vmatpush.msrb.mxu3 %v1923_v6 }
 0xedc   :  { %1958 = vmatmul.f32.gmra.mxu2 %v5085_v7 }
 0xedd   :  { %2003 = vmatpush.msrb.mxu3 %v1922_v1 }
 0xedf   :  { %2004 = vmatpush.msrb.mxu3 %v1921_v25 }
 0xee1   :  { %2005 = vmatpush.msrb.mxu3 %v1920_v5 }
 0xee3   :  { %2006 = vmatpush.msrb.mxu3 %v1919_v0 }
 0xee4   :  { %1961 = vmatmul.f32.gmra.mxu2 %v5088_v63 }
 0xee5   :  { %2007 = vmatpush.msrb.mxu3 %v1918_v15 }
 0xee7   :  { %2008 = vmatpush.msrb.mxu3 %v1917_v8 }
 0xee9   :  { %2009 = vmatpush.msrb.mxu3 %v1916_v22 }
 0xeeb   :  { %2010 = vmatpush.msrb.mxu3 %v1915_v16 }
 0xeec   :  { %1964 = vmatmul.f32.gmra.mxu2 %v5091_v3 }
 0xeed   :  { %2011 = vmatpush.msrb.mxu3 %v1914_v4 }
 0xeef   :  { %2012 = vmatpush.msrb.mxu3 %v1913_v20 }
 0xef1   :  { %2013 = vmatpush.msrb.mxu3 %v1912_v33 }
 0xef4   :  { %1967 = vmatmul.f32.gmra.mxu2 %v4994_v17  ;;  %v5101_v17 = vld [vmem:[#allocation2 + $0x50] sm:$0xff] }
 0xefc   :  { %1970 = vmatmul.f32.gmra.mxu2 %v5095_v11 }
 0xf04   :  { %1973 = vmatmul.f32.gmra.mxu2 %v5098_v10 }
 0xf0c   :  { %1976 = vmatmul.f32.gmra.mxu2 %v5101_v17 }
 0xf14   :  { %1979 = vmatmul.f32.gmra.mxu2 %v5104_v14 }
 0xf1c   :  { %1982 = vmatmul.f32.gmra.mxu2 %v5107_v24 }
 0xf24   :  { %1985 = vmatmul.f32.gmra.mxu2 %v5110_v21 }
 0xf2c   :  { %1988 = vmatmul.f32.gmra.mxu2 %v5113_v38 }
 0xf34   :  { %1991 = vmatmul.f32.gmra.mxu2 %v5116_v2 }
 0xf3f   :  { %v1947_v31 = vpop.f32.mrf.mxu2 }
 0xf40   :  { %2014 = vmatmul.f32.vlgmr.msrb.gmra.mxu3 %v1947_v31 }
 0xf47   :  { %v1950_v32 = vpop.f32.mrf.mxu2 }
 0xf48   :  { %2017 = vmatmul.f32.gmra.mxu3 %v1950_v32 }
 0xf4f   :  { %v1953_v23 = vpop.f32.mrf.mxu2 }
 0xf50   :  { %2020 = vmatmul.f32.gmra.mxu3 %v1953_v23 }
 0xf57   :  { %v1956_v28 = vpop.f32.mrf.mxu2 }
 0xf58   :  { %2023 = vmatmul.f32.gmra.mxu3 %v1956_v28 }
 0xf5f   :  { %v1959_v18 = vpop.f32.mrf.mxu2 }
 0xf60   :  { %2026 = vmatmul.f32.gmra.mxu3 %v1959_v18 }
 0xf67   :  { %v1962_v29 = vpop.f32.mrf.mxu2 }
 0xf68   :  { %2029 = vmatmul.f32.gmra.mxu3 %v1962_v29 }
 0xf6f   :  { %v1965_v30 = vpop.f32.mrf.mxu2 }
 0xf70   :  { %2032 = vmatmul.f32.gmra.mxu3 %v1965_v30 }
 0xf77   :  { %v1968_v36 = vpop.f32.mrf.mxu2 }
 0xf78   :  { %2035 = vmatmul.f32.gmra.mxu3 %v1968_v36 }
 0xf7f   :  { %v1971_v26 = vpop.f32.mrf.mxu2 }
 0xf80   :  { %2038 = vmatmul.f32.gmra.mxu3 %v1971_v26 }
 0xf87   :  { %v1974_v37 = vpop.f32.mrf.mxu2 }
 0xf88   :  { %2041 = vmatmul.f32.gmra.mxu3 %v1974_v37 }
 0xf8f   :  { %v1977_v44 = vpop.f32.mrf.mxu2 }
 0xf90   :  { %2044 = vmatmul.f32.gmra.mxu3 %v1977_v44 }
 0xf97   :  { %v1980_v47 = vpop.f32.mrf.mxu2 }
 0xf98   :  { %2047 = vmatmul.f32.gmra.mxu3 %v1980_v47 }
 0xf9f   :  { %v1983_v43 = vpop.f32.mrf.mxu2 }
 0xfa0   :  { %2050 = vmatmul.f32.gmra.mxu3 %v1983_v43 }
 0xfa7   :  { %v1986_v54 = vpop.f32.mrf.mxu2 }
 0xfa8   :  { %2053 = vmatmul.f32.gmra.mxu3 %v1986_v54 }
 0xfaf   :  { %v1989_v35 = vpop.f32.mrf.mxu2 }
 0xfb0   :  { %2056 = vmatmul.f32.gmra.mxu3 %v1989_v35 }
 0xfb7   :  { %v1992_v45 = vpop.f32.mrf.mxu2 }
 0xfb8   :  { %2059 = vmatmul.f32.gmra.mxu3 %v1992_v45 }
 0xfc3   :  { %v5119_v48 = vpop.f32.mrf.mxu3 }
 0xfcb   :  { %v5121_v49 = vpop.f32.mrf.mxu3 }
 0xfd3   :  { %v5123_v51 = vpop.f32.mrf.mxu3 }
 0xfdb   :  { %v2024_v42 = vpop.f32.mrf.mxu3 }
 0xfdc   :  { %v2025_v54 = vadd.f32 %v5125_v58, %v2024_v42  ;;  %v2016_v42 = vadd.f32 %v5125_v58, %v5119_v48  ;;  %v5149_v48 = vld [vmem:[#allocation2 + $0x18] sm:$0xff] }
 0xfde   :  { %vm2066_vm12 = vcmp.ge.f32.partialorder %v2025_v54, 0.0  ;;  %vm2063_vm15 = vcmp.ge.f32.partialorder %v2016_v42, 0.0 }
 0xfe3   :  { %v2027_v27 = vpop.f32.mrf.mxu3 }
 0xfe4   :  { %v2028_v44 = vadd.f32 %v5125_v58, %v2027_v27  ;;  %v2019_v27 = vadd.f32 %v5125_v58, %v5121_v49 }
 0xfe6   :  { %vm2067_vm11 = vcmp.ge.f32.partialorder %v2028_v44, 0.0  ;;  %vm2064_vm14 = vcmp.ge.f32.partialorder %v2019_v27, 0.0 }
 0xfeb   :  { %v2030_v50 = vpop.f32.mrf.mxu3 }
 0xfec   :  { %v2031_v36 = vadd.f32 %v5125_v58, %v2030_v50 }
 0xfee   :  { %v2084_v45 = vmul.f32 0.01, %v2031_v36  ;;  %vm2068_vm10 = vcmp.ge.f32.partialorder %v2031_v36, 0.0 }
 0xff3   :  { %v2033_v62 = vpop.f32.mrf.mxu3 }
 0xff4   :  { %v2034_v18 = vadd.f32 %v5125_v58, %v2033_v62  ;;  %v2022_v62 = vadd.f32 %v5125_v58, %v5123_v51  ;;  %v2080_v51 = vmul.f32 0.01, %v2019_v27 }
 0xff6   :  { %v2085_v43 = vmul.f32 0.01, %v2034_v18  ;;  %vm2069_vm9 = vcmp.ge.f32.partialorder %v2034_v18, 0.0  ;;  %vm2065_vm13 = vcmp.ge.f32.partialorder %v2022_v62, 0.0  ;;  %v2096_v49 = vsel %vm2064_vm14, %v2019_v27, %v2080_v51 }
 0xff8   :  { %v2101_v50 = vsel %vm2069_vm9, %v2034_v18, %v2085_v43 }
 0xffb   :  { %v2036_v19 = vpop.f32.mrf.mxu3 }
 0xffc   :  { %v2037_v32 = vadd.f32 %v5125_v58, %v2036_v19  ;;  %v2083_v19 = vmul.f32 0.01, %v2028_v44 }
 0xffe   :  { %v2086_v37 = vmul.f32 0.01, %v2037_v32  ;;  %vm2070_vm8 = vcmp.ge.f32.partialorder %v2037_v32, 0.0 }
0x1000   :  { %v2102_v35 = vsel %vm2070_vm8, %v2037_v32, %v2086_v37 }
0x1003   :  { %v2039_v39 = vpop.f32.mrf.mxu3 }
0x1004   :  { %v2040_v20 = vadd.f32 %v5125_v58, %v2039_v39  ;;  %v2100_v39 = vsel %vm2068_vm10, %v2031_v36, %v2084_v45 }
0x1006   :  { %v2087_v30 = vmul.f32 0.01, %v2040_v20  ;;  %vm2071_vm7 = vcmp.ge.f32.partialorder %v2040_v20, 0.0 }
0x1008   :  { %v2103_v47 = vsel %vm2071_vm7, %v2040_v20, %v2087_v30  ;;  %v2112_v20 = vld [vmem:[#allocation7 + $0x500] sm:$0xff] }
0x100b   :  { %v2042_v34 = vpop.f32.mrf.mxu3 }
0x100c   :  { %v2043_v22 = vadd.f32 %v5125_v58, %v2042_v34  ;;  %v2082_v34 = vmul.f32 0.01, %v2025_v54 }
0x100e   :  { %v2088_v28 = vmul.f32 0.01, %v2043_v22  ;;  %vm2072_vm6 = vcmp.ge.f32.partialorder %v2043_v22, 0.0 }
0x1010   :  { %v2104_v26 = vsel %vm2072_vm6, %v2043_v22, %v2088_v28  ;;  %v2115_v22 = vld [vmem:[#allocation7 + $0x518] sm:$0xff] }
0x1013   :  { %v2045_v41 = vpop.f32.mrf.mxu3 }
0x1014   :  { %v2046_v0 = vadd.f32 %v5125_v58, %v2045_v41  ;;  %v2099_v41 = vsel %vm2067_vm11, %v2028_v44, %v2083_v19 }
0x1016   :  { %v2089_v31 = vmul.f32 0.01, %v2046_v0  ;;  %vm2073_vm5 = vcmp.ge.f32.partialorder %v2046_v0, 0.0 }
0x1018   :  { %v2105_v29 = vsel %vm2073_vm5, %v2046_v0, %v2089_v31  ;;  %v2118_v0 = vld [vmem:[#allocation7 + $0x530] sm:$0xff] }
0x101b   :  { %v2048_v46 = vpop.f32.mrf.mxu3 }
0x101c   :  { %v2049_v1 = vadd.f32 %v5125_v58, %v2048_v46  ;;  %v2081_v46 = vmul.f32 0.01, %v2022_v62 }
0x101e   :  { %v2090_v4 = vmul.f32 0.01, %v2049_v1  ;;  %vm2074_vm4 = vcmp.ge.f32.partialorder %v2049_v1, 0.0 }
0x1020   :  { %v2106_v23 = vsel %vm2074_vm4, %v2049_v1, %v2090_v4  ;;  %v2121_v1 = vld [vmem:[#allocation7 + $0x548] sm:$0xff] }
0x1021   :  { %v2113_v4 = vld [vmem:[#allocation7 + $0x508] sm:$0xff] }
0x1023   :  { %v2051_v55 = vpop.f32.mrf.mxu3 }
0x1024   :  { %v2052_v40 = vadd.f32 %v5125_v58, %v2051_v55  ;;  %v2098_v55 = vsel %vm2066_vm12, %v2025_v54, %v2082_v34 }
0x1026   :  { %v2091_v8 = vmul.f32 0.01, %v2052_v40  ;;  %vm2075_vm3 = vcmp.ge.f32.partialorder %v2052_v40, 0.0 }
0x1028   :  { %v2107_v33 = vsel %vm2075_vm3, %v2052_v40, %v2091_v8  ;;  %v2124_v40 = vld [vmem:[#allocation7 + $0x560] sm:$0xff] }
0x1029   :  { %v2116_v8 = vld [vmem:[#allocation7 + $0x520] sm:$0xff] }
0x102b   :  { %v2054_v53 = vpop.f32.mrf.mxu3 }
0x102c   :  { %v2055_v12 = vadd.f32 %v5125_v58, %v2054_v53  ;;  %v2097_v53 = vsel %vm2065_vm13, %v2022_v62, %v2081_v46 }
0x102e   :  { %v2092_v5 = vmul.f32 0.01, %v2055_v12  ;;  %vm2076_vm2 = vcmp.ge.f32.partialorder %v2055_v12, 0.0 }
0x1030   :  { %v2108_v16 = vsel %vm2076_vm2, %v2055_v12, %v2092_v5  ;;  %v2126_v12 = vld [vmem:[#allocation7 + $0x570] sm:$0xff]  ;;  %v2119_v5 = vld [vmem:[#allocation7 + $0x538] sm:$0xff] }
0x1033   :  { %v2057_v56 = vpop.f32.mrf.mxu3 }
0x1034   :  { %v2058_v57 = vadd.f32 %v5125_v58, %v2057_v56  ;;  %v2079_v56 = vmul.f32 0.01, %v2016_v42 }
0x1036   :  { %v2093_v6 = vmul.f32 0.01, %v2058_v57  ;;  %vm2077_vm1 = vcmp.ge.f32.partialorder %v2058_v57, 0.0 }
0x1038   :  { %v2109_v15 = vsel %vm2077_vm1, %v2058_v57, %v2093_v6  ;;  %v2095_v57 = vsel %vm2063_vm15, %v2016_v42, %v2079_v56  ;;  %v2122_v6 = vld [vmem:[#allocation7 + $0x550] sm:$0xff] }
0x103b   :  { %v2060_v59 = vpop.f32.mrf.mxu3 }
0x103c   :  { %v2061_v13 = vadd.f32 %v5125_v58, %v2060_v59  ;;  %v5155_v58 = vld [vmem:[#allocation2 + $0x38] sm:$0xff] }
0x103d   :  { %v2127_v59 = vld [vmem:[#allocation7 + $0x578] sm:$0xff] }
0x103e   :  { %v2094_v9 = vmul.f32 0.01, %v2061_v13  ;;  %vm2078_vm0 = vcmp.ge.f32.partialorder %v2061_v13, 0.0  ;;  %2198 = vmatpush.msra.mxu1 %v2127_v59 }
0x1040   :  { %v2110_v25 = vsel %vm2078_vm0, %v2061_v13, %v2094_v9  ;;  %v2125_v13 = vld [vmem:[#allocation7 + $0x568] sm:$0xff]  ;;  %2199 = vmatpush.msra.mxu1 %v2126_v12  ;;  %v2123_v9 = vld [vmem:[#allocation7 + $0x558] sm:$0xff] }
0x1041   :  { %2130 = vmatpush.msrb.mxu0 %v2110_v25  ;;  %v2120_v25 = vld [vmem:[#allocation7 + $0x540] sm:$0xff] }
0x1042   :  { %2200 = vmatpush.msra.mxu1 %v2125_v13 }
0x1043   :  { %2131 = vmatpush.msrb.mxu0 %v2109_v15  ;;  %v2117_v15 = vld [vmem:[#allocation7 + $0x528] sm:$0xff] }
0x1044   :  { %2201 = vmatpush.msra.mxu1 %v2124_v40 }
0x1045   :  { %2132 = vmatpush.msrb.mxu0 %v2108_v16  ;;  %v2114_v16 = vld [vmem:[#allocation7 + $0x510] sm:$0xff] }
0x1046   :  { %2202 = vmatpush.msra.mxu1 %v2123_v9 }
0x1047   :  { %2133 = vmatpush.msrb.mxu0 %v2107_v33 }
0x1048   :  { %2203 = vmatpush.msra.mxu1 %v2122_v6 }
0x1049   :  { %2134 = vmatpush.msrb.mxu0 %v2106_v23 }
0x104a   :  { %2204 = vmatpush.msra.mxu1 %v2121_v1 }
0x104b   :  { %2135 = vmatpush.msrb.mxu0 %v2105_v29 }
0x104c   :  { %2205 = vmatpush.msra.mxu1 %v2120_v25 }
0x104d   :  { %2136 = vmatpush.msrb.mxu0 %v2104_v26 }
0x104e   :  { %2206 = vmatpush.msra.mxu1 %v2119_v5 }
0x104f   :  { %2137 = vmatpush.msrb.mxu0 %v2103_v47 }
0x1050   :  { %2207 = vmatpush.msra.mxu1 %v2118_v0 }
0x1051   :  { %2138 = vmatpush.msrb.mxu0 %v2102_v35 }
0x1052   :  { %2208 = vmatpush.msra.mxu1 %v2117_v15 }
0x1053   :  { %2139 = vmatpush.msrb.mxu0 %v2101_v50 }
0x1054   :  { %2209 = vmatpush.msra.mxu1 %v2116_v8 }
0x1055   :  { %2140 = vmatpush.msrb.mxu0 %v2100_v39 }
0x1056   :  { %2210 = vmatpush.msra.mxu1 %v2115_v22 }
0x1057   :  { %2141 = vmatpush.msrb.mxu0 %v2099_v41 }
0x1058   :  { %2211 = vmatpush.msra.mxu1 %v2114_v16 }
0x1059   :  { %2142 = vmatpush.msrb.mxu0 %v2098_v55 }
0x105a   :  { %2212 = vmatpush.msra.mxu1 %v2113_v4 }
0x105b   :  { %2143 = vmatpush.msrb.mxu0 %v2097_v53 }
0x105c   :  { %2213 = vmatpush.msra.mxu1 %v2112_v20 }
0x105d   :  { %2144 = vmatpush.msrb.mxu0 %v2096_v49 }
0x105f   :  { %2145 = vmatpush.msrb.mxu0 %v2095_v57  ;;  %v5172_v57 = vld [vmem:[#allocation8 + $0xa] ss:$0 sm:$0xff] }
0x1060   :  { %2146 = vmatmul.f32.vlgmr.msrb.gmra.mxu0 %v5075_v60 }
0x1068   :  { %2149 = vmatmul.f32.gmra.mxu0 %v5078_v52 }
0x1070   :  { %2152 = vmatmul.f32.gmra.mxu0 %v5081_v61 }
0x1078   :  { %2155 = vmatmul.f32.gmra.mxu0 %v5149_v48 }
0x1080   :  { %2158 = vmatmul.f32.gmra.mxu0 %v5085_v7 }
0x1088   :  { %2161 = vmatmul.f32.gmra.mxu0 %v5088_v63 }
0x1090   :  { %2164 = vmatmul.f32.gmra.mxu0 %v5091_v3 }
0x1098   :  { %2167 = vmatmul.f32.gmra.mxu0 %v5155_v58 }
0x10a0   :  { %2170 = vmatmul.f32.gmra.mxu0 %v5095_v11 }
0x10a8   :  { %2173 = vmatmul.f32.gmra.mxu0 %v5098_v10 }
0x10b0   :  { %2176 = vmatmul.f32.gmra.mxu0 %v5101_v17 }
0x10b8   :  { %2179 = vmatmul.f32.gmra.mxu0 %v5104_v14 }
0x10c0   :  { %2182 = vmatmul.f32.gmra.mxu0 %v5107_v24 }
0x10c8   :  { %2185 = vmatmul.f32.gmra.mxu0 %v5110_v21 }
0x10d0   :  { %2188 = vmatmul.f32.gmra.mxu0 %v5113_v38 }
0x10d8   :  { %2191 = vmatmul.f32.gmra.mxu0 %v5116_v2 }
0x10dd   :  { %v2147_v33 = vpop.f32.mrf.mxu0 }
0x10de   :  { %2214 = vmatmul.f32.vlgmr.msra.gmra.mxu1 %v2147_v33 }
0x10e5   :  { %v2150_v31 = vpop.f32.mrf.mxu0 }
0x10e6   :  { %2217 = vmatmul.f32.gmra.mxu1 %v2150_v31 }
0x10ed   :  { %v2153_v32 = vpop.f32.mrf.mxu0 }
0x10ee   :  { %2220 = vmatmul.f32.gmra.mxu1 %v2153_v32 }
0x10f5   :  { %v2156_v23 = vpop.f32.mrf.mxu0 }
0x10f6   :  { %2223 = vmatmul.f32.gmra.mxu1 %v2156_v23 }
0x10fd   :  { %v2159_v28 = vpop.f32.mrf.mxu0 }
0x10fe   :  { %2226 = vmatmul.f32.gmra.mxu1 %v2159_v28 }
0x1105   :  { %v2162_v18 = vpop.f32.mrf.mxu0 }
0x1106   :  { %2229 = vmatmul.f32.gmra.mxu1 %v2162_v18 }
0x110d   :  { %v2165_v29 = vpop.f32.mrf.mxu0 }
0x110e   :  { %2232 = vmatmul.f32.gmra.mxu1 %v2165_v29 }
0x1115   :  { %v2168_v30 = vpop.f32.mrf.mxu0 }
0x1116   :  { %2235 = vmatmul.f32.gmra.mxu1 %v2168_v30 }
0x111d   :  { %v2171_v36 = vpop.f32.mrf.mxu0 }
0x111e   :  { %2238 = vmatmul.f32.gmra.mxu1 %v2171_v36 }
0x1125   :  { %v2174_v26 = vpop.f32.mrf.mxu0 }
0x1126   :  { %2241 = vmatmul.f32.gmra.mxu1 %v2174_v26 }
0x112d   :  { %v2177_v37 = vpop.f32.mrf.mxu0 }
0x112e   :  { %2244 = vmatmul.f32.gmra.mxu1 %v2177_v37 }
0x1135   :  { %v2180_v44 = vpop.f32.mrf.mxu0 }
0x1136   :  { %2247 = vmatmul.f32.gmra.mxu1 %v2180_v44 }
0x113d   :  { %v2183_v47 = vpop.f32.mrf.mxu0 }
0x113e   :  { %2250 = vmatmul.f32.gmra.mxu1 %v2183_v47 }
0x1145   :  { %v2186_v43 = vpop.f32.mrf.mxu0 }
0x1146   :  { %2253 = vmatmul.f32.gmra.mxu1 %v2186_v43 }
0x114d   :  { %v2189_v54 = vpop.f32.mrf.mxu0 }
0x114e   :  { %2256 = vmatmul.f32.gmra.mxu1 %v2189_v54 }
0x1155   :  { %v2192_v35 = vpop.f32.mrf.mxu0 }
0x1156   :  { %2259 = vmatmul.f32.gmra.mxu1 %v2192_v35 }
0x115b   :  { %v5166_v45 = vpop.f32.mrf.mxu1 }
0x1163   :  { %v5168_v62 = vpop.f32.mrf.mxu1 }
0x116b   :  { %v5170_v50 = vpop.f32.mrf.mxu1 }
0x1173   :  { %v2224_v19 = vpop.f32.mrf.mxu1 }
0x1174   :  { %v2225_v35 = vadd.f32 %v5172_v57, %v2224_v19  ;;  %v2216_v19 = vadd.f32 %v5172_v57, %v5166_v45  ;;  %v2327_v45 = vld [vmem:[#allocation7 + $0x5f8] sm:$0xff] }
0x1175   :  { %2398 = vmatpush.msra.mxu3 %v2327_v45 }
0x1176   :  { %vm2266_vm12 = vcmp.ge.f32.partialorder %v2225_v35, 0.0  ;;  %vm2263_vm15 = vcmp.ge.f32.partialorder %v2216_v19, 0.0 }
0x117b   :  { %v2227_v27 = vpop.f32.mrf.mxu1 }
0x117c   :  { %v2228_v47 = vadd.f32 %v5172_v57, %v2227_v27  ;;  %v2219_v27 = vadd.f32 %v5172_v57, %v5168_v62 }
0x117e   :  { %vm2267_vm11 = vcmp.ge.f32.partialorder %v2228_v47, 0.0  ;;  %vm2264_vm14 = vcmp.ge.f32.partialorder %v2219_v27, 0.0 }
0x1183   :  { %v2230_v39 = vpop.f32.mrf.mxu1 }
0x1184   :  { %v2231_v26 = vadd.f32 %v5172_v57, %v2230_v39 }
0x1186   :  { %vm2268_vm10 = vcmp.ge.f32.partialorder %v2231_v26, 0.0 }
0x118b   :  { %v2233_v34 = vpop.f32.mrf.mxu1 }
0x118c   :  { %v2234_v29 = vadd.f32 %v5172_v57, %v2233_v34  ;;  %v2284_v34 = vmul.f32 0.01, %v2231_v26 }
0x118e   :  { %v2285_v54 = vmul.f32 0.01, %v2234_v29  ;;  %vm2269_vm9 = vcmp.ge.f32.partialorder %v2234_v29, 0.0 }
0x1190   :  { %v2301_v39 = vsel %vm2269_vm9, %v2234_v29, %v2285_v54 }
0x1193   :  { %v2236_v42 = vpop.f32.mrf.mxu1 }
0x1194   :  { %v2237_v23 = vadd.f32 %v5172_v57, %v2236_v42 }
0x1196   :  { %v2286_v44 = vmul.f32 0.01, %v2237_v23  ;;  %vm2270_vm8 = vcmp.ge.f32.partialorder %v2237_v23, 0.0 }
0x1198   :  { %v2302_v42 = vsel %vm2270_vm8, %v2237_v23, %v2286_v44 }
0x119b   :  { %v2239_v41 = vpop.f32.mrf.mxu1 }
0x119c   :  { %v2240_v33 = vadd.f32 %v5172_v57, %v2239_v41  ;;  %v2222_v41 = vadd.f32 %v5172_v57, %v5170_v50  ;;  %v2280_v50 = vmul.f32 0.01, %v2219_v27 }
0x119e   :  { %v2287_v36 = vmul.f32 0.01, %v2240_v33  ;;  %vm2271_vm7 = vcmp.ge.f32.partialorder %v2240_v33, 0.0  ;;  %vm2265_vm13 = vcmp.ge.f32.partialorder %v2222_v41, 0.0  ;;  %v2296_v62 = vsel %vm2264_vm14, %v2219_v27, %v2280_v50 }
0x11a0   :  { %v2303_v43 = vsel %vm2271_vm7, %v2240_v33, %v2287_v36 }
0x11a3   :  { %v2242_v46 = vpop.f32.mrf.mxu1 }
0x11a4   :  { %v2243_v16 = vadd.f32 %v5172_v57, %v2242_v46  ;;  %v2283_v46 = vmul.f32 0.01, %v2228_v47 }
0x11a6   :  { %v2288_v18 = vmul.f32 0.01, %v2243_v16  ;;  %vm2272_vm6 = vcmp.ge.f32.partialorder %v2243_v16, 0.0 }
0x11a8   :  { %v2304_v37 = vsel %vm2272_vm6, %v2243_v16, %v2288_v18 }
0x11ab   :  { %v2245_v55 = vpop.f32.mrf.mxu1 }
0x11ac   :  { %v2246_v15 = vadd.f32 %v5172_v57, %v2245_v55  ;;  %v2300_v55 = vsel %vm2268_vm10, %v2231_v26, %v2284_v34 }
0x11ae   :  { %v2289_v32 = vmul.f32 0.01, %v2246_v15  ;;  %vm2273_vm5 = vcmp.ge.f32.partialorder %v2246_v15, 0.0 }
0x11b0   :  { %v2305_v30 = vsel %vm2273_vm5, %v2246_v15, %v2289_v32 }
0x11b3   :  { %v2248_v51 = vpop.f32.mrf.mxu1 }
0x11b4   :  { %v2249_v25 = vadd.f32 %v5172_v57, %v2248_v51  ;;  %v2282_v51 = vmul.f32 0.01, %v2225_v35 }
0x11b6   :  { %v2290_v20 = vmul.f32 0.01, %v2249_v25  ;;  %vm2274_vm4 = vcmp.ge.f32.partialorder %v2249_v25, 0.0 }
0x11b8   :  { %v2306_v28 = vsel %vm2274_vm4, %v2249_v25, %v2290_v20  ;;  %v2313_v25 = vld [vmem:[#allocation7 + $0x588] sm:$0xff] }
0x11bb   :  { %v2251_v53 = vpop.f32.mrf.mxu1 }
0x11bc   :  { %v2252_v9 = vadd.f32 %v5172_v57, %v2251_v53  ;;  %v2299_v53 = vsel %vm2267_vm11, %v2228_v47, %v2283_v46 }
0x11be   :  { %v2291_v22 = vmul.f32 0.01, %v2252_v9  ;;  %vm2275_vm3 = vcmp.ge.f32.partialorder %v2252_v9, 0.0 }
0x11c0   :  { %v2307_v31 = vsel %vm2275_vm3, %v2252_v9, %v2291_v22  ;;  %v2316_v9 = vld [vmem:[#allocation7 + $0x5a0] sm:$0xff] }
0x11c3   :  { %v2254_v56 = vpop.f32.mrf.mxu1 }
0x11c4   :  { %v2255_v13 = vadd.f32 %v5172_v57, %v2254_v56  ;;  %v2281_v56 = vmul.f32 0.01, %v2222_v41 }
0x11c6   :  { %v2292_v0 = vmul.f32 0.01, %v2255_v13  ;;  %vm2276_vm2 = vcmp.ge.f32.partialorder %v2255_v13, 0.0 }
0x11c8   :  { %v2308_v4 = vsel %vm2276_vm2, %v2255_v13, %v2292_v0 }
0x11cb   :  { %v2257_v49 = vpop.f32.mrf.mxu1 }
0x11cc   :  { %v2258_v59 = vadd.f32 %v5172_v57, %v2257_v49  ;;  %v2298_v49 = vsel %vm2266_vm12, %v2225_v35, %v2282_v51 }
0x11ce   :  { %v2293_v1 = vmul.f32 0.01, %v2258_v59  ;;  %vm2277_vm1 = vcmp.ge.f32.partialorder %v2258_v59, 0.0 }
0x11d0   :  { %v2309_v8 = vsel %vm2277_vm1, %v2258_v59, %v2293_v1  ;;  %v2297_v59 = vsel %vm2265_vm13, %v2222_v41, %v2281_v56  ;;  %v2314_v1 = vld [vmem:[#allocation7 + $0x590] sm:$0xff]  ;;  %v5215_v41 = vld [vmem:[#allocation8 + $0xb] ss:$0 sm:$0xff] }
0x11d3   :  { %v2260_v12 = vpop.f32.mrf.mxu1 }
0x11d4   :  { %v2261_v40 = vadd.f32 %v5172_v57, %v2260_v12  ;;  %v2279_v12 = vmul.f32 0.01, %v2216_v19  ;;  %v2326_v57 = vld [vmem:[#allocation7 + $0x5f0] sm:$0xff] }
0x11d5   :  { %2399 = vmatpush.msra.mxu3 %v2326_v57 }
0x11d6   :  { %v2294_v6 = vmul.f32 0.01, %v2261_v40  ;;  %vm2278_vm0 = vcmp.ge.f32.partialorder %v2261_v40, 0.0  ;;  %v2295_v13 = vsel %vm2263_vm15, %v2216_v19, %v2279_v12 }
0x11d8   :  { %v2310_v5 = vsel %vm2278_vm0, %v2261_v40, %v2294_v6  ;;  %v2318_v40 = vld [vmem:[#allocation7 + $0x5b0] sm:$0xff]  ;;  %v2315_v6 = vld [vmem:[#allocation7 + $0x598] sm:$0xff] }
0x11d9   :  { %2330 = vmatpush.msra.mxu2 %v2310_v5 }
0x11db   :  { %2331 = vmatpush.msra.mxu2 %v2309_v8 }
0x11dd   :  { %2332 = vmatpush.msra.mxu2 %v2308_v4 }
0x11df   :  { %2333 = vmatpush.msra.mxu2 %v2307_v31 }
0x11e1   :  { %2334 = vmatpush.msra.mxu2 %v2306_v28 }
0x11e3   :  { %2335 = vmatpush.msra.mxu2 %v2305_v30 }
0x11e5   :  { %2336 = vmatpush.msra.mxu2 %v2304_v37 }
0x11e7   :  { %2337 = vmatpush.msra.mxu2 %v2303_v43 }
0x11e9   :  { %2338 = vmatpush.msra.mxu2 %v2302_v42 }
0x11eb   :  { %2339 = vmatpush.msra.mxu2 %v2301_v39 }
0x11ed   :  { %2340 = vmatpush.msra.mxu2 %v2300_v55 }
0x11ef   :  { %2341 = vmatpush.msra.mxu2 %v2299_v53 }
0x11f1   :  { %2342 = vmatpush.msra.mxu2 %v2298_v49 }
0x11f3   :  { %2343 = vmatpush.msra.mxu2 %v2297_v59 }
0x11f5   :  { %2344 = vmatpush.msra.mxu2 %v2296_v62 }
0x11f7   :  { %2345 = vmatpush.msra.mxu2 %v2295_v13 }
0x11f8   :  { %2346 = vmatmul.f32.vlgmr.msra.gmra.mxu2 %v5075_v60  ;;  %v2325_v60 = vld [vmem:[#allocation7 + $0x5e8] sm:$0xff] }
0x11f9   :  { %2400 = vmatpush.msra.mxu3 %v2325_v60 }
0x1200   :  { %2349 = vmatmul.f32.gmra.mxu2 %v5078_v52  ;;  %v2324_v52 = vld [vmem:[#allocation7 + $0x5e0] sm:$0xff] }
0x1201   :  { %2401 = vmatpush.msra.mxu3 %v2324_v52 }
0x1208   :  { %2352 = vmatmul.f32.gmra.mxu2 %v5081_v61  ;;  %v2323_v61 = vld [vmem:[#allocation7 + $0x5d8] sm:$0xff] }
0x1209   :  { %2402 = vmatpush.msra.mxu3 %v2323_v61 }
0x1210   :  { %2355 = vmatmul.f32.gmra.mxu2 %v5149_v48 }
0x1218   :  { %2358 = vmatmul.f32.gmra.mxu2 %v5085_v7  ;;  %v2322_v7 = vld [vmem:[#allocation7 + $0x5d0] sm:$0xff] }
0x1219   :  { %2403 = vmatpush.msra.mxu3 %v2322_v7 }
0x1220   :  { %2361 = vmatmul.f32.gmra.mxu2 %v5088_v63  ;;  %v2321_v63 = vld [vmem:[#allocation7 + $0x5c8] sm:$0xff] }
0x1221   :  { %2404 = vmatpush.msra.mxu3 %v2321_v63 }
0x1228   :  { %2364 = vmatmul.f32.gmra.mxu2 %v5091_v3  ;;  %v2320_v3 = vld [vmem:[#allocation7 + $0x5c0] sm:$0xff] }
0x1229   :  { %2405 = vmatpush.msra.mxu3 %v2320_v3 }
0x1230   :  { %2367 = vmatmul.f32.gmra.mxu2 %v5155_v58 }
0x1238   :  { %2370 = vmatmul.f32.gmra.mxu2 %v5095_v11  ;;  %v2319_v11 = vld [vmem:[#allocation7 + $0x5b8] sm:$0xff] }
0x1239   :  { %2406 = vmatpush.msra.mxu3 %v2319_v11 }
0x123b   :  { %2407 = vmatpush.msra.mxu3 %v2318_v40 }
0x1240   :  { %2373 = vmatmul.f32.gmra.mxu2 %v5098_v10  ;;  %v2317_v10 = vld [vmem:[#allocation7 + $0x5a8] sm:$0xff] }
0x1241   :  { %2408 = vmatpush.msra.mxu3 %v2317_v10 }
0x1243   :  { %2409 = vmatpush.msra.mxu3 %v2316_v9 }
0x1245   :  { %2410 = vmatpush.msra.mxu3 %v2315_v6 }
0x1247   :  { %2411 = vmatpush.msra.mxu3 %v2314_v1 }
0x1248   :  { %2376 = vmatmul.f32.gmra.mxu2 %v5101_v17  ;;  %v2312_v17 = vld [vmem:[#allocation7 + $0x580] sm:$0xff] }
0x1249   :  { %2412 = vmatpush.msra.mxu3 %v2313_v25 }
0x124b   :  { %2413 = vmatpush.msra.mxu3 %v2312_v17 }
0x1250   :  { %2379 = vmatmul.f32.gmra.mxu2 %v5104_v14 }
0x1258   :  { %2382 = vmatmul.f32.gmra.mxu2 %v5107_v24 }
0x1260   :  { %2385 = vmatmul.f32.gmra.mxu2 %v5110_v21 }
0x1268   :  { %2388 = vmatmul.f32.gmra.mxu2 %v5113_v38 }
0x1270   :  { %2391 = vmatmul.f32.gmra.mxu2 %v5116_v2 }
0x127b   :  { %v2347_v14 = vpop.f32.mrf.mxu2 }
0x127c   :  { %2414 = vmatmul.f32.vlgmr.msra.gmra.mxu3 %v2347_v14 }
0x1283   :  { %v2350_v5 = vpop.f32.mrf.mxu2 }
0x1284   :  { %2417 = vmatmul.f32.gmra.mxu3 %v2350_v5 }
0x128b   :  { %v2353_v0 = vpop.f32.mrf.mxu2 }
0x128c   :  { %2420 = vmatmul.f32.gmra.mxu3 %v2353_v0 }
0x1293   :  { %v2356_v15 = vpop.f32.mrf.mxu2 }
0x1294   :  { %2423 = vmatmul.f32.gmra.mxu3 %v2356_v15 }
0x129b   :  { %v2359_v8 = vpop.f32.mrf.mxu2 }
0x129c   :  { %2426 = vmatmul.f32.gmra.mxu3 %v2359_v8 }
0x12a3   :  { %v2362_v24 = vpop.f32.mrf.mxu2 }
0x12a4   :  { %2429 = vmatmul.f32.gmra.mxu3 %v2362_v24 }
0x12ab   :  { %v2365_v22 = vpop.f32.mrf.mxu2 }
0x12ac   :  { %2432 = vmatmul.f32.gmra.mxu3 %v2365_v22 }
0x12b3   :  { %v2368_v16 = vpop.f32.mrf.mxu2 }
0x12b4   :  { %2435 = vmatmul.f32.gmra.mxu3 %v2368_v16 }
0x12bb   :  { %v2371_v21 = vpop.f32.mrf.mxu2 }
0x12bc   :  { %2438 = vmatmul.f32.gmra.mxu3 %v2371_v21 }
0x12c3   :  { %v2374_v38 = vpop.f32.mrf.mxu2 }
0x12c4   :  { %2441 = vmatmul.f32.gmra.mxu3 %v2374_v38 }
0x12cb   :  { %v2377_v2 = vpop.f32.mrf.mxu2 }
0x12cc   :  { %2444 = vmatmul.f32.gmra.mxu3 %v2377_v2 }
0x12d3   :  { %v2380_v4 = vpop.f32.mrf.mxu2 }
0x12d4   :  { %2447 = vmatmul.f32.gmra.mxu3 %v2380_v4 }
0x12db   :  { %v2383_v20 = vpop.f32.mrf.mxu2 }
0x12dc   :  { %2450 = vmatmul.f32.gmra.mxu3 %v2383_v20 }
0x12e3   :  { %v2386_v33 = vpop.f32.mrf.mxu2 }
0x12e4   :  { %2453 = vmatmul.f32.gmra.mxu3 %v2386_v33 }
0x12eb   :  { %v2389_v31 = vpop.f32.mrf.mxu2 }
0x12ec   :  { %2456 = vmatmul.f32.gmra.mxu3 %v2389_v31 }
0x12f3   :  { %v2392_v32 = vpop.f32.mrf.mxu2 }
0x12f4   :  { %2459 = vmatmul.f32.gmra.mxu3 %v2392_v32 }
0x12ff   :  { %v5209_v23 = vpop.f32.mrf.mxu3 }
0x1300   :  { %v2416_v2 = vadd.f32 %v5215_v41, %v5209_v23  ;;  %v5239_v23 = vld [vmem:[#allocation2 + $0x8] sm:$0xff] }
0x1302   :  { %vm2463_vm15 = vcmp.ge.f32.partialorder %v2416_v2, 0.0 }
0x1307   :  { %v5211_v28 = vpop.f32.mrf.mxu3 }
0x1308   :  { %v2419_v16 = vadd.f32 %v5215_v41, %v5211_v28 }
0x130a   :  { %v2480_v31 = vmul.f32 0.01, %v2419_v16  ;;  %vm2464_vm14 = vcmp.ge.f32.partialorder %v2419_v16, 0.0 }
0x130c   :  { %v2496_v28 = vsel %vm2464_vm14, %v2419_v16, %v2480_v31 }
0x130f   :  { %v5213_v18 = vpop.f32.mrf.mxu3 }
0x1310   :  { %v2422_v8 = vadd.f32 %v5215_v41, %v5213_v18  ;;  %v2479_v18 = vmul.f32 0.01, %v2416_v2 }
0x1312   :  { %v2481_v20 = vmul.f32 0.01, %v2422_v8  ;;  %vm2465_vm13 = vcmp.ge.f32.partialorder %v2422_v8, 0.0 }
0x1314   :  { %v2497_v32 = vsel %vm2465_vm13, %v2422_v8, %v2481_v20 }
0x1317   :  { %v2424_v29 = vpop.f32.mrf.mxu3 }
0x1318   :  { %v2425_v5 = vadd.f32 %v5215_v41, %v2424_v29  ;;  %v2495_v29 = vsel %vm2463_vm15, %v2416_v2, %v2479_v18  ;;  %v5286_v18 = vld [vmem:[#allocation8 + $0xc] ss:$0 sm:$0xff] }
0x131a   :  { %v2482_v38 = vmul.f32 0.01, %v2425_v5  ;;  %vm2466_vm12 = vcmp.ge.f32.partialorder %v2425_v5, 0.0 }
0x131c   :  { %v2498_v33 = vsel %vm2466_vm12, %v2425_v5, %v2482_v38 }
0x131f   :  { %v2427_v30 = vpop.f32.mrf.mxu3 }
0x1320   :  { %v2428_v25 = vadd.f32 %v5215_v41, %v2427_v30  ;;  %v5236_v30 = vld [vmem:[#allocation2] sm:$0xff] }
0x1322   :  { %v2483_v22 = vmul.f32 0.01, %v2428_v25  ;;  %vm2467_vm11 = vcmp.ge.f32.partialorder %v2428_v25, 0.0 }
0x1324   :  { %v2499_v4 = vsel %vm2467_vm11, %v2428_v25, %v2483_v22 }
0x1327   :  { %v2430_v36 = vpop.f32.mrf.mxu3 }
0x1328   :  { %v2431_v9 = vadd.f32 %v5215_v41, %v2430_v36  ;;  %v5242_v36 = vld [vmem:[#allocation2 + $0x10] sm:$0xff] }
0x132a   :  { %v2484_v15 = vmul.f32 0.01, %v2431_v9  ;;  %vm2468_vm10 = vcmp.ge.f32.partialorder %v2431_v9, 0.0 }
0x132c   :  { %v2500_v21 = vsel %vm2468_vm10, %v2431_v9, %v2484_v15 }
0x132f   :  { %v2433_v26 = vpop.f32.mrf.mxu3 }
0x1330   :  { %v2434_v11 = vadd.f32 %v5215_v41, %v2433_v26  ;;  %v5246_v26 = vld [vmem:[#allocation2 + $0x20] sm:$0xff] }
0x1332   :  { %v2485_v14 = vmul.f32 0.01, %v2434_v11  ;;  %vm2469_vm9 = vcmp.ge.f32.partialorder %v2434_v11, 0.0 }
0x1334   :  { %v2501_v24 = vsel %vm2469_vm9, %v2434_v11, %v2485_v14 }
0x1337   :  { %v2436_v37 = vpop.f32.mrf.mxu3 }
0x1338   :  { %v2437_v7 = vadd.f32 %v5215_v41, %v2436_v37  ;;  %v5249_v37 = vld [vmem:[#allocation2 + $0x28] sm:$0xff] }
0x133a   :  { %v2486_v1 = vmul.f32 0.01, %v2437_v7  ;;  %vm2470_vm8 = vcmp.ge.f32.partialorder %v2437_v7, 0.0 }
0x133c   :  { %v2502_v0 = vsel %vm2470_vm8, %v2437_v7, %v2486_v1 }
0x133f   :  { %v2439_v44 = vpop.f32.mrf.mxu3 }
0x1340   :  { %v2440_v60 = vadd.f32 %v5215_v41, %v2439_v44  ;;  %v5252_v44 = vld [vmem:[#allocation2 + $0x30] sm:$0xff] }
0x1342   :  { %v2487_v10 = vmul.f32 0.01, %v2440_v60  ;;  %vm2471_vm7 = vcmp.ge.f32.partialorder %v2440_v60, 0.0 }
0x1344   :  { %v2503_v17 = vsel %vm2471_vm7, %v2440_v60, %v2487_v10 }
0x1347   :  { %v2442_v47 = vpop.f32.mrf.mxu3 }
0x1348   :  { %v2443_v13 = vadd.f32 %v5215_v41, %v2442_v47  ;;  %v2527_v47 = vld [vmem:[#allocation7 + $0x678] sm:$0xff] }
0x1349   :  { %2598 = vmatpush.msrb.mxu1 %v2527_v47 }
0x134a   :  { %v2488_v3 = vmul.f32 0.01, %v2443_v13  ;;  %vm2472_vm6 = vcmp.ge.f32.partialorder %v2443_v13, 0.0 }
0x134c   :  { %v2504_v6 = vsel %vm2472_vm6, %v2443_v13, %v2488_v3  ;;  %v5274_v13 = vld [vmem:[#allocation2 + $0x70] sm:$0xff] }
0x134f   :  { %v2445_v43 = vpop.f32.mrf.mxu3 }
0x1350   :  { %v2446_v59 = vadd.f32 %v5215_v41, %v2445_v43  ;;  %v5256_v43 = vld [vmem:[#allocation2 + $0x40] sm:$0xff] }
0x1352   :  { %v2489_v61 = vmul.f32 0.01, %v2446_v59  ;;  %vm2473_vm5 = vcmp.ge.f32.partialorder %v2446_v59, 0.0 }
0x1354   :  { %v2505_v40 = vsel %vm2473_vm5, %v2446_v59, %v2489_v61  ;;  %v2512_v59 = vld [vmem:[#allocation7 + $0x600] sm:$0xff] }
0x1357   :  { %v2448_v54 = vpop.f32.mrf.mxu3 }
0x1358   :  { %v2449_v56 = vadd.f32 %v5215_v41, %v2448_v54  ;;  %v2525_v54 = vld [vmem:[#allocation7 + $0x668] sm:$0xff] }
0x135a   :  { %v2490_v57 = vmul.f32 0.01, %v2449_v56  ;;  %vm2474_vm4 = vcmp.ge.f32.partialorder %v2449_v56, 0.0 }
0x135c   :  { %v2506_v63 = vsel %vm2474_vm4, %v2449_v56, %v2490_v57  ;;  %v5265_v56 = vld [vmem:[#allocation2 + $0x58] sm:$0xff] }
0x135f   :  { %v2451_v35 = vpop.f32.mrf.mxu3 }
0x1360   :  { %v2452_v51 = vadd.f32 %v5215_v41, %v2451_v35  ;;  %v2524_v35 = vld [vmem:[#allocation7 + $0x660] sm:$0xff] }
0x1362   :  { %v2491_v62 = vmul.f32 0.01, %v2452_v51  ;;  %vm2475_vm3 = vcmp.ge.f32.partialorder %v2452_v51, 0.0 }
0x1364   :  { %v2507_v52 = vsel %vm2475_vm3, %v2452_v51, %v2491_v62  ;;  %v2517_v51 = vld [vmem:[#allocation7 + $0x628] sm:$0xff] }
0x1365   :  { %v5271_v62 = vld [vmem:[#allocation2 + $0x68] sm:$0xff] }
0x1367   :  { %v2454_v42 = vpop.f32.mrf.mxu3 }
0x1368   :  { %v2455_v27 = vadd.f32 %v5215_v41, %v2454_v42  ;;  %v2523_v42 = vld [vmem:[#allocation7 + $0x658] sm:$0xff] }
0x136a   :  { %v2492_v50 = vmul.f32 0.01, %v2455_v27  ;;  %vm2476_vm2 = vcmp.ge.f32.partialorder %v2455_v27, 0.0 }
0x136c   :  { %v2508_v45 = vsel %vm2476_vm2, %v2455_v27, %v2492_v50  ;;  %v5262_v27 = vld [vmem:[#allocation2 + $0x50] sm:$0xff]  ;;  %v2513_v50 = vld [vmem:[#allocation7 + $0x608] sm:$0xff] }
0x136f   :  { %v2457_v34 = vpop.f32.mrf.mxu3 }
0x1370   :  { %v2458_v39 = vadd.f32 %v5215_v41, %v2457_v34  ;;  %v5259_v34 = vld [vmem:[#allocation2 + $0x48] sm:$0xff] }
0x1372   :  { %v2493_v53 = vmul.f32 0.01, %v2458_v39  ;;  %vm2477_vm1 = vcmp.ge.f32.partialorder %v2458_v39, 0.0 }
0x1374   :  { %v2509_v12 = vsel %vm2477_vm1, %v2458_v39, %v2493_v53  ;;  %v2520_v39 = vld [vmem:[#allocation7 + $0x640] sm:$0xff]  ;;  %v2515_v53 = vld [vmem:[#allocation7 + $0x618] sm:$0xff] }
0x1377   :  { %v2460_v46 = vpop.f32.mrf.mxu3 }
0x1378   :  { %v2461_v55 = vadd.f32 %v5215_v41, %v2460_v46  ;;  %v2522_v41 = vld [vmem:[#allocation7 + $0x650] sm:$0xff]  ;;  %v2519_v46 = vld [vmem:[#allocation7 + $0x638] sm:$0xff] }
0x137a   :  { %v2494_v19 = vmul.f32 0.01, %v2461_v55  ;;  %vm2478_vm0 = vcmp.ge.f32.partialorder %v2461_v55, 0.0 }
0x137c   :  { %v2510_v49 = vsel %vm2478_vm0, %v2461_v55, %v2494_v19  ;;  %v2518_v55 = vld [vmem:[#allocation7 + $0x630] sm:$0xff]  ;;  %v2516_v19 = vld [vmem:[#allocation7 + $0x620] sm:$0xff] }
0x137d   :  { %2530 = vmatpush.msra.mxu0 %v2510_v49  ;;  %v2514_v49 = vld [vmem:[#allocation7 + $0x610] sm:$0xff] }
0x137f   :  { %2531 = vmatpush.msra.mxu0 %v2509_v12  ;;  %v5268_v12 = vld [vmem:[#allocation2 + $0x60] sm:$0xff] }
0x1381   :  { %2532 = vmatpush.msra.mxu0 %v2508_v45  ;;  %v5277_v45 = vld [vmem:[#allocation2 + $0x78] sm:$0xff] }
0x1383   :  { %2533 = vmatpush.msra.mxu0 %v2507_v52 }
0x1385   :  { %2534 = vmatpush.msra.mxu0 %v2506_v63 }
0x1387   :  { %2535 = vmatpush.msra.mxu0 %v2505_v40 }
0x1389   :  { %2536 = vmatpush.msra.mxu0 %v2504_v6 }
0x138b   :  { %2537 = vmatpush.msra.mxu0 %v2503_v17 }
0x138d   :  { %2538 = vmatpush.msra.mxu0 %v2502_v0 }
0x138f   :  { %2539 = vmatpush.msra.mxu0 %v2501_v24 }
0x1391   :  { %2540 = vmatpush.msra.mxu0 %v2500_v21 }
0x1393   :  { %2541 = vmatpush.msra.mxu0 %v2499_v4 }
0x1395   :  { %2542 = vmatpush.msra.mxu0 %v2498_v33 }
0x1397   :  { %2543 = vmatpush.msra.mxu0 %v2497_v32 }
0x1399   :  { %2544 = vmatpush.msra.mxu0 %v2496_v28 }
0x139b   :  { %2545 = vmatpush.msra.mxu0 %v2495_v29 }
0x139c   :  { %2546 = vmatmul.f32.vlgmr.msra.gmra.mxu0 %v5236_v30 }
0x13a4   :  { %2549 = vmatmul.f32.gmra.mxu0 %v5239_v23 }
0x13ac   :  { %2552 = vmatmul.f32.gmra.mxu0 %v5242_v36 }
0x13b4   :  { %2555 = vmatmul.f32.gmra.mxu0 %v5149_v48  ;;  %v2526_v48 = vld [vmem:[#allocation7 + $0x670] sm:$0xff] }
0x13b5   :  { %2599 = vmatpush.msrb.mxu1 %v2526_v48 }
0x13b7   :  { %2600 = vmatpush.msrb.mxu1 %v2525_v54 }
0x13b9   :  { %2601 = vmatpush.msrb.mxu1 %v2524_v35 }
0x13bb   :  { %2602 = vmatpush.msrb.mxu1 %v2523_v42 }
0x13bc   :  { %2558 = vmatmul.f32.gmra.mxu0 %v5246_v26 }
0x13bd   :  { %2603 = vmatpush.msrb.mxu1 %v2522_v41 }
0x13c4   :  { %2561 = vmatmul.f32.gmra.mxu0 %v5249_v37 }
0x13cc   :  { %2564 = vmatmul.f32.gmra.mxu0 %v5252_v44 }
0x13d4   :  { %2567 = vmatmul.f32.gmra.mxu0 %v5155_v58  ;;  %v2521_v58 = vld [vmem:[#allocation7 + $0x648] sm:$0xff] }
0x13d5   :  { %2604 = vmatpush.msrb.mxu1 %v2521_v58 }
0x13d7   :  { %2605 = vmatpush.msrb.mxu1 %v2520_v39 }
0x13d9   :  { %2606 = vmatpush.msrb.mxu1 %v2519_v46 }
0x13db   :  { %2607 = vmatpush.msrb.mxu1 %v2518_v55 }
0x13dc   :  { %2570 = vmatmul.f32.gmra.mxu0 %v5256_v43 }
0x13dd   :  { %2608 = vmatpush.msrb.mxu1 %v2517_v51 }
0x13df   :  { %2609 = vmatpush.msrb.mxu1 %v2516_v19 }
0x13e1   :  { %2610 = vmatpush.msrb.mxu1 %v2515_v53 }
0x13e3   :  { %2611 = vmatpush.msrb.mxu1 %v2514_v49 }
0x13e4   :  { %2573 = vmatmul.f32.gmra.mxu0 %v5259_v34 }
0x13e5   :  { %2612 = vmatpush.msrb.mxu1 %v2513_v50 }
0x13e7   :  { %2613 = vmatpush.msrb.mxu1 %v2512_v59 }
0x13ec   :  { %2576 = vmatmul.f32.gmra.mxu0 %v5262_v27 }
0x13f4   :  { %2579 = vmatmul.f32.gmra.mxu0 %v5265_v56 }
0x13fc   :  { %2582 = vmatmul.f32.gmra.mxu0 %v5268_v12 }
0x1404   :  { %2585 = vmatmul.f32.gmra.mxu0 %v5271_v62 }
0x140c   :  { %2588 = vmatmul.f32.gmra.mxu0 %v5274_v13 }
0x1414   :  { %2591 = vmatmul.f32.gmra.mxu0 %v5277_v45 }
0x1419   :  { %v2547_v57 = vpop.f32.mrf.mxu0 }
0x141a   :  { %2614 = vmatmul.f32.vlgmr.msrb.gmra.mxu1 %v2547_v57 }
0x1421   :  { %v2550_v60 = vpop.f32.mrf.mxu0 }
0x1422   :  { %2617 = vmatmul.f32.gmra.mxu1 %v2550_v60 }
0x1429   :  { %v2553_v52 = vpop.f32.mrf.mxu0 }
0x142a   :  { %2620 = vmatmul.f32.gmra.mxu1 %v2553_v52 }
0x1431   :  { %v2556_v61 = vpop.f32.mrf.mxu0 }
0x1432   :  { %2623 = vmatmul.f32.gmra.mxu1 %v2556_v61 }
0x1439   :  { %v2559_v7 = vpop.f32.mrf.mxu0 }
0x143a   :  { %2626 = vmatmul.f32.gmra.mxu1 %v2559_v7 }
0x1441   :  { %v2562_v63 = vpop.f32.mrf.mxu0 }
0x1442   :  { %2629 = vmatmul.f32.gmra.mxu1 %v2562_v63 }
0x1449   :  { %v2565_v3 = vpop.f32.mrf.mxu0 }
0x144a   :  { %2632 = vmatmul.f32.gmra.mxu1 %v2565_v3 }
0x1451   :  { %v2568_v11 = vpop.f32.mrf.mxu0 }
0x1452   :  { %2635 = vmatmul.f32.gmra.mxu1 %v2568_v11 }
0x1459   :  { %v2571_v40 = vpop.f32.mrf.mxu0 }
0x145a   :  { %2638 = vmatmul.f32.gmra.mxu1 %v2571_v40 }
0x1461   :  { %v2574_v10 = vpop.f32.mrf.mxu0 }
0x1462   :  { %2641 = vmatmul.f32.gmra.mxu1 %v2574_v10 }
0x1469   :  { %v2577_v9 = vpop.f32.mrf.mxu0 }
0x146a   :  { %2644 = vmatmul.f32.gmra.mxu1 %v2577_v9 }
0x1471   :  { %v2580_v6 = vpop.f32.mrf.mxu0 }
0x1472   :  { %2647 = vmatmul.f32.gmra.mxu1 %v2580_v6 }
0x1479   :  { %v2583_v1 = vpop.f32.mrf.mxu0 }
0x147a   :  { %2650 = vmatmul.f32.gmra.mxu1 %v2583_v1 }
0x1481   :  { %v2586_v25 = vpop.f32.mrf.mxu0 }
0x1482   :  { %2653 = vmatmul.f32.gmra.mxu1 %v2586_v25 }
0x1489   :  { %v2589_v17 = vpop.f32.mrf.mxu0 }
0x148a   :  { %2656 = vmatmul.f32.gmra.mxu1 %v2589_v17 }
0x1491   :  { %v2592_v14 = vpop.f32.mrf.mxu0 }
0x1492   :  { %2659 = vmatmul.f32.gmra.mxu1 %v2592_v14 }
0x1497   :  { %v5280_v5 = vpop.f32.mrf.mxu1 }
0x149f   :  { %v5282_v0 = vpop.f32.mrf.mxu1 }
0x14a7   :  { %v5284_v15 = vpop.f32.mrf.mxu1 }
0x14af   :  { %v2624_v8 = vpop.f32.mrf.mxu1 }
0x14b0   :  { %v2625_v25 = vadd.f32 %v5286_v18, %v2624_v8  ;;  %v2616_v8 = vadd.f32 %v5286_v18, %v5280_v5  ;;  %v5310_v5 = vld [vmem:[#allocation2 + $0x18] sm:$0xff] }
0x14b2   :  { %vm2666_vm12 = vcmp.ge.f32.partialorder %v2625_v25, 0.0  ;;  %vm2663_vm15 = vcmp.ge.f32.partialorder %v2616_v8, 0.0 }
0x14b7   :  { %v2627_v24 = vpop.f32.mrf.mxu1 }
0x14b8   :  { %v2628_v9 = vadd.f32 %v5286_v18, %v2627_v24  ;;  %v2619_v24 = vadd.f32 %v5286_v18, %v5282_v0 }
0x14ba   :  { %vm2667_vm11 = vcmp.ge.f32.partialorder %v2628_v9, 0.0  ;;  %vm2664_vm14 = vcmp.ge.f32.partialorder %v2619_v24, 0.0 }
0x14bf   :  { %v2630_v22 = vpop.f32.mrf.mxu1 }
0x14c0   :  { %v2631_v11 = vadd.f32 %v5286_v18, %v2630_v22 }
0x14c2   :  { %v2684_v14 = vmul.f32 0.01, %v2631_v11  ;;  %vm2668_vm10 = vcmp.ge.f32.partialorder %v2631_v11, 0.0 }
0x14c7   :  { %v2633_v16 = vpop.f32.mrf.mxu1 }
0x14c8   :  { %v2634_v7 = vadd.f32 %v5286_v18, %v2633_v16  ;;  %v2622_v16 = vadd.f32 %v5286_v18, %v5284_v15  ;;  %v2680_v15 = vmul.f32 0.01, %v2619_v24 }
0x14ca   :  { %v2685_v1 = vmul.f32 0.01, %v2634_v7  ;;  %vm2669_vm9 = vcmp.ge.f32.partialorder %v2634_v7, 0.0  ;;  %vm2665_vm13 = vcmp.ge.f32.partialorder %v2622_v16, 0.0  ;;  %v2696_v0 = vsel %vm2664_vm14, %v2619_v24, %v2680_v15 }
0x14cc   :  { %v2701_v22 = vsel %vm2669_vm9, %v2634_v7, %v2685_v1 }
0x14cf   :  { %v2636_v21 = vpop.f32.mrf.mxu1 }
0x14d0   :  { %v2637_v60 = vadd.f32 %v5286_v18, %v2636_v21  ;;  %v2683_v21 = vmul.f32 0.01, %v2628_v9 }
0x14d2   :  { %v2686_v10 = vmul.f32 0.01, %v2637_v60  ;;  %vm2670_vm8 = vcmp.ge.f32.partialorder %v2637_v60, 0.0 }
0x14d4   :  { %v2702_v17 = vsel %vm2670_vm8, %v2637_v60, %v2686_v10 }
0x14d7   :  { %v2639_v38 = vpop.f32.mrf.mxu1 }
0x14d8   :  { %v2640_v50 = vadd.f32 %v5286_v18, %v2639_v38  ;;  %v2700_v38 = vsel %vm2668_vm10, %v2631_v11, %v2684_v14 }
0x14da   :  { %v2687_v3 = vmul.f32 0.01, %v2640_v50  ;;  %vm2671_vm7 = vcmp.ge.f32.partialorder %v2640_v50, 0.0 }
0x14dc   :  { %v2703_v6 = vsel %vm2671_vm7, %v2640_v50, %v2687_v3  ;;  %v2712_v50 = vld [vmem:[#allocation7 + $0x680] sm:$0xff] }
0x14df   :  { %v2642_v2 = vpop.f32.mrf.mxu1 }
0x14e0   :  { %v2643_v19 = vadd.f32 %v5286_v18, %v2642_v2  ;;  %v2682_v2 = vmul.f32 0.01, %v2625_v25 }
0x14e2   :  { %v2688_v61 = vmul.f32 0.01, %v2643_v19  ;;  %vm2672_vm6 = vcmp.ge.f32.partialorder %v2643_v19, 0.0 }
0x14e4   :  { %v2704_v40 = vsel %vm2672_vm6, %v2643_v19, %v2688_v61  ;;  %v2715_v19 = vld [vmem:[#allocation7 + $0x698] sm:$0xff] }
0x14e7   :  { %v2645_v4 = vpop.f32.mrf.mxu1 }
0x14e8   :  { %v2646_v46 = vadd.f32 %v5286_v18, %v2645_v4  ;;  %v2699_v4 = vsel %vm2667_vm11, %v2628_v9, %v2683_v21 }
0x14ea   :  { %v2689_v57 = vmul.f32 0.01, %v2646_v46  ;;  %vm2673_vm5 = vcmp.ge.f32.partialorder %v2646_v46, 0.0 }
0x14ec   :  { %v2705_v63 = vsel %vm2673_vm5, %v2646_v46, %v2689_v57  ;;  %v2718_v46 = vld [vmem:[#allocation7 + $0x6b0] sm:$0xff] }
0x14ef   :  { %v2648_v20 = vpop.f32.mrf.mxu1 }
0x14f0   :  { %v2649_v41 = vadd.f32 %v5286_v18, %v2648_v20  ;;  %v2681_v20 = vmul.f32 0.01, %v2622_v16 }
0x14f2   :  { %v2690_v49 = vmul.f32 0.01, %v2649_v41  ;;  %vm2674_vm4 = vcmp.ge.f32.partialorder %v2649_v41, 0.0 }
0x14f4   :  { %v2706_v52 = vsel %vm2674_vm4, %v2649_v41, %v2690_v49  ;;  %v2721_v41 = vld [vmem:[#allocation7 + $0x6c8] sm:$0xff] }
0x14f5   :  { %v2713_v49 = vld [vmem:[#allocation7 + $0x688] sm:$0xff] }
0x14f7   :  { %v2651_v33 = vpop.f32.mrf.mxu1 }
0x14f8   :  { %v2652_v54 = vadd.f32 %v5286_v18, %v2651_v33  ;;  %v2698_v33 = vsel %vm2666_vm12, %v2625_v25, %v2682_v2 }
0x14fa   :  { %v2691_v51 = vmul.f32 0.01, %v2652_v54  ;;  %vm2675_vm3 = vcmp.ge.f32.partialorder %v2652_v54, 0.0 }
0x14fc   :  { %v2707_v59 = vsel %vm2675_vm3, %v2652_v54, %v2691_v51  ;;  %v2724_v54 = vld [vmem:[#allocation7 + $0x6e0] sm:$0xff] }
0x14fd   :  { %v2716_v51 = vld [vmem:[#allocation7 + $0x6a0] sm:$0xff] }
0x14ff   :  { %v2654_v31 = vpop.f32.mrf.mxu1 }
0x1500   :  { %v2655_v47 = vadd.f32 %v5286_v18, %v2654_v31  ;;  %v2697_v31 = vsel %vm2665_vm13, %v2622_v16, %v2681_v20 }
0x1502   :  { %v2692_v39 = vmul.f32 0.01, %v2655_v47  ;;  %vm2676_vm2 = vcmp.ge.f32.partialorder %v2655_v47, 0.0 }
0x1504   :  { %v2708_v53 = vsel %vm2676_vm2, %v2655_v47, %v2692_v39  ;;  %v2726_v47 = vld [vmem:[#allocation7 + $0x6f0] sm:$0xff]  ;;  %v2719_v39 = vld [vmem:[#allocation7 + $0x6b8] sm:$0xff] }
0x1507   :  { %v2657_v32 = vpop.f32.mrf.mxu1 }
0x1508   :  { %v2658_v28 = vadd.f32 %v5286_v18, %v2657_v32  ;;  %v2679_v32 = vmul.f32 0.01, %v2616_v8 }
0x150a   :  { %v2693_v42 = vmul.f32 0.01, %v2658_v28  ;;  %vm2677_vm1 = vcmp.ge.f32.partialorder %v2658_v28, 0.0 }
0x150c   :  { %v2709_v55 = vsel %vm2677_vm1, %v2658_v28, %v2693_v42  ;;  %v2695_v28 = vsel %vm2663_vm15, %v2616_v8, %v2679_v32  ;;  %v2722_v42 = vld [vmem:[#allocation7 + $0x6d0] sm:$0xff] }
0x150f   :  { %v2660_v29 = vpop.f32.mrf.mxu1 }
0x1510   :  { %v2661_v48 = vadd.f32 %v5286_v18, %v2660_v29  ;;  %v5316_v18 = vld [vmem:[#allocation2 + $0x38] sm:$0xff] }
0x1511   :  { %v2727_v29 = vld [vmem:[#allocation7 + $0x6f8] sm:$0xff] }
0x1512   :  { %v2694_v35 = vmul.f32 0.01, %v2661_v48  ;;  %vm2678_vm0 = vcmp.ge.f32.partialorder %v2661_v48, 0.0  ;;  %2798 = vmatpush.msrb.mxu3 %v2727_v29 }
0x1514   :  { %v2710_v58 = vsel %vm2678_vm0, %v2661_v48, %v2694_v35  ;;  %2799 = vmatpush.msrb.mxu3 %v2726_v47  ;;  %v2725_v48 = vld [vmem:[#allocation7 + $0x6e8] sm:$0xff]  ;;  %v2723_v35 = vld [vmem:[#allocation7 + $0x6d8] sm:$0xff] }
0x1515   :  { %2730 = vmatpush.msrb.mxu2 %v2710_v58  ;;  %v2720_v58 = vld [vmem:[#allocation7 + $0x6c0] sm:$0xff] }
0x1516   :  { %2800 = vmatpush.msrb.mxu3 %v2725_v48 }
0x1517   :  { %2731 = vmatpush.msrb.mxu2 %v2709_v55  ;;  %v2717_v55 = vld [vmem:[#allocation7 + $0x6a8] sm:$0xff] }
0x1518   :  { %2801 = vmatpush.msrb.mxu3 %v2724_v54 }
0x1519   :  { %2732 = vmatpush.msrb.mxu2 %v2708_v53  ;;  %v2714_v53 = vld [vmem:[#allocation7 + $0x690] sm:$0xff] }
0x151a   :  { %2802 = vmatpush.msrb.mxu3 %v2723_v35 }
0x151b   :  { %2733 = vmatpush.msrb.mxu2 %v2707_v59 }
0x151c   :  { %2803 = vmatpush.msrb.mxu3 %v2722_v42 }
0x151d   :  { %2734 = vmatpush.msrb.mxu2 %v2706_v52 }
0x151e   :  { %2804 = vmatpush.msrb.mxu3 %v2721_v41 }
0x151f   :  { %2735 = vmatpush.msrb.mxu2 %v2705_v63 }
0x1520   :  { %2805 = vmatpush.msrb.mxu3 %v2720_v58 }
0x1521   :  { %2736 = vmatpush.msrb.mxu2 %v2704_v40 }
0x1522   :  { %2806 = vmatpush.msrb.mxu3 %v2719_v39 }
0x1523   :  { %2737 = vmatpush.msrb.mxu2 %v2703_v6 }
0x1524   :  { %2807 = vmatpush.msrb.mxu3 %v2718_v46 }
0x1525   :  { %2738 = vmatpush.msrb.mxu2 %v2702_v17 }
0x1526   :  { %2808 = vmatpush.msrb.mxu3 %v2717_v55 }
0x1527   :  { %2739 = vmatpush.msrb.mxu2 %v2701_v22 }
0x1528   :  { %2809 = vmatpush.msrb.mxu3 %v2716_v51 }
0x1529   :  { %2740 = vmatpush.msrb.mxu2 %v2700_v38 }
0x152a   :  { %2810 = vmatpush.msrb.mxu3 %v2715_v19 }
0x152b   :  { %2741 = vmatpush.msrb.mxu2 %v2699_v4 }
0x152c   :  { %2811 = vmatpush.msrb.mxu3 %v2714_v53 }
0x152d   :  { %2742 = vmatpush.msrb.mxu2 %v2698_v33 }
0x152e   :  { %2812 = vmatpush.msrb.mxu3 %v2713_v49 }
0x152f   :  { %2743 = vmatpush.msrb.mxu2 %v2697_v31 }
0x1530   :  { %2813 = vmatpush.msrb.mxu3 %v2712_v50 }
0x1531   :  { %2744 = vmatpush.msrb.mxu2 %v2696_v0 }
0x1533   :  { %2745 = vmatpush.msrb.mxu2 %v2695_v28  ;;  %v5333_v28 = vld [vmem:[#allocation8 + $0xd] ss:$0 sm:$0xff] }
0x1534   :  { %2746 = vmatmul.f32.vlgmr.msrb.gmra.mxu2 %v5236_v30 }
0x153c   :  { %2749 = vmatmul.f32.gmra.mxu2 %v5239_v23 }
0x1544   :  { %2752 = vmatmul.f32.gmra.mxu2 %v5242_v36 }
0x154c   :  { %2755 = vmatmul.f32.gmra.mxu2 %v5310_v5 }
0x1554   :  { %2758 = vmatmul.f32.gmra.mxu2 %v5246_v26 }
0x155c   :  { %2761 = vmatmul.f32.gmra.mxu2 %v5249_v37 }
0x1564   :  { %2764 = vmatmul.f32.gmra.mxu2 %v5252_v44 }
0x156c   :  { %2767 = vmatmul.f32.gmra.mxu2 %v5316_v18 }
0x1574   :  { %2770 = vmatmul.f32.gmra.mxu2 %v5256_v43 }
0x157c   :  { %2773 = vmatmul.f32.gmra.mxu2 %v5259_v34 }
0x1584   :  { %2776 = vmatmul.f32.gmra.mxu2 %v5262_v27 }
0x158c   :  { %2779 = vmatmul.f32.gmra.mxu2 %v5265_v56 }
0x1594   :  { %2782 = vmatmul.f32.gmra.mxu2 %v5268_v12 }
0x159c   :  { %2785 = vmatmul.f32.gmra.mxu2 %v5271_v62 }
0x15a4   :  { %2788 = vmatmul.f32.gmra.mxu2 %v5274_v13 }
0x15ac   :  { %2791 = vmatmul.f32.gmra.mxu2 %v5277_v45 }
0x15b7   :  { %v2747_v59 = vpop.f32.mrf.mxu2 }
0x15b8   :  { %2814 = vmatmul.f32.vlgmr.msrb.gmra.mxu3 %v2747_v59 }
0x15bf   :  { %v2750_v57 = vpop.f32.mrf.mxu2 }
0x15c0   :  { %2817 = vmatmul.f32.gmra.mxu3 %v2750_v57 }
0x15c7   :  { %v2753_v60 = vpop.f32.mrf.mxu2 }
0x15c8   :  { %2820 = vmatmul.f32.gmra.mxu3 %v2753_v60 }
0x15cf   :  { %v2756_v52 = vpop.f32.mrf.mxu2 }
0x15d0   :  { %2823 = vmatmul.f32.gmra.mxu3 %v2756_v52 }
0x15d7   :  { %v2759_v61 = vpop.f32.mrf.mxu2 }
0x15d8   :  { %2826 = vmatmul.f32.gmra.mxu3 %v2759_v61 }
0x15df   :  { %v2762_v7 = vpop.f32.mrf.mxu2 }
0x15e0   :  { %2829 = vmatmul.f32.gmra.mxu3 %v2762_v7 }
0x15e7   :  { %v2765_v63 = vpop.f32.mrf.mxu2 }
0x15e8   :  { %2832 = vmatmul.f32.gmra.mxu3 %v2765_v63 }
0x15ef   :  { %v2768_v3 = vpop.f32.mrf.mxu2 }
0x15f0   :  { %2835 = vmatmul.f32.gmra.mxu3 %v2768_v3 }
0x15f7   :  { %v2771_v11 = vpop.f32.mrf.mxu2 }
0x15f8   :  { %2838 = vmatmul.f32.gmra.mxu3 %v2771_v11 }
0x15ff   :  { %v2774_v40 = vpop.f32.mrf.mxu2 }
0x1600   :  { %2841 = vmatmul.f32.gmra.mxu3 %v2774_v40 }
0x1607   :  { %v2777_v10 = vpop.f32.mrf.mxu2 }
0x1608   :  { %2844 = vmatmul.f32.gmra.mxu3 %v2777_v10 }
0x160f   :  { %v2780_v9 = vpop.f32.mrf.mxu2 }
0x1610   :  { %2847 = vmatmul.f32.gmra.mxu3 %v2780_v9 }
0x1617   :  { %v2783_v6 = vpop.f32.mrf.mxu2 }
0x1618   :  { %2850 = vmatmul.f32.gmra.mxu3 %v2783_v6 }
0x161f   :  { %v2786_v1 = vpop.f32.mrf.mxu2 }
0x1620   :  { %2853 = vmatmul.f32.gmra.mxu3 %v2786_v1 }
0x1627   :  { %v2789_v25 = vpop.f32.mrf.mxu2 }
0x1628   :  { %2856 = vmatmul.f32.gmra.mxu3 %v2789_v25 }
0x162f   :  { %v2792_v17 = vpop.f32.mrf.mxu2 }
0x1630   :  { %2859 = vmatmul.f32.gmra.mxu3 %v2792_v17 }
0x163b   :  { %v5327_v14 = vpop.f32.mrf.mxu3 }
0x1643   :  { %v5329_v16 = vpop.f32.mrf.mxu3 }
0x164b   :  { %v5331_v22 = vpop.f32.mrf.mxu3 }
0x1653   :  { %v2824_v21 = vpop.f32.mrf.mxu3 }
0x1654   :  { %v2825_v17 = vadd.f32 %v5333_v28, %v2824_v21  ;;  %v2816_v21 = vadd.f32 %v5333_v28, %v5327_v14  ;;  %v2927_v14 = vld [vmem:[#allocation7 + $0x778] sm:$0xff] }
0x1655   :  { %2998 = vmatpush.msra.mxu1 %v2927_v14 }
0x1656   :  { %vm2866_vm12 = vcmp.ge.f32.partialorder %v2825_v17, 0.0  ;;  %vm2863_vm15 = vcmp.ge.f32.partialorder %v2816_v21, 0.0 }
0x165b   :  { %v2827_v24 = vpop.f32.mrf.mxu3 }
0x165c   :  { %v2828_v6 = vadd.f32 %v5333_v28, %v2827_v24  ;;  %v2819_v24 = vadd.f32 %v5333_v28, %v5329_v16 }
0x165e   :  { %vm2867_vm11 = vcmp.ge.f32.partialorder %v2828_v6, 0.0  ;;  %vm2864_vm14 = vcmp.ge.f32.partialorder %v2819_v24, 0.0 }
0x1663   :  { %v2830_v38 = vpop.f32.mrf.mxu3 }
0x1664   :  { %v2831_v40 = vadd.f32 %v5333_v28, %v2830_v38 }
0x1666   :  { %vm2868_vm10 = vcmp.ge.f32.partialorder %v2831_v40, 0.0 }
0x166b   :  { %v2833_v2 = vpop.f32.mrf.mxu3 }
0x166c   :  { %v2834_v63 = vadd.f32 %v5333_v28, %v2833_v2  ;;  %v2884_v2 = vmul.f32 0.01, %v2831_v40 }
0x166e   :  { %v2885_v25 = vmul.f32 0.01, %v2834_v63  ;;  %vm2869_vm9 = vcmp.ge.f32.partialorder %v2834_v63, 0.0 }
0x1670   :  { %v2901_v38 = vsel %vm2869_vm9, %v2834_v63, %v2885_v25 }
0x1673   :  { %v2836_v8 = vpop.f32.mrf.mxu3 }
0x1674   :  { %v2837_v52 = vadd.f32 %v5333_v28, %v2836_v8 }
0x1676   :  { %v2886_v9 = vmul.f32 0.01, %v2837_v52  ;;  %vm2870_vm8 = vcmp.ge.f32.partialorder %v2837_v52, 0.0 }
0x1678   :  { %v2902_v8 = vsel %vm2870_vm8, %v2837_v52, %v2886_v9 }
0x167b   :  { %v2839_v4 = vpop.f32.mrf.mxu3 }
0x167c   :  { %v2840_v59 = vadd.f32 %v5333_v28, %v2839_v4  ;;  %v2822_v4 = vadd.f32 %v5333_v28, %v5331_v22  ;;  %v2880_v22 = vmul.f32 0.01, %v2819_v24 }
0x167e   :  { %v2887_v11 = vmul.f32 0.01, %v2840_v59  ;;  %vm2871_vm7 = vcmp.ge.f32.partialorder %v2840_v59, 0.0  ;;  %vm2865_vm13 = vcmp.ge.f32.partialorder %v2822_v4, 0.0  ;;  %v2896_v16 = vsel %vm2864_vm14, %v2819_v24, %v2880_v22 }
0x1680   :  { %v2903_v1 = vsel %vm2871_vm7, %v2840_v59, %v2887_v11 }
0x1683   :  { %v2842_v20 = vpop.f32.mrf.mxu3 }
0x1684   :  { %v2843_v53 = vadd.f32 %v5333_v28, %v2842_v20  ;;  %v2883_v20 = vmul.f32 0.01, %v2828_v6 }
0x1686   :  { %v2888_v7 = vmul.f32 0.01, %v2843_v53  ;;  %vm2872_vm6 = vcmp.ge.f32.partialorder %v2843_v53, 0.0 }
0x1688   :  { %v2904_v10 = vsel %vm2872_vm6, %v2843_v53, %v2888_v7 }
0x168b   :  { %v2845_v33 = vpop.f32.mrf.mxu3 }
0x168c   :  { %v2846_v55 = vadd.f32 %v5333_v28, %v2845_v33  ;;  %v2900_v33 = vsel %vm2868_vm10, %v2831_v40, %v2884_v2 }
0x168e   :  { %v2889_v60 = vmul.f32 0.01, %v2846_v55  ;;  %vm2873_vm5 = vcmp.ge.f32.partialorder %v2846_v55, 0.0 }
0x1690   :  { %v2905_v3 = vsel %vm2873_vm5, %v2846_v55, %v2889_v60 }
0x1693   :  { %v2848_v15 = vpop.f32.mrf.mxu3 }
0x1694   :  { %v2849_v58 = vadd.f32 %v5333_v28, %v2848_v15  ;;  %v2882_v15 = vmul.f32 0.01, %v2825_v17 }
0x1696   :  { %v2890_v50 = vmul.f32 0.01, %v2849_v58  ;;  %vm2874_vm4 = vcmp.ge.f32.partialorder %v2849_v58, 0.0 }
0x1698   :  { %v2906_v61 = vsel %vm2874_vm4, %v2849_v58, %v2890_v50  ;;  %v2913_v58 = vld [vmem:[#allocation7 + $0x708] sm:$0xff] }
0x169b   :  { %v2851_v31 = vpop.f32.mrf.mxu3 }
0x169c   :  { %v2852_v35 = vadd.f32 %v5333_v28, %v2851_v31  ;;  %v2899_v31 = vsel %vm2867_vm11, %v2828_v6, %v2883_v20 }
0x169e   :  { %v2891_v19 = vmul.f32 0.01, %v2852_v35  ;;  %vm2875_vm3 = vcmp.ge.f32.partialorder %v2852_v35, 0.0 }
0x16a0   :  { %v2907_v57 = vsel %vm2875_vm3, %v2852_v35, %v2891_v19  ;;  %v2917_v35 = vld [vmem:[#allocation7 + $0x728] sm:$0xff] }
0x16a3   :  { %v2854_v32 = vpop.f32.mrf.mxu3 }
0x16a4   :  { %v2855_v48 = vadd.f32 %v5333_v28, %v2854_v32  ;;  %v2881_v32 = vmul.f32 0.01, %v2822_v4 }
0x16a6   :  { %v2892_v46 = vmul.f32 0.01, %v2855_v48  ;;  %vm2876_vm2 = vcmp.ge.f32.partialorder %v2855_v48, 0.0 }
0x16a8   :  { %v2908_v49 = vsel %vm2876_vm2, %v2855_v48, %v2892_v46 }
0x16ab   :  { %v2857_v0 = vpop.f32.mrf.mxu3 }
0x16ac   :  { %v2858_v29 = vadd.f32 %v5333_v28, %v2857_v0  ;;  %v2898_v0 = vsel %vm2866_vm12, %v2825_v17, %v2882_v15 }
0x16ae   :  { %v2893_v41 = vmul.f32 0.01, %v2858_v29  ;;  %vm2877_vm1 = vcmp.ge.f32.partialorder %v2858_v29, 0.0 }
0x16b0   :  { %v2909_v51 = vsel %vm2877_vm1, %v2858_v29, %v2893_v41  ;;  %v2897_v29 = vsel %vm2865_vm13, %v2822_v4, %v2881_v32  ;;  %v2915_v41 = vld [vmem:[#allocation7 + $0x718] sm:$0xff]  ;;  %v5376_v4 = vld [vmem:[#allocation8 + $0xe] ss:$0 sm:$0xff] }
0x16b3   :  { %v2860_v47 = vpop.f32.mrf.mxu3 }
0x16b4   :  { %v2861_v54 = vadd.f32 %v5333_v28, %v2860_v47  ;;  %v2879_v47 = vmul.f32 0.01, %v2816_v21  ;;  %v2926_v28 = vld [vmem:[#allocation7 + $0x770] sm:$0xff] }
0x16b5   :  { %2999 = vmatpush.msra.mxu1 %v2926_v28 }
0x16b6   :  { %v2894_v42 = vmul.f32 0.01, %v2861_v54  ;;  %vm2878_vm0 = vcmp.ge.f32.partialorder %v2861_v54, 0.0  ;;  %v2895_v48 = vsel %vm2863_vm15, %v2816_v21, %v2879_v47 }
0x16b8   :  { %v2910_v39 = vsel %vm2878_vm0, %v2861_v54, %v2894_v42  ;;  %v2919_v54 = vld [vmem:[#allocation7 + $0x738] sm:$0xff]  ;;  %v2916_v42 = vld [vmem:[#allocation7 + $0x720] sm:$0xff] }
0x16b9   :  { %2930 = vmatpush.msrb.mxu0 %v2910_v39  ;;  %v2912_v39 = vld [vmem:[#allocation7 + $0x700] sm:$0xff] }
0x16bb   :  { %2931 = vmatpush.msrb.mxu0 %v2909_v51 }
0x16bd   :  { %2932 = vmatpush.msrb.mxu0 %v2908_v49 }
0x16bf   :  { %2933 = vmatpush.msrb.mxu0 %v2907_v57 }
0x16c1   :  { %2934 = vmatpush.msrb.mxu0 %v2906_v61 }
0x16c3   :  { %2935 = vmatpush.msrb.mxu0 %v2905_v3 }
0x16c5   :  { %2936 = vmatpush.msrb.mxu0 %v2904_v10 }
0x16c7   :  { %2937 = vmatpush.msrb.mxu0 %v2903_v1 }
0x16c9   :  { %2938 = vmatpush.msrb.mxu0 %v2902_v8 }
0x16cb   :  { %2939 = vmatpush.msrb.mxu0 %v2901_v38 }
0x16cd   :  { %2940 = vmatpush.msrb.mxu0 %v2900_v33 }
0x16cf   :  { %2941 = vmatpush.msrb.mxu0 %v2899_v31 }
0x16d1   :  { %2942 = vmatpush.msrb.mxu0 %v2898_v0 }
0x16d3   :  { %2943 = vmatpush.msrb.mxu0 %v2897_v29 }
0x16d5   :  { %2944 = vmatpush.msrb.mxu0 %v2896_v16 }
0x16d7   :  { %2945 = vmatpush.msrb.mxu0 %v2895_v48 }
0x16d8   :  { %2946 = vmatmul.f32.vlgmr.msrb.gmra.mxu0 %v5236_v30  ;;  %v2925_v30 = vld [vmem:[#allocation7 + $0x768] sm:$0xff] }
0x16d9   :  { %3000 = vmatpush.msra.mxu1 %v2925_v30 }
0x16e0   :  { %2949 = vmatmul.f32.gmra.mxu0 %v5239_v23  ;;  %v2924_v23 = vld [vmem:[#allocation7 + $0x760] sm:$0xff] }
0x16e1   :  { %3001 = vmatpush.msra.mxu1 %v2924_v23 }
0x16e8   :  { %2952 = vmatmul.f32.gmra.mxu0 %v5242_v36  ;;  %v2923_v36 = vld [vmem:[#allocation7 + $0x758] sm:$0xff] }
0x16e9   :  { %3002 = vmatpush.msra.mxu1 %v2923_v36 }
0x16f0   :  { %2955 = vmatmul.f32.gmra.mxu0 %v5310_v5 }
0x16f8   :  { %2958 = vmatmul.f32.gmra.mxu0 %v5246_v26  ;;  %v2922_v26 = vld [vmem:[#allocation7 + $0x750] sm:$0xff] }
0x16f9   :  { %3003 = vmatpush.msra.mxu1 %v2922_v26 }
0x1700   :  { %2961 = vmatmul.f32.gmra.mxu0 %v5249_v37  ;;  %v2921_v37 = vld [vmem:[#allocation7 + $0x748] sm:$0xff] }
0x1701   :  { %3004 = vmatpush.msra.mxu1 %v2921_v37 }
0x1708   :  { %2964 = vmatmul.f32.gmra.mxu0 %v5252_v44  ;;  %v2920_v44 = vld [vmem:[#allocation7 + $0x740] sm:$0xff] }
0x1709   :  { %3005 = vmatpush.msra.mxu1 %v2920_v44 }
0x170b   :  { %3006 = vmatpush.msra.mxu1 %v2919_v54 }
0x1710   :  { %2967 = vmatmul.f32.gmra.mxu0 %v5316_v18 }
0x1718   :  { %2970 = vmatmul.f32.gmra.mxu0 %v5256_v43  ;;  %v2918_v43 = vld [vmem:[#allocation7 + $0x730] sm:$0xff] }
0x1719   :  { %3007 = vmatpush.msra.mxu1 %v2918_v43 }
0x171b   :  { %3008 = vmatpush.msra.mxu1 %v2917_v35 }
0x171d   :  { %3009 = vmatpush.msra.mxu1 %v2916_v42 }
0x171f   :  { %3010 = vmatpush.msra.mxu1 %v2915_v41 }
0x1720   :  { %2973 = vmatmul.f32.gmra.mxu0 %v5259_v34  ;;  %v2914_v34 = vld [vmem:[#allocation7 + $0x710] sm:$0xff] }
0x1721   :  { %3011 = vmatpush.msra.mxu1 %v2914_v34 }
0x1723   :  { %3012 = vmatpush.msra.mxu1 %v2913_v58 }
0x1725   :  { %3013 = vmatpush.msra.mxu1 %v2912_v39 }
0x1728   :  { %2976 = vmatmul.f32.gmra.mxu0 %v5262_v27 }
0x1730   :  { %2979 = vmatmul.f32.gmra.mxu0 %v5265_v56 }
0x1738   :  { %2982 = vmatmul.f32.gmra.mxu0 %v5268_v12 }
0x1740   :  { %2985 = vmatmul.f32.gmra.mxu0 %v5271_v62 }
0x1748   :  { %2988 = vmatmul.f32.gmra.mxu0 %v5274_v13 }
0x1750   :  { %2991 = vmatmul.f32.gmra.mxu0 %v5277_v45 }
0x1755   :  { %v2947_v27 = vpop.f32.mrf.mxu0 }
0x1756   :  { %3014 = vmatmul.f32.vlgmr.msra.gmra.mxu1 %v2947_v27 }
0x175d   :  { %v2950_v46 = vpop.f32.mrf.mxu0 }
0x175e   :  { %3017 = vmatmul.f32.gmra.mxu1 %v2950_v46 }
0x1765   :  { %v2953_v55 = vpop.f32.mrf.mxu0 }
0x1766   :  { %3020 = vmatmul.f32.gmra.mxu1 %v2953_v55 }
0x176d   :  { %v2956_v56 = vpop.f32.mrf.mxu0 }
0x176e   :  { %3023 = vmatmul.f32.gmra.mxu1 %v2956_v56 }
0x1775   :  { %v2959_v51 = vpop.f32.mrf.mxu0 }
0x1776   :  { %3026 = vmatmul.f32.gmra.mxu1 %v2959_v51 }
0x177d   :  { %v2962_v19 = vpop.f32.mrf.mxu0 }
0x177e   :  { %3029 = vmatmul.f32.gmra.mxu1 %v2962_v19 }
0x1785   :  { %v2965_v53 = vpop.f32.mrf.mxu0 }
0x1786   :  { %3032 = vmatmul.f32.gmra.mxu1 %v2965_v53 }
0x178d   :  { %v2968_v12 = vpop.f32.mrf.mxu0 }
0x178e   :  { %3035 = vmatmul.f32.gmra.mxu1 %v2968_v12 }
0x1795   :  { %v2971_v62 = vpop.f32.mrf.mxu0 }
0x1796   :  { %3038 = vmatmul.f32.gmra.mxu1 %v2971_v62 }
0x179d   :  { %v2974_v13 = vpop.f32.mrf.mxu0 }
0x179e   :  { %3041 = vmatmul.f32.gmra.mxu1 %v2974_v13 }
0x17a5   :  { %v2977_v45 = vpop.f32.mrf.mxu0 }
0x17a6   :  { %3044 = vmatmul.f32.gmra.mxu1 %v2977_v45 }
0x17ad   :  { %v2980_v49 = vpop.f32.mrf.mxu0 }
0x17ae   :  { %3047 = vmatmul.f32.gmra.mxu1 %v2980_v49 }
0x17b5   :  { %v2983_v50 = vpop.f32.mrf.mxu0 }
0x17b6   :  { %3050 = vmatmul.f32.gmra.mxu1 %v2983_v50 }
0x17bd   :  { %v2986_v59 = vpop.f32.mrf.mxu0 }
0x17be   :  { %3053 = vmatmul.f32.gmra.mxu1 %v2986_v59 }
0x17c5   :  { %v2989_v57 = vpop.f32.mrf.mxu0 }
0x17c6   :  { %3056 = vmatmul.f32.gmra.mxu1 %v2989_v57 }
0x17cd   :  { %v2992_v60 = vpop.f32.mrf.mxu0 }
0x17ce   :  { %3059 = vmatmul.f32.gmra.mxu1 %v2992_v60 }
0x17d3   :  { %v5370_v52 = vpop.f32.mrf.mxu1 }
0x17d4   :  { %v3016_v45 = vadd.f32 %v5376_v4, %v5370_v52  ;;  %v5400_v52 = vld [vmem:[#allocation2 + $0x8] sm:$0xff] }
0x17d6   :  { %vm3063_vm15 = vcmp.ge.f32.partialorder %v3016_v45, 0.0 }
0x17db   :  { %v5372_v61 = vpop.f32.mrf.mxu1 }
0x17dc   :  { %v3019_v12 = vadd.f32 %v5376_v4, %v5372_v61 }
0x17de   :  { %v3080_v57 = vmul.f32 0.01, %v3019_v12  ;;  %vm3064_vm14 = vcmp.ge.f32.partialorder %v3019_v12, 0.0 }
0x17e0   :  { %v3096_v61 = vsel %vm3064_vm14, %v3019_v12, %v3080_v57 }
0x17e3   :  { %v5374_v7 = vpop.f32.mrf.mxu1 }
0x17e4   :  { %v3022_v51 = vadd.f32 %v5376_v4, %v5374_v7  ;;  %v3079_v7 = vmul.f32 0.01, %v3016_v45 }
0x17e6   :  { %v3081_v50 = vmul.f32 0.01, %v3022_v51  ;;  %vm3065_vm13 = vcmp.ge.f32.partialorder %v3022_v51, 0.0 }
0x17e8   :  { %v3097_v60 = vsel %vm3065_vm13, %v3022_v51, %v3081_v50 }
0x17eb   :  { %v3024_v63 = vpop.f32.mrf.mxu1 }
0x17ec   :  { %v3025_v46 = vadd.f32 %v5376_v4, %v3024_v63  ;;  %v3095_v63 = vsel %vm3063_vm15, %v3016_v45, %v3079_v7  ;;  %v5447_v7 = vld [vmem:[#allocation8 + $0xf] ss:$0 sm:$0xff] }
0x17ee   :  { %v3082_v13 = vmul.f32 0.01, %v3025_v46  ;;  %vm3066_vm12 = vcmp.ge.f32.partialorder %v3025_v46, 0.0 }
0x17f0   :  { %v3098_v59 = vsel %vm3066_vm12, %v3025_v46, %v3082_v13 }
0x17f3   :  { %v3027_v3 = vpop.f32.mrf.mxu1 }
0x17f4   :  { %v3028_v58 = vadd.f32 %v5376_v4, %v3027_v3  ;;  %v5397_v3 = vld [vmem:[#allocation2] sm:$0xff] }
0x17f6   :  { %v3083_v53 = vmul.f32 0.01, %v3028_v58  ;;  %vm3067_vm11 = vcmp.ge.f32.partialorder %v3028_v58, 0.0 }
0x17f8   :  { %v3099_v49 = vsel %vm3067_vm11, %v3028_v58, %v3083_v53 }
0x17fb   :  { %v3030_v11 = vpop.f32.mrf.mxu1 }
0x17fc   :  { %v3031_v42 = vadd.f32 %v5376_v4, %v3030_v11  ;;  %v5403_v11 = vld [vmem:[#allocation2 + $0x10] sm:$0xff] }
0x17fe   :  { %v3084_v56 = vmul.f32 0.01, %v3031_v42  ;;  %vm3068_vm10 = vcmp.ge.f32.partialorder %v3031_v42, 0.0 }
0x1800   :  { %v3100_v62 = vsel %vm3068_vm10, %v3031_v42, %v3084_v56 }
0x1803   :  { %v3033_v40 = vpop.f32.mrf.mxu1 }
0x1804   :  { %v3034_v54 = vadd.f32 %v5376_v4, %v3033_v40  ;;  %v5407_v40 = vld [vmem:[#allocation2 + $0x20] sm:$0xff] }
0x1806   :  { %v3085_v27 = vmul.f32 0.01, %v3034_v54  ;;  %vm3069_vm9 = vcmp.ge.f32.partialorder %v3034_v54, 0.0 }
0x1808   :  { %v3101_v19 = vsel %vm3069_vm9, %v3034_v54, %v3085_v27 }
0x180b   :  { %v3036_v10 = vpop.f32.mrf.mxu1 }
0x180c   :  { %v3037_v26 = vadd.f32 %v5376_v4, %v3036_v10  ;;  %v5410_v10 = vld [vmem:[#allocation2 + $0x28] sm:$0xff] }
0x180e   :  { %v3086_v34 = vmul.f32 0.01, %v3037_v26  ;;  %vm3070_vm8 = vcmp.ge.f32.partialorder %v3037_v26, 0.0 }
0x1810   :  { %v3102_v55 = vsel %vm3070_vm8, %v3037_v26, %v3086_v34 }
0x1813   :  { %v3039_v9 = vpop.f32.mrf.mxu1 }
0x1814   :  { %v3040_v30 = vadd.f32 %v5376_v4, %v3039_v9  ;;  %v5413_v9 = vld [vmem:[#allocation2 + $0x30] sm:$0xff] }
0x1816   :  { %v3087_v35 = vmul.f32 0.01, %v3040_v30  ;;  %vm3071_vm7 = vcmp.ge.f32.partialorder %v3040_v30, 0.0 }
0x1818   :  { %v3103_v39 = vsel %vm3071_vm7, %v3040_v30, %v3087_v35 }
0x181b   :  { %v3042_v6 = vpop.f32.mrf.mxu1 }
0x181c   :  { %v3043_v48 = vadd.f32 %v5376_v4, %v3042_v6  ;;  %v5417_v6 = vld [vmem:[#allocation2 + $0x40] sm:$0xff] }
0x181e   :  { %v3088_v44 = vmul.f32 0.01, %v3043_v48  ;;  %vm3072_vm6 = vcmp.ge.f32.partialorder %v3043_v48, 0.0 }
0x1820   :  { %v3104_v41 = vsel %vm3072_vm6, %v3043_v48, %v3088_v44  ;;  %v5435_v48 = vld [vmem:[#allocation2 + $0x70] sm:$0xff] }
0x1823   :  { %v3045_v1 = vpop.f32.mrf.mxu1 }
0x1824   :  { %v3046_v29 = vadd.f32 %v5376_v4, %v3045_v1  ;;  %v3127_v1 = vld [vmem:[#allocation7 + $0x7f8] sm:$0xff] }
0x1825   :  { %3198 = vmatpush.msra.mxu3 %v3127_v1 }
0x1826   :  { %v3089_v36 = vmul.f32 0.01, %v3046_v29  ;;  %vm3073_vm5 = vcmp.ge.f32.partialorder %v3046_v29, 0.0 }
0x1828   :  { %v3105_v43 = vsel %vm3073_vm5, %v3046_v29, %v3089_v36  ;;  %v5429_v29 = vld [vmem:[#allocation2 + $0x60] sm:$0xff] }
0x182b   :  { %v3048_v25 = vpop.f32.mrf.mxu1 }
0x182c   :  { %v3049_v32 = vadd.f32 %v5376_v4, %v3048_v25  ;;  %v5420_v25 = vld [vmem:[#allocation2 + $0x48] sm:$0xff] }
0x182e   :  { %v3090_v28 = vmul.f32 0.01, %v3049_v32  ;;  %vm3074_vm4 = vcmp.ge.f32.partialorder %v3049_v32, 0.0 }
0x1830   :  { %v3106_v37 = vsel %vm3074_vm4, %v3049_v32, %v3090_v28  ;;  %v3115_v32 = vld [vmem:[#allocation7 + $0x798] sm:$0xff] }
0x1833   :  { %v3051_v17 = vpop.f32.mrf.mxu1 }
0x1834   :  { %v3052_v15 = vadd.f32 %v5376_v4, %v3051_v17  ;;  %v3125_v17 = vld [vmem:[#allocation7 + $0x7e8] sm:$0xff] }
0x1836   :  { %v3091_v16 = vmul.f32 0.01, %v3052_v15  ;;  %vm3075_vm3 = vcmp.ge.f32.partialorder %v3052_v15, 0.0 }
0x1838   :  { %v3107_v23 = vsel %vm3075_vm3, %v3052_v15, %v3091_v16  ;;  %v5426_v15 = vld [vmem:[#allocation2 + $0x58] sm:$0xff]  ;;  %v5432_v16 = vld [vmem:[#allocation2 + $0x68] sm:$0xff] }
0x183b   :  { %v3054_v8 = vpop.f32.mrf.mxu1 }
0x183c   :  { %v3055_v24 = vadd.f32 %v5376_v4, %v3054_v8  ;;  %v3124_v8 = vld [vmem:[#allocation7 + $0x7e0] sm:$0xff] }
0x183e   :  { %v3092_v22 = vmul.f32 0.01, %v3055_v24  ;;  %vm3076_vm2 = vcmp.ge.f32.partialorder %v3055_v24, 0.0 }
0x1840   :  { %v3108_v14 = vsel %vm3076_vm2, %v3055_v24, %v3092_v22  ;;  %v3119_v24 = vld [vmem:[#allocation7 + $0x7b8] sm:$0xff]  ;;  %v3113_v22 = vld [vmem:[#allocation7 + $0x788] sm:$0xff] }
0x1843   :  { %v3057_v2 = vpop.f32.mrf.mxu1 }
0x1844   :  { %v3058_v38 = vadd.f32 %v5376_v4, %v3057_v2  ;;  %v3123_v2 = vld [vmem:[#allocation7 + $0x7d8] sm:$0xff] }
0x1846   :  { %v3093_v31 = vmul.f32 0.01, %v3058_v38  ;;  %vm3077_vm1 = vcmp.ge.f32.partialorder %v3058_v38, 0.0 }
0x1848   :  { %v3109_v47 = vsel %vm3077_vm1, %v3058_v38, %v3093_v31  ;;  %v3121_v38 = vld [vmem:[#allocation7 + $0x7c8] sm:$0xff]  ;;  %v3116_v31 = vld [vmem:[#allocation7 + $0x7a0] sm:$0xff] }
0x184b   :  { %v3060_v20 = vpop.f32.mrf.mxu1 }
0x184c   :  { %v3061_v33 = vadd.f32 %v5376_v4, %v3060_v20  ;;  %v3122_v4 = vld [vmem:[#allocation7 + $0x7d0] sm:$0xff]  ;;  %v3120_v20 = vld [vmem:[#allocation7 + $0x7c0] sm:$0xff] }
0x184e   :  { %v3094_v21 = vmul.f32 0.01, %v3061_v33  ;;  %vm3078_vm0 = vcmp.ge.f32.partialorder %v3061_v33, 0.0 }
0x1850   :  { %v3110_v0 = vsel %vm3078_vm0, %v3061_v33, %v3094_v21  ;;  %v3118_v33 = vld [vmem:[#allocation7 + $0x7b0] sm:$0xff]  ;;  %v3117_v21 = vld [vmem:[#allocation7 + $0x7a8] sm:$0xff] }
0x1851   :  { %3130 = vmatpush.msra.mxu2 %v3110_v0  ;;  %v3114_v0 = vld [vmem:[#allocation7 + $0x790] sm:$0xff] }
0x1853   :  { %3131 = vmatpush.msra.mxu2 %v3109_v47  ;;  %v3112_v47 = vld [vmem:[#allocation7 + $0x780] sm:$0xff] }
0x1855   :  { %3132 = vmatpush.msra.mxu2 %v3108_v14  ;;  %v5438_v14 = vld [vmem:[#allocation2 + $0x78] sm:$0xff] }
0x1857   :  { %3133 = vmatpush.msra.mxu2 %v3107_v23 }
0x1859   :  { %3134 = vmatpush.msra.mxu2 %v3106_v37 }
0x185b   :  { %3135 = vmatpush.msra.mxu2 %v3105_v43 }
0x185d   :  { %3136 = vmatpush.msra.mxu2 %v3104_v41 }
0x185f   :  { %3137 = vmatpush.msra.mxu2 %v3103_v39 }
0x1861   :  { %3138 = vmatpush.msra.mxu2 %v3102_v55 }
0x1863   :  { %3139 = vmatpush.msra.mxu2 %v3101_v19 }
0x1865   :  { %3140 = vmatpush.msra.mxu2 %v3100_v62 }
0x1867   :  { %3141 = vmatpush.msra.mxu2 %v3099_v49 }
0x1869   :  { %3142 = vmatpush.msra.mxu2 %v3098_v59 }
0x186b   :  { %3143 = vmatpush.msra.mxu2 %v3097_v60 }
0x186d   :  { %3144 = vmatpush.msra.mxu2 %v3096_v61 }
0x186f   :  { %3145 = vmatpush.msra.mxu2 %v3095_v63 }
0x1870   :  { %3146 = vmatmul.f32.vlgmr.msra.gmra.mxu2 %v5397_v3 }
0x1878   :  { %3149 = vmatmul.f32.gmra.mxu2 %v5400_v52 }
0x1880   :  { %3152 = vmatmul.f32.gmra.mxu2 %v5403_v11 }
0x1888   :  { %3155 = vmatmul.f32.gmra.mxu2 %v5310_v5  ;;  %v3126_v5 = vld [vmem:[#allocation7 + $0x7f0] sm:$0xff] }
0x1889   :  { %3199 = vmatpush.msra.mxu3 %v3126_v5 }
0x188b   :  { %3200 = vmatpush.msra.mxu3 %v3125_v17 }
0x188d   :  { %3201 = vmatpush.msra.mxu3 %v3124_v8 }
0x188f   :  { %3202 = vmatpush.msra.mxu3 %v3123_v2 }
0x1890   :  { %3158 = vmatmul.f32.gmra.mxu2 %v5407_v40 }
0x1891   :  { %3203 = vmatpush.msra.mxu3 %v3122_v4 }
0x1893   :  { %3204 = vmatpush.msra.mxu3 %v3121_v38 }
0x1895   :  { %3205 = vmatpush.msra.mxu3 %v3120_v20 }
0x1897   :  { %3206 = vmatpush.msra.mxu3 %v3119_v24 }
0x1898   :  { %3161 = vmatmul.f32.gmra.mxu2 %v5410_v10 }
0x1899   :  { %3207 = vmatpush.msra.mxu3 %v3118_v33 }
0x189b   :  { %3208 = vmatpush.msra.mxu3 %v3117_v21 }
0x189d   :  { %3209 = vmatpush.msra.mxu3 %v3116_v31 }
0x189f   :  { %3210 = vmatpush.msra.mxu3 %v3115_v32 }
0x18a0   :  { %3164 = vmatmul.f32.gmra.mxu2 %v5413_v9 }
0x18a1   :  { %3211 = vmatpush.msra.mxu3 %v3114_v0 }
0x18a3   :  { %3212 = vmatpush.msra.mxu3 %v3113_v22 }
0x18a5   :  { %3213 = vmatpush.msra.mxu3 %v3112_v47 }
0x18a8   :  { %3167 = vmatmul.f32.gmra.mxu2 %v5316_v18  ;;  %v5423_v18 = vld [vmem:[#allocation2 + $0x50] sm:$0xff] }
0x18b0   :  { %3170 = vmatmul.f32.gmra.mxu2 %v5417_v6 }
0x18b8   :  { %3173 = vmatmul.f32.gmra.mxu2 %v5420_v25 }
0x18c0   :  { %3176 = vmatmul.f32.gmra.mxu2 %v5423_v18 }
0x18c8   :  { %3179 = vmatmul.f32.gmra.mxu2 %v5426_v15 }
0x18d0   :  { %3182 = vmatmul.f32.gmra.mxu2 %v5429_v29 }
0x18d8   :  { %3185 = vmatmul.f32.gmra.mxu2 %v5432_v16 }
0x18e0   :  { %3188 = vmatmul.f32.gmra.mxu2 %v5435_v48 }
0x18e8   :  { %3191 = vmatmul.f32.gmra.mxu2 %v5438_v14 }
0x18f3   :  { %v3147_v28 = vpop.f32.mrf.mxu2 }
0x18f4   :  { %3214 = vmatmul.f32.vlgmr.msra.gmra.mxu3 %v3147_v28 }
0x18fb   :  { %v3150_v30 = vpop.f32.mrf.mxu2 }
0x18fc   :  { %3217 = vmatmul.f32.gmra.mxu3 %v3150_v30 }
0x1903   :  { %v3153_v23 = vpop.f32.mrf.mxu2 }
0x1904   :  { %3220 = vmatmul.f32.gmra.mxu3 %v3153_v23 }
0x190b   :  { %v3156_v36 = vpop.f32.mrf.mxu2 }
0x190c   :  { %3223 = vmatmul.f32.gmra.mxu3 %v3156_v36 }
0x1913   :  { %v3159_v26 = vpop.f32.mrf.mxu2 }
0x1914   :  { %3226 = vmatmul.f32.gmra.mxu3 %v3159_v26 }
0x191b   :  { %v3162_v37 = vpop.f32.mrf.mxu2 }
0x191c   :  { %3229 = vmatmul.f32.gmra.mxu3 %v3162_v37 }
0x1923   :  { %v3165_v44 = vpop.f32.mrf.mxu2 }
0x1924   :  { %3232 = vmatmul.f32.gmra.mxu3 %v3165_v44 }
0x192b   :  { %v3168_v54 = vpop.f32.mrf.mxu2 }
0x192c   :  { %3235 = vmatmul.f32.gmra.mxu3 %v3168_v54 }
0x1933   :  { %v3171_v43 = vpop.f32.mrf.mxu2 }
0x1934   :  { %3238 = vmatmul.f32.gmra.mxu3 %v3171_v43 }
0x193b   :  { %v3174_v35 = vpop.f32.mrf.mxu2 }
0x193c   :  { %3241 = vmatmul.f32.gmra.mxu3 %v3174_v35 }
0x1943   :  { %v3177_v42 = vpop.f32.mrf.mxu2 }
0x1944   :  { %3244 = vmatmul.f32.gmra.mxu3 %v3177_v42 }
0x194b   :  { %v3180_v41 = vpop.f32.mrf.mxu2 }
0x194c   :  { %3247 = vmatmul.f32.gmra.mxu3 %v3180_v41 }
0x1953   :  { %v3183_v34 = vpop.f32.mrf.mxu2 }
0x1954   :  { %3250 = vmatmul.f32.gmra.mxu3 %v3183_v34 }
0x195b   :  { %v3186_v58 = vpop.f32.mrf.mxu2 }
0x195c   :  { %3253 = vmatmul.f32.gmra.mxu3 %v3186_v58 }
0x1963   :  { %v3189_v39 = vpop.f32.mrf.mxu2 }
0x1964   :  { %3256 = vmatmul.f32.gmra.mxu3 %v3189_v39 }
0x196b   :  { %v3192_v27 = vpop.f32.mrf.mxu2 }
0x196c   :  { %3259 = vmatmul.f32.gmra.mxu3 %v3192_v27 }
0x1977   :  { %v5441_v46 = vpop.f32.mrf.mxu3 }
0x197f   :  { %v5443_v55 = vpop.f32.mrf.mxu3 }
0x1987   :  { %v5445_v56 = vpop.f32.mrf.mxu3 }
0x198f   :  { %v3224_v51 = vpop.f32.mrf.mxu3 }
0x1990   :  { %v3225_v58 = vadd.f32 %v5447_v7, %v3224_v51  ;;  %v3216_v51 = vadd.f32 %v5447_v7, %v5441_v46  ;;  %v5471_v46 = vld [vmem:[#allocation2 + $0x18] sm:$0xff] }
0x1992   :  { %vm3266_vm12 = vcmp.ge.f32.partialorder %v3225_v58, 0.0  ;;  %vm3263_vm15 = vcmp.ge.f32.partialorder %v3216_v51, 0.0 }
0x1997   :  { %v3227_v19 = vpop.f32.mrf.mxu3 }
0x1998   :  { %v3228_v42 = vadd.f32 %v5447_v7, %v3227_v19  ;;  %v3219_v19 = vadd.f32 %v5447_v7, %v5443_v55 }
0x199a   :  { %vm3267_vm11 = vcmp.ge.f32.partialorder %v3228_v42, 0.0  ;;  %vm3264_vm14 = vcmp.ge.f32.partialorder %v3219_v19, 0.0 }
0x199f   :  { %v3230_v53 = vpop.f32.mrf.mxu3 }
0x19a0   :  { %v3231_v54 = vadd.f32 %v5447_v7, %v3230_v53 }
0x19a2   :  { %v3284_v27 = vmul.f32 0.01, %v3231_v54  ;;  %vm3268_vm10 = vcmp.ge.f32.partialorder %v3231_v54, 0.0 }
0x19a7   :  { %v3233_v12 = vpop.f32.mrf.mxu3 }
0x19a8   :  { %v3234_v26 = vadd.f32 %v5447_v7, %v3233_v12  ;;  %v3222_v12 = vadd.f32 %v5447_v7, %v5445_v56  ;;  %v3280_v56 = vmul.f32 0.01, %v3219_v19 }
0x19aa   :  { %v3285_v34 = vmul.f32 0.01, %v3234_v26  ;;  %vm3269_vm9 = vcmp.ge.f32.partialorder %v3234_v26, 0.0  ;;  %vm3265_vm13 = vcmp.ge.f32.partialorder %v3222_v12, 0.0  ;;  %v3296_v55 = vsel %vm3264_vm14, %v3219_v19, %v3280_v56 }
0x19ac   :  { %v3301_v53 = vsel %vm3269_vm9, %v3234_v26, %v3285_v34 }
0x19af   :  { %v3236_v62 = vpop.f32.mrf.mxu3 }
0x19b0   :  { %v3237_v30 = vadd.f32 %v5447_v7, %v3236_v62  ;;  %v3283_v62 = vmul.f32 0.01, %v3228_v42 }
0x19b2   :  { %v3286_v35 = vmul.f32 0.01, %v3237_v30  ;;  %vm3270_vm8 = vcmp.ge.f32.partialorder %v3237_v30, 0.0 }
0x19b4   :  { %v3302_v39 = vsel %vm3270_vm8, %v3237_v30, %v3286_v35 }
0x19b7   :  { %v3239_v13 = vpop.f32.mrf.mxu3 }
0x19b8   :  { %v3240_v22 = vadd.f32 %v5447_v7, %v3239_v13  ;;  %v3300_v13 = vsel %vm3268_vm10, %v3231_v54, %v3284_v27 }
0x19ba   :  { %v3287_v44 = vmul.f32 0.01, %v3240_v22  ;;  %vm3271_vm7 = vcmp.ge.f32.partialorder %v3240_v22, 0.0 }
0x19bc   :  { %v3303_v41 = vsel %vm3271_vm7, %v3240_v22, %v3287_v44  ;;  %v3312_v22 = vld [vmem:[#allocation7 + $0x800] sm:$0xff] }
0x19bf   :  { %v3242_v45 = vpop.f32.mrf.mxu3 }
0x19c0   :  { %v3243_v31 = vadd.f32 %v5447_v7, %v3242_v45  ;;  %v3282_v45 = vmul.f32 0.01, %v3225_v58 }
0x19c2   :  { %v3288_v36 = vmul.f32 0.01, %v3243_v31  ;;  %vm3272_vm6 = vcmp.ge.f32.partialorder %v3243_v31, 0.0 }
0x19c4   :  { %v3304_v43 = vsel %vm3272_vm6, %v3243_v31, %v3288_v36  ;;  %v3315_v31 = vld [vmem:[#allocation7 + $0x818] sm:$0xff] }
0x19c7   :  { %v3245_v49 = vpop.f32.mrf.mxu3 }
0x19c8   :  { %v3246_v24 = vadd.f32 %v5447_v7, %v3245_v49  ;;  %v3299_v49 = vsel %vm3267_vm11, %v3228_v42, %v3283_v62 }
0x19ca   :  { %v3289_v28 = vmul.f32 0.01, %v3246_v24  ;;  %vm3273_vm5 = vcmp.ge.f32.partialorder %v3246_v24, 0.0 }
0x19cc   :  { %v3305_v37 = vsel %vm3273_vm5, %v3246_v24, %v3289_v28  ;;  %v3318_v24 = vld [vmem:[#allocation7 + $0x830] sm:$0xff] }
0x19cf   :  { %v3248_v50 = vpop.f32.mrf.mxu3 }
0x19d0   :  { %v3249_v4 = vadd.f32 %v5447_v7, %v3248_v50  ;;  %v3281_v50 = vmul.f32 0.01, %v3222_v12 }
0x19d2   :  { %v3290_v0 = vmul.f32 0.01, %v3249_v4  ;;  %vm3274_vm4 = vcmp.ge.f32.partialorder %v3249_v4, 0.0 }
0x19d4   :  { %v3306_v23 = vsel %vm3274_vm4, %v3249_v4, %v3290_v0  ;;  %v3321_v4 = vld [vmem:[#allocation7 + $0x848] sm:$0xff] }
0x19d5   :  { %v3313_v0 = vld [vmem:[#allocation7 + $0x808] sm:$0xff] }
0x19d7   :  { %v3251_v59 = vpop.f32.mrf.mxu3 }
0x19d8   :  { %v3252_v17 = vadd.f32 %v5447_v7, %v3251_v59  ;;  %v3298_v59 = vsel %vm3266_vm12, %v3225_v58, %v3282_v45 }
0x19da   :  { %v3291_v21 = vmul.f32 0.01, %v3252_v17  ;;  %vm3275_vm3 = vcmp.ge.f32.partialorder %v3252_v17, 0.0 }
0x19dc   :  { %v3307_v47 = vsel %vm3275_vm3, %v3252_v17, %v3291_v21  ;;  %v3324_v17 = vld [vmem:[#allocation7 + $0x860] sm:$0xff] }
0x19dd   :  { %v3316_v21 = vld [vmem:[#allocation7 + $0x820] sm:$0xff] }
0x19df   :  { %v3254_v57 = vpop.f32.mrf.mxu3 }
0x19e0   :  { %v3255_v1 = vadd.f32 %v5447_v7, %v3254_v57  ;;  %v3297_v57 = vsel %vm3265_vm13, %v3222_v12, %v3281_v50 }
0x19e2   :  { %v3292_v20 = vmul.f32 0.01, %v3255_v1  ;;  %vm3276_vm2 = vcmp.ge.f32.partialorder %v3255_v1, 0.0 }
0x19e4   :  { %v3308_v32 = vsel %vm3276_vm2, %v3255_v1, %v3292_v20  ;;  %v3326_v1 = vld [vmem:[#allocation7 + $0x870] sm:$0xff]  ;;  %v3319_v20 = vld [vmem:[#allocation7 + $0x838] sm:$0xff] }
0x19e7   :  { %v3257_v60 = vpop.f32.mrf.mxu3 }
0x19e8   :  { %v3258_v61 = vadd.f32 %v5447_v7, %v3257_v60  ;;  %v3279_v60 = vmul.f32 0.01, %v3216_v51 }
0x19ea   :  { %v3293_v2 = vmul.f32 0.01, %v3258_v61  ;;  %vm3277_vm1 = vcmp.ge.f32.partialorder %v3258_v61, 0.0 }
0x19ec   :  { %v3309_v33 = vsel %vm3277_vm1, %v3258_v61, %v3293_v2  ;;  %v3295_v61 = vsel %vm3263_vm15, %v3216_v51, %v3279_v60  ;;  %v3322_v2 = vld [vmem:[#allocation7 + $0x850] sm:$0xff] }
0x19ef   :  { %v3260_v63 = vpop.f32.mrf.mxu3 }
0x19f0   :  { %v3261_v5 = vadd.f32 %v5447_v7, %v3260_v63  ;;  %v5477_v7 = vld [vmem:[#allocation2 + $0x38] sm:$0xff] }
0x19f1   :  { %v3327_v63 = vld [vmem:[#allocation7 + $0x878] sm:$0xff] }
0x19f2   :  { %v3294_v8 = vmul.f32 0.01, %v3261_v5  ;;  %vm3278_vm0 = vcmp.ge.f32.partialorder %v3261_v5, 0.0  ;;  %3398 = vmatpush.msrb.mxu1 %v3327_v63 }
0x19f4   :  { %v3310_v38 = vsel %vm3278_vm0, %v3261_v5, %v3294_v8  ;;  %v3325_v5 = vld [vmem:[#allocation7 + $0x868] sm:$0xff]  ;;  %3399 = vmatpush.msrb.mxu1 %v3326_v1  ;;  %v3323_v8 = vld [vmem:[#allocation7 + $0x858] sm:$0xff] }
0x19f5   :  { %3330 = vmatpush.msra.mxu0 %v3310_v38  ;;  %v3320_v38 = vld [vmem:[#allocation7 + $0x840] sm:$0xff] }
0x19f6   :  { %3400 = vmatpush.msrb.mxu1 %v3325_v5 }
0x19f7   :  { %3331 = vmatpush.msra.mxu0 %v3309_v33  ;;  %v3317_v33 = vld [vmem:[#allocation7 + $0x828] sm:$0xff] }
0x19f8   :  { %3401 = vmatpush.msrb.mxu1 %v3324_v17 }
0x19f9   :  { %3332 = vmatpush.msra.mxu0 %v3308_v32  ;;  %v3314_v32 = vld [vmem:[#allocation7 + $0x810] sm:$0xff] }
0x19fa   :  { %3402 = vmatpush.msrb.mxu1 %v3323_v8 }
0x19fb   :  { %3333 = vmatpush.msra.mxu0 %v3307_v47 }
0x19fc   :  { %3403 = vmatpush.msrb.mxu1 %v3322_v2 }
0x19fd   :  { %3334 = vmatpush.msra.mxu0 %v3306_v23 }
0x19fe   :  { %3404 = vmatpush.msrb.mxu1 %v3321_v4 }
0x19ff   :  { %3335 = vmatpush.msra.mxu0 %v3305_v37 }
0x1a00   :  { %3405 = vmatpush.msrb.mxu1 %v3320_v38 }
0x1a01   :  { %3336 = vmatpush.msra.mxu0 %v3304_v43 }
0x1a02   :  { %3406 = vmatpush.msrb.mxu1 %v3319_v20 }
0x1a03   :  { %3337 = vmatpush.msra.mxu0 %v3303_v41 }
0x1a04   :  { %3407 = vmatpush.msrb.mxu1 %v3318_v24 }
0x1a05   :  { %3338 = vmatpush.msra.mxu0 %v3302_v39 }
0x1a06   :  { %3408 = vmatpush.msrb.mxu1 %v3317_v33 }
0x1a07   :  { %3339 = vmatpush.msra.mxu0 %v3301_v53 }
0x1a08   :  { %3409 = vmatpush.msrb.mxu1 %v3316_v21 }
0x1a09   :  { %3340 = vmatpush.msra.mxu0 %v3300_v13 }
0x1a0a   :  { %3410 = vmatpush.msrb.mxu1 %v3315_v31 }
0x1a0b   :  { %3341 = vmatpush.msra.mxu0 %v3299_v49 }
0x1a0c   :  { %3411 = vmatpush.msrb.mxu1 %v3314_v32 }
0x1a0d   :  { %3342 = vmatpush.msra.mxu0 %v3298_v59 }
0x1a0e   :  { %3412 = vmatpush.msrb.mxu1 %v3313_v0 }
0x1a0f   :  { %3343 = vmatpush.msra.mxu0 %v3297_v57 }
0x1a10   :  { %3413 = vmatpush.msrb.mxu1 %v3312_v22 }
0x1a11   :  { %3344 = vmatpush.msra.mxu0 %v3296_v55 }
0x1a13   :  { %3345 = vmatpush.msra.mxu0 %v3295_v61  ;;  %v5494_v61 = vld [vmem:[#allocation8 + $0x10] ss:$0 sm:$0xff] }
0x1a14   :  { %3346 = vmatmul.f32.vlgmr.msra.gmra.mxu0 %v5397_v3 }
0x1a1c   :  { %3349 = vmatmul.f32.gmra.mxu0 %v5400_v52 }
0x1a24   :  { %3352 = vmatmul.f32.gmra.mxu0 %v5403_v11 }
0x1a2c   :  { %3355 = vmatmul.f32.gmra.mxu0 %v5471_v46 }
0x1a34   :  { %3358 = vmatmul.f32.gmra.mxu0 %v5407_v40 }
0x1a3c   :  { %3361 = vmatmul.f32.gmra.mxu0 %v5410_v10 }
0x1a44   :  { %3364 = vmatmul.f32.gmra.mxu0 %v5413_v9 }
0x1a4c   :  { %3367 = vmatmul.f32.gmra.mxu0 %v5477_v7 }
0x1a54   :  { %3370 = vmatmul.f32.gmra.mxu0 %v5417_v6 }
0x1a5c   :  { %3373 = vmatmul.f32.gmra.mxu0 %v5420_v25 }
0x1a64   :  { %3376 = vmatmul.f32.gmra.mxu0 %v5423_v18 }
0x1a6c   :  { %3379 = vmatmul.f32.gmra.mxu0 %v5426_v15 }
0x1a74   :  { %3382 = vmatmul.f32.gmra.mxu0 %v5429_v29 }
0x1a7c   :  { %3385 = vmatmul.f32.gmra.mxu0 %v5432_v16 }
0x1a84   :  { %3388 = vmatmul.f32.gmra.mxu0 %v5435_v48 }
0x1a8c   :  { %3391 = vmatmul.f32.gmra.mxu0 %v5438_v14 }
0x1a91   :  { %v3347_v47 = vpop.f32.mrf.mxu0 }
0x1a92   :  { %3414 = vmatmul.f32.vlgmr.msrb.gmra.mxu1 %v3347_v47 }
0x1a99   :  { %v3350_v28 = vpop.f32.mrf.mxu0 }
0x1a9a   :  { %3417 = vmatmul.f32.gmra.mxu1 %v3350_v28 }
0x1aa1   :  { %v3353_v30 = vpop.f32.mrf.mxu0 }
0x1aa2   :  { %3420 = vmatmul.f32.gmra.mxu1 %v3353_v30 }
0x1aa9   :  { %v3356_v23 = vpop.f32.mrf.mxu0 }
0x1aaa   :  { %3423 = vmatmul.f32.gmra.mxu1 %v3356_v23 }
0x1ab1   :  { %v3359_v36 = vpop.f32.mrf.mxu0 }
0x1ab2   :  { %3426 = vmatmul.f32.gmra.mxu1 %v3359_v36 }
0x1ab9   :  { %v3362_v26 = vpop.f32.mrf.mxu0 }
0x1aba   :  { %3429 = vmatmul.f32.gmra.mxu1 %v3362_v26 }
0x1ac1   :  { %v3365_v37 = vpop.f32.mrf.mxu0 }
0x1ac2   :  { %3432 = vmatmul.f32.gmra.mxu1 %v3365_v37 }
0x1ac9   :  { %v3368_v44 = vpop.f32.mrf.mxu0 }
0x1aca   :  { %3435 = vmatmul.f32.gmra.mxu1 %v3368_v44 }
0x1ad1   :  { %v3371_v54 = vpop.f32.mrf.mxu0 }
0x1ad2   :  { %3438 = vmatmul.f32.gmra.mxu1 %v3371_v54 }
0x1ad9   :  { %v3374_v43 = vpop.f32.mrf.mxu0 }
0x1ada   :  { %3441 = vmatmul.f32.gmra.mxu1 %v3374_v43 }
0x1ae1   :  { %v3377_v35 = vpop.f32.mrf.mxu0 }
0x1ae2   :  { %3444 = vmatmul.f32.gmra.mxu1 %v3377_v35 }
0x1ae9   :  { %v3380_v42 = vpop.f32.mrf.mxu0 }
0x1aea   :  { %3447 = vmatmul.f32.gmra.mxu1 %v3380_v42 }
0x1af1   :  { %v3383_v41 = vpop.f32.mrf.mxu0 }
0x1af2   :  { %3450 = vmatmul.f32.gmra.mxu1 %v3383_v41 }
0x1af9   :  { %v3386_v34 = vpop.f32.mrf.mxu0 }
0x1afa   :  { %3453 = vmatmul.f32.gmra.mxu1 %v3386_v34 }
0x1b01   :  { %v3389_v58 = vpop.f32.mrf.mxu0 }
0x1b02   :  { %3456 = vmatmul.f32.gmra.mxu1 %v3389_v58 }
0x1b09   :  { %v3392_v39 = vpop.f32.mrf.mxu0 }
0x1b0a   :  { %3459 = vmatmul.f32.gmra.mxu1 %v3392_v39 }
0x1b0f   :  { %v5488_v27 = vpop.f32.mrf.mxu1 }
0x1b17   :  { %v5490_v12 = vpop.f32.mrf.mxu1 }
0x1b1f   :  { %v5492_v53 = vpop.f32.mrf.mxu1 }
0x1b27   :  { %v3424_v62 = vpop.f32.mrf.mxu1 }
0x1b28   :  { %v3425_v39 = vadd.f32 %v5494_v61, %v3424_v62  ;;  %v3416_v62 = vadd.f32 %v5494_v61, %v5488_v27  ;;  %v3527_v27 = vld [vmem:[#allocation7 + $0x8f8] sm:$0xff] }
0x1b29   :  { %3598 = vmatpush.msrb.mxu3 %v3527_v27 }
0x1b2a   :  { %vm3466_vm12 = vcmp.ge.f32.partialorder %v3425_v39, 0.0  ;;  %vm3463_vm15 = vcmp.ge.f32.partialorder %v3416_v62, 0.0 }
0x1b2f   :  { %v3427_v19 = vpop.f32.mrf.mxu1 }
0x1b30   :  { %v3428_v41 = vadd.f32 %v5494_v61, %v3427_v19  ;;  %v3419_v19 = vadd.f32 %v5494_v61, %v5490_v12 }
0x1b32   :  { %vm3467_vm11 = vcmp.ge.f32.partialorder %v3428_v41, 0.0  ;;  %vm3464_vm14 = vcmp.ge.f32.partialorder %v3419_v19, 0.0 }
0x1b37   :  { %v3430_v13 = vpop.f32.mrf.mxu1 }
0x1b38   :  { %v3431_v43 = vadd.f32 %v5494_v61, %v3430_v13 }
0x1b3a   :  { %vm3468_vm10 = vcmp.ge.f32.partialorder %v3431_v43, 0.0 }
0x1b3f   :  { %v3433_v45 = vpop.f32.mrf.mxu1 }
0x1b40   :  { %v3434_v37 = vadd.f32 %v5494_v61, %v3433_v45  ;;  %v3484_v45 = vmul.f32 0.01, %v3431_v43 }
0x1b42   :  { %v3485_v58 = vmul.f32 0.01, %v3434_v37  ;;  %vm3469_vm9 = vcmp.ge.f32.partialorder %v3434_v37, 0.0 }
0x1b44   :  { %v3501_v13 = vsel %vm3469_vm9, %v3434_v37, %v3485_v58 }
0x1b47   :  { %v3436_v51 = vpop.f32.mrf.mxu1 }
0x1b48   :  { %v3437_v23 = vadd.f32 %v5494_v61, %v3436_v51 }
0x1b4a   :  { %v3486_v42 = vmul.f32 0.01, %v3437_v23  ;;  %vm3470_vm8 = vcmp.ge.f32.partialorder %v3437_v23, 0.0 }
0x1b4c   :  { %v3502_v51 = vsel %vm3470_vm8, %v3437_v23, %v3486_v42 }
0x1b4f   :  { %v3439_v49 = vpop.f32.mrf.mxu1 }
0x1b50   :  { %v3440_v47 = vadd.f32 %v5494_v61, %v3439_v49  ;;  %v3422_v49 = vadd.f32 %v5494_v61, %v5492_v53  ;;  %v3480_v53 = vmul.f32 0.01, %v3419_v19 }
0x1b52   :  { %v3487_v44 = vmul.f32 0.01, %v3440_v47  ;;  %vm3471_vm7 = vcmp.ge.f32.partialorder %v3440_v47, 0.0  ;;  %vm3465_vm13 = vcmp.ge.f32.partialorder %v3422_v49, 0.0  ;;  %v3496_v12 = vsel %vm3464_vm14, %v3419_v19, %v3480_v53 }
0x1b54   :  { %v3503_v34 = vsel %vm3471_vm7, %v3440_v47, %v3487_v44 }
0x1b57   :  { %v3442_v50 = vpop.f32.mrf.mxu1 }
0x1b58   :  { %v3443_v32 = vadd.f32 %v5494_v61, %v3442_v50  ;;  %v3483_v50 = vmul.f32 0.01, %v3428_v41 }
0x1b5a   :  { %v3488_v36 = vmul.f32 0.01, %v3443_v32  ;;  %vm3472_vm6 = vcmp.ge.f32.partialorder %v3443_v32, 0.0 }
0x1b5c   :  { %v3504_v35 = vsel %vm3472_vm6, %v3443_v32, %v3488_v36 }
0x1b5f   :  { %v3445_v59 = vpop.f32.mrf.mxu1 }
0x1b60   :  { %v3446_v33 = vadd.f32 %v5494_v61, %v3445_v59  ;;  %v3500_v59 = vsel %vm3468_vm10, %v3431_v43, %v3484_v45 }
0x1b62   :  { %v3489_v28 = vmul.f32 0.01, %v3446_v33  ;;  %vm3473_vm5 = vcmp.ge.f32.partialorder %v3446_v33, 0.0 }
0x1b64   :  { %v3505_v54 = vsel %vm3473_vm5, %v3446_v33, %v3489_v28 }
0x1b67   :  { %v3448_v56 = vpop.f32.mrf.mxu1 }
0x1b68   :  { %v3449_v38 = vadd.f32 %v5494_v61, %v3448_v56  ;;  %v3482_v56 = vmul.f32 0.01, %v3425_v39 }
0x1b6a   :  { %v3490_v0 = vmul.f32 0.01, %v3449_v38  ;;  %vm3474_vm4 = vcmp.ge.f32.partialorder %v3449_v38, 0.0 }
0x1b6c   :  { %v3506_v26 = vsel %vm3474_vm4, %v3449_v38, %v3490_v0  ;;  %v3513_v38 = vld [vmem:[#allocation7 + $0x888] sm:$0xff] }
0x1b6f   :  { %v3451_v57 = vpop.f32.mrf.mxu1 }
0x1b70   :  { %v3452_v8 = vadd.f32 %v5494_v61, %v3451_v57  ;;  %v3499_v57 = vsel %vm3467_vm11, %v3428_v41, %v3483_v50 }
0x1b72   :  { %v3491_v21 = vmul.f32 0.01, %v3452_v8  ;;  %vm3475_vm3 = vcmp.ge.f32.partialorder %v3452_v8, 0.0 }
0x1b74   :  { %v3507_v30 = vsel %vm3475_vm3, %v3452_v8, %v3491_v21  ;;  %v3516_v8 = vld [vmem:[#allocation7 + $0x8a0] sm:$0xff] }
0x1b77   :  { %v3454_v60 = vpop.f32.mrf.mxu1 }
0x1b78   :  { %v3455_v5 = vadd.f32 %v5494_v61, %v3454_v60  ;;  %v3481_v60 = vmul.f32 0.01, %v3422_v49 }
0x1b7a   :  { %v3492_v20 = vmul.f32 0.01, %v3455_v5  ;;  %vm3476_vm2 = vcmp.ge.f32.partialorder %v3455_v5, 0.0 }
0x1b7c   :  { %v3508_v22 = vsel %vm3476_vm2, %v3455_v5, %v3492_v20 }
0x1b7f   :  { %v3457_v55 = vpop.f32.mrf.mxu1 }
0x1b80   :  { %v3458_v63 = vadd.f32 %v5494_v61, %v3457_v55  ;;  %v3498_v55 = vsel %vm3466_vm12, %v3425_v39, %v3482_v56 }
0x1b82   :  { %v3493_v2 = vmul.f32 0.01, %v3458_v63  ;;  %vm3477_vm1 = vcmp.ge.f32.partialorder %v3458_v63, 0.0 }
0x1b84   :  { %v3509_v31 = vsel %vm3477_vm1, %v3458_v63, %v3493_v2  ;;  %v3497_v63 = vsel %vm3465_vm13, %v3422_v49, %v3481_v60  ;;  %v3515_v2 = vld [vmem:[#allocation7 + $0x898] sm:$0xff]  ;;  %v5537_v49 = vld [vmem:[#allocation8 + $0x11] ss:$0 sm:$0xff] }
0x1b87   :  { %v3460_v1 = vpop.f32.mrf.mxu1 }
0x1b88   :  { %v3461_v17 = vadd.f32 %v5494_v61, %v3460_v1  ;;  %v3479_v1 = vmul.f32 0.01, %v3416_v62  ;;  %v3526_v61 = vld [vmem:[#allocation7 + $0x8f0] sm:$0xff] }
0x1b89   :  { %3599 = vmatpush.msrb.mxu3 %v3526_v61 }
0x1b8a   :  { %vm3478_vm0 = vcmp.ge.f32.partialorder %v3461_v17, 0.0  ;;  %v3494_v4 = vmul.f32 0.01, %v3461_v17  ;;  %v3495_v5 = vsel %vm3463_vm15, %v3416_v62, %v3479_v1 }
0x1b8c   :  { %v3510_v24 = vsel %vm3478_vm0, %v3461_v17, %v3494_v4  ;;  %v3518_v17 = vld [vmem:[#allocation7 + $0x8b0] sm:$0xff] }
0x1b8d   :  { %3530 = vmatpush.msrb.mxu2 %v3510_v24  ;;  %v3514_v4 = vld [vmem:[#allocation7 + $0x890] sm:$0xff] }
0x1b8f   :  { %3531 = vmatpush.msrb.mxu2 %v3509_v31 }
0x1b91   :  { %3532 = vmatpush.msrb.mxu2 %v3508_v22 }
0x1b93   :  { %3533 = vmatpush.msrb.mxu2 %v3507_v30 }
0x1b95   :  { %3534 = vmatpush.msrb.mxu2 %v3506_v26 }
0x1b97   :  { %3535 = vmatpush.msrb.mxu2 %v3505_v54 }
0x1b99   :  { %3536 = vmatpush.msrb.mxu2 %v3504_v35 }
0x1b9b   :  { %3537 = vmatpush.msrb.mxu2 %v3503_v34 }
0x1b9d   :  { %3538 = vmatpush.msrb.mxu2 %v3502_v51 }
0x1b9f   :  { %3539 = vmatpush.msrb.mxu2 %v3501_v13 }
0x1ba1   :  { %3540 = vmatpush.msrb.mxu2 %v3500_v59 }
0x1ba3   :  { %3541 = vmatpush.msrb.mxu2 %v3499_v57 }
0x1ba5   :  { %3542 = vmatpush.msrb.mxu2 %v3498_v55 }
0x1ba7   :  { %3543 = vmatpush.msrb.mxu2 %v3497_v63 }
0x1ba9   :  { %3544 = vmatpush.msrb.mxu2 %v3496_v12 }
0x1bab   :  { %3545 = vmatpush.msrb.mxu2 %v3495_v5 }
0x1bac   :  { %3546 = vmatmul.f32.vlgmr.msrb.gmra.mxu2 %v5397_v3  ;;  %v3525_v3 = vld [vmem:[#allocation7 + $0x8e8] sm:$0xff] }
0x1bad   :  { %3600 = vmatpush.msrb.mxu3 %v3525_v3 }
0x1bb4   :  { %3549 = vmatmul.f32.gmra.mxu2 %v5400_v52  ;;  %v3524_v52 = vld [vmem:[#allocation7 + $0x8e0] sm:$0xff] }
0x1bb5   :  { %3601 = vmatpush.msrb.mxu3 %v3524_v52 }
0x1bbc   :  { %3552 = vmatmul.f32.gmra.mxu2 %v5403_v11  ;;  %v3523_v11 = vld [vmem:[#allocation7 + $0x8d8] sm:$0xff] }
0x1bbd   :  { %3602 = vmatpush.msrb.mxu3 %v3523_v11 }
0x1bc4   :  { %3555 = vmatmul.f32.gmra.mxu2 %v5471_v46 }
0x1bcc   :  { %3558 = vmatmul.f32.gmra.mxu2 %v5407_v40  ;;  %v3522_v40 = vld [vmem:[#allocation7 + $0x8d0] sm:$0xff] }
0x1bcd   :  { %3603 = vmatpush.msrb.mxu3 %v3522_v40 }
0x1bd4   :  { %3561 = vmatmul.f32.gmra.mxu2 %v5410_v10  ;;  %v3521_v10 = vld [vmem:[#allocation7 + $0x8c8] sm:$0xff] }
0x1bd5   :  { %3604 = vmatpush.msrb.mxu3 %v3521_v10 }
0x1bdc   :  { %3564 = vmatmul.f32.gmra.mxu2 %v5413_v9  ;;  %v3520_v9 = vld [vmem:[#allocation7 + $0x8c0] sm:$0xff] }
0x1bdd   :  { %3605 = vmatpush.msrb.mxu3 %v3520_v9 }
0x1be4   :  { %3567 = vmatmul.f32.gmra.mxu2 %v5477_v7 }
0x1bec   :  { %3570 = vmatmul.f32.gmra.mxu2 %v5417_v6  ;;  %v3519_v6 = vld [vmem:[#allocation7 + $0x8b8] sm:$0xff] }
0x1bed   :  { %3606 = vmatpush.msrb.mxu3 %v3519_v6 }
0x1bef   :  { %3607 = vmatpush.msrb.mxu3 %v3518_v17 }
0x1bf4   :  { %3573 = vmatmul.f32.gmra.mxu2 %v5420_v25  ;;  %v3517_v25 = vld [vmem:[#allocation7 + $0x8a8] sm:$0xff] }
0x1bf5   :  { %3608 = vmatpush.msrb.mxu3 %v3517_v25 }
0x1bf7   :  { %3609 = vmatpush.msrb.mxu3 %v3516_v8 }
0x1bf9   :  { %3610 = vmatpush.msrb.mxu3 %v3515_v2 }
0x1bfb   :  { %3611 = vmatpush.msrb.mxu3 %v3514_v4 }
0x1bfc   :  { %3576 = vmatmul.f32.gmra.mxu2 %v5423_v18  ;;  %v3512_v18 = vld [vmem:[#allocation7 + $0x880] sm:$0xff] }
0x1bfd   :  { %3612 = vmatpush.msrb.mxu3 %v3513_v38 }
0x1bff   :  { %3613 = vmatpush.msrb.mxu3 %v3512_v18 }
0x1c04   :  { %3579 = vmatmul.f32.gmra.mxu2 %v5426_v15 }
0x1c0c   :  { %3582 = vmatmul.f32.gmra.mxu2 %v5429_v29 }
0x1c14   :  { %3585 = vmatmul.f32.gmra.mxu2 %v5432_v16 }
0x1c1c   :  { %3588 = vmatmul.f32.gmra.mxu2 %v5435_v48 }
0x1c24   :  { %3591 = vmatmul.f32.gmra.mxu2 %v5438_v14 }
0x1c2f   :  { %v3547_v15 = vpop.f32.mrf.mxu2 }
0x1c30   :  { %3614 = vmatmul.f32.vlgmr.msrb.gmra.mxu3 %v3547_v15 }
0x1c37   :  { %v3550_v20 = vpop.f32.mrf.mxu2 }
0x1c38   :  { %3617 = vmatmul.f32.gmra.mxu3 %v3550_v20 }
0x1c3f   :  { %v3553_v24 = vpop.f32.mrf.mxu2 }
0x1c40   :  { %3620 = vmatmul.f32.gmra.mxu3 %v3553_v24 }
0x1c47   :  { %v3556_v33 = vpop.f32.mrf.mxu2 }
0x1c48   :  { %3623 = vmatmul.f32.gmra.mxu3 %v3556_v33 }
0x1c4f   :  { %v3559_v21 = vpop.f32.mrf.mxu2 }
0x1c50   :  { %3626 = vmatmul.f32.gmra.mxu3 %v3559_v21 }
0x1c57   :  { %v3562_v29 = vpop.f32.mrf.mxu2 }
0x1c58   :  { %3629 = vmatmul.f32.gmra.mxu3 %v3562_v29 }
0x1c5f   :  { %v3565_v31 = vpop.f32.mrf.mxu2 }
0x1c60   :  { %3632 = vmatmul.f32.gmra.mxu3 %v3565_v31 }
0x1c67   :  { %v3568_v32 = vpop.f32.mrf.mxu2 }
0x1c68   :  { %3635 = vmatmul.f32.gmra.mxu3 %v3568_v32 }
0x1c6f   :  { %v3571_v16 = vpop.f32.mrf.mxu2 }
0x1c70   :  { %3638 = vmatmul.f32.gmra.mxu3 %v3571_v16 }
0x1c77   :  { %v3574_v48 = vpop.f32.mrf.mxu2 }
0x1c78   :  { %3641 = vmatmul.f32.gmra.mxu3 %v3574_v48 }
0x1c7f   :  { %v3577_v14 = vpop.f32.mrf.mxu2 }
0x1c80   :  { %3644 = vmatmul.f32.gmra.mxu3 %v3577_v14 }
0x1c87   :  { %v3580_v0 = vpop.f32.mrf.mxu2 }
0x1c88   :  { %3647 = vmatmul.f32.gmra.mxu3 %v3580_v0 }
0x1c8f   :  { %v3583_v22 = vpop.f32.mrf.mxu2 }
0x1c90   :  { %3650 = vmatmul.f32.gmra.mxu3 %v3583_v22 }
0x1c97   :  { %v3586_v47 = vpop.f32.mrf.mxu2 }
0x1c98   :  { %3653 = vmatmul.f32.gmra.mxu3 %v3586_v47 }
0x1c9f   :  { %v3589_v28 = vpop.f32.mrf.mxu2 }
0x1ca0   :  { %3656 = vmatmul.f32.gmra.mxu3 %v3589_v28 }
0x1ca7   :  { %v3592_v30 = vpop.f32.mrf.mxu2 }
0x1ca8   :  { %3659 = vmatmul.f32.gmra.mxu3 %v3592_v30 }
0x1cb3   :  { %v5531_v23 = vpop.f32.mrf.mxu3 }
0x1cb4   :  { %v3616_v14 = vadd.f32 %v5537_v49, %v5531_v23  ;;  %v5561_v23 = vld [vmem:[#allocation2 + $0x8] sm:$0xff] }
0x1cb6   :  { %vm3663_vm15 = vcmp.ge.f32.partialorder %v3616_v14, 0.0 }
0x1cbb   :  { %v5533_v36 = vpop.f32.mrf.mxu3 }
0x1cbc   :  { %v3619_v32 = vadd.f32 %v5537_v49, %v5533_v36 }
0x1cbe   :  { %v3680_v28 = vmul.f32 0.01, %v3619_v32  ;;  %vm3664_vm14 = vcmp.ge.f32.partialorder %v3619_v32, 0.0 }
0x1cc0   :  { %v3696_v36 = vsel %vm3664_vm14, %v3619_v32, %v3680_v28 }
0x1cc3   :  { %v5535_v26 = vpop.f32.mrf.mxu3 }
0x1cc4   :  { %v3622_v21 = vadd.f32 %v5537_v49, %v5535_v26  ;;  %v3679_v26 = vmul.f32 0.01, %v3616_v14 }
0x1cc6   :  { %v3681_v22 = vmul.f32 0.01, %v3622_v21  ;;  %vm3665_vm13 = vcmp.ge.f32.partialorder %v3622_v21, 0.0 }
0x1cc8   :  { %v3697_v30 = vsel %vm3665_vm13, %v3622_v21, %v3681_v22 }
0x1ccb   :  { %v3624_v37 = vpop.f32.mrf.mxu3 }
0x1ccc   :  { %v3625_v20 = vadd.f32 %v5537_v49, %v3624_v37  ;;  %v3695_v37 = vsel %vm3663_vm15, %v3616_v14, %v3679_v26  ;;  %v5610_v26 = vld [vmem:[#allocation8 + $0x12] ss:$0 sm:$0xff] }
0x1cce   :  { %v3682_v48 = vmul.f32 0.01, %v3625_v20  ;;  %vm3666_vm12 = vcmp.ge.f32.partialorder %v3625_v20, 0.0 }
0x1cd0   :  { %v3698_v47 = vsel %vm3666_vm12, %v3625_v20, %v3682_v48 }
0x1cd3   :  { %v3627_v44 = vpop.f32.mrf.mxu3 }
0x1cd4   :  { %v3628_v38 = vadd.f32 %v5537_v49, %v3627_v44  ;;  %v5558_v44 = vld [vmem:[#allocation2] sm:$0xff] }
0x1cd6   :  { %v3683_v31 = vmul.f32 0.01, %v3628_v38  ;;  %vm3667_vm11 = vcmp.ge.f32.partialorder %v3628_v38, 0.0 }
0x1cd8   :  { %v3699_v0 = vsel %vm3667_vm11, %v3628_v38, %v3683_v31 }
0x1cdb   :  { %v3630_v54 = vpop.f32.mrf.mxu3 }
0x1cdc   :  { %v3631_v8 = vadd.f32 %v5537_v49, %v3630_v54  ;;  %v5564_v54 = vld [vmem:[#allocation2 + $0x10] sm:$0xff] }
0x1cde   :  { %v3684_v33 = vmul.f32 0.01, %v3631_v8  ;;  %vm3668_vm10 = vcmp.ge.f32.partialorder %v3631_v8, 0.0 }
0x1ce0   :  { %v3700_v16 = vsel %vm3668_vm10, %v3631_v8, %v3684_v33 }
0x1ce3   :  { %v3633_v43 = vpop.f32.mrf.mxu3 }
0x1ce4   :  { %v3634_v6 = vadd.f32 %v5537_v49, %v3633_v43  ;;  %v5568_v43 = vld [vmem:[#allocation2 + $0x20] sm:$0xff] }
0x1ce6   :  { %v3685_v15 = vmul.f32 0.01, %v3634_v6  ;;  %vm3669_vm9 = vcmp.ge.f32.partialorder %v3634_v6, 0.0 }
0x1ce8   :  { %v3701_v29 = vsel %vm3669_vm9, %v3634_v6, %v3685_v15 }
0x1ceb   :  { %v3636_v35 = vpop.f32.mrf.mxu3 }
0x1cec   :  { %v3637_v40 = vadd.f32 %v5537_v49, %v3636_v35  ;;  %v5571_v35 = vld [vmem:[#allocation2 + $0x28] sm:$0xff] }
0x1cee   :  { %v3686_v4 = vmul.f32 0.01, %v3637_v40  ;;  %vm3670_vm8 = vcmp.ge.f32.partialorder %v3637_v40, 0.0 }
0x1cf0   :  { %v3702_v24 = vsel %vm3670_vm8, %v3637_v40, %v3686_v4 }
0x1cf3   :  { %v3639_v42 = vpop.f32.mrf.mxu3 }
0x1cf4   :  { %v3640_v3 = vadd.f32 %v5537_v49, %v3639_v42  ;;  %v5574_v42 = vld [vmem:[#allocation2 + $0x30] sm:$0xff] }
0x1cf6   :  { %v3687_v17 = vmul.f32 0.01, %v3640_v3  ;;  %vm3671_vm7 = vcmp.ge.f32.partialorder %v3640_v3, 0.0 }
0x1cf8   :  { %v3703_v18 = vsel %vm3671_vm7, %v3640_v3, %v3687_v17 }
0x1cfb   :  { %v3642_v41 = vpop.f32.mrf.mxu3 }
0x1cfc   :  { %v3643_v5 = vadd.f32 %v5537_v49, %v3642_v41  ;;  %v3727_v41 = vld [vmem:[#allocation7 + $0x978] sm:$0xff] }
0x1cfd   :  { %3798 = vmatpush.msra.mxu1 %v3727_v41 }
0x1cfe   :  { %v3688_v10 = vmul.f32 0.01, %v3643_v5  ;;  %vm3672_vm6 = vcmp.ge.f32.partialorder %v3643_v5, 0.0 }
0x1d00   :  { %v3704_v2 = vsel %vm3672_vm6, %v3643_v5, %v3688_v10  ;;  %v5596_v5 = vld [vmem:[#allocation2 + $0x70] sm:$0xff] }
0x1d03   :  { %v3645_v34 = vpop.f32.mrf.mxu3 }
0x1d04   :  { %v3646_v63 = vadd.f32 %v5537_v49, %v3645_v34  ;;  %v5578_v34 = vld [vmem:[#allocation2 + $0x40] sm:$0xff] }
0x1d06   :  { %v3689_v52 = vmul.f32 0.01, %v3646_v63  ;;  %vm3673_vm5 = vcmp.ge.f32.partialorder %v3646_v63, 0.0 }
0x1d08   :  { %v3705_v25 = vsel %vm3673_vm5, %v3646_v63, %v3689_v52  ;;  %v3712_v63 = vld [vmem:[#allocation7 + $0x900] sm:$0xff] }
0x1d0b   :  { %v3648_v58 = vpop.f32.mrf.mxu3 }
0x1d0c   :  { %v3649_v60 = vadd.f32 %v5537_v49, %v3648_v58  ;;  %v3725_v58 = vld [vmem:[#allocation7 + $0x968] sm:$0xff] }
0x1d0e   :  { %v3690_v27 = vmul.f32 0.01, %v3649_v60  ;;  %vm3674_vm4 = vcmp.ge.f32.partialorder %v3649_v60, 0.0 }
0x1d10   :  { %v3706_v9 = vsel %vm3674_vm4, %v3649_v60, %v3690_v27  ;;  %v5587_v60 = vld [vmem:[#allocation2 + $0x58] sm:$0xff] }
0x1d11   :  { %v5599_v27 = vld [vmem:[#allocation2 + $0x78] sm:$0xff] }
0x1d13   :  { %v3651_v39 = vpop.f32.mrf.mxu3 }
0x1d14   :  { %v3652_v56 = vadd.f32 %v5537_v49, %v3651_v39  ;;  %v3724_v39 = vld [vmem:[#allocation7 + $0x960] sm:$0xff] }
0x1d16   :  { %v3691_v1 = vmul.f32 0.01, %v3652_v56  ;;  %vm3675_vm3 = vcmp.ge.f32.partialorder %v3652_v56, 0.0 }
0x1d18   :  { %v3707_v11 = vsel %vm3675_vm3, %v3652_v56, %v3691_v1  ;;  %v3717_v56 = vld [vmem:[#allocation7 + $0x928] sm:$0xff]  ;;  %v5590_v1 = vld [vmem:[#allocation2 + $0x60] sm:$0xff] }
0x1d1b   :  { %v3654_v51 = vpop.f32.mrf.mxu3 }
0x1d1c   :  { %v3655_v19 = vadd.f32 %v5537_v49, %v3654_v51  ;;  %v3723_v51 = vld [vmem:[#allocation7 + $0x958] sm:$0xff] }
0x1d1e   :  { %v3692_v55 = vmul.f32 0.01, %v3655_v19  ;;  %vm3676_vm2 = vcmp.ge.f32.partialorder %v3655_v19, 0.0 }
0x1d20   :  { %v3708_v61 = vsel %vm3676_vm2, %v3655_v19, %v3692_v55  ;;  %v5584_v19 = vld [vmem:[#allocation2 + $0x50] sm:$0xff] }
0x1d21   :  { %v3714_v55 = vld [vmem:[#allocation7 + $0x910] sm:$0xff] }
0x1d23   :  { %v3657_v45 = vpop.f32.mrf.mxu3 }
0x1d24   :  { %v3658_v13 = vadd.f32 %v5537_v49, %v3657_v45  ;;  %v5581_v45 = vld [vmem:[#allocation2 + $0x48] sm:$0xff] }
0x1d26   :  { %v3693_v62 = vmul.f32 0.01, %v3658_v13  ;;  %vm3677_vm1 = vcmp.ge.f32.partialorder %v3658_v13, 0.0 }
0x1d28   :  { %v3709_v12 = vsel %vm3677_vm1, %v3658_v13, %v3693_v62  ;;  %v3720_v13 = vld [vmem:[#allocation7 + $0x940] sm:$0xff] }
0x1d29   :  { %v3716_v62 = vld [vmem:[#allocation7 + $0x920] sm:$0xff] }
0x1d2b   :  { %v3660_v50 = vpop.f32.mrf.mxu3 }
0x1d2c   :  { %v3661_v59 = vadd.f32 %v5537_v49, %v3660_v50  ;;  %v3722_v49 = vld [vmem:[#allocation7 + $0x950] sm:$0xff]  ;;  %v3719_v50 = vld [vmem:[#allocation7 + $0x938] sm:$0xff] }
0x1d2e   :  { %vm3678_vm0 = vcmp.ge.f32.partialorder %v3661_v59, 0.0  ;;  %v3694_v57 = vmul.f32 0.01, %v3661_v59 }
0x1d30   :  { %v3710_v53 = vsel %vm3678_vm0, %v3661_v59, %v3694_v57  ;;  %v3718_v59 = vld [vmem:[#allocation7 + $0x930] sm:$0xff]  ;;  %v3715_v57 = vld [vmem:[#allocation7 + $0x918] sm:$0xff] }
0x1d31   :  { %3730 = vmatpush.msrb.mxu0 %v3710_v53  ;;  %v3713_v53 = vld [vmem:[#allocation7 + $0x908] sm:$0xff] }
0x1d33   :  { %3731 = vmatpush.msrb.mxu0 %v3709_v12  ;;  %v5593_v12 = vld [vmem:[#allocation2 + $0x68] sm:$0xff] }
0x1d35   :  { %3732 = vmatpush.msrb.mxu0 %v3708_v61 }
0x1d37   :  { %3733 = vmatpush.msrb.mxu0 %v3707_v11 }
0x1d39   :  { %3734 = vmatpush.msrb.mxu0 %v3706_v9 }
0x1d3b   :  { %3735 = vmatpush.msrb.mxu0 %v3705_v25 }
0x1d3d   :  { %3736 = vmatpush.msrb.mxu0 %v3704_v2 }
0x1d3f   :  { %3737 = vmatpush.msrb.mxu0 %v3703_v18 }
0x1d41   :  { %3738 = vmatpush.msrb.mxu0 %v3702_v24 }
0x1d43   :  { %3739 = vmatpush.msrb.mxu0 %v3701_v29 }
0x1d45   :  { %3740 = vmatpush.msrb.mxu0 %v3700_v16 }
0x1d47   :  { %3741 = vmatpush.msrb.mxu0 %v3699_v0 }
0x1d49   :  { %3742 = vmatpush.msrb.mxu0 %v3698_v47 }
0x1d4b   :  { %3743 = vmatpush.msrb.mxu0 %v3697_v30 }
0x1d4d   :  { %3744 = vmatpush.msrb.mxu0 %v3696_v36 }
0x1d4f   :  { %3745 = vmatpush.msrb.mxu0 %v3695_v37 }
0x1d50   :  { %3746 = vmatmul.f32.vlgmr.msrb.gmra.mxu0 %v5558_v44 }
0x1d58   :  { %3749 = vmatmul.f32.gmra.mxu0 %v5561_v23 }
0x1d60   :  { %3752 = vmatmul.f32.gmra.mxu0 %v5564_v54 }
0x1d68   :  { %3755 = vmatmul.f32.gmra.mxu0 %v5471_v46  ;;  %v3726_v46 = vld [vmem:[#allocation7 + $0x970] sm:$0xff] }
0x1d69   :  { %3799 = vmatpush.msra.mxu1 %v3726_v46 }
0x1d6b   :  { %3800 = vmatpush.msra.mxu1 %v3725_v58 }
0x1d6d   :  { %3801 = vmatpush.msra.mxu1 %v3724_v39 }
0x1d6f   :  { %3802 = vmatpush.msra.mxu1 %v3723_v51 }
0x1d70   :  { %3758 = vmatmul.f32.gmra.mxu0 %v5568_v43 }
0x1d71   :  { %3803 = vmatpush.msra.mxu1 %v3722_v49 }
0x1d78   :  { %3761 = vmatmul.f32.gmra.mxu0 %v5571_v35 }
0x1d80   :  { %3764 = vmatmul.f32.gmra.mxu0 %v5574_v42 }
0x1d88   :  { %3767 = vmatmul.f32.gmra.mxu0 %v5477_v7  ;;  %v3721_v7 = vld [vmem:[#allocation7 + $0x948] sm:$0xff] }
0x1d89   :  { %3804 = vmatpush.msra.mxu1 %v3721_v7 }
0x1d8b   :  { %3805 = vmatpush.msra.mxu1 %v3720_v13 }
0x1d8d   :  { %3806 = vmatpush.msra.mxu1 %v3719_v50  ;;  %v3927_v50 = vld [vmem:[#allocation7 + $0x9f8] sm:$0xff] }
0x1d8e   :  { %3998 = vmatpush.msra.mxu3 %v3927_v50  ;;  %v3915_v50 = vld [vmem:[#allocation7 + $0x998] sm:$0xff] }
0x1d8f   :  { %3807 = vmatpush.msra.mxu1 %v3718_v59 }
0x1d90   :  { %3770 = vmatmul.f32.gmra.mxu0 %v5578_v34 }
0x1d91   :  { %3808 = vmatpush.msra.mxu1 %v3717_v56 }
0x1d93   :  { %3809 = vmatpush.msra.mxu1 %v3716_v62 }
0x1d95   :  { %3810 = vmatpush.msra.mxu1 %v3715_v57 }
0x1d97   :  { %3811 = vmatpush.msra.mxu1 %v3714_v55 }
0x1d98   :  { %3773 = vmatmul.f32.gmra.mxu0 %v5581_v45 }
0x1d99   :  { %3812 = vmatpush.msra.mxu1 %v3713_v53 }
0x1d9b   :  { %3813 = vmatpush.msra.mxu1 %v3712_v63 }
0x1da0   :  { %3776 = vmatmul.f32.gmra.mxu0 %v5584_v19 }
0x1da8   :  { %3779 = vmatmul.f32.gmra.mxu0 %v5587_v60 }
0x1db0   :  { %3782 = vmatmul.f32.gmra.mxu0 %v5590_v1 }
0x1db8   :  { %3785 = vmatmul.f32.gmra.mxu0 %v5593_v12 }
0x1dc0   :  { %3788 = vmatmul.f32.gmra.mxu0 %v5596_v5 }
0x1dc8   :  { %3791 = vmatmul.f32.gmra.mxu0 %v5599_v27 }
0x1dcd   :  { %v3747_v61 = vpop.f32.mrf.mxu0 }
0x1dce   :  { %3814 = vmatmul.f32.vlgmr.msra.gmra.mxu1 %v3747_v61 }
0x1dd5   :  { %v3750_v3 = vpop.f32.mrf.mxu0 }
0x1dd6   :  { %3817 = vmatmul.f32.gmra.mxu1 %v3750_v3 }
0x1ddd   :  { %v3753_v52 = vpop.f32.mrf.mxu0 }
0x1dde   :  { %3820 = vmatmul.f32.gmra.mxu1 %v3753_v52 }
0x1de5   :  { %v3756_v11 = vpop.f32.mrf.mxu0 }
0x1de6   :  { %3823 = vmatmul.f32.gmra.mxu1 %v3756_v11 }
0x1ded   :  { %v3759_v40 = vpop.f32.mrf.mxu0 }
0x1dee   :  { %3826 = vmatmul.f32.gmra.mxu1 %v3759_v40 }
0x1df5   :  { %v3762_v10 = vpop.f32.mrf.mxu0 }
0x1df6   :  { %3829 = vmatmul.f32.gmra.mxu1 %v3762_v10  ;;  %v3926_v10 = vld [vmem:[#allocation7 + $0x9f0] sm:$0xff] }
0x1df7   :  { %3999 = vmatpush.msra.mxu3 %v3926_v10  ;;  %v4116_v10 = vld [vmem:[#allocation7 + $0xa20] sm:$0xff] }
0x1dfd   :  { %v3765_v9 = vpop.f32.mrf.mxu0 }
0x1dfe   :  { %3832 = vmatmul.f32.gmra.mxu1 %v3765_v9 }
0x1e05   :  { %v3768_v6 = vpop.f32.mrf.mxu0 }
0x1e06   :  { %3835 = vmatmul.f32.gmra.mxu1 %v3768_v6 }
0x1e0d   :  { %v3771_v17 = vpop.f32.mrf.mxu0 }
0x1e0e   :  { %3838 = vmatmul.f32.gmra.mxu1 %v3771_v17 }
0x1e15   :  { %v3774_v25 = vpop.f32.mrf.mxu0 }
0x1e16   :  { %3841 = vmatmul.f32.gmra.mxu1 %v3774_v25 }
0x1e1d   :  { %v3777_v8 = vpop.f32.mrf.mxu0 }
0x1e1e   :  { %3844 = vmatmul.f32.gmra.mxu1 %v3777_v8 }
0x1e25   :  { %v3780_v2 = vpop.f32.mrf.mxu0 }
0x1e26   :  { %3847 = vmatmul.f32.gmra.mxu1 %v3780_v2 }
0x1e2d   :  { %v3783_v4 = vpop.f32.mrf.mxu0 }
0x1e2e   :  { %3850 = vmatmul.f32.gmra.mxu1 %v3783_v4 }
0x1e35   :  { %v3786_v38 = vpop.f32.mrf.mxu0 }
0x1e36   :  { %3853 = vmatmul.f32.gmra.mxu1 %v3786_v38 }
0x1e3d   :  { %v3789_v18 = vpop.f32.mrf.mxu0 }
0x1e3e   :  { %3856 = vmatmul.f32.gmra.mxu1 %v3789_v18 }
0x1e45   :  { %v3792_v15 = vpop.f32.mrf.mxu0 }
0x1e46   :  { %3859 = vmatmul.f32.gmra.mxu1 %v3792_v15 }
0x1e4b   :  { %v5602_v20 = vpop.f32.mrf.mxu1 }
0x1e53   :  { %v5604_v24 = vpop.f32.mrf.mxu1 }
0x1e5b   :  { %v5606_v33 = vpop.f32.mrf.mxu1 }
0x1e63   :  { %v5608_v21 = vpop.f32.mrf.mxu1 }
0x1e64   :  { %v3825_v15 = vadd.f32 %v5610_v26, %v5608_v21  ;;  %v3816_v21 = vadd.f32 %v5610_v26, %v5602_v20  ;;  %v3923_v20 = vld [vmem:[#allocation7 + $0x9d8] sm:$0xff] }
0x1e66   :  { %vm3866_vm12 = vcmp.ge.f32.partialorder %v3825_v15, 0.0  ;;  %vm3863_vm15 = vcmp.ge.f32.partialorder %v3816_v21, 0.0 }
0x1e6b   :  { %v3827_v29 = vpop.f32.mrf.mxu1 }
0x1e6c   :  { %v3828_v4 = vadd.f32 %v5610_v26, %v3827_v29  ;;  %v3819_v29 = vadd.f32 %v5610_v26, %v5604_v24 }
0x1e6e   :  { %vm3867_vm11 = vcmp.ge.f32.partialorder %v3828_v4, 0.0  ;;  %vm3864_vm14 = vcmp.ge.f32.partialorder %v3819_v29, 0.0 }
0x1e73   :  { %v3830_v31 = vpop.f32.mrf.mxu1 }
0x1e74   :  { %v3831_v25 = vadd.f32 %v5610_v26, %v3830_v31  ;;  %v3822_v31 = vadd.f32 %v5610_v26, %v5606_v33 }
0x1e76   :  { %vm3868_vm10 = vcmp.ge.f32.partialorder %v3831_v25, 0.0  ;;  %vm3865_vm13 = vcmp.ge.f32.partialorder %v3822_v31, 0.0 }
0x1e7b   :  { %v3833_v32 = vpop.f32.mrf.mxu1 }
0x1e7c   :  { %v3834_v9 = vadd.f32 %v5610_v26, %v3833_v32  ;;  %v3884_v32 = vmul.f32 0.01, %v3831_v25 }
0x1e7e   :  { %v3885_v38 = vmul.f32 0.01, %v3834_v9  ;;  %vm3869_vm9 = vcmp.ge.f32.partialorder %v3834_v9, 0.0 }
0x1e83   :  { %v3836_v16 = vpop.f32.mrf.mxu1 }
0x1e84   :  { %v3837_v52 = vadd.f32 %v5610_v26, %v3836_v16 }
0x1e86   :  { %v3886_v8 = vmul.f32 0.01, %v3837_v52  ;;  %vm3870_vm8 = vcmp.ge.f32.partialorder %v3837_v52, 0.0 }
0x1e88   :  { %v3902_v16 = vsel %vm3870_vm8, %v3837_v52, %v3886_v8 }
0x1e8b   :  { %v3839_v48 = vpop.f32.mrf.mxu1 }
0x1e8c   :  { %v3840_v63 = vadd.f32 %v5610_v26, %v3839_v48  ;;  %v3925_v48 = vld [vmem:[#allocation7 + $0x9e8] sm:$0xff] }
0x1e8d   :  { %4000 = vmatpush.msra.mxu3 %v3925_v48 }
0x1e8e   :  { %v3887_v6 = vmul.f32 0.01, %v3840_v63  ;;  %vm3871_vm7 = vcmp.ge.f32.partialorder %v3840_v63, 0.0 }
0x1e90   :  { %v3903_v18 = vsel %vm3871_vm7, %v3840_v63, %v3887_v6  ;;  %v4119_v63 = vld [vmem:[#allocation7 + $0xa38] sm:$0xff] }
0x1e91   :  { %v4115_v6 = vld [vmem:[#allocation7 + $0xa18] sm:$0xff] }
0x1e93   :  { %v3842_v14 = vpop.f32.mrf.mxu1 }
0x1e94   :  { %v3843_v57 = vadd.f32 %v5610_v26, %v3842_v14  ;;  %v3883_v14 = vmul.f32 0.01, %v3828_v4 }
0x1e96   :  { %v3888_v11 = vmul.f32 0.01, %v3843_v57  ;;  %vm3872_vm6 = vcmp.ge.f32.partialorder %v3843_v57, 0.0 }
0x1e98   :  { %v3904_v2 = vsel %vm3872_vm6, %v3843_v57, %v3888_v11  ;;  %v4117_v11 = vld [vmem:[#allocation7 + $0xa28] sm:$0xff] }
0x1e9b   :  { %v3845_v0 = vpop.f32.mrf.mxu1 }
0x1e9c   :  { %v3846_v59 = vadd.f32 %v5610_v26, %v3845_v0  ;;  %v3901_v0 = vsel %vm3869_vm9, %v3834_v9, %v3885_v38 }
0x1e9e   :  { %v3889_v61 = vmul.f32 0.01, %v3846_v59  ;;  %vm3873_vm5 = vcmp.ge.f32.partialorder %v3846_v59, 0.0 }
0x1ea0   :  { %v3905_v17 = vsel %vm3873_vm5, %v3846_v59, %v3889_v61  ;;  %v4127_v59 = vld [vmem:[#allocation7 + $0xa78] sm:$0xff] }
0x1ea1   :  { %4133 = vmatpush.msra.mxu0 %v4127_v59 }
0x1ea3   :  { %v3848_v22 = vpop.f32.mrf.mxu1 }
0x1ea4   :  { %v3849_v49 = vadd.f32 %v5610_v26, %v3848_v22  ;;  %v3882_v22 = vmul.f32 0.01, %v3825_v15 }
0x1ea6   :  { %v3890_v55 = vmul.f32 0.01, %v3849_v49  ;;  %vm3874_vm4 = vcmp.ge.f32.partialorder %v3849_v49, 0.0  ;;  %v3898_v33 = vsel %vm3866_vm12, %v3825_v15, %v3882_v22 }
0x1ea8   :  { %v3906_v40 = vsel %vm3874_vm4, %v3849_v49, %v3890_v55  ;;  %v3920_v49 = vld [vmem:[#allocation7 + $0x9c0] sm:$0xff] }
0x1eab   :  { %v3851_v47 = vpop.f32.mrf.mxu1 }
0x1eac   :  { %v3852_v58 = vadd.f32 %v5610_v26, %v3851_v47  ;;  %v3900_v47 = vsel %vm3868_vm10, %v3831_v25, %v3884_v32  ;;  %v4114_v25 = vld [vmem:[#allocation7 + $0xa10] sm:$0xff] }
0x1eae   :  { %v3891_v56 = vmul.f32 0.01, %v3852_v58  ;;  %vm3875_vm3 = vcmp.ge.f32.partialorder %v3852_v58, 0.0 }
0x1eb0   :  { %v3907_v3 = vsel %vm3875_vm3, %v3852_v58, %v3891_v56  ;;  %v4124_v56 = vld [vmem:[#allocation7 + $0xa60] sm:$0xff] }
0x1eb3   :  { %v3854_v28 = vpop.f32.mrf.mxu1 }
0x1eb4   :  { %v3855_v41 = vadd.f32 %v5610_v26, %v3854_v28  ;;  %v3881_v28 = vmul.f32 0.01, %v3822_v31 }
0x1eb6   :  { %v3892_v7 = vmul.f32 0.01, %v3855_v41  ;;  %vm3876_vm2 = vcmp.ge.f32.partialorder %v3855_v41, 0.0 }
0x1eb8   :  { %v3908_v53 = vsel %vm3876_vm2, %v3855_v41, %v3892_v7  ;;  %v3879_v41 = vmul.f32 0.01, %v3816_v21  ;;  %v3919_v7 = vld [vmem:[#allocation7 + $0x9b8] sm:$0xff] }
0x1eba   :  { %v3895_v58 = vsel %vm3863_vm15, %v3816_v21, %v3879_v41 }
0x1ebb   :  { %v3857_v30 = vpop.f32.mrf.mxu1 }
0x1ebc   :  { %v3858_v36 = vadd.f32 %v5610_v26, %v3857_v30  ;;  %v3899_v30 = vsel %vm3867_vm11, %v3828_v4, %v3883_v14 }
0x1ebe   :  { %v3893_v39 = vmul.f32 0.01, %v3858_v36  ;;  %vm3877_vm1 = vcmp.ge.f32.partialorder %v3858_v36, 0.0 }
0x1ec0   :  { %v3909_v62 = vsel %vm3877_vm1, %v3858_v36, %v3893_v39  ;;  %v3880_v36 = vmul.f32 0.01, %v3819_v29  ;;  %v3921_v39 = vld [vmem:[#allocation7 + $0x9c8] sm:$0xff] }
0x1ec2   :  { %v3896_v24 = vsel %vm3864_vm14, %v3819_v29, %v3880_v36 }
0x1ec3   :  { %v3860_v37 = vpop.f32.mrf.mxu1 }
0x1ec4   :  { %v3861_v46 = vadd.f32 %v5610_v26, %v3860_v37  ;;  %v3924_v37 = vld [vmem:[#allocation7 + $0x9e0] sm:$0xff]  ;;  %v3922_v26 = vld [vmem:[#allocation7 + $0x9d0] sm:$0xff] }
0x1ec5   :  { %4001 = vmatpush.msra.mxu3 %v3924_v37 }
0x1ec6   :  { %vm3878_vm0 = vcmp.ge.f32.partialorder %v3861_v46, 0.0  ;;  %v3894_v51 = vmul.f32 0.01, %v3861_v46 }
0x1ec7   :  { %4002 = vmatpush.msra.mxu3 %v3923_v20 }
0x1ec8   :  { %v3910_v13 = vsel %vm3878_vm0, %v3861_v46, %v3894_v51  ;;  %v3897_v46 = vsel %vm3865_vm13, %v3822_v31, %v3881_v28  ;;  %v4407_v51 = vld [vmem:[#allocation2 + $0x18] sm:$0xff] }
0x1ec9   :  { %3930 = vmatpush.msra.mxu2 %v3910_v13  ;;  %4003 = vmatpush.msra.mxu3 %v3922_v26  ;;  %v4408_v13 = vld [vmem:[#allocation2 + $0x38] sm:$0xff] }
0x1ecb   :  { %3931 = vmatpush.msra.mxu2 %v3909_v62  ;;  %4004 = vmatpush.msra.mxu3 %v3921_v39  ;;  %v4123_v62 = vld [vmem:[#allocation7 + $0xa58] sm:$0xff] }
0x1ecd   :  { %3932 = vmatpush.msra.mxu2 %v3908_v53  ;;  %4005 = vmatpush.msra.mxu3 %v3920_v49 }
0x1ecf   :  { %3933 = vmatpush.msra.mxu2 %v3907_v3  ;;  %4006 = vmatpush.msra.mxu3 %v3919_v7  ;;  %v4118_v3 = vld [vmem:[#allocation7 + $0xa30] sm:$0xff] }
0x1ed1   :  { %3934 = vmatpush.msra.mxu2 %v3906_v40 }
0x1ed3   :  { %3935 = vmatpush.msra.mxu2 %v3905_v17 }
0x1ed5   :  { %3936 = vmatpush.msra.mxu2 %v3904_v2  ;;  %v4113_v2 = vld [vmem:[#allocation7 + $0xa08] sm:$0xff] }
0x1ed7   :  { %3937 = vmatpush.msra.mxu2 %v3903_v18  ;;  %v4112_v18 = vld [vmem:[#allocation7 + $0xa00] sm:$0xff] }
0x1ed9   :  { %3938 = vmatpush.msra.mxu2 %v3902_v16  ;;  %v5646_v16 = vld [vmem:[#allocation8 + $0x13] ss:$0 sm:$0xff] }
0x1edb   :  { %3939 = vmatpush.msra.mxu2 %v3901_v0 }
0x1edd   :  { %3940 = vmatpush.msra.mxu2 %v3900_v47 }
0x1edf   :  { %3941 = vmatpush.msra.mxu2 %v3899_v30 }
0x1ee1   :  { %3942 = vmatpush.msra.mxu2 %v3898_v33 }
0x1ee3   :  { %3943 = vmatpush.msra.mxu2 %v3897_v46 }
0x1ee5   :  { %3944 = vmatpush.msra.mxu2 %v3896_v24 }
0x1ee7   :  { %3945 = vmatpush.msra.mxu2 %v3895_v58 }
0x1ee8   :  { %3946 = vmatmul.f32.vlgmr.msra.gmra.mxu2 %v5558_v44  ;;  %v3918_v44 = vld [vmem:[#allocation7 + $0x9b0] sm:$0xff] }
0x1ee9   :  { %4007 = vmatpush.msra.mxu3 %v3918_v44 }
0x1ef0   :  { %3949 = vmatmul.f32.gmra.mxu2 %v5561_v23  ;;  %v3917_v23 = vld [vmem:[#allocation7 + $0x9a8] sm:$0xff] }
0x1ef1   :  { %4008 = vmatpush.msra.mxu3 %v3917_v23 }
0x1ef8   :  { %3952 = vmatmul.f32.gmra.mxu2 %v5564_v54  ;;  %v3916_v54 = vld [vmem:[#allocation7 + $0x9a0] sm:$0xff] }
0x1ef9   :  { %4009 = vmatpush.msra.mxu3 %v3916_v54 }
0x1efb   :  { %4010 = vmatpush.msra.mxu3 %v3915_v50 }
0x1f00   :  { %3955 = vmatmul.f32.gmra.mxu2 %v4407_v51 }
0x1f08   :  { %3958 = vmatmul.f32.gmra.mxu2 %v5568_v43  ;;  %v3914_v43 = vld [vmem:[#allocation7 + $0x990] sm:$0xff] }
0x1f09   :  { %4011 = vmatpush.msra.mxu3 %v3914_v43 }
0x1f10   :  { %3961 = vmatmul.f32.gmra.mxu2 %v5571_v35  ;;  %v3913_v35 = vld [vmem:[#allocation7 + $0x988] sm:$0xff] }
0x1f11   :  { %4012 = vmatpush.msra.mxu3 %v3913_v35 }
0x1f18   :  { %3964 = vmatmul.f32.gmra.mxu2 %v5574_v42  ;;  %v3912_v42 = vld [vmem:[#allocation7 + $0x980] sm:$0xff] }
0x1f19   :  { %4013 = vmatpush.msra.mxu3 %v3912_v42 }
0x1f20   :  { %3967 = vmatmul.f32.gmra.mxu2 %v4408_v13 }
0x1f28   :  { %3970 = vmatmul.f32.gmra.mxu2 %v5578_v34  ;;  %v4126_v34 = vld [vmem:[#allocation7 + $0xa70] sm:$0xff] }
0x1f29   :  { %4134 = vmatpush.msra.mxu0 %v4126_v34 }
0x1f30   :  { %3973 = vmatmul.f32.gmra.mxu2 %v5581_v45  ;;  %v4125_v45 = vld [vmem:[#allocation7 + $0xa68] sm:$0xff] }
0x1f31   :  { %4135 = vmatpush.msra.mxu0 %v4125_v45 }
0x1f33   :  { %4136 = vmatpush.msra.mxu0 %v4124_v56 }
0x1f35   :  { %4137 = vmatpush.msra.mxu0 %v4123_v62 }
0x1f38   :  { %3976 = vmatmul.f32.gmra.mxu2 %v5584_v19 }
0x1f40   :  { %3979 = vmatmul.f32.gmra.mxu2 %v5587_v60 }
0x1f48   :  { %3982 = vmatmul.f32.gmra.mxu2 %v5590_v1 }
0x1f50   :  { %3985 = vmatmul.f32.gmra.mxu2 %v5593_v12  ;;  %v4122_v12 = vld [vmem:[#allocation7 + $0xa50] sm:$0xff] }
0x1f51   :  { %4138 = vmatpush.msra.mxu0 %v4122_v12 }
0x1f58   :  { %3988 = vmatmul.f32.gmra.mxu2 %v5596_v5  ;;  %v4121_v5 = vld [vmem:[#allocation7 + $0xa48] sm:$0xff] }
0x1f59   :  { %4139 = vmatpush.msra.mxu0 %v4121_v5 }
0x1f60   :  { %3991 = vmatmul.f32.gmra.mxu2 %v5599_v27  ;;  %v4120_v27 = vld [vmem:[#allocation7 + $0xa40] sm:$0xff] }
0x1f61   :  { %4140 = vmatpush.msra.mxu0 %v4120_v27 }
0x1f63   :  { %4141 = vmatpush.msra.mxu0 %v4119_v63 }
0x1f65   :  { %4142 = vmatpush.msra.mxu0 %v4118_v3 }
0x1f67   :  { %4143 = vmatpush.msra.mxu0 %v4117_v11 }
0x1f69   :  { %4144 = vmatpush.msra.mxu0 %v4116_v10 }
0x1f6b   :  { %v3947_v19 = vpop.f32.mrf.mxu2  ;;  %4145 = vmatpush.msra.mxu0 %v4115_v6 }
0x1f6c   :  { %4014 = vmatmul.f32.vlgmr.msra.gmra.mxu3 %v3947_v19 }
0x1f6d   :  { %4146 = vmatpush.msra.mxu0 %v4114_v25 }
0x1f6f   :  { %4147 = vmatpush.msra.mxu0 %v4113_v2 }
0x1f71   :  { %4148 = vmatpush.msra.mxu0 %v4112_v18 }
0x1f73   :  { %v3950_v60 = vpop.f32.mrf.mxu2 }
0x1f74   :  { %4017 = vmatmul.f32.gmra.mxu3 %v3950_v60 }
0x1f7b   :  { %v3953_v1 = vpop.f32.mrf.mxu2 }
0x1f7c   :  { %4020 = vmatmul.f32.gmra.mxu3 %v3953_v1 }
0x1f83   :  { %v3956_v57 = vpop.f32.mrf.mxu2 }
0x1f84   :  { %4023 = vmatmul.f32.gmra.mxu3 %v3956_v57 }
0x1f8b   :  { %v3959_v55 = vpop.f32.mrf.mxu2 }
0x1f8c   :  { %4026 = vmatmul.f32.gmra.mxu3 %v3959_v55 }
0x1f93   :  { %v3962_v53 = vpop.f32.mrf.mxu2 }
0x1f94   :  { %4029 = vmatmul.f32.gmra.mxu3 %v3962_v53 }
0x1f9b   :  { %v3965_v61 = vpop.f32.mrf.mxu2 }
0x1f9c   :  { %4032 = vmatmul.f32.gmra.mxu3 %v3965_v61 }
0x1fa3   :  { %v3968_v52 = vpop.f32.mrf.mxu2 }
0x1fa4   :  { %4035 = vmatmul.f32.gmra.mxu3 %v3968_v52 }
0x1fab   :  { %v3971_v40 = vpop.f32.mrf.mxu2 }
0x1fac   :  { %4038 = vmatmul.f32.gmra.mxu3 %v3971_v40 }
0x1fb3   :  { %v3974_v9 = vpop.f32.mrf.mxu2 }
0x1fb4   :  { %4041 = vmatmul.f32.gmra.mxu3 %v3974_v9 }
0x1fbb   :  { %v3977_v17 = vpop.f32.mrf.mxu2 }
0x1fbc   :  { %4044 = vmatmul.f32.gmra.mxu3 %v3977_v17 }
0x1fc3   :  { %v3980_v8 = vpop.f32.mrf.mxu2 }
0x1fc4   :  { %4047 = vmatmul.f32.gmra.mxu3 %v3980_v8 }
0x1fcb   :  { %v3983_v4 = vpop.f32.mrf.mxu2 }
0x1fcc   :  { %4050 = vmatmul.f32.gmra.mxu3 %v3983_v4 }
0x1fd3   :  { %v3986_v38 = vpop.f32.mrf.mxu2 }
0x1fd4   :  { %4053 = vmatmul.f32.gmra.mxu3 %v3986_v38 }
0x1fdb   :  { %v3989_v15 = vpop.f32.mrf.mxu2 }
0x1fdc   :  { %4056 = vmatmul.f32.gmra.mxu3 %v3989_v15 }
0x1fe3   :  { %v3992_v32 = vpop.f32.mrf.mxu2 }
0x1fe4   :  { %4059 = vmatmul.f32.gmra.mxu3 %v3992_v32 }
0x1fef   :  { %v4015_v48 = vpop.f32.mrf.mxu3 }
0x1ff0   :  { %v4016_v31 = vadd.f32 %v5646_v16, %v4015_v48 }
0x1ff2   :  { %vm4063_vm0 = vcmp.ge.f32.partialorder %v4016_v31, 0.0  ;;  %v4079_v14 = vmul.f32 0.01, %v4016_v31 }
0x1ff4   :  { %v4095_v0 = vsel %vm4063_vm0, %v4016_v31, %v4079_v14  ;;  %v4312_v31 = vld [vmem:[#allocation8 + $0x14] ss:$0 sm:$0xff] }
0x1ff5   :  { %4149 = vmatmul.f32.vlgmr.msra.gmra.mxu0 %v4095_v0 }
0x1ff7   :  { %v4018_v29 = vpop.f32.mrf.mxu3 }
0x1ff8   :  { %v4019_v22 = vadd.f32 %v5646_v16, %v4018_v29 }
0x1ffa   :  { %v4080_v47 = vmul.f32 0.01, %v4019_v22  ;;  %vm4064_vm1 = vcmp.ge.f32.partialorder %v4019_v22, 0.0 }
0x1ffc   :  { %v4096_v21 = vsel %vm4064_vm1, %v4019_v22, %v4080_v47 }
0x1ffd   :  { %4152 = vmatmul.f32.gmra.mxu0 %v4096_v21 }
0x1fff   :  { %v4021_v28 = vpop.f32.mrf.mxu3 }
0x2000   :  { %v4022_v30 = vadd.f32 %v5646_v16, %v4021_v28 }
0x2002   :  { %v4081_v36 = vmul.f32 0.01, %v4022_v30  ;;  %vm4065_vm2 = vcmp.ge.f32.partialorder %v4022_v30, 0.0 }
0x2004   :  { %v4097_v33 = vsel %vm4065_vm2, %v4022_v30, %v4081_v36 }
0x2005   :  { %4155 = vmatmul.f32.gmra.mxu0 %v4097_v33 }
0x2007   :  { %v4024_v37 = vpop.f32.mrf.mxu3 }
0x2008   :  { %v4025_v41 = vadd.f32 %v5646_v16, %v4024_v37 }
0x200a   :  { %v4082_v46 = vmul.f32 0.01, %v4025_v41  ;;  %vm4066_vm3 = vcmp.ge.f32.partialorder %v4025_v41, 0.0 }
0x200c   :  { %v4098_v24 = vsel %vm4066_vm3, %v4025_v41, %v4082_v46 }
0x200d   :  { %4158 = vmatmul.f32.gmra.mxu0 %v4098_v24 }
0x200f   :  { %v4027_v58 = vpop.f32.mrf.mxu3 }
0x2010   :  { %v4028_v20 = vadd.f32 %v5646_v16, %v4027_v58 }
0x2012   :  { %v4083_v26 = vmul.f32 0.01, %v4028_v20  ;;  %vm4067_vm4 = vcmp.ge.f32.partialorder %v4028_v20, 0.0 }
0x2014   :  { %v4099_v39 = vsel %vm4067_vm4, %v4028_v20, %v4083_v26 }
0x2015   :  { %4161 = vmatmul.f32.gmra.mxu0 %v4099_v39 }
0x2017   :  { %v4030_v51 = vpop.f32.mrf.mxu3 }
0x2018   :  { %v4031_v49 = vadd.f32 %v5646_v16, %v4030_v51 }
0x201a   :  { %v4084_v7 = vmul.f32 0.01, %v4031_v49  ;;  %vm4068_vm5 = vcmp.ge.f32.partialorder %v4031_v49, 0.0 }
0x201c   :  { %v4100_v44 = vsel %vm4068_vm5, %v4031_v49, %v4084_v7 }
0x201d   :  { %4164 = vmatmul.f32.gmra.mxu0 %v4100_v44 }
0x201f   :  { %v4033_v23 = vpop.f32.mrf.mxu3 }
0x2020   :  { %v4034_v13 = vadd.f32 %v5646_v16, %v4033_v23 }
0x2022   :  { %v4085_v54 = vmul.f32 0.01, %v4034_v13  ;;  %vm4069_vm6 = vcmp.ge.f32.partialorder %v4034_v13, 0.0 }
0x2024   :  { %v4101_v50 = vsel %vm4069_vm6, %v4034_v13, %v4085_v54 }
0x2025   :  { %4167 = vmatmul.f32.gmra.mxu0 %v4101_v50 }
0x2027   :  { %v4036_v43 = vpop.f32.mrf.mxu3 }
0x2028   :  { %v4037_v35 = vadd.f32 %v5646_v16, %v4036_v43 }
0x202a   :  { %v4086_v42 = vmul.f32 0.01, %v4037_v35  ;;  %vm4070_vm7 = vcmp.ge.f32.partialorder %v4037_v35, 0.0 }
0x202c   :  { %v4102_v59 = vsel %vm4070_vm7, %v4037_v35, %v4086_v42 }
0x202d   :  { %4170 = vmatmul.f32.gmra.mxu0 %v4102_v59 }
0x202f   :  { %v4039_v34 = vpop.f32.mrf.mxu3 }
0x2030   :  { %v4040_v45 = vadd.f32 %v5646_v16, %v4039_v34 }
0x2032   :  { %v4087_v19 = vmul.f32 0.01, %v4040_v45  ;;  %vm4071_vm8 = vcmp.ge.f32.partialorder %v4040_v45, 0.0 }
0x2034   :  { %v4103_v56 = vsel %vm4071_vm8, %v4040_v45, %v4087_v19 }
0x2035   :  { %4173 = vmatmul.f32.gmra.mxu0 %v4103_v56 }
0x2037   :  { %v4042_v60 = vpop.f32.mrf.mxu3 }
0x2038   :  { %v4043_v62 = vadd.f32 %v5646_v16, %v4042_v60 }
0x203a   :  { %v4088_v1 = vmul.f32 0.01, %v4043_v62  ;;  %vm4072_vm9 = vcmp.ge.f32.partialorder %v4043_v62, 0.0 }
0x203c   :  { %v4104_v12 = vsel %vm4072_vm9, %v4043_v62, %v4088_v1 }
0x203d   :  { %4176 = vmatmul.f32.gmra.mxu0 %v4104_v12 }
0x203f   :  { %v4045_v57 = vpop.f32.mrf.mxu3 }
0x2040   :  { %v4046_v5 = vadd.f32 %v5646_v16, %v4045_v57 }
0x2042   :  { %v4089_v55 = vmul.f32 0.01, %v4046_v5  ;;  %vm4073_vm10 = vcmp.ge.f32.partialorder %v4046_v5, 0.0 }
0x2044   :  { %v4105_v27 = vsel %vm4073_vm10, %v4046_v5, %v4089_v55 }
0x2045   :  { %4179 = vmatmul.f32.gmra.mxu0 %v4105_v27 }
0x2047   :  { %v4048_v53 = vpop.f32.mrf.mxu3 }
0x2048   :  { %v4049_v63 = vadd.f32 %v5646_v16, %v4048_v53 }
0x204a   :  { %v4090_v61 = vmul.f32 0.01, %v4049_v63  ;;  %vm4074_vm11 = vcmp.ge.f32.partialorder %v4049_v63, 0.0 }
0x204c   :  { %v4106_v3 = vsel %vm4074_vm11, %v4049_v63, %v4090_v61 }
0x204d   :  { %4182 = vmatmul.f32.gmra.mxu0 %v4106_v3 }
0x204f   :  { %v4051_v52 = vpop.f32.mrf.mxu3 }
0x2050   :  { %v4052_v11 = vadd.f32 %v5646_v16, %v4051_v52 }
0x2052   :  { %v4091_v40 = vmul.f32 0.01, %v4052_v11  ;;  %vm4075_vm12 = vcmp.ge.f32.partialorder %v4052_v11, 0.0 }
0x2054   :  { %v4107_v10 = vsel %vm4075_vm12, %v4052_v11, %v4091_v40 }
0x2055   :  { %4185 = vmatmul.f32.gmra.mxu0 %v4107_v10 }
0x2057   :  { %v4054_v9 = vpop.f32.mrf.mxu3 }
0x2058   :  { %v4055_v6 = vadd.f32 %v5646_v16, %v4054_v9 }
0x205a   :  { %v4092_v17 = vmul.f32 0.01, %v4055_v6  ;;  %vm4076_vm13 = vcmp.ge.f32.partialorder %v4055_v6, 0.0 }
0x205c   :  { %v4108_v25 = vsel %vm4076_vm13, %v4055_v6, %v4092_v17 }
0x205d   :  { %4188 = vmatmul.f32.gmra.mxu0 %v4108_v25 }
0x205f   :  { %v4057_v8 = vpop.f32.mrf.mxu3 }
0x2060   :  { %v4058_v2 = vadd.f32 %v5646_v16, %v4057_v8 }
0x2062   :  { %v4093_v4 = vmul.f32 0.01, %v4058_v2  ;;  %vm4077_vm14 = vcmp.ge.f32.partialorder %v4058_v2, 0.0 }
0x2064   :  { %v4109_v38 = vsel %vm4077_vm14, %v4058_v2, %v4093_v4 }
0x2065   :  { %4191 = vmatmul.f32.gmra.mxu0 %v4109_v38 }
0x2067   :  { %v4060_v18 = vpop.f32.mrf.mxu3 }
0x2068   :  { %v4061_v15 = vadd.f32 %v5646_v16, %v4060_v18 }
0x206a   :  { %v4094_v32 = vmul.f32 0.01, %v4061_v15  ;;  %vm4078_vm15 = vcmp.ge.f32.partialorder %v4061_v15, 0.0 }
0x206c   :  { %v4110_v48 = vsel %vm4078_vm15, %v4061_v15, %v4094_v32 }
0x206d   :  { %4194 = vmatmul.f32.gmra.mxu0 %v4110_v48 }
0x2072   :  { %v4150_v14 = vpop.f32.mrf.mxu0 }
0x2073   :  { %v4151_v0 = vadd.f32 %v4312_v31, %v4150_v14 }
0x2075   :  { %4198 = vst [vmem:[#allocation10] sm:$0xff] %v4151_v0 }
0x207a   :  { %v4153_v29 = vpop.f32.mrf.mxu0 }
0x207b   :  { %v4154_v22 = vadd.f32 %v4312_v31, %v4153_v29 }
0x207d   :  { %4199 = vst [vmem:[#allocation10 + $0x8] sm:$0xff] %v4154_v22 }
0x2082   :  { %v4156_v47 = vpop.f32.mrf.mxu0 }
0x2083   :  { %v4157_v21 = vadd.f32 %v4312_v31, %v4156_v47 }
0x2085   :  { %4200 = vst [vmem:[#allocation10 + $0x10] sm:$0xff] %v4157_v21 }
0x208a   :  { %v4159_v28 = vpop.f32.mrf.mxu0 }
0x208b   :  { %v4160_v30 = vadd.f32 %v4312_v31, %v4159_v28 }
0x208d   :  { %4201 = vst [vmem:[#allocation10 + $0x18] sm:$0xff] %v4160_v30 }
0x2092   :  { %v4162_v36 = vpop.f32.mrf.mxu0 }
0x2093   :  { %v4163_v33 = vadd.f32 %v4312_v31, %v4162_v36 }
0x2095   :  { %4202 = vst [vmem:[#allocation10 + $0x20] sm:$0xff] %v4163_v33 }
0x209a   :  { %v4165_v16 = vpop.f32.mrf.mxu0 }
0x209b   :  { %v4166_v37 = vadd.f32 %v4312_v31, %v4165_v16 }
0x209d   :  { %4203 = vst [vmem:[#allocation10 + $0x28] sm:$0xff] %v4166_v37 }
0x20a2   :  { %v4168_v41 = vpop.f32.mrf.mxu0 }
0x20a3   :  { %v4169_v46 = vadd.f32 %v4312_v31, %v4168_v41 }
0x20a5   :  { %4204 = vst [vmem:[#allocation10 + $0x30] sm:$0xff] %v4169_v46 }
0x20aa   :  { %v4171_v24 = vpop.f32.mrf.mxu0 }
0x20ab   :  { %v4172_v58 = vadd.f32 %v4312_v31, %v4171_v24 }
0x20ad   :  { %4205 = vst [vmem:[#allocation10 + $0x38] sm:$0xff] %v4172_v58 }
0x20b2   :  { %v4174_v20 = vpop.f32.mrf.mxu0 }
0x20b3   :  { %v4175_v26 = vadd.f32 %v4312_v31, %v4174_v20 }
0x20b5   :  { %4206 = vst [vmem:[#allocation10 + $0x40] sm:$0xff] %v4175_v26 }
0x20ba   :  { %v4177_v39 = vpop.f32.mrf.mxu0 }
0x20bb   :  { %v4178_v51 = vadd.f32 %v4312_v31, %v4177_v39 }
0x20bd   :  { %4207 = vst [vmem:[#allocation10 + $0x48] sm:$0xff] %v4178_v51 }
0x20c2   :  { %v4180_v49 = vpop.f32.mrf.mxu0 }
0x20c3   :  { %v4181_v7 = vadd.f32 %v4312_v31, %v4180_v49 }
0x20c5   :  { %4208 = vst [vmem:[#allocation10 + $0x50] sm:$0xff] %v4181_v7 }
0x20ca   :  { %v4183_v44 = vpop.f32.mrf.mxu0 }
0x20cb   :  { %v4184_v23 = vadd.f32 %v4312_v31, %v4183_v44 }
0x20cd   :  { %4209 = vst [vmem:[#allocation10 + $0x58] sm:$0xff] %v4184_v23 }
0x20d2   :  { %v4186_v13 = vpop.f32.mrf.mxu0 }
0x20d3   :  { %v4187_v54 = vadd.f32 %v4312_v31, %v4186_v13 }
0x20d5   :  { %4210 = vst [vmem:[#allocation10 + $0x60] sm:$0xff] %v4187_v54 }
0x20da   :  { %v4189_v50 = vpop.f32.mrf.mxu0 }
0x20db   :  { %v4190_v43 = vadd.f32 %v4312_v31, %v4189_v50 }
0x20dd   :  { %4211 = vst [vmem:[#allocation10 + $0x68] sm:$0xff] %v4190_v43 }
0x20e2   :  { %v4192_v35 = vpop.f32.mrf.mxu0 }
0x20e3   :  { %v4193_v42 = vadd.f32 %v4312_v31, %v4192_v35 }
0x20e5   :  { %4212 = vst [vmem:[#allocation10 + $0x70] sm:$0xff] %v4193_v42 }
0x20ea   :  { %v4195_v59 = vpop.f32.mrf.mxu0 }
0x20eb   :  { %v4196_v34 = vadd.f32 %v4312_v31, %v4195_v59 }
0x20ed   :  { %4213 = vst [vmem:[#allocation10 + $0x78] sm:$0xff] %v4196_v34 }
0x20ee   :  { %4226 = dma.vmem_to_hbm [thread:$0]  %s4219_s10, 2048, %s4221_s13, [#allocation4], %s4538_s23, %s4538_s23, %s4539_s24  }
0x20ef   :  { %4535 = dma.done.wait [#allocation4], 2048  }
0x20f0   :  { %4536 = vsyncadd [#allocation4], 4294965248 }
0x20f1   :  { %4231 = vsyncpa [#allocation3], 1 }
0x20f2   :  { %4232 = vsyncpa [#allocation6], 1 }
0x20f3   :  { %4233 = vsyncpa [#allocation9], 1 }
0x20f4   :  { %4234 = vsyncpa [#allocation4], 1 }

</bundles_post_ra>
